<compile_context>
chip_gen: v7x
topology: tpu7x:2x2x1
jax: 0.10.0
libtpu: 0.0.40
codegen_flags: <defaults>
</compile_context>

<pallas_src>
from functools import partial

import jax
import jax.numpy as jnp
import numpy as np
from jax.experimental import pallas as pl
from jax.experimental.pallas import tpu as pltpu

LN_EPS = 1e-5
BN_EPS = 1e-5
MXU_DTYPE = jnp.bfloat16   # MXU operand dtype (accumulation stays f32)
HALO = 16                  # sublane-aligned zero pad per sequence side, >= (K-1)//2
TAP_GROUP = 8              # taps per partial-sum group (tree accumulation)


def conv_module_kernel(x_ref, vec_ref, w1_ref, wdw_ref, w2_ref, o_ref, zp_ref,
                       *, seq_len, batch_block, fused_glu):
    Mb, D = x_ref.shape                  # Mb = Bb * T rows (batch folded into rows)
    K = wdw_ref.shape[0]
    PAD = (K - 1) // 2
    T = seq_len
    Bb = batch_block
    Tp = T + 2 * HALO                    # padded rows per sequence
    Mp = Bb * Tp

    # Packed per-channel vectors: rows of vec_ref (8, D).
    ln_g = vec_ref[0:1, :]
    ln_b = vec_ref[1:2, :]
    b1a = vec_ref[2:3, :]
    b1g = vec_ref[3:4, :]
    bdw = vec_ref[4:5, :]
    bn_s = vec_ref[5:6, :]
    bn_b = vec_ref[6:7, :]
    b2 = vec_ref[7:8, :]

    # ---- LayerNorm over the feature dim D (f32) ----
    # NOTE: x is not kept live past LN; the residual re-reads x_ref at the end.
    x = x_ref[...].astype(jnp.float32)
    mean = jnp.mean(x, axis=-1, keepdims=True)
    var = jnp.mean((x - mean) ** 2, axis=-1, keepdims=True)
    xn = (x - mean) * jax.lax.rsqrt(var + LN_EPS)
    xn = xn * ln_g + ln_b
    del x

    # ---- pointwise_conv1 + GLU (bf16 MXU operands, f32 accumulation) ----
    xn_b = xn.astype(w2_ref.dtype)
    if fused_glu:
        # One wide dot; D % 128 == 0 so the column slices are tile-aligned.
        y = jnp.dot(xn_b, w1_ref[...], preferred_element_type=jnp.float32)
        a = y[:, :D] + b1a
        g = y[:, D:] + b1g
    else:
        # Split path (w1_ref is (2, D, D)); avoids lane-offset slicing.
        a = jnp.dot(xn_b, w1_ref[0], preferred_element_type=jnp.float32) + b1a
        g = jnp.dot(xn_b, w1_ref[1], preferred_element_type=jnp.float32) + b1g
    z = a * jax.nn.sigmoid(g)            # GLU, (Mb, D) f32

    # ---- depthwise conv via zero-filled halo scratch ----
    # Each sequence occupies Tp rows of zp_ref: [HALO zeros | T data | HALO zeros].
    # Then out[t] = sum_k zp[HALO + t + k - PAD] * w[k] is realized as whole-buffer
    # sublane rolls (XLU) -- the roll never wraps into another sequence's data
    # rows because the per-sequence pad (16) exceeds PAD (15).
    zeros_h = jnp.zeros((HALO, D), jnp.float32)
    for b in range(Bb):                  # static unroll; all offsets sublane-aligned
        base = b * Tp
        zp_ref[base:base + HALO, :] = zeros_h
        zp_ref[base + HALO:base + HALO + T, :] = z[b * T:(b + 1) * T, :]
        zp_ref[base + HALO + T:base + Tp, :] = zeros_h
    zp = zp_ref[...]                     # (Mp, D) f32

    acc = None
    for k0 in range(0, K, TAP_GROUP):    # grouped (tree) accumulation
        part = None
        for k in range(k0, min(k0 + TAP_GROUP, K)):
            wk = wdw_ref[k:k + 1, :]     # (1, D) tap weight straight from the ref
            s = (PAD - k) % Mp
            zr = zp if s == 0 else pltpu.roll(zp, shift=s, axis=0)
            term = zr * wk
            part = term if part is None else part + term
        acc = part if acc is None else acc + part

    # Extract the valid middle rows of each sequence back to (Mb, D).
    if Bb == 1:
        dw = acc[HALO:HALO + T, :]
    else:
        dw = jnp.concatenate(
            [acc[b * Tp + HALO:b * Tp + HALO + T, :] for b in range(Bb)], axis=0)
    dw = dw + bdw

    # ---- BatchNorm1d (eval, folded scale/shift) + SiLU (f32) ----
    h = dw * bn_s + bn_b
    h = h * jax.nn.sigmoid(h)

    # ---- pointwise_conv2: (Mb, D) @ (D, D) bf16 MXU dot, f32 accumulation ----
    out = jnp.dot(h.astype(w2_ref.dtype), w2_ref[...],
                  preferred_element_type=jnp.float32) + b2

    # ---- dropout = identity (eval); residual re-reads the resident x block ----
    o_ref[...] = (x_ref[...].astype(jnp.float32) + out).astype(o_ref.dtype)


def _pick_batch_block(B, T, target_rows=512):
    """Largest divisor Bb of B with Bb*T <= target_rows, sublane-aligned rows,
    and (when possible) an even grid length so both v7x TensorCores get work."""
    divs = [d for d in range(1, B + 1) if B % d == 0]
    aligned = [d for d in divs if (d * T) % 8 == 0] or [B]
    fitting = [d for d in aligned if d * T <= max(target_rows, T)] or [min(aligned)]
    even_grid = [d for d in fitting if (B // d) % 2 == 0]
    return max(even_grid) if even_grid else max(fitting)


def _vmem_limit_bytes(Bb, T, D, K):
    """Shape-derived VMEM limit, capped well below physical capacity (matters
    most on v7x's 64 MiB; generous on v5e/v6e's 128 MiB)."""
    Mb = Bb * T
    Mp = Bb * (T + 2 * HALO)
    est = (
        2 * 2 * Mb * D * 4            # x / out blocks, double-buffered
        + Mp * D * 4                  # halo scratch
        + 8 * Mp * D * 4              # straight-line f32 intermediates (headroom)
        + 2 * 3 * D * D * 2           # bf16 matmul weights, double-buffered
        + 2 * (K + 8) * D * 4         # depthwise weights + packed vectors
        + (4 << 20)                   # fixed slack
    )
    try:
        cap = pltpu.get_tpu_info().vmem_capacity_bytes
    except Exception:
        cap = 128 * 1024 * 1024
    return int(min(max(est, 32 * 1024 * 1024), 0.6 * cap))


def conv_module_forward(x, params, *, target_rows=512):
    B, T, D = x.shape
    ln_g, ln_b, w1, b1, wdw, bdw, bn_s, bn_b, w2, b2 = params
    K = wdw.shape[0]
    assert (K - 1) // 2 <= HALO, "kernel_size too large for the fixed 16-row halo"

    # Pointwise-conv1 weights: fuse to one (D, 2D) operand when the lane dim is
    # 128-aligned (single wider MXU pass); otherwise keep the two GLU halves
    # stacked as (2, D, D) so no lane-offset slicing is needed in the kernel.
    fused_glu = (D % 128 == 0)
    if fused_glu:
        w1_in = w1.astype(MXU_DTYPE)                                   # (D, 2D)
        w1_shape = (D, 2 * D)
    else:
        w1_in = jnp.stack([w1[:, :D], w1[:, D:]], axis=0).astype(MXU_DTYPE)  # (2,D,D)
        w1_shape = (2, D, D)
    w2_in = w2.astype(MXU_DTYPE)

    # All per-channel (1, D) vectors packed into a single (8, D) input.
    vecs = jnp.concatenate(
        [ln_g, ln_b, b1[:, :D], b1[:, D:], bdw, bn_s, bn_b, b2], axis=0)

    Bb = _pick_batch_block(B, T, target_rows)
    Mb = Bb * T
    Tp = T + 2 * HALO

    x2 = x.reshape(B * T, D)   # metadata-only reshape for contiguous (B, T, D)

    kernel = partial(conv_module_kernel, seq_len=T, batch_block=Bb,
                     fused_glu=fused_glu)

    def full(shape):
        return pl.BlockSpec(shape, lambda i, _n=len(shape): (0,) * _n)

    out2 = pl.pallas_call(
        kernel,
        out_shape=jax.ShapeDtypeStruct((B * T, D), x.dtype),
        grid_spec=pltpu.PrefetchScalarGridSpec(
            num_scalar_prefetch=0,
            grid=(B // Bb,),
            in_specs=[
                pl.BlockSpec((Mb, D), lambda i: (i, 0)),   # x rows for this step
                full((8, D)),                              # packed per-channel vectors
                full(w1_shape),                            # pointwise_conv1 weights
                full((K, D)),                              # depthwise weights
                full((D, D)),                              # pointwise_conv2 weights
            ],
            out_specs=pl.BlockSpec((Mb, D), lambda i: (i, 0)),
            scratch_shapes=[pltpu.VMEM((Bb * Tp, D), jnp.float32)],  # halo buffer
        ),
        compiler_params=pltpu.CompilerParams(
            dimension_semantics=("parallel",),             # no cross-step carry
            vmem_limit_bytes=_vmem_limit_bytes(Bb, T, D, K),
        ),
    )(x2, vecs, w1_in, wdw, w2_in)
    return out2.reshape(B, T, D)


def reference_forward(x, params):
    """Plain-JAX reference with the SAME bf16 MXU-operand casts as the kernel
    (so the check isolates kernel logic, not bf16 rounding)."""
    ln_g, ln_b, w1, b1, wdw, bdw, bn_s, bn_b, w2, b2 = params
    B, T, D = x.shape
    K = wdw.shape[0]
    pad = (K - 1) // 2
    mean = jnp.mean(x, axis=-1, keepdims=True)
    var = jnp.mean((x - mean) ** 2, axis=-1, keepdims=True)
    xn = (x - mean) * jax.lax.rsqrt(var + LN_EPS) * ln_g + ln_b
    xb = xn.astype(MXU_DTYPE)
    a = jnp.einsum("btd,de->bte", xb, w1[:, :D].astype(MXU_DTYPE),
                   preferred_element_type=jnp.float32) + b1[:, :D]
    g = jnp.einsum("btd,de->bte", xb, w1[:, D:].astype(MXU_DTYPE),
                   preferred_element_type=jnp.float32) + b1[:, D:]
    z = a * jax.nn.sigmoid(g)
    zp = jnp.pad(z, ((0, 0), (pad, pad), (0, 0)))
    acc = jnp.zeros_like(z)
    for k in range(K):
        acc = acc + zp[:, k:k + T, :] * wdw[k]
    acc = acc + bdw
    h = acc * bn_s + bn_b
    h = h * jax.nn.sigmoid(h)
    out = jnp.einsum("btd,de->bte", h.astype(MXU_DTYPE), w2.astype(MXU_DTYPE),
                     preferred_element_type=jnp.float32) + b2
    return x + out


def make_params(key, d_model, kernel_size):
    """Deterministic synthetic parameters matching nn.Module shapes
    (pointwise conv weights stored pre-transposed as (C_in, C_out),
     depthwise conv weight stored as (K, D))."""
    ks = jax.random.split(key, 8)
    D, K = d_model, kernel_size
    ln_g = jnp.ones((1, D), jnp.float32) + 0.1 * jax.random.normal(ks[0], (1, D))
    ln_b = 0.1 * jax.random.normal(ks[1], (1, D))
    w1 = 0.2 * jax.random.normal(ks[2], (D, 2 * D), jnp.float32)
    b1 = 0.1 * jax.random.normal(ks[3], (1, 2 * D), jnp.float32)
    wdw = 0.2 * jax.random.normal(ks[4], (K, D), jnp.float32)
    bdw = 0.1 * jax.random.normal(ks[5], (1, D), jnp.float32)
    # BatchNorm: gamma/beta learned, running stats at their init values,
    # folded into per-channel scale/shift (eval mode).
    bn_gamma = jnp.ones((1, D), jnp.float32) + 0.1 * jax.random.normal(ks[6], (1, D))
    bn_beta = 0.1 * jax.random.normal(ks[7], (1, D))
    running_mean = jnp.zeros((1, D), jnp.float32)
    running_var = jnp.ones((1, D), jnp.float32)
    bn_s = bn_gamma / jnp.sqrt(running_var + BN_EPS)
    bn_b = bn_beta - running_mean * bn_s
    w2 = 0.2 * jax.random.normal(jax.random.fold_in(key, 100), (D, D), jnp.float32)
    b2 = 0.1 * jax.random.normal(jax.random.fold_in(key, 101), (1, D), jnp.float32)
    return (ln_g, ln_b, w1, b1, wdw, bdw, bn_s, bn_b, w2, b2)


if __name__ == "__main__":
    B, T, D = 8, 64, 32        # small demo shapes; Bb=4 -> Mb=256 rows, grid=(2,)
    KERNEL_SIZE = 31

    key = jax.random.PRNGKey(0)
    kx, kp = jax.random.split(key)
    x = jax.random.normal(kx, (B, T, D), jnp.float32)
    params = make_params(kp, D, KERNEL_SIZE)

    out = jax.block_until_ready(conv_module_forward(x, params))
    ref = jax.block_until_ready(reference_forward(x, params))
    np.testing.assert_allclose(np.asarray(out), np.asarray(ref), rtol=1e-2, atol=1e-2)

    print("KERNEL_OK")
</pallas_src>

<mosaic_0001>
module attributes {stable_mosaic.version = 11 : i64} {
  func.func @conv_module_kernel(%arg0: i32, %arg1: memref<256x32xf32, #tpu.memory_space<vmem>>, %arg2: memref<8x32xf32, #tpu.memory_space<vmem>>, %arg3: memref<2x32x32xbf16, #tpu.memory_space<vmem>>, %arg4: memref<31x32xf32, #tpu.memory_space<vmem>>, %arg5: memref<32x32xbf16, #tpu.memory_space<vmem>>, %arg6: memref<256x32xf32, #tpu.memory_space<vmem>>, %arg7: memref<384x32xf32, #tpu.memory_space<vmem>>) attributes {dimension_semantics = [#tpu.dimension_semantics<parallel>], iteration_bounds = array<i64: 2>, scalar_prefetch = 0 : i64, scratch_operands = 1 : i64, tpu.core_type = #tpu.core_type<tc>, window_params = [{transform_indices = @transform_0, window_bounds = array<i64: 256, 32>}, {pipeline_mode = #tpu.pipeline_mode<synchronous>, transform_indices = @transform_1, window_bounds = array<i64: 8, 32>}, {pipeline_mode = #tpu.pipeline_mode<synchronous>, transform_indices = @transform_2, window_bounds = array<i64: 2, 32, 32>}, {pipeline_mode = #tpu.pipeline_mode<synchronous>, transform_indices = @transform_3, window_bounds = array<i64: 31, 32>}, {pipeline_mode = #tpu.pipeline_mode<synchronous>, transform_indices = @transform_4, window_bounds = array<i64: 32, 32>}, {transform_indices = @transform_5, window_bounds = array<i64: 256, 32>}]} {
    %c0 = arith.constant 0 : index
    %c0_0 = arith.constant 0 : index
    %0 = vector.load %arg2[%c0, %c0_0] : memref<8x32xf32, #tpu.memory_space<vmem>>, vector<1x32xf32>
    %c1 = arith.constant 1 : index
    %c0_1 = arith.constant 0 : index
    %1 = vector.load %arg2[%c1, %c0_1] : memref<8x32xf32, #tpu.memory_space<vmem>>, vector<1x32xf32>
    %c2 = arith.constant 2 : index
    %c0_2 = arith.constant 0 : index
    %2 = vector.load %arg2[%c2, %c0_2] : memref<8x32xf32, #tpu.memory_space<vmem>>, vector<1x32xf32>
    %c3 = arith.constant 3 : index
    %c0_3 = arith.constant 0 : index
    %3 = vector.load %arg2[%c3, %c0_3] : memref<8x32xf32, #tpu.memory_space<vmem>>, vector<1x32xf32>
    %c4 = arith.constant 4 : index
    %c0_4 = arith.constant 0 : index
    %4 = vector.load %arg2[%c4, %c0_4] : memref<8x32xf32, #tpu.memory_space<vmem>>, vector<1x32xf32>
    %c5 = arith.constant 5 : index
    %c0_5 = arith.constant 0 : index
    %5 = vector.load %arg2[%c5, %c0_5] : memref<8x32xf32, #tpu.memory_space<vmem>>, vector<1x32xf32>
    %c6 = arith.constant 6 : index
    %c0_6 = arith.constant 0 : index
    %6 = vector.load %arg2[%c6, %c0_6] : memref<8x32xf32, #tpu.memory_space<vmem>>, vector<1x32xf32>
    %c7 = arith.constant 7 : index
    %c0_7 = arith.constant 0 : index
    %7 = vector.load %arg2[%c7, %c0_7] : memref<8x32xf32, #tpu.memory_space<vmem>>, vector<1x32xf32>
    %c0_8 = arith.constant 0 : index
    %c0_9 = arith.constant 0 : index
    %8 = vector.load %arg1[%c0_8, %c0_9] : memref<256x32xf32, #tpu.memory_space<vmem>>, vector<256x32xf32>
    %cst = arith.constant dense<0.000000e+00> : vector<256xf32>
    %9 = vector.multi_reduction <add>, %8, %cst [1] : vector<256x32xf32> to vector<256xf32>
    %10 = vector.shape_cast %9 : vector<256xf32> to vector<256x1xf32>
    %cst_10 = arith.constant 3.200000e+01 : f32
    %11 = vector.broadcast %cst_10 : f32 to vector<256x1xf32>
    %12 = arith.divf %10, %11 : vector<256x1xf32>
    %13 = vector.broadcast %12 : vector<256x1xf32> to vector<256x32xf32>
    %14 = arith.subf %8, %13 : vector<256x32xf32>
    %15 = arith.mulf %14, %14 : vector<256x32xf32>
    %cst_11 = arith.constant dense<0.000000e+00> : vector<256xf32>
    %16 = vector.multi_reduction <add>, %15, %cst_11 [1] : vector<256x32xf32> to vector<256xf32>
    %17 = vector.shape_cast %16 : vector<256xf32> to vector<256x1xf32>
    %cst_12 = arith.constant 3.200000e+01 : f32
    %18 = vector.broadcast %cst_12 : f32 to vector<256x1xf32>
    %19 = arith.divf %17, %18 : vector<256x1xf32>
    %20 = vector.broadcast %12 : vector<256x1xf32> to vector<256x32xf32>
    %21 = arith.subf %8, %20 : vector<256x32xf32>
    %cst_13 = arith.constant 9.99999974E-6 : f32
    %22 = vector.broadcast %cst_13 : f32 to vector<256x1xf32>
    %23 = arith.addf %19, %22 : vector<256x1xf32>
    %24 = math.rsqrt %23 : vector<256x1xf32>
    %25 = vector.broadcast %24 : vector<256x1xf32> to vector<256x32xf32>
    %26 = arith.mulf %21, %25 : vector<256x32xf32>
    %27 = vector.broadcast %0 : vector<1x32xf32> to vector<256x32xf32>
    %28 = arith.mulf %26, %27 : vector<256x32xf32>
    %29 = vector.broadcast %1 : vector<1x32xf32> to vector<256x32xf32>
    %30 = arith.addf %28, %29 : vector<256x32xf32>
    %31 = arith.truncf %30 : vector<256x32xf32> to vector<256x32xbf16>
    %c0_14 = arith.constant 0 : index
    %c0_15 = arith.constant 0 : index
    %c0_16 = arith.constant 0 : index
    %32 = vector.load %arg3[%c0_14, %c0_15, %c0_16] : memref<2x32x32xbf16, #tpu.memory_space<vmem>>, vector<1x32x32xbf16>
    %33 = vector.shape_cast %32 : vector<1x32x32xbf16> to vector<32x32xbf16>
    %cst_17 = arith.constant dense<0.000000e+00> : vector<256x32xf32>
    %34 = tpu.matmul %31, %33, %cst_17 {dimension_numbers = #tpu.dot_dimension_numbers<[1], [0], [0], [1], [0, 0, 1, 1], [], []>} : vector<256x32xbf16>, vector<32x32xbf16>, vector<256x32xf32> -> vector<256x32xf32>
    %35 = vector.broadcast %2 : vector<1x32xf32> to vector<256x32xf32>
    %36 = arith.addf %34, %35 : vector<256x32xf32>
    %c1_18 = arith.constant 1 : index
    %c0_19 = arith.constant 0 : index
    %c0_20 = arith.constant 0 : index
    %37 = vector.load %arg3[%c1_18, %c0_19, %c0_20] : memref<2x32x32xbf16, #tpu.memory_space<vmem>>, vector<1x32x32xbf16>
    %38 = vector.shape_cast %37 : vector<1x32x32xbf16> to vector<32x32xbf16>
    %cst_21 = arith.constant dense<0.000000e+00> : vector<256x32xf32>
    %39 = tpu.matmul %31, %38, %cst_21 {dimension_numbers = #tpu.dot_dimension_numbers<[1], [0], [0], [1], [0, 0, 1, 1], [], []>} : vector<256x32xbf16>, vector<32x32xbf16>, vector<256x32xf32> -> vector<256x32xf32>
    %40 = vector.broadcast %3 : vector<1x32xf32> to vector<256x32xf32>
    %41 = arith.addf %39, %40 : vector<256x32xf32>
    %42 = arith.negf %41 : vector<256x32xf32>
    %43 = math.exp %42 : vector<256x32xf32>
    %cst_22 = arith.constant 1.000000e+00 : f32
    %44 = vector.broadcast %cst_22 : f32 to vector<256x32xf32>
    %45 = arith.addf %44, %43 : vector<256x32xf32>
    %46 = arith.divf %44, %45 : vector<256x32xf32>
    %47 = arith.mulf %36, %46 : vector<256x32xf32>
    %cst_23 = arith.constant 0.000000e+00 : f32
    %48 = vector.broadcast %cst_23 : f32 to vector<16x32xf32>
    %c0_24 = arith.constant 0 : index
    %c0_25 = arith.constant 0 : index
    %49 = vector.load %arg7[%c0_24, %c0_25] : memref<384x32xf32, #tpu.memory_space<vmem>>, vector<16x32xf32>
    tpu.vector_store %arg7[%c0_24, %c0_25], %48 {strides = array<i32>} : memref<384x32xf32, #tpu.memory_space<vmem>>, vector<16x32xf32>,
    %50 = vector.extract_strided_slice %47 {offsets = [0, 0], sizes = [64, 32], strides = [1, 1]} : vector<256x32xf32> to vector<64x32xf32>
    %c16 = arith.constant 16 : index
    %c0_26 = arith.constant 0 : index
    %51 = vector.load %arg7[%c16, %c0_26] : memref<384x32xf32, #tpu.memory_space<vmem>>, vector<64x32xf32>
    tpu.vector_store %arg7[%c16, %c0_26], %50 {strides = array<i32>} : memref<384x32xf32, #tpu.memory_space<vmem>>, vector<64x32xf32>,
    %c80 = arith.constant 80 : index
    %c0_27 = arith.constant 0 : index
    %52 = vector.load %arg7[%c80, %c0_27] : memref<384x32xf32, #tpu.memory_space<vmem>>, vector<16x32xf32>
    tpu.vector_store %arg7[%c80, %c0_27], %48 {strides = array<i32>} : memref<384x32xf32, #tpu.memory_space<vmem>>, vector<16x32xf32>,
    %c96 = arith.constant 96 : index
    %c0_28 = arith.constant 0 : index
    %53 = vector.load %arg7[%c96, %c0_28] : memref<384x32xf32, #tpu.memory_space<vmem>>, vector<16x32xf32>
    tpu.vector_store %arg7[%c96, %c0_28], %48 {strides = array<i32>} : memref<384x32xf32, #tpu.memory_space<vmem>>, vector<16x32xf32>,
    %54 = vector.extract_strided_slice %47 {offsets = [64, 0], sizes = [64, 32], strides = [1, 1]} : vector<256x32xf32> to vector<64x32xf32>
    %c112 = arith.constant 112 : index
    %c0_29 = arith.constant 0 : index
    %55 = vector.load %arg7[%c112, %c0_29] : memref<384x32xf32, #tpu.memory_space<vmem>>, vector<64x32xf32>
    tpu.vector_store %arg7[%c112, %c0_29], %54 {strides = array<i32>} : memref<384x32xf32, #tpu.memory_space<vmem>>, vector<64x32xf32>,
    %c176 = arith.constant 176 : index
    %c0_30 = arith.constant 0 : index
    %56 = vector.load %arg7[%c176, %c0_30] : memref<384x32xf32, #tpu.memory_space<vmem>>, vector<16x32xf32>
    tpu.vector_store %arg7[%c176, %c0_30], %48 {strides = array<i32>} : memref<384x32xf32, #tpu.memory_space<vmem>>, vector<16x32xf32>,
    %c192 = arith.constant 192 : index
    %c0_31 = arith.constant 0 : index
    %57 = vector.load %arg7[%c192, %c0_31] : memref<384x32xf32, #tpu.memory_space<vmem>>, vector<16x32xf32>
    tpu.vector_store %arg7[%c192, %c0_31], %48 {strides = array<i32>} : memref<384x32xf32, #tpu.memory_space<vmem>>, vector<16x32xf32>,
    %58 = vector.extract_strided_slice %47 {offsets = [128, 0], sizes = [64, 32], strides = [1, 1]} : vector<256x32xf32> to vector<64x32xf32>
    %c208 = arith.constant 208 : index
    %c0_32 = arith.constant 0 : index
    %59 = vector.load %arg7[%c208, %c0_32] : memref<384x32xf32, #tpu.memory_space<vmem>>, vector<64x32xf32>
    tpu.vector_store %arg7[%c208, %c0_32], %58 {strides = array<i32>} : memref<384x32xf32, #tpu.memory_space<vmem>>, vector<64x32xf32>,
    %c272 = arith.constant 272 : index
    %c0_33 = arith.constant 0 : index
    %60 = vector.load %arg7[%c272, %c0_33] : memref<384x32xf32, #tpu.memory_space<vmem>>, vector<16x32xf32>
    tpu.vector_store %arg7[%c272, %c0_33], %48 {strides = array<i32>} : memref<384x32xf32, #tpu.memory_space<vmem>>, vector<16x32xf32>,
    %c288 = arith.constant 288 : index
    %c0_34 = arith.constant 0 : index
    %61 = vector.load %arg7[%c288, %c0_34] : memref<384x32xf32, #tpu.memory_space<vmem>>, vector<16x32xf32>
    tpu.vector_store %arg7[%c288, %c0_34], %48 {strides = array<i32>} : memref<384x32xf32, #tpu.memory_space<vmem>>, vector<16x32xf32>,
    %62 = vector.extract_strided_slice %47 {offsets = [192, 0], sizes = [64, 32], strides = [1, 1]} : vector<256x32xf32> to vector<64x32xf32>
    %c304 = arith.constant 304 : index
    %c0_35 = arith.constant 0 : index
    %63 = vector.load %arg7[%c304, %c0_35] : memref<384x32xf32, #tpu.memory_space<vmem>>, vector<64x32xf32>
    tpu.vector_store %arg7[%c304, %c0_35], %62 {strides = array<i32>} : memref<384x32xf32, #tpu.memory_space<vmem>>, vector<64x32xf32>,
    %c368 = arith.constant 368 : index
    %c0_36 = arith.constant 0 : index
    %64 = vector.load %arg7[%c368, %c0_36] : memref<384x32xf32, #tpu.memory_space<vmem>>, vector<16x32xf32>
    tpu.vector_store %arg7[%c368, %c0_36], %48 {strides = array<i32>} : memref<384x32xf32, #tpu.memory_space<vmem>>, vector<16x32xf32>,
    %c0_37 = arith.constant 0 : index
    %c0_38 = arith.constant 0 : index
    %65 = vector.load %arg7[%c0_37, %c0_38] : memref<384x32xf32, #tpu.memory_space<vmem>>, vector<384x32xf32>
    %c0_39 = arith.constant 0 : index
    %c0_40 = arith.constant 0 : index
    %66 = vector.load %arg4[%c0_39, %c0_40] : memref<31x32xf32, #tpu.memory_space<vmem>>, vector<1x32xf32>
    %c15_i32 = arith.constant 15 : i32
    %67 = tpu.dynamic_rotate %65 by %c15_i32 dim 0 : vector<384x32xf32>, i32 -> vector<384x32xf32>
    %68 = vector.broadcast %66 : vector<1x32xf32> to vector<384x32xf32>
    %69 = arith.mulf %67, %68 : vector<384x32xf32>
    %c1_41 = arith.constant 1 : index
    %c0_42 = arith.constant 0 : index
    %70 = vector.load %arg4[%c1_41, %c0_42] : memref<31x32xf32, #tpu.memory_space<vmem>>, vector<1x32xf32>
    %c14_i32 = arith.constant 14 : i32
    %71 = tpu.dynamic_rotate %65 by %c14_i32 dim 0 : vector<384x32xf32>, i32 -> vector<384x32xf32>
    %72 = vector.broadcast %70 : vector<1x32xf32> to vector<384x32xf32>
    %73 = arith.mulf %71, %72 : vector<384x32xf32>
    %74 = arith.addf %69, %73 : vector<384x32xf32>
    %c2_43 = arith.constant 2 : index
    %c0_44 = arith.constant 0 : index
    %75 = vector.load %arg4[%c2_43, %c0_44] : memref<31x32xf32, #tpu.memory_space<vmem>>, vector<1x32xf32>
    %c13_i32 = arith.constant 13 : i32
    %76 = tpu.dynamic_rotate %65 by %c13_i32 dim 0 : vector<384x32xf32>, i32 -> vector<384x32xf32>
    %77 = vector.broadcast %75 : vector<1x32xf32> to vector<384x32xf32>
    %78 = arith.mulf %76, %77 : vector<384x32xf32>
    %79 = arith.addf %74, %78 : vector<384x32xf32>
    %c3_45 = arith.constant 3 : index
    %c0_46 = arith.constant 0 : index
    %80 = vector.load %arg4[%c3_45, %c0_46] : memref<31x32xf32, #tpu.memory_space<vmem>>, vector<1x32xf32>
    %c12_i32 = arith.constant 12 : i32
    %81 = tpu.dynamic_rotate %65 by %c12_i32 dim 0 : vector<384x32xf32>, i32 -> vector<384x32xf32>
    %82 = vector.broadcast %80 : vector<1x32xf32> to vector<384x32xf32>
    %83 = arith.mulf %81, %82 : vector<384x32xf32>
    %84 = arith.addf %79, %83 : vector<384x32xf32>
    %c4_47 = arith.constant 4 : index
    %c0_48 = arith.constant 0 : index
    %85 = vector.load %arg4[%c4_47, %c0_48] : memref<31x32xf32, #tpu.memory_space<vmem>>, vector<1x32xf32>
    %c11_i32 = arith.constant 11 : i32
    %86 = tpu.dynamic_rotate %65 by %c11_i32 dim 0 : vector<384x32xf32>, i32 -> vector<384x32xf32>
    %87 = vector.broadcast %85 : vector<1x32xf32> to vector<384x32xf32>
    %88 = arith.mulf %86, %87 : vector<384x32xf32>
    %89 = arith.addf %84, %88 : vector<384x32xf32>
    %c5_49 = arith.constant 5 : index
    %c0_50 = arith.constant 0 : index
    %90 = vector.load %arg4[%c5_49, %c0_50] : memref<31x32xf32, #tpu.memory_space<vmem>>, vector<1x32xf32>
    %c10_i32 = arith.constant 10 : i32
    %91 = tpu.dynamic_rotate %65 by %c10_i32 dim 0 : vector<384x32xf32>, i32 -> vector<384x32xf32>
    %92 = vector.broadcast %90 : vector<1x32xf32> to vector<384x32xf32>
    %93 = arith.mulf %91, %92 : vector<384x32xf32>
    %94 = arith.addf %89, %93 : vector<384x32xf32>
    %c6_51 = arith.constant 6 : index
    %c0_52 = arith.constant 0 : index
    %95 = vector.load %arg4[%c6_51, %c0_52] : memref<31x32xf32, #tpu.memory_space<vmem>>, vector<1x32xf32>
    %c9_i32 = arith.constant 9 : i32
    %96 = tpu.dynamic_rotate %65 by %c9_i32 dim 0 : vector<384x32xf32>, i32 -> vector<384x32xf32>
    %97 = vector.broadcast %95 : vector<1x32xf32> to vector<384x32xf32>
    %98 = arith.mulf %96, %97 : vector<384x32xf32>
    %99 = arith.addf %94, %98 : vector<384x32xf32>
    %c7_53 = arith.constant 7 : index
    %c0_54 = arith.constant 0 : index
    %100 = vector.load %arg4[%c7_53, %c0_54] : memref<31x32xf32, #tpu.memory_space<vmem>>, vector<1x32xf32>
    %c8_i32 = arith.constant 8 : i32
    %101 = tpu.dynamic_rotate %65 by %c8_i32 dim 0 : vector<384x32xf32>, i32 -> vector<384x32xf32>
    %102 = vector.broadcast %100 : vector<1x32xf32> to vector<384x32xf32>
    %103 = arith.mulf %101, %102 : vector<384x32xf32>
    %104 = arith.addf %99, %103 : vector<384x32xf32>
    %c8 = arith.constant 8 : index
    %c0_55 = arith.constant 0 : index
    %105 = vector.load %arg4[%c8, %c0_55] : memref<31x32xf32, #tpu.memory_space<vmem>>, vector<1x32xf32>
    %c7_i32 = arith.constant 7 : i32
    %106 = tpu.dynamic_rotate %65 by %c7_i32 dim 0 : vector<384x32xf32>, i32 -> vector<384x32xf32>
    %107 = vector.broadcast %105 : vector<1x32xf32> to vector<384x32xf32>
    %108 = arith.mulf %106, %107 : vector<384x32xf32>
    %c9 = arith.constant 9 : index
    %c0_56 = arith.constant 0 : index
    %109 = vector.load %arg4[%c9, %c0_56] : memref<31x32xf32, #tpu.memory_space<vmem>>, vector<1x32xf32>
    %c6_i32 = arith.constant 6 : i32
    %110 = tpu.dynamic_rotate %65 by %c6_i32 dim 0 : vector<384x32xf32>, i32 -> vector<384x32xf32>
    %111 = vector.broadcast %109 : vector<1x32xf32> to vector<384x32xf32>
    %112 = arith.mulf %110, %111 : vector<384x32xf32>
    %113 = arith.addf %108, %112 : vector<384x32xf32>
    %c10 = arith.constant 10 : index
    %c0_57 = arith.constant 0 : index
    %114 = vector.load %arg4[%c10, %c0_57] : memref<31x32xf32, #tpu.memory_space<vmem>>, vector<1x32xf32>
    %c5_i32 = arith.constant 5 : i32
    %115 = tpu.dynamic_rotate %65 by %c5_i32 dim 0 : vector<384x32xf32>, i32 -> vector<384x32xf32>
    %116 = vector.broadcast %114 : vector<1x32xf32> to vector<384x32xf32>
    %117 = arith.mulf %115, %116 : vector<384x32xf32>
    %118 = arith.addf %113, %117 : vector<384x32xf32>
    %c11 = arith.constant 11 : index
    %c0_58 = arith.constant 0 : index
    %119 = vector.load %arg4[%c11, %c0_58] : memref<31x32xf32, #tpu.memory_space<vmem>>, vector<1x32xf32>
    %c4_i32 = arith.constant 4 : i32
    %120 = tpu.dynamic_rotate %65 by %c4_i32 dim 0 : vector<384x32xf32>, i32 -> vector<384x32xf32>
    %121 = vector.broadcast %119 : vector<1x32xf32> to vector<384x32xf32>
    %122 = arith.mulf %120, %121 : vector<384x32xf32>
    %123 = arith.addf %118, %122 : vector<384x32xf32>
    %c12 = arith.constant 12 : index
    %c0_59 = arith.constant 0 : index
    %124 = vector.load %arg4[%c12, %c0_59] : memref<31x32xf32, #tpu.memory_space<vmem>>, vector<1x32xf32>
    %c3_i32 = arith.constant 3 : i32
    %125 = tpu.dynamic_rotate %65 by %c3_i32 dim 0 : vector<384x32xf32>, i32 -> vector<384x32xf32>
    %126 = vector.broadcast %124 : vector<1x32xf32> to vector<384x32xf32>
    %127 = arith.mulf %125, %126 : vector<384x32xf32>
    %128 = arith.addf %123, %127 : vector<384x32xf32>
    %c13 = arith.constant 13 : index
    %c0_60 = arith.constant 0 : index
    %129 = vector.load %arg4[%c13, %c0_60] : memref<31x32xf32, #tpu.memory_space<vmem>>, vector<1x32xf32>
    %c2_i32 = arith.constant 2 : i32
    %130 = tpu.dynamic_rotate %65 by %c2_i32 dim 0 : vector<384x32xf32>, i32 -> vector<384x32xf32>
    %131 = vector.broadcast %129 : vector<1x32xf32> to vector<384x32xf32>
    %132 = arith.mulf %130, %131 : vector<384x32xf32>
    %133 = arith.addf %128, %132 : vector<384x32xf32>
    %c14 = arith.constant 14 : index
    %c0_61 = arith.constant 0 : index
    %134 = vector.load %arg4[%c14, %c0_61] : memref<31x32xf32, #tpu.memory_space<vmem>>, vector<1x32xf32>
    %c1_i32 = arith.constant 1 : i32
    %135 = tpu.dynamic_rotate %65 by %c1_i32 dim 0 : vector<384x32xf32>, i32 -> vector<384x32xf32>
    %136 = vector.broadcast %134 : vector<1x32xf32> to vector<384x32xf32>
    %137 = arith.mulf %135, %136 : vector<384x32xf32>
    %138 = arith.addf %133, %137 : vector<384x32xf32>
    %c15 = arith.constant 15 : index
    %c0_62 = arith.constant 0 : index
    %139 = vector.load %arg4[%c15, %c0_62] : memref<31x32xf32, #tpu.memory_space<vmem>>, vector<1x32xf32>
    %140 = vector.broadcast %139 : vector<1x32xf32> to vector<384x32xf32>
    %141 = arith.mulf %65, %140 : vector<384x32xf32>
    %142 = arith.addf %138, %141 : vector<384x32xf32>
    %143 = arith.addf %104, %142 : vector<384x32xf32>
    %c16_63 = arith.constant 16 : index
    %c0_64 = arith.constant 0 : index
    %144 = vector.load %arg4[%c16_63, %c0_64] : memref<31x32xf32, #tpu.memory_space<vmem>>, vector<1x32xf32>
    %c383_i32 = arith.constant 383 : i32
    %145 = tpu.dynamic_rotate %65 by %c383_i32 dim 0 : vector<384x32xf32>, i32 -> vector<384x32xf32>
    %146 = vector.broadcast %144 : vector<1x32xf32> to vector<384x32xf32>
    %147 = arith.mulf %145, %146 : vector<384x32xf32>
    %c17 = arith.constant 17 : index
    %c0_65 = arith.constant 0 : index
    %148 = vector.load %arg4[%c17, %c0_65] : memref<31x32xf32, #tpu.memory_space<vmem>>, vector<1x32xf32>
    %c382_i32 = arith.constant 382 : i32
    %149 = tpu.dynamic_rotate %65 by %c382_i32 dim 0 : vector<384x32xf32>, i32 -> vector<384x32xf32>
    %150 = vector.broadcast %148 : vector<1x32xf32> to vector<384x32xf32>
    %151 = arith.mulf %149, %150 : vector<384x32xf32>
    %152 = arith.addf %147, %151 : vector<384x32xf32>
    %c18 = arith.constant 18 : index
    %c0_66 = arith.constant 0 : index
    %153 = vector.load %arg4[%c18, %c0_66] : memref<31x32xf32, #tpu.memory_space<vmem>>, vector<1x32xf32>
    %c381_i32 = arith.constant 381 : i32
    %154 = tpu.dynamic_rotate %65 by %c381_i32 dim 0 : vector<384x32xf32>, i32 -> vector<384x32xf32>
    %155 = vector.broadcast %153 : vector<1x32xf32> to vector<384x32xf32>
    %156 = arith.mulf %154, %155 : vector<384x32xf32>
    %157 = arith.addf %152, %156 : vector<384x32xf32>
    %c19 = arith.constant 19 : index
    %c0_67 = arith.constant 0 : index
    %158 = vector.load %arg4[%c19, %c0_67] : memref<31x32xf32, #tpu.memory_space<vmem>>, vector<1x32xf32>
    %c380_i32 = arith.constant 380 : i32
    %159 = tpu.dynamic_rotate %65 by %c380_i32 dim 0 : vector<384x32xf32>, i32 -> vector<384x32xf32>
    %160 = vector.broadcast %158 : vector<1x32xf32> to vector<384x32xf32>
    %161 = arith.mulf %159, %160 : vector<384x32xf32>
    %162 = arith.addf %157, %161 : vector<384x32xf32>
    %c20 = arith.constant 20 : index
    %c0_68 = arith.constant 0 : index
    %163 = vector.load %arg4[%c20, %c0_68] : memref<31x32xf32, #tpu.memory_space<vmem>>, vector<1x32xf32>
    %c379_i32 = arith.constant 379 : i32
    %164 = tpu.dynamic_rotate %65 by %c379_i32 dim 0 : vector<384x32xf32>, i32 -> vector<384x32xf32>
    %165 = vector.broadcast %163 : vector<1x32xf32> to vector<384x32xf32>
    %166 = arith.mulf %164, %165 : vector<384x32xf32>
    %167 = arith.addf %162, %166 : vector<384x32xf32>
    %c21 = arith.constant 21 : index
    %c0_69 = arith.constant 0 : index
    %168 = vector.load %arg4[%c21, %c0_69] : memref<31x32xf32, #tpu.memory_space<vmem>>, vector<1x32xf32>
    %c378_i32 = arith.constant 378 : i32
    %169 = tpu.dynamic_rotate %65 by %c378_i32 dim 0 : vector<384x32xf32>, i32 -> vector<384x32xf32>
    %170 = vector.broadcast %168 : vector<1x32xf32> to vector<384x32xf32>
    %171 = arith.mulf %169, %170 : vector<384x32xf32>
    %172 = arith.addf %167, %171 : vector<384x32xf32>
    %c22 = arith.constant 22 : index
    %c0_70 = arith.constant 0 : index
    %173 = vector.load %arg4[%c22, %c0_70] : memref<31x32xf32, #tpu.memory_space<vmem>>, vector<1x32xf32>
    %c377_i32 = arith.constant 377 : i32
    %174 = tpu.dynamic_rotate %65 by %c377_i32 dim 0 : vector<384x32xf32>, i32 -> vector<384x32xf32>
    %175 = vector.broadcast %173 : vector<1x32xf32> to vector<384x32xf32>
    %176 = arith.mulf %174, %175 : vector<384x32xf32>
    %177 = arith.addf %172, %176 : vector<384x32xf32>
    %c23 = arith.constant 23 : index
    %c0_71 = arith.constant 0 : index
    %178 = vector.load %arg4[%c23, %c0_71] : memref<31x32xf32, #tpu.memory_space<vmem>>, vector<1x32xf32>
    %c376_i32 = arith.constant 376 : i32
    %179 = tpu.dynamic_rotate %65 by %c376_i32 dim 0 : vector<384x32xf32>, i32 -> vector<384x32xf32>
    %180 = vector.broadcast %178 : vector<1x32xf32> to vector<384x32xf32>
    %181 = arith.mulf %179, %180 : vector<384x32xf32>
    %182 = arith.addf %177, %181 : vector<384x32xf32>
    %183 = arith.addf %143, %182 : vector<384x32xf32>
    %c24 = arith.constant 24 : index
    %c0_72 = arith.constant 0 : index
    %184 = vector.load %arg4[%c24, %c0_72] : memref<31x32xf32, #tpu.memory_space<vmem>>, vector<1x32xf32>
    %c375_i32 = arith.constant 375 : i32
    %185 = tpu.dynamic_rotate %65 by %c375_i32 dim 0 : vector<384x32xf32>, i32 -> vector<384x32xf32>
    %186 = vector.broadcast %184 : vector<1x32xf32> to vector<384x32xf32>
    %187 = arith.mulf %185, %186 : vector<384x32xf32>
    %c25 = arith.constant 25 : index
    %c0_73 = arith.constant 0 : index
    %188 = vector.load %arg4[%c25, %c0_73] : memref<31x32xf32, #tpu.memory_space<vmem>>, vector<1x32xf32>
    %c374_i32 = arith.constant 374 : i32
    %189 = tpu.dynamic_rotate %65 by %c374_i32 dim 0 : vector<384x32xf32>, i32 -> vector<384x32xf32>
    %190 = vector.broadcast %188 : vector<1x32xf32> to vector<384x32xf32>
    %191 = arith.mulf %189, %190 : vector<384x32xf32>
    %192 = arith.addf %187, %191 : vector<384x32xf32>
    %c26 = arith.constant 26 : index
    %c0_74 = arith.constant 0 : index
    %193 = vector.load %arg4[%c26, %c0_74] : memref<31x32xf32, #tpu.memory_space<vmem>>, vector<1x32xf32>
    %c373_i32 = arith.constant 373 : i32
    %194 = tpu.dynamic_rotate %65 by %c373_i32 dim 0 : vector<384x32xf32>, i32 -> vector<384x32xf32>
    %195 = vector.broadcast %193 : vector<1x32xf32> to vector<384x32xf32>
    %196 = arith.mulf %194, %195 : vector<384x32xf32>
    %197 = arith.addf %192, %196 : vector<384x32xf32>
    %c27 = arith.constant 27 : index
    %c0_75 = arith.constant 0 : index
    %198 = vector.load %arg4[%c27, %c0_75] : memref<31x32xf32, #tpu.memory_space<vmem>>, vector<1x32xf32>
    %c372_i32 = arith.constant 372 : i32
    %199 = tpu.dynamic_rotate %65 by %c372_i32 dim 0 : vector<384x32xf32>, i32 -> vector<384x32xf32>
    %200 = vector.broadcast %198 : vector<1x32xf32> to vector<384x32xf32>
    %201 = arith.mulf %199, %200 : vector<384x32xf32>
    %202 = arith.addf %197, %201 : vector<384x32xf32>
    %c28 = arith.constant 28 : index
    %c0_76 = arith.constant 0 : index
    %203 = vector.load %arg4[%c28, %c0_76] : memref<31x32xf32, #tpu.memory_space<vmem>>, vector<1x32xf32>
    %c371_i32 = arith.constant 371 : i32
    %204 = tpu.dynamic_rotate %65 by %c371_i32 dim 0 : vector<384x32xf32>, i32 -> vector<384x32xf32>
    %205 = vector.broadcast %203 : vector<1x32xf32> to vector<384x32xf32>
    %206 = arith.mulf %204, %205 : vector<384x32xf32>
    %207 = arith.addf %202, %206 : vector<384x32xf32>
    %c29 = arith.constant 29 : index
    %c0_77 = arith.constant 0 : index
    %208 = vector.load %arg4[%c29, %c0_77] : memref<31x32xf32, #tpu.memory_space<vmem>>, vector<1x32xf32>
    %c370_i32 = arith.constant 370 : i32
    %209 = tpu.dynamic_rotate %65 by %c370_i32 dim 0 : vector<384x32xf32>, i32 -> vector<384x32xf32>
    %210 = vector.broadcast %208 : vector<1x32xf32> to vector<384x32xf32>
    %211 = arith.mulf %209, %210 : vector<384x32xf32>
    %212 = arith.addf %207, %211 : vector<384x32xf32>
    %c30 = arith.constant 30 : index
    %c0_78 = arith.constant 0 : index
    %213 = vector.load %arg4[%c30, %c0_78] : memref<31x32xf32, #tpu.memory_space<vmem>>, vector<1x32xf32>
    %c369_i32 = arith.constant 369 : i32
    %214 = tpu.dynamic_rotate %65 by %c369_i32 dim 0 : vector<384x32xf32>, i32 -> vector<384x32xf32>
    %215 = vector.broadcast %213 : vector<1x32xf32> to vector<384x32xf32>
    %216 = arith.mulf %214, %215 : vector<384x32xf32>
    %217 = arith.addf %212, %216 : vector<384x32xf32>
    %218 = arith.addf %183, %217 : vector<384x32xf32>
    %219 = vector.extract_strided_slice %218 {offsets = [16, 0], sizes = [64, 32], strides = [1, 1]} : vector<384x32xf32> to vector<64x32xf32>
    %220 = vector.extract_strided_slice %218 {offsets = [112, 0], sizes = [64, 32], strides = [1, 1]} : vector<384x32xf32> to vector<64x32xf32>
    %221 = vector.extract_strided_slice %218 {offsets = [208, 0], sizes = [64, 32], strides = [1, 1]} : vector<384x32xf32> to vector<64x32xf32>
    %222 = vector.extract_strided_slice %218 {offsets = [304, 0], sizes = [64, 32], strides = [1, 1]} : vector<384x32xf32> to vector<64x32xf32>
    %223 = tpu.concatenate %219, %220, %221, %222 in 0 : vector<64x32xf32>, vector<64x32xf32>, vector<64x32xf32>, vector<64x32xf32> -> vector<256x32xf32>
    %224 = vector.broadcast %4 : vector<1x32xf32> to vector<256x32xf32>
    %225 = arith.addf %223, %224 : vector<256x32xf32>
    %226 = vector.broadcast %5 : vector<1x32xf32> to vector<256x32xf32>
    %227 = arith.mulf %225, %226 : vector<256x32xf32>
    %228 = vector.broadcast %6 : vector<1x32xf32> to vector<256x32xf32>
    %229 = arith.addf %227, %228 : vector<256x32xf32>
    %230 = arith.negf %229 : vector<256x32xf32>
    %231 = math.exp %230 : vector<256x32xf32>
    %cst_79 = arith.constant 1.000000e+00 : f32
    %232 = vector.broadcast %cst_79 : f32 to vector<256x32xf32>
    %233 = arith.addf %232, %231 : vector<256x32xf32>
    %234 = arith.divf %232, %233 : vector<256x32xf32>
    %235 = arith.mulf %229, %234 : vector<256x32xf32>
    %236 = arith.truncf %235 : vector<256x32xf32> to vector<256x32xbf16>
    %c0_80 = arith.constant 0 : index
    %c0_81 = arith.constant 0 : index
    %237 = vector.load %arg5[%c0_80, %c0_81] : memref<32x32xbf16, #tpu.memory_space<vmem>>, vector<32x32xbf16>
    %cst_82 = arith.constant dense<0.000000e+00> : vector<256x32xf32>
    %238 = tpu.matmul %236, %237, %cst_82 {dimension_numbers = #tpu.dot_dimension_numbers<[1], [0], [0], [1], [0, 0, 1, 1], [], []>} : vector<256x32xbf16>, vector<32x32xbf16>, vector<256x32xf32> -> vector<256x32xf32>
    %239 = vector.broadcast %7 : vector<1x32xf32> to vector<256x32xf32>
    %240 = arith.addf %238, %239 : vector<256x32xf32>
    %c0_83 = arith.constant 0 : index
    %c0_84 = arith.constant 0 : index
    %241 = vector.load %arg1[%c0_83, %c0_84] : memref<256x32xf32, #tpu.memory_space<vmem>>, vector<256x32xf32>
    %242 = arith.addf %241, %240 : vector<256x32xf32>
    %c0_85 = arith.constant 0 : index
    %c0_86 = arith.constant 0 : index
    %243 = vector.load %arg6[%c0_85, %c0_86] : memref<256x32xf32, #tpu.memory_space<vmem>>, vector<256x32xf32>
    tpu.vector_store %arg6[%c0_85, %c0_86], %242 {strides = array<i32>} : memref<256x32xf32, #tpu.memory_space<vmem>>, vector<256x32xf32>,
    return
  }
  func.func @transform_0(%arg0: i32) -> (i32, i32) {
    %c0_i32 = arith.constant 0 : i32
    %c0_i32_0 = arith.constant 0 : i32
    return %arg0, %c0_i32 : i32, i32
  }
  func.func @transform_1(%arg0: i32) -> (i32, i32) {
    %c0_i32 = arith.constant 0 : i32
    %c0_i32_0 = arith.constant 0 : i32
    %c0_i32_1 = arith.constant 0 : i32
    return %c0_i32, %c0_i32_0 : i32, i32
  }
  func.func @transform_2(%arg0: i32) -> (i32, i32, i32) {
    %c0_i32 = arith.constant 0 : i32
    %c0_i32_0 = arith.constant 0 : i32
    %c0_i32_1 = arith.constant 0 : i32
    %c0_i32_2 = arith.constant 0 : i32
    return %c0_i32, %c0_i32_0, %c0_i32_1 : i32, i32, i32
  }
  func.func @transform_3(%arg0: i32) -> (i32, i32) {
    %c0_i32 = arith.constant 0 : i32
    %c0_i32_0 = arith.constant 0 : i32
    %c0_i32_1 = arith.constant 0 : i32
    return %c0_i32, %c0_i32_0 : i32, i32
  }
  func.func @transform_4(%arg0: i32) -> (i32, i32) {
    %c0_i32 = arith.constant 0 : i32
    %c0_i32_0 = arith.constant 0 : i32
    %c0_i32_1 = arith.constant 0 : i32
    return %c0_i32, %c0_i32_0 : i32, i32
  }
  func.func @transform_5(%arg0: i32) -> (i32, i32) {
    %c0_i32 = arith.constant 0 : i32
    %c0_i32_0 = arith.constant 0 : i32
    return %arg0, %c0_i32 : i32, i32
  }
}

</mosaic_0001>

<bundles_post_ra>
// kernel: tpu_custom_call.1
= control target key start
LH: loop header
LB: loop body
LE: loop exit
PB: predicated region body
PF: predicated region fallthrough
CT: control target
= control target key end

     0   :  { %s5842_s18 = smov 0   ;;  %s12006_s0 = inlined_call_operand.vmem [shape: f32[512,32], index: 0, kind: input, shape index: {}]   ;;  %s12007_s1 = inlined_call_operand.vmem [shape: f32[8,32], index: 1, kind: input, shape index: {}]   ;;  %s12008_s2 = inlined_call_operand.vmem [shape: bf16[2,32,32], index: 2, kind: input, shape index: {}]   ;;  %s12009_s3 = inlined_call_operand.vmem [shape: f32[31,32], index: 3, kind: input, shape index: {}]   ;;  %s12010_s4 = inlined_call_operand.vmem [shape: bf16[32,32], index: 4, kind: input, shape index: {}]   ;;  %s12011_s5 = inlined_call_operand.vmem [shape: f32[512,32], index: 5, kind: output, shape index: {}]  }
   0x1 LB: > { %s4995_s19 = sadd.s32 4294967295, %s5809_s18   ;;  %p4999_p0 = scmp.ge.s32.totalorder %s5809_s18, 1  ;;  %s5809_s18 = sphi %s5842_s18, %s15_s18  }
   0x2   : > { %p188_p1 = scmp.lt.s32.totalorder %s5809_s18, 3 }
   0x4   : > { %p189_p2 = pnand %p4999_p0, %p188_p1 }
   0x6   : > { %192 = sbr.rel (%p189_p2) target bundleno = 1651 (0x673), region = 40 }
   0xd   : > { %s5000_s20 = sshll.u32 %s4995_s19, 5  ;;  %vm269_vm0 = vcmask 261120  }
   0xe   : > { %p217_p3 = scmp.lt.s32.totalorder %s5000_s20, 63 }
  0x10   : > { %s13081_s20 = smov (!%p217_p3, %s5000_s20), 63 }
  0x11   : > { %s5001_s21 = sshll.u32 %s13081_s20, 3 }
  0x12   : > { %s5858_s24 = scalar_lea.vmem %s12006_s0, %s5001_s21  ;;  %s11850_s26 = scalar_lea.vmem %s12011_s5, %s5001_s21 }
  0x13   : > { %v5861_v0 = vld [vmem:[%s5858_s24 + $0x80] sm:$0xff]  ;;  %v5864_v1 = vld [vmem:[%s5858_s24 + $0x90] sm:$0xff]  ;;  %v5867_v2 = vld [vmem:[%s5858_s24 + $0x88] sm:$0xff] }
  0x14   : > { %v318_v3 = vsel %vm269_vm0, %v5861_v0, 0.0  ;;  %v324_v4 = vsel %vm269_vm0, %v5864_v1, 0.0  ;;  %v5874_v5 = vld [vmem:[%s5858_s24 + $0x98] sm:$0xff]  ;;  %v321_v6 = vsel %vm269_vm0, %v5867_v2, 0.0  ;;  %v5881_v8 = vld [vmem:[%s5858_s24 + $0xa0] sm:$0xff]  ;;  %v5884_v9 = vld [vmem:[%s5858_s24 + $0xa8] sm:$0xff] }
  0x15   : > { %319 = vadd.xlane.f32.xlu0 %v318_v3  ;;  %325 = vadd.xlane.f32.xlu1 %v324_v4  ;;  %v327_v7 = vsel %vm269_vm0, %v5874_v5, 0.0  ;;  %v330_v10 = vsel %vm269_vm0, %v5881_v8, 0.0  ;;  %v333_v11 = vsel %vm269_vm0, %v5884_v9, 0.0  ;;  %v5891_v12 = vld [vmem:[%s5858_s24 + $0xb0] sm:$0xff]  ;;  %v5894_v13 = vld [vmem:[%s5858_s24 + $0xb8] sm:$0xff]  ;;  %v5901_v16 = vld [vmem:[%s5858_s24 + $0xc0] sm:$0xff] }
  0x16   : > { %v336_v14 = vsel %vm269_vm0, %v5891_v12, 0.0  ;;  %v339_v15 = vsel %vm269_vm0, %v5894_v13, 0.0  ;;  %v5904_v17 = vld [vmem:[%s5858_s24 + $0xc8] sm:$0xff]  ;;  %v342_v18 = vsel %vm269_vm0, %v5901_v16, 0.0  ;;  %v5911_v20 = vld [vmem:[%s5858_s24 + $0xd0] sm:$0xff]  ;;  %v5914_v21 = vld [vmem:[%s5858_s24 + $0xd8] sm:$0xff] }
  0x17   : > { %v345_v19 = vsel %vm269_vm0, %v5904_v17, 0.0  ;;  %v348_v22 = vsel %vm269_vm0, %v5911_v20, 0.0  ;;  %v351_v23 = vsel %vm269_vm0, %v5914_v21, 0.0  ;;  %v5921_v24 = vld [vmem:[%s5858_s24 + $0xe0] sm:$0xff]  ;;  %v5924_v25 = vld [vmem:[%s5858_s24 + $0xe8] sm:$0xff]  ;;  %v5931_v28 = vld [vmem:[%s5858_s24 + $0xf0] sm:$0xff] }
  0x18   : > { %v354_v26 = vsel %vm269_vm0, %v5921_v24, 0.0  ;;  %v357_v27 = vsel %vm269_vm0, %v5924_v25, 0.0  ;;  %v5934_v29 = vld [vmem:[%s5858_s24 + $0xf8] sm:$0xff]  ;;  %v360_v30 = vsel %vm269_vm0, %v5931_v28, 0.0  ;;  %v5941_v32 = vld [vmem:[%s5858_s24] sm:$0xff]  ;;  %v5944_v33 = vld [vmem:[%s5858_s24 + $0x8] sm:$0xff] }
  0x19   : > { %322 = vadd.xlane.f32.xlu0 %v321_v6  ;;  %328 = vadd.xlane.f32.xlu1 %v327_v7  ;;  %v363_v31 = vsel %vm269_vm0, %v5934_v29, 0.0  ;;  %v270_v34 = vsel %vm269_vm0, %v5941_v32, 0.0  ;;  %v273_v35 = vsel %vm269_vm0, %v5944_v33, 0.0  ;;  %v5951_v36 = vld [vmem:[%s5858_s24 + $0x10] sm:$0xff]  ;;  %v5954_v37 = vld [vmem:[%s5858_s24 + $0x18] sm:$0xff]  ;;  %v5961_v40 = vld [vmem:[%s5858_s24 + $0x20] sm:$0xff] }
  0x1a   : > { %v276_v38 = vsel %vm269_vm0, %v5951_v36, 0.0  ;;  %v279_v39 = vsel %vm269_vm0, %v5954_v37, 0.0  ;;  %v5964_v41 = vld [vmem:[%s5858_s24 + $0x28] sm:$0xff]  ;;  %v282_v42 = vsel %vm269_vm0, %v5961_v40, 0.0  ;;  %v5971_v44 = vld [vmem:[%s5858_s24 + $0x30] sm:$0xff]  ;;  %v5974_v45 = vld [vmem:[%s5858_s24 + $0x38] sm:$0xff] }
  0x1b   : > { %v285_v43 = vsel %vm269_vm0, %v5964_v41, 0.0  ;;  %v288_v46 = vsel %vm269_vm0, %v5971_v44, 0.0  ;;  %v291_v47 = vsel %vm269_vm0, %v5974_v45, 0.0  ;;  %v5981_v48 = vld [vmem:[%s5858_s24 + $0x40] sm:$0xff]  ;;  %v5984_v49 = vld [vmem:[%s5858_s24 + $0x48] sm:$0xff]  ;;  %v5991_v52 = vld [vmem:[%s5858_s24 + $0x50] sm:$0xff] }
  0x1c   : > { %v294_v50 = vsel %vm269_vm0, %v5981_v48, 0.0  ;;  %v297_v51 = vsel %vm269_vm0, %v5984_v49, 0.0  ;;  %v5994_v53 = vld [vmem:[%s5858_s24 + $0x58] sm:$0xff]  ;;  %v300_v54 = vsel %vm269_vm0, %v5991_v52, 0.0  ;;  %v6001_v56 = vld [vmem:[%s5858_s24 + $0x60] sm:$0xff]  ;;  %v6004_v57 = vld [vmem:[%s5858_s24 + $0x68] sm:$0xff] }
  0x1d   : > { %331 = vadd.xlane.f32.xlu0 %v330_v10  ;;  %334 = vadd.xlane.f32.xlu1 %v333_v11  ;;  %v303_v55 = vsel %vm269_vm0, %v5994_v53, 0.0  ;;  %v306_v58 = vsel %vm269_vm0, %v6001_v56, 0.0  ;;  %v309_v59 = vsel %vm269_vm0, %v6004_v57, 0.0  ;;  %v6011_v60 = vld [vmem:[%s5858_s24 + $0x70] sm:$0xff]  ;;  %v6014_v61 = vld [vmem:[%s5858_s24 + $0x78] sm:$0xff] }
  0x1e   : > { %v312_v62 = vsel %vm269_vm0, %v6011_v60, 0.0  ;;  %v315_v63 = vsel %vm269_vm0, %v6014_v61, 0.0 }
  0x21   : > { %337 = vadd.xlane.f32.xlu0 %v336_v14  ;;  %340 = vadd.xlane.f32.xlu1 %v339_v15 }
  0x25   : > { %343 = vadd.xlane.f32.xlu0 %v342_v18  ;;  %346 = vadd.xlane.f32.xlu1 %v345_v19 }
  0x29   : > { %349 = vadd.xlane.f32.xlu0 %v348_v22  ;;  %352 = vadd.xlane.f32.xlu1 %v351_v23 }
  0x2d   : > { %355 = vadd.xlane.f32.xlu0 %v354_v26  ;;  %358 = vadd.xlane.f32.xlu1 %v357_v27 }
  0x31   : > { %361 = vadd.xlane.f32.xlu0 %v360_v30  ;;  %364 = vadd.xlane.f32.xlu1 %v363_v31 }
  0x35   : > { %271 = vadd.xlane.f32.xlu0 %v270_v34  ;;  %274 = vadd.xlane.f32.xlu1 %v273_v35 }
  0x39   : > { %277 = vadd.xlane.f32.xlu0 %v276_v38  ;;  %280 = vadd.xlane.f32.xlu1 %v279_v39 }
  0x3d   : > { %283 = vadd.xlane.f32.xlu0 %v282_v42  ;;  %286 = vadd.xlane.f32.xlu1 %v285_v43 }
  0x41   : > { %289 = vadd.xlane.f32.xlu0 %v288_v46  ;;  %292 = vadd.xlane.f32.xlu1 %v291_v47 }
  0x45   : > { %295 = vadd.xlane.f32.xlu0 %v294_v50  ;;  %298 = vadd.xlane.f32.xlu1 %v297_v51 }
  0x49   : > { %301 = vadd.xlane.f32.xlu0 %v300_v54  ;;  %304 = vadd.xlane.f32.xlu1 %v303_v55 }
  0x4d   : > { %307 = vadd.xlane.f32.xlu0 %v306_v58  ;;  %310 = vadd.xlane.f32.xlu1 %v309_v59 }
  0x51   : > { %313 = vadd.xlane.f32.xlu0 %v312_v62  ;;  %316 = vadd.xlane.f32.xlu1 %v315_v63 }
  0xa2   : > { %v320_v3 = vpop.xlane.xlu0 %319  ;;  %v326_v4 = vpop.xlane.xlu1 %325 }
  0xa3   : > { %v383_v6 = vmul.f32 0.03125, %v320_v3  ;;  %v385_v7 = vmul.f32 0.03125, %v326_v4 }
  0xa5   : > { %v6021_v10 = vsub.f32 %v5861_v0, %v383_v6  ;;  %v6024_v11 = vsub.f32 %v5864_v1, %v385_v7 }
  0xa6   : > { %v323_v14 = vpop.xlane.xlu0 %322  ;;  %v329_v15 = vpop.xlane.xlu1 %328 }
  0xa7   : > { %v384_v18 = vmul.f32 0.03125, %v323_v14  ;;  %v386_v19 = vmul.f32 0.03125, %v329_v15  ;;  %v447_v22 = vmul.f32 %v6021_v10, %v6021_v10  ;;  %v449_v23 = vmul.f32 %v6024_v11, %v6024_v11 }
  0xa9   : > { %v6031_v26 = vsub.f32 %v5867_v2, %v384_v18  ;;  %v6034_v27 = vsub.f32 %v5874_v5, %v386_v19  ;;  %v511_v0 = vsel %vm269_vm0, %v447_v22, 0.0  ;;  %v517_v31 = vsel %vm269_vm0, %v449_v23, 0.0 }
  0xaa   : > { %v332_v1 = vpop.xlane.xlu0 %331  ;;  %512 = vadd.xlane.f32.xlu0 %v511_v0  ;;  %v335_v30 = vpop.xlane.xlu1 %334 }
  0xab   : > { %v387_v34 = vmul.f32 0.03125, %v332_v1  ;;  %v388_v35 = vmul.f32 0.03125, %v335_v30  ;;  %v448_v38 = vmul.f32 %v6031_v26, %v6031_v26  ;;  %v450_v39 = vmul.f32 %v6034_v27, %v6034_v27 }
  0xad   : > { %v6043_v2 = vsub.f32 %v5881_v8, %v387_v34  ;;  %v6046_v5 = vsub.f32 %v5884_v9, %v388_v35  ;;  %v514_v42 = vsel %vm269_vm0, %v448_v38, 0.0  ;;  %v520_v47 = vsel %vm269_vm0, %v450_v39, 0.0 }
  0xae   : > { %v338_v43 = vpop.xlane.xlu0 %337  ;;  %515 = vadd.xlane.f32.xlu1 %v514_v42  ;;  %518 = vadd.xlane.f32.xlu0 %v517_v31  ;;  %v341_v46 = vpop.xlane.xlu1 %340 }
  0xaf   : > { %v389_v50 = vmul.f32 0.03125, %v338_v43  ;;  %v390_v51 = vmul.f32 0.03125, %v341_v46  ;;  %v451_v54 = vmul.f32 %v6043_v2, %v6043_v2  ;;  %v452_v8 = vmul.f32 %v6046_v5, %v6046_v5 }
  0xb1   : > { %v6055_v55 = vsub.f32 %v5891_v12, %v389_v50  ;;  %v6058_v9 = vsub.f32 %v5894_v13, %v390_v51  ;;  %v523_v58 = vsel %vm269_vm0, %v451_v54, 0.0  ;;  %v526_v63 = vsel %vm269_vm0, %v452_v8, 0.0 }
  0xb2   : > { %v344_v59 = vpop.xlane.xlu0 %343  ;;  %521 = vadd.xlane.f32.xlu1 %v520_v47  ;;  %524 = vadd.xlane.f32.xlu0 %v523_v58  ;;  %v347_v62 = vpop.xlane.xlu1 %346 }
  0xb3   : > { %v391_v3 = vmul.f32 0.03125, %v344_v59  ;;  %v392_v4 = vmul.f32 0.03125, %v347_v62  ;;  %v453_v6 = vmul.f32 %v6055_v55, %v6055_v55  ;;  %v454_v12 = vmul.f32 %v6058_v9, %v6058_v9 }
  0xb5   : > { %v6067_v7 = vsub.f32 %v5901_v16, %v391_v3  ;;  %v6070_v13 = vsub.f32 %v5904_v17, %v392_v4  ;;  %v529_v14 = vsel %vm269_vm0, %v453_v6, 0.0  ;;  %v532_v19 = vsel %vm269_vm0, %v454_v12, 0.0 }
  0xb6   : > { %v350_v15 = vpop.xlane.xlu0 %349  ;;  %527 = vadd.xlane.f32.xlu1 %v526_v63  ;;  %530 = vadd.xlane.f32.xlu0 %v529_v14  ;;  %v353_v18 = vpop.xlane.xlu1 %352 }
  0xb7   : > { %v393_v22 = vmul.f32 0.03125, %v350_v15  ;;  %v394_v23 = vmul.f32 0.03125, %v353_v18  ;;  %v455_v0 = vmul.f32 %v6067_v7, %v6067_v7  ;;  %v456_v16 = vmul.f32 %v6070_v13, %v6070_v13 }
  0xb9   : > { %v6079_v1 = vsub.f32 %v5911_v20, %v393_v22  ;;  %v6082_v17 = vsub.f32 %v5914_v21, %v394_v23  ;;  %v535_v30 = vsel %vm269_vm0, %v455_v0, 0.0  ;;  %v538_v35 = vsel %vm269_vm0, %v456_v16, 0.0 }
  0xba   : > { %v356_v31 = vpop.xlane.xlu0 %355  ;;  %533 = vadd.xlane.f32.xlu1 %v532_v19  ;;  %536 = vadd.xlane.f32.xlu0 %v535_v30  ;;  %v359_v34 = vpop.xlane.xlu1 %358 }
  0xbb   : > { %v395_v38 = vmul.f32 0.03125, %v356_v31  ;;  %v396_v39 = vmul.f32 0.03125, %v359_v34  ;;  %v457_v42 = vmul.f32 %v6079_v1, %v6079_v1  ;;  %v458_v20 = vmul.f32 %v6082_v17, %v6082_v17 }
  0xbd   : > { %v6091_v43 = vsub.f32 %v5921_v24, %v395_v38  ;;  %v6094_v21 = vsub.f32 %v5924_v25, %v396_v39  ;;  %v541_v46 = vsel %vm269_vm0, %v457_v42, 0.0  ;;  %v544_v51 = vsel %vm269_vm0, %v458_v20, 0.0 }
  0xbe   : > { %v362_v47 = vpop.xlane.xlu0 %361  ;;  %539 = vadd.xlane.f32.xlu1 %v538_v35  ;;  %542 = vadd.xlane.f32.xlu0 %v541_v46  ;;  %v365_v50 = vpop.xlane.xlu1 %364 }
  0xbf   : > { %v397_v54 = vmul.f32 0.03125, %v362_v47  ;;  %v398_v8 = vmul.f32 0.03125, %v365_v50  ;;  %v459_v58 = vmul.f32 %v6091_v43, %v6091_v43  ;;  %v460_v24 = vmul.f32 %v6094_v21, %v6094_v21 }
  0xc1   : > { %v6103_v59 = vsub.f32 %v5931_v28, %v397_v54  ;;  %v6106_v25 = vsub.f32 %v5934_v29, %v398_v8  ;;  %v547_v62 = vsel %vm269_vm0, %v459_v58, 0.0  ;;  %v550_v3 = vsel %vm269_vm0, %v460_v24, 0.0  ;;  %v5342_v58 = vld [vmem:[%s12008_s2] sm:$0xff]  }
  0xc2   : > { %545 = vadd.xlane.f32.xlu1 %v544_v51  ;;  %548 = vadd.xlane.f32.xlu0 %v547_v62  ;;  %v272_v63 = vpop.xlane.xlu0 %271  ;;  %v275_v4 = vpop.xlane.xlu1 %274 }
  0xc3   : > { %v367_v6 = vmul.f32 0.03125, %v272_v63  ;;  %v368_v12 = vmul.f32 0.03125, %v275_v4  ;;  %v461_v14 = vmul.f32 %v6103_v59, %v6103_v59  ;;  %v462_v28 = vmul.f32 %v6106_v25, %v6106_v25  ;;  %5329 = vmatprep.subr.bf16.mxu1 %v5342_v58  ;;  %5221 = vmatprep.subr.bf16.mxu0 %v5342_v58 }
  0xc4   : > { %5331 = vmatpush3.bf16.msra.mxu1 %v5342_v58  ;;  %5222 = vmatpush3.bf16.msra.mxu0 %v5342_v58 }
  0xc5   : > { %v6115_v15 = vsub.f32 %v5941_v32, %v367_v6  ;;  %v6118_v29 = vsub.f32 %v5944_v33, %v368_v12  ;;  %v553_v18 = vsel %vm269_vm0, %v461_v14, 0.0  ;;  %v556_v22 = vsel %vm269_vm0, %v462_v28, 0.0  ;;  %v5343_v28 = vld [vmem:[%s12008_s2 + $0x8] sm:$0xff]  }
  0xc6   : > { %551 = vadd.xlane.f32.xlu1 %v550_v3  ;;  %554 = vadd.xlane.f32.xlu0 %v553_v18  ;;  %v278_v19 = vpop.xlane.xlu0 %277  ;;  %v281_v23 = vpop.xlane.xlu1 %280 }
  0xc7   : > { %v369_v0 = vmul.f32 0.03125, %v278_v19  ;;  %v370_v16 = vmul.f32 0.03125, %v281_v23  ;;  %v431_v30 = vmul.f32 %v6115_v15, %v6115_v15  ;;  %v432_v32 = vmul.f32 %v6118_v29, %v6118_v29  ;;  %5330 = vmatprep.subr.bf16.mxu1 %v5343_v28  ;;  %5223 = vmatprep.subr.bf16.mxu0 %v5343_v28 }
  0xc8   : > { %5332 = vmatpush3.bf16.msra.mxu1 %v5343_v28  ;;  %5224 = vmatpush3.bf16.msra.mxu0 %v5343_v28 }
  0xc9   : > { %v6127_v31 = vsub.f32 %v5951_v36, %v369_v0  ;;  %v6130_v33 = vsub.f32 %v5954_v37, %v370_v16  ;;  %v463_v34 = vsel %vm269_vm0, %v431_v30, 0.0  ;;  %v466_v38 = vsel %vm269_vm0, %v432_v32, 0.0 }
  0xca   : > { %557 = vadd.xlane.f32.xlu1 %v556_v22  ;;  %464 = vadd.xlane.f32.xlu0 %v463_v34  ;;  %v284_v35 = vpop.xlane.xlu0 %283  ;;  %v287_v39 = vpop.xlane.xlu1 %286 }
  0xcb   : > { %v371_v42 = vmul.f32 0.03125, %v284_v35  ;;  %v372_v20 = vmul.f32 0.03125, %v287_v39  ;;  %v433_v46 = vmul.f32 %v6127_v31, %v6127_v31  ;;  %v434_v36 = vmul.f32 %v6130_v33, %v6130_v33 }
  0xcd   : > { %v6139_v47 = vsub.f32 %v5961_v40, %v371_v42  ;;  %v6142_v37 = vsub.f32 %v5964_v41, %v372_v20  ;;  %v469_v50 = vsel %vm269_vm0, %v433_v46, 0.0  ;;  %v472_v54 = vsel %vm269_vm0, %v434_v36, 0.0 }
  0xce   : > { %467 = vadd.xlane.f32.xlu1 %v466_v38  ;;  %470 = vadd.xlane.f32.xlu0 %v469_v50  ;;  %v290_v51 = vpop.xlane.xlu0 %289  ;;  %v293_v8 = vpop.xlane.xlu1 %292 }
  0xcf   : > { %v373_v24 = vmul.f32 0.03125, %v290_v51  ;;  %v374_v62 = vmul.f32 0.03125, %v293_v8  ;;  %v435_v40 = vmul.f32 %v6139_v47, %v6139_v47  ;;  %v436_v41 = vmul.f32 %v6142_v37, %v6142_v37 }
  0xd1   : > { %v6154_v63 = vsub.f32 %v5971_v44, %v373_v24  ;;  %v6157_v3 = vsub.f32 %v5974_v45, %v374_v62  ;;  %v475_v4 = vsel %vm269_vm0, %v435_v40, 0.0  ;;  %v478_v12 = vsel %vm269_vm0, %v436_v41, 0.0 }
  0xd2   : > { %473 = vadd.xlane.f32.xlu1 %v472_v54  ;;  %476 = vadd.xlane.f32.xlu0 %v475_v4  ;;  %v296_v6 = vpop.xlane.xlu0 %295  ;;  %v299_v14 = vpop.xlane.xlu1 %298 }
  0xd3   : > { %v375_v18 = vmul.f32 0.03125, %v296_v6  ;;  %v376_v44 = vmul.f32 0.03125, %v299_v14  ;;  %v437_v45 = vmul.f32 %v6154_v63, %v6154_v63  ;;  %v438_v19 = vmul.f32 %v6157_v3, %v6157_v3 }
  0xd5   : > { %v6169_v22 = vsub.f32 %v5981_v48, %v375_v18  ;;  %v6172_v23 = vsub.f32 %v5984_v49, %v376_v44  ;;  %v481_v0 = vsel %vm269_vm0, %v437_v45, 0.0  ;;  %v484_v30 = vsel %vm269_vm0, %v438_v19, 0.0 }
  0xd6   : > { %479 = vadd.xlane.f32.xlu1 %v478_v12  ;;  %482 = vadd.xlane.f32.xlu0 %v481_v0  ;;  %v302_v16 = vpop.xlane.xlu0 %301  ;;  %v305_v32 = vpop.xlane.xlu1 %304 }
  0xd7   : > { %v377_v34 = vmul.f32 0.03125, %v302_v16  ;;  %v378_v35 = vmul.f32 0.03125, %v305_v32  ;;  %v439_v38 = vmul.f32 %v6169_v22, %v6169_v22  ;;  %v440_v48 = vmul.f32 %v6172_v23, %v6172_v23 }
  0xd9   : > { %v6181_v49 = vsub.f32 %v5991_v52, %v377_v34  ;;  %v6184_v39 = vsub.f32 %v5994_v53, %v378_v35  ;;  %v487_v42 = vsel %vm269_vm0, %v439_v38, 0.0  ;;  %v490_v46 = vsel %vm269_vm0, %v440_v48, 0.0 }
  0xda   : > { %485 = vadd.xlane.f32.xlu1 %v484_v30  ;;  %488 = vadd.xlane.f32.xlu0 %v487_v42  ;;  %v308_v20 = vpop.xlane.xlu0 %307  ;;  %v311_v36 = vpop.xlane.xlu1 %310 }
  0xdb   : > { %v379_v50 = vmul.f32 0.03125, %v308_v20  ;;  %v380_v51 = vmul.f32 0.03125, %v311_v36  ;;  %v441_v54 = vmul.f32 %v6181_v49, %v6181_v49  ;;  %v442_v52 = vmul.f32 %v6184_v39, %v6184_v39 }
  0xdd   : > { %v6193_v8 = vsub.f32 %v6001_v56, %v379_v50  ;;  %v6196_v53 = vsub.f32 %v6004_v57, %v380_v51  ;;  %v493_v58 = vsel %vm269_vm0, %v441_v54, 0.0  ;;  %v496_v62 = vsel %vm269_vm0, %v442_v52, 0.0 }
  0xde   : > { %491 = vadd.xlane.f32.xlu1 %v490_v46  ;;  %494 = vadd.xlane.f32.xlu0 %v493_v58  ;;  %v314_v24 = vpop.xlane.xlu0 %313  ;;  %v317_v40 = vpop.xlane.xlu1 %316 }
  0xdf   : > { %v381_v41 = vmul.f32 0.03125, %v314_v24  ;;  %v382_v4 = vmul.f32 0.03125, %v317_v40  ;;  %v443_v6 = vmul.f32 %v6193_v8, %v6193_v8  ;;  %v444_v56 = vmul.f32 %v6196_v53, %v6196_v53 }
  0xe1   : > { %v6205_v12 = vsub.f32 %v6011_v60, %v381_v41  ;;  %v6208_v57 = vsub.f32 %v6014_v61, %v382_v4  ;;  %v499_v14 = vsel %vm269_vm0, %v443_v6, 0.0  ;;  %v502_v28 = vsel %vm269_vm0, %v444_v56, 0.0  ;;  %v6219_v60 = vld [vmem:[%s12008_s2 + $0x10] sm:$0xff]  }
  0xe2   : > { %497 = vadd.xlane.f32.xlu1 %v496_v62  ;;  %500 = vadd.xlane.f32.xlu0 %v499_v14 }
  0xe3   : > { %v445_v18 = vmul.f32 %v6205_v12, %v6205_v12  ;;  %v446_v44 = vmul.f32 %v6208_v57, %v6208_v57  ;;  %5257 = vmatprep.subr.bf16.mxu1 %v6219_v60 }
  0xe5   : > { %v505_v61 = vsel %vm269_vm0, %v445_v18, 0.0  ;;  %v508_v45 = vsel %vm269_vm0, %v446_v44, 0.0  ;;  %v6228_v18 = vld [vmem:[%s12007_s1] ss:$0 sm:$0xff] }
  0xe6   : > { %503 = vadd.xlane.f32.xlu1 %v502_v28  ;;  %506 = vadd.xlane.f32.xlu0 %v505_v61 }
  0xea   : > { %509 = vadd.xlane.f32.xlu1 %v508_v45 }
 0x137   : > { %v513_v19 = vpop.xlane.xlu0 %512 }
 0x138   : > { %v575_v0 = vmul.f32 0.03125, %v513_v19 }
 0x13a   : > { %v607_v16 = vadd.f32 1e-05, %v575_v0 }
 0x13b   : > { %v516_v30 = vpop.xlane.xlu1 %515  ;;  %v519_v32 = vpop.xlane.xlu0 %518 }
 0x13c   : > { %5348 = vrsqrt.f32 %v607_v16  ;;  %v576_v34 = vmul.f32 0.03125, %v516_v30  ;;  %v577_v35 = vmul.f32 0.03125, %v519_v32 }
 0x13e   : > { %v608_v38 = vadd.f32 1e-05, %v576_v34  ;;  %v609_v48 = vadd.f32 1e-05, %v577_v35 }
 0x13f   : > { %v522_v42 = vpop.xlane.xlu1 %521  ;;  %v525_v20 = vpop.xlane.xlu0 %524 }
 0x140   : > { %5350 = vrsqrt.f32 %v608_v38  ;;  %v578_v46 = vmul.f32 0.03125, %v522_v42  ;;  %v579_v36 = vmul.f32 0.03125, %v525_v20  ;;  %v6236_v38 = vld [vmem:[%s12007_s1 + $0x1] ss:$0 sm:$0xff] }
 0x141   : > { %5352 = vrsqrt.f32 %v609_v48 }
 0x142   : > { %v610_v50 = vadd.f32 1e-05, %v578_v46  ;;  %v611_v51 = vadd.f32 1e-05, %v579_v36 }
 0x143   : > { %v528_v54 = vpop.xlane.xlu1 %527  ;;  %v531_v52 = vpop.xlane.xlu0 %530 }
 0x144   : > { %5354 = vrsqrt.f32 %v610_v50  ;;  %v580_v58 = vmul.f32 0.03125, %v528_v54  ;;  %v581_v24 = vmul.f32 0.03125, %v531_v52 }
 0x145   : > { %5356 = vrsqrt.f32 %v611_v51 }
 0x146   : > { %v5349_v62 = vpop.eup %5348  ;;  %v612_v40 = vadd.f32 1e-05, %v580_v58  ;;  %v613_v41 = vadd.f32 1e-05, %v581_v24 }
 0x147   : > { %v534_v4 = vpop.xlane.xlu1 %533  ;;  %v537_v6 = vpop.xlane.xlu0 %536  ;;  %v671_v56 = vmul.f32 %v5349_v62, %v6021_v10 }
 0x148   : > { %5358 = vrsqrt.f32 %v612_v40  ;;  %v582_v14 = vmul.f32 0.03125, %v534_v4  ;;  %v583_v28 = vmul.f32 0.03125, %v537_v6 }
 0x149   : > { %5360 = vrsqrt.f32 %v613_v41  ;;  %v707_v32 = vmul.f32 %v6228_v18, %v671_v56 }
 0x14a   : > { %v5351_v44 = vpop.eup %5350  ;;  %v614_v61 = vadd.f32 1e-05, %v582_v14  ;;  %v615_v45 = vadd.f32 1e-05, %v583_v28 }
 0x14b   : > { %v5353_v19 = vpop.eup %5352  ;;  %v540_v0 = vpop.xlane.xlu1 %539  ;;  %v672_v30 = vmul.f32 %v5351_v44, %v6031_v26 }
 0x14c   : > { %v543_v16 = vpop.xlane.xlu0 %542  ;;  %v673_v10 = vmul.f32 %v5353_v19, %v6024_v11  ;;  %5362 = vrsqrt.f32 %v614_v61  ;;  %v584_v34 = vmul.f32 0.03125, %v540_v0  ;;  %v743_v11 = vadd.f32 %v6236_v38, %v707_v32  ;;  %v5345_v32 = vld [vmem:[%s12008_s2 + $0x18] sm:$0xff]  }
 0x14d   : > { %v585_v35 = vmul.f32 0.03125, %v543_v16  ;;  %5364 = vrsqrt.f32 %v615_v45  ;;  %v708_v48 = vmul.f32 %v6228_v18, %v672_v30 }
 0x14e   : > { %v5355_v42 = vpop.eup %5354  ;;  %v616_v20 = vadd.f32 1e-05, %v584_v34  ;;  %v709_v52 = vmul.f32 %v6228_v18, %v673_v10 }
 0x14f   : > { %v617_v46 = vadd.f32 1e-05, %v585_v35  ;;  %v5357_v36 = vpop.eup %5356  ;;  %v674_v26 = vmul.f32 %v5355_v42, %v6034_v27  ;;  %v546_v50 = vpop.xlane.xlu1 %545  ;;  %v744_v54 = vadd.f32 %v6236_v38, %v708_v48 }
 0x150   : > { %v549_v51 = vpop.xlane.xlu0 %548  ;;  %v675_v58 = vmul.f32 %v5357_v36, %v6043_v2  ;;  %5366 = vrsqrt.f32 %v616_v20  ;;  %v586_v24 = vmul.f32 0.03125, %v546_v50  ;;  %v745_v2 = vadd.f32 %v6236_v38, %v709_v52 }
 0x151   : > { %v587_v62 = vmul.f32 0.03125, %v549_v51  ;;  %5368 = vrsqrt.f32 %v617_v46  ;;  %v6244_v40 = vpack.c.bf16 %v744_v54, %v743_v11  ;;  %v710_v41 = vmul.f32 %v6228_v18, %v674_v26 }
 0x152   : > { %v5359_v4 = vpop.eup %5358  ;;  %v618_v27 = vadd.f32 1e-05, %v586_v24  ;;  %v711_v45 = vmul.f32 %v6228_v18, %v675_v58 }
 0x153   : > { %v619_v6 = vadd.f32 1e-05, %v587_v62  ;;  %v5361_v56 = vpop.eup %5360  ;;  %v676_v14 = vmul.f32 %v5359_v4, %v6046_v5  ;;  %v552_v28 = vpop.xlane.xlu1 %551  ;;  %5241 = vmatprep.mubr.msk.bf16.mxu1 %vm269_vm0, %v6244_v40  ;;  %v746_v61 = vadd.f32 %v6236_v38, %v710_v41 }
 0x154   : > { %v555_v44 = vpop.xlane.xlu0 %554  ;;  %v677_v19 = vmul.f32 %v5361_v56, %v6055_v55  ;;  %5370 = vrsqrt.f32 %v618_v27  ;;  %v588_v0 = vmul.f32 0.03125, %v552_v28  ;;  %v747_v46 = vadd.f32 %v6236_v38, %v711_v45 }
 0x155   : > { %v589_v16 = vmul.f32 0.03125, %v555_v44  ;;  %5372 = vrsqrt.f32 %v619_v6  ;;  %v6254_v30 = vpack.c.bf16 %v746_v61, %v745_v2  ;;  %v712_v5 = vmul.f32 %v6228_v18, %v676_v14 }
 0x156   : > { %v5363_v10 = vpop.eup %5362  ;;  %v620_v34 = vadd.f32 1e-05, %v588_v0  ;;  %v713_v26 = vmul.f32 %v6228_v18, %v677_v19 }
 0x157   : > { %v621_v35 = vadd.f32 1e-05, %v589_v16  ;;  %v5365_v48 = vpop.eup %5364  ;;  %v678_v42 = vmul.f32 %v5363_v10, %v6058_v9  ;;  %v558_v20 = vpop.xlane.xlu1 %557  ;;  %5242 = vmatmul.mubr.msk.bf16.vlgmr.msra.gmra.mrb[0].mxu1 %vm269_vm0, %v6254_v30  ;;  %v748_v36 = vadd.f32 %v6236_v38, %v712_v5 }
 0x158   : > { %v465_v55 = vpop.xlane.xlu0 %464  ;;  %v679_v50 = vmul.f32 %v5365_v48, %v6067_v7  ;;  %5374 = vrsqrt.f32 %v620_v34  ;;  %v590_v51 = vmul.f32 0.03125, %v558_v20  ;;  %5258 = vmatpush3.bf16.msra.mxu1 %v6219_v60  ;;  %v749_v60 = vadd.f32 %v6236_v38, %v713_v26 }
 0x159   : > { %v559_v11 = vmul.f32 0.03125, %v465_v55  ;;  %5376 = vrsqrt.f32 %v621_v35  ;;  %v6268_v9 = vpack.c.bf16 %v748_v36, %v747_v46  ;;  %v714_v54 = vmul.f32 %v6228_v18, %v678_v42  ;;  %5259 = vmatprep.subr.bf16.mxu1 %v5345_v32 }
 0x15a   : > { %v5367_v52 = vpop.eup %5366  ;;  %v622_v58 = vadd.f32 1e-05, %v590_v51  ;;  %v715_v6 = vmul.f32 %v6228_v18, %v679_v50 }
 0x15b   : > { %v591_v24 = vadd.f32 1e-05, %v559_v11  ;;  %v5369_v62 = vpop.eup %5368  ;;  %v680_v41 = vmul.f32 %v5367_v52, %v6070_v13  ;;  %v468_v4 = vpop.xlane.xlu1 %467  ;;  %5245 = vmatprep.mubr.msk.bf16.mxu1 %vm269_vm0, %v6268_v9  ;;  %v750_v27 = vadd.f32 %v6236_v38, %v714_v54 }
 0x15c   : > { %v471_v7 = vpop.xlane.xlu0 %470  ;;  %v681_v56 = vmul.f32 %v5369_v62, %v6079_v1  ;;  %5378 = vrsqrt.f32 %v622_v58  ;;  %v560_v14 = vmul.f32 0.03125, %v468_v4  ;;  %5260 = vmatpush3.bf16.msra.mxu1 %v5345_v32  ;;  %v751_v5 = vadd.f32 %v6236_v38, %v715_v6 }
 0x15d   : > { %v561_v28 = vmul.f32 0.03125, %v471_v7  ;;  %5380 = vrsqrt.f32 %v591_v24  ;;  %v6278_v44 = vpack.c.bf16 %v750_v27, %v749_v60  ;;  %v716_v13 = vmul.f32 %v6228_v18, %v680_v41 }
 0x15e   : > { %v5371_v2 = vpop.eup %5370  ;;  %v592_v61 = vadd.f32 1e-05, %v560_v14  ;;  %v717_v10 = vmul.f32 %v6228_v18, %v681_v56 }
 0x15f   : > { %v593_v45 = vadd.f32 1e-05, %v561_v28  ;;  %v5373_v19 = vpop.eup %5372  ;;  %v682_v0 = vmul.f32 %v5371_v2, %v6082_v17  ;;  %v474_v16 = vpop.xlane.xlu1 %473  ;;  %5246 = vmatmul.mubr.msk.bf16.gmra.mrb[4].mxu1 %vm269_vm0, %v6278_v44  ;;  %v752_v32 = vadd.f32 %v6236_v38, %v716_v13 }
 0x160   : > { %v477_v1 = vpop.xlane.xlu0 %476  ;;  %v683_v34 = vmul.f32 %v5373_v19, %v6091_v43  ;;  %5382 = vrsqrt.f32 %v592_v61  ;;  %v562_v35 = vmul.f32 0.03125, %v474_v16  ;;  %v753_v43 = vadd.f32 %v6236_v38, %v717_v10 }
 0x161   : > { %v563_v48 = vmul.f32 0.03125, %v477_v1  ;;  %5384 = vrsqrt.f32 %v593_v45  ;;  %v6288_v42 = vpack.c.bf16 %v752_v32, %v751_v5  ;;  %v718_v17 = vmul.f32 %v6228_v18, %v682_v0 }
 0x162   : > { %v5375_v20 = vpop.eup %5374  ;;  %v594_v55 = vadd.f32 1e-05, %v562_v35  ;;  %v719_v54 = vmul.f32 %v6228_v18, %v683_v34 }
 0x163   : > { %v595_v46 = vadd.f32 1e-05, %v563_v48  ;;  %v5377_v36 = vpop.eup %5376  ;;  %v684_v26 = vmul.f32 %v5375_v20, %v6094_v21  ;;  %v480_v50 = vpop.xlane.xlu1 %479  ;;  %5249 = vmatprep.mubr.msk.bf16.mxu1 %vm269_vm0, %v6288_v42  ;;  %v754_v11 = vadd.f32 %v6236_v38, %v718_v17 }
 0x164   : > { %v483_v51 = vpop.xlane.xlu0 %482  ;;  %v685_v52 = vmul.f32 %v5377_v36, %v6103_v59  ;;  %5386 = vrsqrt.f32 %v594_v55  ;;  %v564_v58 = vmul.f32 0.03125, %v480_v50  ;;  %v755_v59 = vadd.f32 %v6236_v38, %v719_v54 }
 0x165   : > { %v565_v24 = vmul.f32 0.03125, %v483_v51  ;;  %5388 = vrsqrt.f32 %v595_v46  ;;  %v6298_v62 = vpack.c.bf16 %v754_v11, %v753_v43  ;;  %v720_v21 = vmul.f32 %v6228_v18, %v684_v26 }
 0x166   : > { %v5379_v41 = vpop.eup %5378  ;;  %v596_v4 = vadd.f32 1e-05, %v564_v58  ;;  %v721_v28 = vmul.f32 %v6228_v18, %v685_v52 }
 0x167   : > { %v597_v7 = vadd.f32 1e-05, %v565_v24  ;;  %v5381_v60 = vpop.eup %5380  ;;  %v686_v27 = vmul.f32 %v5379_v41, %v6106_v25  ;;  %v486_v6 = vpop.xlane.xlu1 %485  ;;  %5250 = vmatmul.mubr.msk.bf16.gmra.mrb[8].mxu1 %vm269_vm0, %v6298_v62  ;;  %v756_v14 = vadd.f32 %v6236_v38, %v720_v21 }
 0x168   : > { %v489_v56 = vpop.xlane.xlu0 %488  ;;  %5390 = vrsqrt.f32 %v596_v4  ;;  %v566_v13 = vmul.f32 0.03125, %v486_v6  ;;  %v655_v25 = vmul.f32 %v5381_v60, %v6115_v15  ;;  %v757_v10 = vadd.f32 %v6236_v38, %v721_v28 }
 0x169   : > { %v567_v2 = vmul.f32 0.03125, %v489_v56  ;;  %5392 = vrsqrt.f32 %v597_v7  ;;  %v6307_v61 = vpack.c.bf16 %v756_v14, %v755_v59  ;;  %v722_v45 = vmul.f32 %v6228_v18, %v686_v27 }
 0x16a   : > { %v5383_v19 = vpop.eup %5382  ;;  %v598_v0 = vadd.f32 1e-05, %v566_v13  ;;  %v691_v48 = vmul.f32 %v6228_v18, %v655_v25 }
 0x16b   : > { %v599_v16 = vadd.f32 1e-05, %v567_v2  ;;  %v5385_v1 = vpop.eup %5384  ;;  %v492_v5 = vpop.xlane.xlu1 %491  ;;  %5253 = vmatprep.mubr.msk.bf16.mxu1 %vm269_vm0, %v6307_v61  ;;  %v758_v34 = vadd.f32 %v6236_v38, %v722_v45  ;;  %v656_v35 = vmul.f32 %v5383_v19, %v6118_v29 }
 0x16c   : > { %v495_v32 = vpop.xlane.xlu0 %494  ;;  %v657_v17 = vmul.f32 %v5385_v1, %v6127_v31  ;;  %5394 = vrsqrt.f32 %v598_v0  ;;  %v568_v15 = vmul.f32 0.03125, %v492_v5  ;;  %v727_v31 = vadd.f32 %v6236_v38, %v691_v48 }
 0x16d   : > { %v569_v20 = vmul.f32 0.03125, %v495_v32  ;;  %5396 = vrsqrt.f32 %v599_v16  ;;  %v6318_v55 = vpack.c.bf16 %v758_v34, %v757_v10  ;;  %v692_v46 = vmul.f32 %v6228_v18, %v656_v35 }
 0x16e   : > { %v5387_v36 = vpop.eup %5386  ;;  %v600_v26 = vadd.f32 1e-05, %v568_v15  ;;  %v693_v52 = vmul.f32 %v6228_v18, %v657_v17 }
 0x16f   : > { %v601_v50 = vadd.f32 1e-05, %v569_v20  ;;  %v5389_v51 = vpop.eup %5388  ;;  %v658_v43 = vmul.f32 %v5387_v36, %v6130_v33  ;;  %v498_v11 = vpop.xlane.xlu1 %497  ;;  %5254 = vmatmul.mubr.msk.bf16.gmra.mrb[12].mxu1 %vm269_vm0, %v6318_v55  ;;  %v728_v54 = vadd.f32 %v6236_v38, %v692_v46 }
 0x170   : > { %v501_v29 = vpop.xlane.xlu0 %500  ;;  %v659_v58 = vmul.f32 %v5389_v51, %v6139_v47  ;;  %5398 = vrsqrt.f32 %v600_v26  ;;  %v570_v24 = vmul.f32 0.03125, %v498_v11  ;;  %v729_v14 = vadd.f32 %v6236_v38, %v693_v52 }
 0x171   : > { %v571_v21 = vmul.f32 0.03125, %v501_v29  ;;  %5400 = vrsqrt.f32 %v601_v50  ;;  %v759_v41 = vpack.c.bf16 %v728_v54, %v727_v31  ;;  %v694_v33 = vmul.f32 %v6228_v18, %v658_v43 }
 0x172   : > { %v5391_v4 = vpop.eup %5390  ;;  %v602_v7 = vadd.f32 1e-05, %v570_v24  ;;  %v695_v27 = vmul.f32 %v6228_v18, %v659_v58 }
 0x173   : > { %v603_v60 = vadd.f32 1e-05, %v571_v21  ;;  %v5393_v6 = vpop.eup %5392  ;;  %v660_v56 = vmul.f32 %v5391_v4, %v6142_v37  ;;  %v504_v59 = vpop.xlane.xlu1 %503  ;;  %5225 = vmatprep.mubr.msk.bf16.mxu0 %vm269_vm0, %v759_v41  ;;  %5261 = vmatprep.mubr.msk.bf16.mxu1 %vm269_vm0, %v759_v41  ;;  %v730_v28 = vadd.f32 %v6236_v38, %v694_v33 }
 0x174   : > { %v507_v47 = vpop.xlane.xlu0 %506  ;;  %v661_v13 = vmul.f32 %v5393_v6, %v6154_v63  ;;  %5402 = vrsqrt.f32 %v602_v7  ;;  %v572_v2 = vmul.f32 0.03125, %v504_v59  ;;  %v731_v1 = vadd.f32 %v6236_v38, %v695_v27 }
 0x175   : > { %v573_v45 = vmul.f32 0.03125, %v507_v47  ;;  %5404 = vrsqrt.f32 %v603_v60  ;;  %v760_v25 = vpack.c.bf16 %v730_v28, %v729_v14  ;;  %v696_v19 = vmul.f32 %v6228_v18, %v660_v56 }
 0x176   : > { %v5395_v37 = vpop.eup %5394  ;;  %v604_v0 = vadd.f32 1e-05, %v572_v2  ;;  %v697_v34 = vmul.f32 %v6228_v18, %v661_v13 }
 0x177   : > { %v605_v16 = vadd.f32 1e-05, %v573_v45  ;;  %v5397_v5 = vpop.eup %5396  ;;  %v662_v32 = vmul.f32 %v5395_v37, %v6157_v3  ;;  %v510_v10 = vpop.xlane.xlu1 %509  ;;  %5226 = vmatmul.mubr.msk.bf16.vlgmr.msra.gmra.mrb[0].mxu0 %vm269_vm0, %v760_v25  ;;  %5262 = vmatmul.mubr.msk.bf16.vlgmr.msra.gmra.mrb[16].mxu1 %vm269_vm0, %v760_v25  ;;  %v732_v63 = vadd.f32 %v6236_v38, %v696_v19 }
 0x178   : > { %v663_v35 = vmul.f32 %v5397_v5, %v6169_v22  ;;  %5406 = vrsqrt.f32 %v604_v0  ;;  %v574_v48 = vmul.f32 0.03125, %v510_v10  ;;  %v733_v50 = vadd.f32 %v6236_v38, %v697_v34  ;;  %v6455_v34 = vld [vmem:[%s12009_s3] ss:$0 sm:$0xff] }
 0x179   : > { %5408 = vrsqrt.f32 %v605_v16  ;;  %v761_v17 = vpack.c.bf16 %v732_v63, %v731_v1  ;;  %v698_v15 = vmul.f32 %v6228_v18, %v662_v32 }
 0x17a   : > { %v5399_v20 = vpop.eup %5398  ;;  %v606_v46 = vadd.f32 1e-05, %v574_v48  ;;  %v699_v3 = vmul.f32 %v6228_v18, %v663_v35  ;;  %v6464_v48 = vld [vmem:[%s12009_s3 + $0x1] ss:$0 sm:$0xff] }
 0x17b   : > { %v5401_v36 = vpop.eup %5400  ;;  %v664_v26 = vmul.f32 %v5399_v20, %v6172_v23  ;;  %5229 = vmatprep.mubr.msk.bf16.mxu0 %vm269_vm0, %v761_v17  ;;  %5265 = vmatprep.mubr.msk.bf16.mxu1 %vm269_vm0, %v761_v17  ;;  %v734_v22 = vadd.f32 %v6236_v38, %v698_v15 }
 0x17c   : > { %v665_v51 = vmul.f32 %v5401_v36, %v6181_v49  ;;  %5410 = vrsqrt.f32 %v606_v46  ;;  %v735_v31 = vadd.f32 %v6236_v38, %v699_v3 }
 0x17d   : > { %v762_v43 = vpack.c.bf16 %v734_v22, %v733_v50  ;;  %v700_v11 = vmul.f32 %v6228_v18, %v664_v26 }
 0x17e   : > { %v5403_v29 = vpop.eup %5402  ;;  %v701_v58 = vmul.f32 %v6228_v18, %v665_v51  ;;  %v6487_v51 = vld [vmem:[%s12009_s3 + $0x2] ss:$0 sm:$0xff] }
 0x17f   : > { %v5405_v54 = vpop.eup %5404  ;;  %v666_v23 = vmul.f32 %v5403_v29, %v6184_v39  ;;  %5230 = vmatmul.mubr.msk.bf16.gmra.mrb[4].mxu0 %vm269_vm0, %v762_v43  ;;  %5266 = vmatmul.mubr.msk.bf16.gmra.mrb[20].mxu1 %vm269_vm0, %v762_v43  ;;  %v736_v52 = vadd.f32 %v6236_v38, %v700_v11 }
 0x180   : > { %v667_v49 = vmul.f32 %v5405_v54, %v6193_v8  ;;  %v737_v39 = vadd.f32 %v6236_v38, %v701_v58 }
 0x181   : > { %v763_v24 = vpack.c.bf16 %v736_v52, %v735_v31  ;;  %v702_v21 = vmul.f32 %v6228_v18, %v666_v23 }
 0x182   : > { %v5407_v41 = vpop.eup %5406  ;;  %v703_v33 = vmul.f32 %v6228_v18, %v667_v49 }
 0x183   : > { %v5409_v4 = vpop.eup %5408  ;;  %v668_v7 = vmul.f32 %v5407_v41, %v6196_v53  ;;  %5233 = vmatprep.mubr.msk.bf16.mxu0 %vm269_vm0, %v763_v24  ;;  %5269 = vmatprep.mubr.msk.bf16.mxu1 %vm269_vm0, %v763_v24  ;;  %v738_v60 = vadd.f32 %v6236_v38, %v702_v21  ;;  %v6508_v24 = vld [vmem:[%s12009_s3 + $0x3] ss:$0 sm:$0xff] }
 0x184   : > { %v669_v27 = vmul.f32 %v5409_v4, %v6205_v12  ;;  %v739_v59 = vadd.f32 %v6236_v38, %v703_v33 }
 0x185   : > { %v764_v8 = vpack.c.bf16 %v738_v60, %v737_v39  ;;  %v704_v6 = vmul.f32 %v6228_v18, %v668_v7  ;;  %v6521_v39 = vld [vmem:[%s12007_s1 + $0x3] ss:$0 sm:$0xff]  ;;  %v6526_v60 = vld [vmem:[%s12009_s3 + $0x4] ss:$0 sm:$0xff] }
 0x186   : > { %v5411_v56 = vpop.eup %5410  ;;  %v705_v14 = vmul.f32 %v6228_v18, %v669_v27 }
 0x187   : > { %v670_v47 = vmul.f32 %v5411_v56, %v6208_v57  ;;  %5234 = vmatmul.mubr.msk.bf16.gmra.mrb[8].mxu0 %vm269_vm0, %v764_v8  ;;  %5270 = vmatmul.mubr.msk.bf16.gmra.mrb[24].mxu1 %vm269_vm0, %v764_v8  ;;  %v740_v53 = vadd.f32 %v6236_v38, %v704_v6 }
 0x188   : > { %v741_v12 = vadd.f32 %v6236_v38, %v705_v14 }
 0x189   : > { %v765_v28 = vpack.c.bf16 %v740_v53, %v739_v59  ;;  %v706_v13 = vmul.f32 %v6228_v18, %v670_v47  ;;  %v5811_v18 = vmov 0.0  }
 0x18a   : > { %1410 = vst.msk [vmem:[#allocation2] sm:$0xff] %vm269_vm0, %v5811_v18  ;;  %1411 = vst.msk [vmem:[#allocation2 + $0x8] sm:$0xff] %vm269_vm0, %v5811_v18 }
 0x18b   : > { %5237 = vmatprep.mubr.msk.bf16.mxu0 %vm269_vm0, %v765_v28  ;;  %5273 = vmatprep.mubr.msk.bf16.mxu1 %vm269_vm0, %v765_v28  ;;  %v742_v2 = vadd.f32 %v6236_v38, %v706_v13  ;;  %1420 = vst.msk [vmem:[#allocation2 + $0x50] sm:$0xff] %vm269_vm0, %v5811_v18  ;;  %1421 = vst.msk [vmem:[#allocation2 + $0x58] sm:$0xff] %vm269_vm0, %v5811_v18 }
 0x18c   : > { %1422 = vst.msk [vmem:[#allocation2 + $0x60] sm:$0xff] %vm269_vm0, %v5811_v18  ;;  %1423 = vst.msk [vmem:[#allocation2 + $0x68] sm:$0xff] %vm269_vm0, %v5811_v18 }
 0x18d   : > { %v766_v57 = vpack.c.bf16 %v742_v2, %v741_v12  ;;  %1432 = vst.msk [vmem:[#allocation2 + $0xb0] sm:$0xff] %vm269_vm0, %v5811_v18  ;;  %1433 = vst.msk [vmem:[#allocation2 + $0xb8] sm:$0xff] %vm269_vm0, %v5811_v18 }
 0x18e   : > { %1434 = vst.msk [vmem:[#allocation2 + $0xc0] sm:$0xff] %vm269_vm0, %v5811_v18  ;;  %1435 = vst.msk [vmem:[#allocation2 + $0xc8] sm:$0xff] %vm269_vm0, %v5811_v18 }
 0x18f   : > { %5238 = vmatmul.mubr.msk.bf16.gmra.mrb[12].mxu0 %vm269_vm0, %v766_v57  ;;  %5274 = vmatmul.mubr.msk.bf16.gmra.mrb[28].mxu1 %vm269_vm0, %v766_v57  ;;  %1444 = vst.msk [vmem:[#allocation2 + $0x110] sm:$0xff] %vm269_vm0, %v5811_v18  ;;  %1445 = vst.msk [vmem:[#allocation2 + $0x118] sm:$0xff] %vm269_vm0, %v5811_v18 }
 0x190   : > { %5277 = vmatprep.mubr.msk.bf16.mxu1 %vm269_vm0, %v6244_v40  ;;  %1446 = vst.msk [vmem:[#allocation2 + $0x120] sm:$0xff] %vm269_vm0, %v5811_v18  ;;  %1447 = vst.msk [vmem:[#allocation2 + $0x128] sm:$0xff] %vm269_vm0, %v5811_v18 }
 0x191   : > { %1456 = vst.msk [vmem:[#allocation2 + $0x170] sm:$0xff] %vm269_vm0, %v5811_v18  ;;  %1457 = vst.msk [vmem:[#allocation2 + $0x178] sm:$0xff] %vm269_vm0, %v5811_v18  ;;  %v6434_v25 = vld [vmem:[#allocation2] sm:$0xff]  ;;  %v6436_v19 = vld [vmem:[#allocation2 + $0x8] sm:$0xff] }
 0x192   : > { %v1507_v16 = vrot.slane %v6434_v25, 1  ;;  %v1508_v1 = vrot.slane %v6436_v19, 1  ;;  %v1615_v5 = vrot.slane %v6434_v25, 2  ;;  %v12017_v32 = vrot.slane %v6436_v19, 2  ;;  %v6547_v18 = vld [vmem:[%s12009_s3 + $0x5] ss:$0 sm:$0xff] }
 0x193   : > { %v1753_v15 = vrot.slane %v6434_v25, 3  ;;  %v12016_v3 = vrot.slane %v6436_v19, 3  ;;  %v1891_v22 = vrot.slane %v6434_v25, 4  ;;  %v12015_v43 = vrot.slane %v6436_v19, 4 }
 0x194   : > { %v2029_v52 = vrot.slane %v6434_v25, 5  ;;  %v12014_v21 = vrot.slane %v6436_v19, 5  ;;  %v2167_v7 = vrot.slane %v6434_v25, 6  ;;  %v12013_v27 = vrot.slane %v6436_v19, 6 }
 0x195   : > { %v2305_v13 = vrot.slane %v6434_v25, 7 }
 0x197   : > { %5278 = vmatmul.mubr.msk.bf16.gmra.mrb[32].mxu1 %vm269_vm0, %v6254_v30 }
 0x198   : > { %5281 = vmatprep.mubr.msk.bf16.mxu1 %vm269_vm0, %v6268_v9 }
 0x19f   : > { %5282 = vmatmul.mubr.msk.bf16.gmra.mrb[36].mxu1 %vm269_vm0, %v6278_v44  ;;  %v5346_v44 = vld [vmem:[%s12010_s4] sm:$0xff]  }
 0x1a0   : > { %5285 = vmatprep.mubr.msk.bf16.mxu1 %vm269_vm0, %v6288_v42  ;;  %v5347_v42 = vld [vmem:[%s12010_s4 + $0x8] sm:$0xff]   ;;  %5293 = vmatprep.subr.bf16.mxu0 %v5346_v44 }
 0x1a1   : > { %5294 = vmatpush3.bf16.msra.mxu0 %v5346_v44 }
 0x1a2   : > { %5295 = vmatprep.subr.bf16.mxu0 %v5347_v42 }
 0x1a5   : > { %5296 = vmatpush3.bf16.msra.mxu0 %v5347_v42 }
 0x1a7   : > { %5286 = vmatmul.mubr.msk.bf16.gmra.mrb[40].mxu1 %vm269_vm0, %v6298_v62  ;;  %v1543_v62 = vlaneseq }
 0x1a8   : > { %5289 = vmatprep.mubr.msk.bf16.mxu1 %vm269_vm0, %v6307_v61 }
 0x1a9   : > { %v6438_v37 = vshrl.u32 %v1543_v62, 7 }
 0x1ab   : > { %12486 = vst [vmem:[#allocation3_spill] sm:$0xff] %v6438_v37  ;;  %vm1545_vm1 = vcmp.lt.s32.totalorder %v6438_v37, 7  ;;  %vm1651_vm2 = vcmp.lt.s32.totalorder %v6438_v37, 6  ;;  %vm1789_vm3 = vcmp.lt.s32.totalorder %v6438_v37, 5  ;;  %vm1927_vm4 = vcmp.lt.s32.totalorder %v6438_v37, 4 }
 0x1ac   : > { %v1577_v35 = vsel %vm1545_vm1, %v1507_v16, %v1508_v1  ;;  %v1683_v17 = vsel %vm1651_vm2, %v1615_v5, %v12017_v32  ;;  %v1821_v50 = vsel %vm1789_vm3, %v1753_v15, %v12016_v3  ;;  %v1959_v23 = vsel %vm1927_vm4, %v1891_v22, %v12015_v43  ;;  %v6563_v22 = vld [vmem:[%s12009_s3 + $0x6] ss:$0 sm:$0xff] }
 0x1ad   : > { %v1582_v36 = vmul.f32 %v6455_v34, %v1577_v35  ;;  %v1688_v26 = vmul.f32 %v6464_v48, %v1683_v17  ;;  %v1826_v31 = vmul.f32 %v6487_v51, %v1821_v50  ;;  %v1964_v33 = vmul.f32 %v6508_v24, %v1959_v23 }
 0x1ae   : > { %vm2065_vm5 = vcmp.lt.s32.totalorder %v6438_v37, 3  ;;  %vm2203_vm6 = vcmp.lt.s32.totalorder %v6438_v37, 2  ;;  %v12012_v5 = vrot.slane %v6436_v19, 7  ;;  %vm2341_vm7 = vcmp.lt.s32.totalorder %v6438_v37, 1 }
 0x1af   : > { %5290 = vmatmul.mubr.msk.bf16.gmra.mrb[44].mxu1 %vm269_vm0, %v6318_v55  ;;  %v1720_v29 = vadd.f32 %v1688_v26, %v1582_v36  ;;  %v2097_v4 = vsel %vm2065_vm5, %v2029_v52, %v12014_v21  ;;  %v2235_v28 = vsel %vm2203_vm6, %v2167_v7, %v12013_v27  ;;  %v6574_v7 = vld [vmem:[%s12007_s1 + $0x2] ss:$0 sm:$0xff] }
 0x1b0   : > { %v2102_v59 = vmul.f32 %v6526_v60, %v2097_v4  ;;  %v2240_v15 = vmul.f32 %v6547_v18, %v2235_v28  ;;  %v2373_v26 = vsel %vm2341_vm7, %v2305_v13, %v12012_v5 }
 0x1b1   : > { %v1858_v41 = vadd.f32 %v1826_v31, %v1720_v29  ;;  %v2378_v52 = vmul.f32 %v6563_v22, %v2373_v26 }
 0x1b3   : > { %v1996_v56 = vadd.f32 %v1964_v33, %v1858_v41 }
 0x1b5   : > { %v2134_v17 = vadd.f32 %v2102_v59, %v1996_v56 }
 0x1b7   : > { %v2272_v23 = vadd.f32 %v2240_v15, %v2134_v17 }
 0x22a   : > { %v6414_v38 = vpop.f32.mrb[0].mxu1 }
 0x22b   : > { %v6416_v40 = vpop.f32.mrb[1].mxu1 }
 0x22c   : > { %v6418_v30 = vpop.f32.mrb[2].mxu1 }
 0x22d   : > { %v6420_v9 = vpop.f32.mrb[3].mxu1  ;;  %v6600_v26 = vadd.f32 %v6418_v30, %v6574_v7 }
 0x232   : > { %v6428_v61 = vpop.f32.mrb[4].mxu1 }
 0x233   : > { %v6430_v55 = vpop.f32.mrb[5].mxu1 }
 0x234   : > { %v6432_v45 = vpop.f32.mrb[6].mxu1  ;;  %v6616_v30 = vadd.f32 %v6574_v7, %v6430_v55 }
 0x235   : > { %v6440_v0 = vpop.f32.mrb[7].mxu1 }
 0x23a   : > { %v6448_v10 = vpop.f32.mrb[8].mxu1 }
 0x23b   : > { %v6450_v63 = vpop.f32.mrb[9].mxu1 }
 0x23c   : > { %v6471_v20 = vpop.f32.mrb[10].mxu1 }
 0x23d   : > { %v6473_v46 = vpop.f32.mrb[11].mxu1 }
 0x242   : > { %v6490_v11 = vpop.f32.mrb[12].mxu1 }
 0x243   : > { %v6494_v54 = vpop.f32.mrb[13].mxu1 }
 0x244   : > { %v6501_v58 = vpop.f32.mrb[14].mxu1 }
 0x245   : > { %v6503_v49 = vpop.f32.mrb[15].mxu1 }
 0x24a   : > { %v6529_v8 = vpop.f32.mrb[0].mxu0  ;;  %v5263_v6 = vpop.f32.mrb[16].mxu1 }
 0x24b   : > { %v1068_v47 = vadd.f32 %v5263_v6, %v6521_v39  ;;  %v6534_v53 = vpop.f32.mrb[1].mxu0  ;;  %v1059_v14 = vpop.f32.mrb[17].mxu1 }
 0x24c   : > { %v1060_v12 = vadd.f32 %v6521_v39, %v1059_v14  ;;  %v6542_v2 = vpop.f32.mrb[2].mxu0  ;;  %v5264_v57 = vpop.f32.mrb[18].mxu1 }
 0x24d   : > { %v5050_v44 = vmul.f32 -1.442695, %v1068_v47  ;;  %v1071_v42 = vadd.f32 %v5264_v57, %v6521_v39  ;;  %v6550_v62 = vpop.f32.mrb[3].mxu0  ;;  %v1062_v16 = vpop.f32.mrb[19].mxu1 }
 0x24e   : > { %v5048_v25 = vmul.f32 -1.442695, %v1060_v12  ;;  %v1063_v35 = vadd.f32 %v6521_v39, %v1062_v16  ;;  %v6585_v12 = vld [vmem:[%s12009_s3 + $0x7] ss:$0 sm:$0xff] }
 0x24f   : > { %5412 = vpow2.f32 %v5050_v44  ;;  %v5051_v36 = vmul.f32 -1.442695, %v1071_v42  ;;  %v2410_v42 = vadd.f32 %v2378_v52, %v2272_v23  ;;  %v2447_v16 = vmul.f32 %v6585_v12, %v6436_v19 }
 0x250   : > { %5414 = vpow2.f32 %v5048_v25  ;;  %v5049_v50 = vmul.f32 -1.442695, %v1063_v35  ;;  %v6592_v35 = vadd.f32 %v6414_v38, %v6574_v7  ;;  %v6608_v38 = vadd.f32 %v6428_v61, %v6574_v7 }
 0x251   : > { %5416 = vpow2.f32 %v5051_v36  ;;  %v6596_v36 = vadd.f32 %v6574_v7, %v6416_v40 }
 0x252   : > { %5418 = vpow2.f32 %v5049_v50  ;;  %v6565_v29 = vpop.f32.mrb[4].mxu0  ;;  %v5267_v31 = vpop.f32.mrb[20].mxu1  ;;  %v6604_v50 = vadd.f32 %v6574_v7, %v6420_v9  ;;  %v6620_v9 = vadd.f32 %v6432_v45, %v6574_v7  ;;  %v6634_v45 = vadd.f32 %v6448_v10, %v6574_v7 }
 0x253   : > { %v1084_v41 = vadd.f32 %v5267_v31, %v6521_v39  ;;  %v6569_v33 = vpop.f32.mrb[5].mxu0  ;;  %v1075_v4 = vpop.f32.mrb[21].mxu1  ;;  %v6649_v10 = vadd.f32 %v6574_v7, %v6473_v46  ;;  %v6666_v46 = vadd.f32 %v6574_v7, %v6503_v49 }
 0x254   : > { %v1076_v6 = vadd.f32 %v6521_v39, %v1075_v4  ;;  %v6577_v56 = vpop.f32.mrb[6].mxu0  ;;  %v5268_v59 = vpop.f32.mrb[22].mxu1 }
 0x255   : > { %v5054_v47 = vmul.f32 -1.442695, %v1084_v41  ;;  %v1087_v14 = vadd.f32 %v5268_v59, %v6521_v39  ;;  %v6580_v28 = vpop.f32.mrb[7].mxu0  ;;  %v1078_v13 = vpop.f32.mrb[23].mxu1  ;;  %v6612_v41 = vadd.f32 %v2447_v16, %v2410_v42  ;;  %v905_v3 = vadd.f32 %v6577_v56, %v6574_v7 }
 0x256   : > { %v5052_v57 = vmul.f32 -1.442695, %v1076_v6  ;;  %v1079_v44 = vadd.f32 %v6521_v39, %v1078_v13  ;;  %v6627_v13 = vadd.f32 %v6574_v7, %v6440_v0  ;;  %v6640_v0 = vadd.f32 %v6574_v7, %v6450_v63 }
 0x257   : > { %5420 = vpow2.f32 %v5054_v47  ;;  %v5055_v25 = vmul.f32 -1.442695, %v1087_v14  ;;  %v6658_v63 = vadd.f32 %v6574_v7, %v6494_v54  ;;  %v878_v54 = vadd.f32 %v6574_v7, %v6534_v53 }
 0x258   : > { %5422 = vpow2.f32 %v5052_v57  ;;  %v5053_v17 = vmul.f32 -1.442695, %v1079_v44 }
 0x259   : > { %v5413_v15 = vpop.eup %5412  ;;  %5424 = vpow2.f32 %v5055_v25 }
 0x25a   : > { %v5415_v31 = vpop.eup %5414  ;;  %v1284_v23 = vadd.f32 1.0, %v5413_v15  ;;  %5426 = vpow2.f32 %v5053_v17  ;;  %v6610_v52 = vpop.f32.mrb[8].mxu0 }
 0x25b   : > { %v5271_v40 = vpop.f32.mrb[24].mxu1  ;;  %v5417_v4 = vpop.eup %5416  ;;  %v1282_v6 = vadd.f32 1.0, %v5415_v31 }
 0x25c   : > { %v1100_v61 = vadd.f32 %v5271_v40, %v6521_v39  ;;  %v6623_v59 = vpop.f32.mrb[9].mxu0  ;;  %v1091_v47 = vpop.f32.mrb[25].mxu1  ;;  %5428 = vrcp.f32 %v1284_v23  ;;  %v1285_v57 = vadd.f32 1.0, %v5417_v4  ;;  %v6645_v40 = vadd.f32 %v6471_v20, %v6574_v7 }
 0x25d   : > { %v5419_v14 = vpop.eup %5418  ;;  %v1092_v55 = vadd.f32 %v6521_v39, %v1091_v47  ;;  %v6630_v44 = vpop.f32.mrb[10].mxu0  ;;  %5430 = vrcp.f32 %v1282_v6  ;;  %v6654_v6 = vadd.f32 %v6490_v11, %v6574_v7  ;;  %v6662_v20 = vadd.f32 %v6501_v58, %v6574_v7 }
 0x25e   : > { %v5272_v42 = vpop.f32.mrb[26].mxu1  ;;  %v1283_v16 = vadd.f32 1.0, %v5419_v14  ;;  %v5058_v25 = vmul.f32 -1.442695, %v1100_v61  ;;  %v6636_v17 = vpop.f32.mrb[11].mxu0  ;;  %5432 = vrcp.f32 %v1285_v57  ;;  %v886_v11 = vadd.f32 %v6529_v8, %v6574_v7 }
 0x25f   : > { %v1094_v15 = vpop.f32.mrb[27].mxu1  ;;  %v5056_v31 = vmul.f32 -1.442695, %v1092_v55  ;;  %v1103_v23 = vadd.f32 %v5272_v42, %v6521_v39  ;;  %v889_v58 = vadd.f32 %v6542_v2, %v6574_v7  ;;  %v881_v8 = vadd.f32 %v6574_v7, %v6550_v62 }
 0x260   : > { %5434 = vrcp.f32 %v1283_v16  ;;  %v1095_v4 = vadd.f32 %v6521_v39, %v1094_v15  ;;  %v902_v2 = vadd.f32 %v6565_v29, %v6574_v7  ;;  %v894_v62 = vadd.f32 %v6574_v7, %v6569_v33 }
 0x261   : > { %5436 = vpow2.f32 %v5058_v25  ;;  %v5059_v61 = vmul.f32 -1.442695, %v1103_v23  ;;  %v5421_v47 = vpop.eup %5420 }
 0x262   : > { %5438 = vpow2.f32 %v5056_v31  ;;  %v5057_v14 = vmul.f32 -1.442695, %v1095_v4  ;;  %v5423_v57 = vpop.eup %5422  ;;  %v1288_v55 = vadd.f32 1.0, %v5421_v47  ;;  %v5239_v42 = vpop.f32.mrb[12].mxu0 }
 0x263   : > { %5440 = vpow2.f32 %v5059_v61  ;;  %v5275_v16 = vpop.f32.mrb[28].mxu1  ;;  %v5425_v25 = vpop.eup %5424  ;;  %v1286_v15 = vadd.f32 1.0, %v5423_v57 }
 0x264   : > { %5442 = vpow2.f32 %v5057_v14  ;;  %v1116_v49 = vadd.f32 %v5275_v16, %v6521_v39  ;;  %v925_v31 = vpop.f32.mrb[13].mxu0  ;;  %v1107_v23 = vpop.f32.mrb[29].mxu1  ;;  %v1289_v53 = vadd.f32 1.0, %v5425_v25 }
 0x265   : > { %v5427_v4 = vpop.eup %5426  ;;  %5444 = vrcp.f32 %v1288_v55  ;;  %v1108_v61 = vadd.f32 %v6521_v39, %v1107_v23  ;;  %v6678_v47 = vpop.f32.mrb[14].mxu0 }
 0x266   : > { %v5276_v5 = vpop.f32.mrb[30].mxu1  ;;  %5446 = vrcp.f32 %v1286_v15  ;;  %v1287_v14 = vadd.f32 1.0, %v5427_v4  ;;  %v5062_v57 = vmul.f32 -1.442695, %v1116_v49  ;;  %v6682_v16 = vpop.f32.mrb[15].mxu0  ;;  %v897_v4 = vadd.f32 %v6574_v7, %v6580_v28 }
 0x267   : > { %v1110_v27 = vpop.f32.mrb[31].mxu1  ;;  %v5429_v21 = vpop.eup %5428  ;;  %5448 = vrcp.f32 %v1289_v53  ;;  %v5060_v55 = vmul.f32 -1.442695, %v1108_v61  ;;  %v1119_v25 = vadd.f32 %v5276_v5, %v6521_v39  ;;  %v6704_v28 = vadd.f32 %v6630_v44, %v6574_v7 }
 0x268   : > { %v5431_v23 = vpop.eup %5430  ;;  %v1380_v43 = vmul.f32 %v5429_v21, %v886_v11  ;;  %5450 = vrcp.f32 %v1287_v14  ;;  %v1111_v29 = vadd.f32 %v6521_v39, %v1110_v27  ;;  %v6695_v21 = vadd.f32 %v6610_v52, %v6574_v7 }
 0x269   : > { %v5433_v15 = vpop.eup %5432  ;;  %v1378_v49 = vmul.f32 %v5431_v23, %v878_v54  ;;  %5452 = vpow2.f32 %v5062_v57  ;;  %v5063_v32 = vmul.f32 -1.442695, %v1119_v25  ;;  %v6700_v11 = vadd.f32 %v6574_v7, %v6623_v59 }
 0x26a   : > { %v5435_v33 = vpop.eup %5434  ;;  %1414 = vst.msk [vmem:[#allocation2 + $0x20] sm:$0xff] %vm269_vm0, %v1380_v43  ;;  %v1381_v53 = vmul.f32 %v5433_v15, %v889_v58  ;;  %5454 = vpow2.f32 %v5060_v55  ;;  %v5061_v5 = vmul.f32 -1.442695, %v1111_v29  ;;  %v5279_v43 = vpop.f32.mrb[32].mxu1  ;;  %v6709_v58 = vadd.f32 %v6574_v7, %v6636_v17 }
 0x26b   : > { %v5437_v56 = vpop.eup %5436  ;;  %1412 = vst.msk [vmem:[#allocation2 + $0x10] sm:$0xff] %vm269_vm0, %v1378_v49  ;;  %v1379_v27 = vmul.f32 %v5435_v33, %v881_v8  ;;  %5456 = vpow2.f32 %v5063_v32  ;;  %v1132_v8 = vadd.f32 %v5279_v43, %v6521_v39  ;;  %v1123_v61 = vpop.f32.mrb[33].mxu1  ;;  %v6714_v44 = vadd.f32 %v5239_v42, %v6574_v7 }
 0x26c   : > { %v5439_v54 = vpop.eup %5438  ;;  %1415 = vst.msk [vmem:[#allocation2 + $0x28] sm:$0xff] %vm269_vm0, %v1381_v53  ;;  %v1292_v52 = vadd.f32 1.0, %v5437_v56  ;;  %5458 = vpow2.f32 %v5061_v5  ;;  %v6717_v32 = vadd.f32 %v6574_v7, %v925_v31  ;;  %v1124_v57 = vadd.f32 %v6521_v39, %v1123_v61  ;;  %v5280_v55 = vpop.f32.mrb[34].mxu1 }
 0x26d   : > { %v5441_v59 = vpop.eup %5440  ;;  %1413 = vst.msk [vmem:[#allocation2 + $0x18] sm:$0xff] %vm269_vm0, %v1379_v27  ;;  %v1290_v14 = vadd.f32 1.0, %v5439_v54  ;;  %v5066_v23 = vmul.f32 -1.442695, %v1132_v8  ;;  %v1135_v29 = vadd.f32 %v5280_v55, %v6521_v39  ;;  %v1126_v15 = vpop.f32.mrb[35].mxu1  ;;  %v6724_v31 = vadd.f32 %v6678_v47, %v6574_v7 }
 0x26e   : > { %v5443_v25 = vpop.eup %5442  ;;  %5460 = vrcp.f32 %v1292_v52  ;;  %v1293_v17 = vadd.f32 1.0, %v5441_v59  ;;  %v5064_v53 = vmul.f32 -1.442695, %v1124_v57  ;;  %v1127_v42 = vadd.f32 %v6521_v39, %v1126_v15 }
 0x26f   : > { %v5445_v49 = vpop.eup %5444  ;;  %5462 = vrcp.f32 %v1290_v14  ;;  %v1291_v33 = vadd.f32 1.0, %v5443_v25  ;;  %v5067_v27 = vmul.f32 -1.442695, %v1135_v29  ;;  %v6728_v52 = vadd.f32 %v6574_v7, %v6682_v16 }
 0x270   : > { %v5447_v5 = vpop.eup %5446  ;;  %v1384_v56 = vmul.f32 %v5445_v49, %v902_v2  ;;  %5464 = vrcp.f32 %v1293_v17  ;;  %v5065_v8 = vmul.f32 -1.442695, %v1127_v42 }
 0x271   : > { %v5449_v43 = vpop.eup %5448  ;;  %v1382_v54 = vmul.f32 %v5447_v5, %v894_v62  ;;  %5466 = vrcp.f32 %v1291_v33  ;;  %v6730_v61 = vld [vmem:[#allocation2 + $0x20] sm:$0xff] }
 0x272   : > { %v5451_v59 = vpop.eup %5450  ;;  %1418 = vst.msk [vmem:[#allocation2 + $0x40] sm:$0xff] %vm269_vm0, %v1384_v56  ;;  %v1385_v2 = vmul.f32 %v5449_v43, %v905_v3  ;;  %5468 = vpow2.f32 %v5066_v23  ;;  %v6733_v14 = vld [vmem:[#allocation2 + $0x10] sm:$0xff]  ;;  %v1511_v47 = vrot.slane %v6730_v61, 1  ;;  %v5283_v16 = vpop.f32.mrb[36].mxu1 }
 0x273   : > { %v5453_v62 = vpop.eup %5452  ;;  %v6737_v55 = vld [vmem:[#allocation2 + $0x28] sm:$0xff]  ;;  %1416 = vst.msk [vmem:[#allocation2 + $0x30] sm:$0xff] %vm269_vm0, %v1382_v54  ;;  %v1383_v7 = vmul.f32 %v5451_v59, %v897_v4  ;;  %5470 = vpow2.f32 %v5064_v53  ;;  %v1509_v25 = vrot.slane %v6733_v14, 1  ;;  %v1148_v29 = vadd.f32 %v5283_v16, %v6521_v39  ;;  %v1139_v15 = vpop.f32.mrb[37].mxu1 }
 0x274   : > { %v5455_v3 = vpop.eup %5454  ;;  %1419 = vst.msk [vmem:[#allocation2 + $0x48] sm:$0xff] %vm269_vm0, %v1385_v2  ;;  %v1296_v23 = vadd.f32 1.0, %v5453_v62  ;;  %5472 = vpow2.f32 %v5067_v27  ;;  %v6744_v49 = vld [vmem:[#allocation2 + $0x18] sm:$0xff]  ;;  %v1512_v33 = vrot.slane %v6737_v55, 1  ;;  %v1140_v53 = vadd.f32 %v6521_v39, %v1139_v15  ;;  %v5284_v5 = vpop.f32.mrb[38].mxu1 }
 0x275   : > { %v5457_v42 = vpop.eup %5456  ;;  %1417 = vst.msk [vmem:[#allocation2 + $0x38] sm:$0xff] %vm269_vm0, %v1383_v7  ;;  %v1294_v4 = vadd.f32 1.0, %v5455_v3  ;;  %5474 = vpow2.f32 %v5065_v8  ;;  %v1510_v56 = vrot.slane %v6744_v49, 1  ;;  %v5070_v54 = vmul.f32 -1.442695, %v1148_v29  ;;  %v1142_v2 = vpop.f32.mrb[39].mxu1 }
 0x276   : > { %v5459_v43 = vpop.eup %5458  ;;  %5476 = vrcp.f32 %v1296_v23  ;;  %v1297_v27 = vadd.f32 1.0, %v5457_v42  ;;  %v1151_v59 = vadd.f32 %v5284_v5, %v6521_v39  ;;  %v5068_v16 = vmul.f32 -1.442695, %v1140_v53 }
 0x277   : > { %5478 = vrcp.f32 %v1294_v4  ;;  %v1295_v62 = vadd.f32 1.0, %v5459_v43  ;;  %v1143_v17 = vadd.f32 %v6521_v39, %v1142_v2  ;;  %v6754_v3 = vsel %vm1545_vm1, %v1511_v47, %v1512_v33 }
 0x278   : > { %v5461_v7 = vpop.eup %5460  ;;  %5480 = vrcp.f32 %v1297_v27  ;;  %v5071_v8 = vmul.f32 -1.442695, %v1151_v59  ;;  %v6758_v23 = vsel %vm1545_vm1, %v1510_v56, %v1511_v47  ;;  %v6763_v4 = vsel %vm1545_vm1, %v1509_v25, %v1510_v56 }
 0x279   : > { %v5463_v29 = vpop.eup %5462  ;;  %v1388_v15 = vmul.f32 %v5461_v7, %v6695_v21  ;;  %5482 = vrcp.f32 %v1295_v62  ;;  %v5069_v42 = vmul.f32 -1.442695, %v1143_v17  ;;  %v6772_v47 = vsel %vm1545_vm1, %v1508_v1, %v1509_v25 }
 0x27a   : > { %v5465_v53 = vpop.eup %5464  ;;  %v6765_v5 = vld [vmem:[#allocation2 + $0x30] sm:$0xff]  ;;  %v1386_v43 = vmul.f32 %v5463_v29, %v6700_v11  ;;  %5484 = vpow2.f32 %v5070_v54  ;;  %v6776_v21 = vmul.f32 %v6455_v34, %v6763_v4  ;;  %v5287_v27 = vpop.f32.mrb[40].mxu1  ;;  %v6783_v54 = vmul.f32 %v6455_v34, %v6772_v47 }
 0x27b   : > { %v5467_v17 = vpop.eup %5466  ;;  %1426 = vst.msk [vmem:[#allocation2 + $0x80] sm:$0xff] %vm269_vm0, %v1388_v15  ;;  %v1389_v56 = vmul.f32 %v5465_v53, %v6704_v28  ;;  %5486 = vpow2.f32 %v5068_v16  ;;  %v12018_v11 = vrot.slane %v6765_v5, 1  ;;  %v1164_v25 = vadd.f32 %v5287_v27, %v6521_v39  ;;  %v1155_v2 = vpop.f32.mrb[41].mxu1 }
 0x27c   : > { %v5469_v59 = vpop.eup %5468  ;;  %1424 = vst.msk [vmem:[#allocation2 + $0x70] sm:$0xff] %vm269_vm0, %v1386_v43  ;;  %v1387_v1 = vmul.f32 %v5467_v17, %v6709_v58  ;;  %5488 = vpow2.f32 %v5071_v8  ;;  %v6790_v28 = vmul.f32 %v6455_v34, %v6758_v23  ;;  %v1156_v7 = vadd.f32 %v6521_v39, %v1155_v2  ;;  %v5288_v29 = vpop.f32.mrb[42].mxu1 }
 0x27d   : > { %v5471_v62 = vpop.eup %5470  ;;  %1427 = vst.msk [vmem:[#allocation2 + $0x88] sm:$0xff] %vm269_vm0, %v1389_v56  ;;  %v1300_v16 = vadd.f32 1.0, %v5469_v59  ;;  %5490 = vpow2.f32 %v5069_v42  ;;  %v6798_v58 = vsel %vm1545_vm1, %v1512_v33, %v12018_v11  ;;  %v5074_v34 = vmul.f32 -1.442695, %v1164_v25  ;;  %v1158_v43 = vpop.f32.mrb[43].mxu1 }
 0x27e   : > { %12487 = vst [vmem:[#allocation4_spill] sm:$0xff] %v6798_v58  ;;  %v5473_v8 = vpop.eup %5472  ;;  %1425 = vst.msk [vmem:[#allocation2 + $0x78] sm:$0xff] %vm269_vm0, %v1387_v1  ;;  %v1298_v15 = vadd.f32 1.0, %v5471_v62  ;;  %v1167_v53 = vadd.f32 %v5288_v29, %v6521_v39  ;;  %v1618_v17 = vrot.slane %v6744_v49, 2  ;;  %v5072_v27 = vmul.f32 -1.442695, %v1156_v7 }
 0x27f   : > { %v5475_v42 = vpop.eup %5474  ;;  %5492 = vrcp.f32 %v1300_v16  ;;  %v1301_v56 = vadd.f32 1.0, %v5473_v8  ;;  %v1159_v59 = vadd.f32 %v6521_v39, %v1158_v43  ;;  %v1620_v57 = vrot.slane %v6737_v55, 2 }
 0x280   : > { %v5477_v2 = vpop.eup %5476  ;;  %5494 = vrcp.f32 %v1298_v15  ;;  %v1299_v33 = vadd.f32 1.0, %v5475_v42  ;;  %v5075_v11 = vmul.f32 -1.442695, %v1167_v53  ;;  %v12020_v29 = vrot.slane %v6765_v5, 2 }
 0x281   : > { %v5479_v1 = vpop.eup %5478  ;;  %v1392_v25 = vmul.f32 %v5477_v2, %v6714_v44  ;;  %5496 = vrcp.f32 %v1301_v56  ;;  %v5073_v62 = vmul.f32 -1.442695, %v1159_v59  ;;  %v12488_v7 = vrot.slane %v6730_v61, 2 }
 0x282   : > { %v5481_v58 = vpop.eup %5480  ;;  %v1390_v16 = vmul.f32 %v5479_v1, %v6717_v32  ;;  %5498 = vrcp.f32 %v1299_v33  ;;  %v5291_v32 = vpop.f32.mrb[44].mxu1  ;;  %v6826_v42 = vsel %vm1651_vm2, %v1620_v57, %v12020_v29  ;;  %v12491_v56 = vrot.slane %v6733_v14, 2 }
 0x283   : > { %v6812_v8 = vsel %vm1651_vm2, %v12488_v7, %v1620_v57  ;;  %v12489_v15 = vmov %v12488_v7  ;;  %v5483_v44 = vpop.eup %5482  ;;  %1430 = vst.msk [vmem:[#allocation2 + $0xa0] sm:$0xff] %vm269_vm0, %v1392_v25  ;;  %v1393_v43 = vmul.f32 %v5481_v58, %v6724_v31  ;;  %5500 = vpow2.f32 %v5074_v34  ;;  %12490 = vst [vmem:[#allocation5_spill] sm:$0xff] %v6826_v42  ;;  %v1171_v58 = vpop.f32.mrb[45].mxu1 }
 0x284   : > { %v6818_v53 = vsel %vm1651_vm2, %v1618_v17, %v12489_v15  ;;  %v6832_v59 = vsel %vm1651_vm2, %v12491_v56, %v1618_v17  ;;  %v5485_v2 = vpop.eup %5484  ;;  %1428 = vst.msk [vmem:[#allocation2 + $0x90] sm:$0xff] %vm269_vm0, %v1390_v16  ;;  %v1391_v33 = vmul.f32 %v5483_v44, %v6728_v52  ;;  %5502 = vpow2.f32 %v5072_v27  ;;  %v5292_v52 = vpop.f32.mrb[46].mxu1 }
 0x285   : > { %v1180_v31 = vadd.f32 %v5291_v32, %v6521_v39  ;;  %v12492_v34 = vmov %v12491_v56  ;;  %v12493_v57 = vrot.slane %v6436_v19, 2  ;;  %v5487_v25 = vpop.eup %5486  ;;  %1431 = vst.msk [vmem:[#allocation2 + $0xa8] sm:$0xff] %vm269_vm0, %v1393_v43  ;;  %v1304_v17 = vadd.f32 1.0, %v5485_v2  ;;  %v1174_v56 = vpop.f32.mrb[47].mxu1 }
 0x286   : > { %5504 = vpow2.f32 %v5075_v11  ;;  %v1172_v16 = vadd.f32 %v6521_v39, %v1171_v58  ;;  %v5489_v7 = vpop.eup %5488  ;;  %1429 = vst.msk [vmem:[#allocation2 + $0x98] sm:$0xff] %vm269_vm0, %v1391_v33  ;;  %v1302_v15 = vadd.f32 1.0, %v5487_v25  ;;  %v1183_v32 = vadd.f32 %v5292_v52, %v6521_v39 }
 0x287   : > { %v6843_v1 = vsel %vm1651_vm2, %v12493_v57, %v12492_v34  ;;  %5506 = vpow2.f32 %v5073_v62  ;;  %v5078_v44 = vmul.f32 -1.442695, %v1180_v31  ;;  %v5491_v34 = vpop.eup %5490  ;;  %v1305_v43 = vadd.f32 1.0, %v5489_v7 }
 0x288   : > { %v1689_v27 = vmul.f32 %v6464_v48, %v6843_v1  ;;  %5508 = vrcp.f32 %v1304_v17  ;;  %v5076_v2 = vmul.f32 -1.442695, %v1172_v16  ;;  %v1175_v11 = vadd.f32 %v6521_v39, %v1174_v56 }
 0x289   : > { %5510 = vrcp.f32 %v1302_v15  ;;  %v1303_v58 = vadd.f32 1.0, %v5491_v34  ;;  %v5079_v57 = vmul.f32 -1.442695, %v1183_v32  ;;  %v1690_v29 = vmul.f32 %v6464_v48, %v6832_v59  ;;  %v5493_v42 = vpop.eup %5492 }
 0x28a   : > { %5512 = vrcp.f32 %v1305_v43  ;;  %v5077_v33 = vmul.f32 -1.442695, %v1175_v11  ;;  %v1691_v62 = vmul.f32 %v6464_v48, %v6818_v53  ;;  %v1721_v31 = vadd.f32 %v1689_v27, %v6783_v54  ;;  %v5495_v25 = vpop.eup %5494 }
 0x28b   : > { %v1396_v17 = vmul.f32 %v5493_v42, %v6592_v35  ;;  %5514 = vrcp.f32 %v1303_v58  ;;  %v1722_v39 = vadd.f32 %v1690_v29, %v6776_v21  ;;  %v1755_v16 = vrot.slane %v6733_v14, 3  ;;  %v5497_v52 = vpop.eup %5496 }
 0x28c   : > { %v1394_v7 = vmul.f32 %v5495_v25, %v6596_v36  ;;  %5516 = vpow2.f32 %v5078_v44  ;;  %v1723_v15 = vadd.f32 %v1691_v62, %v6790_v28  ;;  %v1756_v32 = vrot.slane %v6744_v49, 3  ;;  %v5499_v56 = vpop.eup %5498 }
 0x28d   : > { %1438 = vst.msk [vmem:[#allocation2 + $0xe0] sm:$0xff] %vm269_vm0, %v1396_v17  ;;  %v1397_v48 = vmul.f32 %v5497_v52, %v6600_v26  ;;  %5518 = vpow2.f32 %v5076_v2  ;;  %v1757_v35 = vrot.slane %v6730_v61, 3  ;;  %v1758_v21 = vrot.slane %v6737_v55, 3  ;;  %v5501_v54 = vpop.eup %5500 }
 0x28e   : > { %1436 = vst.msk [vmem:[#allocation2 + $0xd0] sm:$0xff] %vm269_vm0, %v1394_v7  ;;  %v1395_v36 = vmul.f32 %v5499_v56, %v6604_v50  ;;  %5520 = vpow2.f32 %v5079_v57  ;;  %v12026_v28 = vrot.slane %v6765_v5, 3  ;;  %v6872_v29 = vsel %vm1789_vm3, %v1755_v16, %v1756_v32  ;;  %v5503_v42 = vpop.eup %5502 }
 0x28f   : > { %1439 = vst.msk [vmem:[#allocation2 + $0xe8] sm:$0xff] %vm269_vm0, %v1397_v48  ;;  %v1308_v26 = vadd.f32 1.0, %v5501_v54  ;;  %5522 = vpow2.f32 %v5077_v33  ;;  %v6877_v27 = vsel %vm1789_vm3, %v1757_v35, %v1758_v21  ;;  %v6881_v44 = vsel %vm1789_vm3, %v1756_v32, %v1757_v35 }
 0x290   : > { %v5505_v50 = vpop.eup %5504  ;;  %1437 = vst.msk [vmem:[#allocation2 + $0xd8] sm:$0xff] %vm269_vm0, %v1395_v36  ;;  %v1306_v34 = vadd.f32 1.0, %v5503_v42  ;;  %v6888_v43 = vsel %vm1789_vm3, %v1758_v21, %v12026_v28  ;;  %v12494_v2 = vrot.slane %v6436_v19, 3  ;;  %v1828_v58 = vmul.f32 %v6487_v51, %v6872_v29  ;;  %v7174_v28 = vld [vmem:[%s12009_s3 + $0x11] ss:$0 sm:$0xff] }
 0x291   : > { %v5507_v57 = vpop.eup %5506  ;;  %5524 = vrcp.f32 %v1308_v26  ;;  %v1309_v33 = vadd.f32 1.0, %v5505_v50  ;;  %v1829_v25 = vmul.f32 %v6487_v51, %v6881_v44  ;;  %v1893_v32 = vrot.slane %v6733_v14, 4  ;;  %12509 = vst [vmem:[#allocation16_spill] sm:$0xff] %v7174_v28 }
 0x292   : > { %v6894_v11 = vsel %vm1789_vm3, %v12494_v2, %v1755_v16  ;;  %v5509_v17 = vpop.eup %5508  ;;  %5526 = vrcp.f32 %v1306_v34  ;;  %v1307_v52 = vadd.f32 1.0, %v5507_v57  ;;  %v1860_v7 = vadd.f32 %v1828_v58, %v1722_v39 }
 0x293   : > { %v1827_v62 = vmul.f32 %v6487_v51, %v6894_v11  ;;  %v5511_v16 = vpop.eup %5510  ;;  %v1400_v56 = vmul.f32 %v5509_v17, %v6608_v38  ;;  %5528 = vrcp.f32 %v1309_v33  ;;  %v1861_v35 = vadd.f32 %v1829_v25, %v1723_v15 }
 0x294   : > { %v5513_v21 = vpop.eup %5512  ;;  %v1398_v54 = vmul.f32 %v5511_v16, %v6616_v30  ;;  %5530 = vrcp.f32 %v1307_v52  ;;  %v1894_v36 = vrot.slane %v6744_v49, 4  ;;  %v1895_v51 = vrot.slane %v6730_v61, 4 }
 0x295   : > { %v1859_v48 = vadd.f32 %v1827_v62, %v1721_v31  ;;  %v5515_v42 = vpop.eup %5514  ;;  %1442 = vst.msk [vmem:[#allocation2 + $0x100] sm:$0xff] %vm269_vm0, %v1400_v56  ;;  %v1401_v39 = vmul.f32 %v5513_v21, %v6620_v9  ;;  %v1896_v26 = vrot.slane %v6737_v55, 4  ;;  %v12024_v38 = vrot.slane %v6765_v5, 4 }
 0x296   : > { %v12495_v31 = vrot.slane %v6436_v19, 4  ;;  %v5517_v30 = vpop.eup %5516  ;;  %1440 = vst.msk [vmem:[#allocation2 + $0xf0] sm:$0xff] %vm269_vm0, %v1398_v54  ;;  %v1399_v50 = vmul.f32 %v5515_v42, %v6627_v13  ;;  %v6921_v34 = vsel %vm1927_vm4, %v1894_v36, %v1895_v51  ;;  %v6925_v9 = vsel %vm1927_vm4, %v1893_v32, %v1894_v36 }
 0x297   : > { %v5519_v58 = vpop.eup %5518  ;;  %1443 = vst.msk [vmem:[#allocation2 + $0x108] sm:$0xff] %vm269_vm0, %v1401_v39  ;;  %v1312_v57 = vadd.f32 1.0, %v5517_v30  ;;  %v6934_v13 = vsel %vm1927_vm4, %v1896_v26, %v12024_v38  ;;  %v6938_v33 = vsel %vm1927_vm4, %v1895_v51, %v1896_v26  ;;  %v1966_v62 = vmul.f32 %v6508_v24, %v6925_v9 }
 0x298   : > { %v6915_v15 = vsel %vm1927_vm4, %v12495_v31, %v1893_v32  ;;  %v5521_v25 = vpop.eup %5520  ;;  %1441 = vst.msk [vmem:[#allocation2 + $0xf8] sm:$0xff] %vm269_vm0, %v1399_v50  ;;  %v1310_v17 = vadd.f32 1.0, %v5519_v58  ;;  %v1967_v52 = vmul.f32 %v6508_v24, %v6921_v34  ;;  %v2031_v16 = vrot.slane %v6733_v14, 5 }
 0x299   : > { %v1965_v2 = vmul.f32 %v6508_v24, %v6915_v15  ;;  %v5523_v56 = vpop.eup %5522  ;;  %5532 = vrcp.f32 %v1312_v57  ;;  %v1313_v21 = vadd.f32 1.0, %v5521_v25  ;;  %v1998_v54 = vadd.f32 %v1966_v62, %v1860_v7 }
 0x29a   : > { %v2032_v36 = vrot.slane %v6744_v49, 5  ;;  %5534 = vrcp.f32 %v1310_v17  ;;  %v1311_v51 = vadd.f32 1.0, %v5523_v56  ;;  %v1999_v42 = vadd.f32 %v1967_v52, %v1861_v35 }
 0x29b   : > { %v1997_v32 = vadd.f32 %v1965_v2, %v1859_v48  ;;  %v2033_v39 = vrot.slane %v6730_v61, 5  ;;  %v5525_v26 = vpop.eup %5524  ;;  %5536 = vrcp.f32 %v1313_v21  ;;  %v2034_v31 = vrot.slane %v6737_v55, 5 }
 0x29c   : > { %v12023_v24 = vrot.slane %v6765_v5, 5  ;;  %v6952_v48 = vsel %vm2065_vm5, %v2031_v16, %v2032_v36  ;;  %v5527_v30 = vpop.eup %5526  ;;  %v1404_v7 = vmul.f32 %v5525_v26, %v6634_v45  ;;  %5538 = vrcp.f32 %v1311_v51 }
 0x29d   : > { %v6957_v50 = vsel %vm2065_vm5, %v2032_v36, %v2033_v39  ;;  %v12496_v35 = vrot.slane %v6436_v19, 5  ;;  %v5529_v58 = vpop.eup %5528  ;;  %v1402_v57 = vmul.f32 %v5527_v30, %v6640_v0  ;;  %v6974_v45 = vsel %vm2065_vm5, %v2033_v39, %v2034_v31 }
 0x29e   : > { %v6970_v62 = vsel %vm2065_vm5, %v2034_v31, %v12023_v24  ;;  %12497 = vst [vmem:[#allocation6_spill] sm:$0xff] %v6974_v45  ;;  %v5531_v17 = vpop.eup %5530  ;;  %1450 = vst.msk [vmem:[#allocation2 + $0x140] sm:$0xff] %vm269_vm0, %v1404_v7  ;;  %v1405_v52 = vmul.f32 %v5529_v58, %v6645_v40  ;;  %v2104_v0 = vmul.f32 %v6526_v60, %v6952_v48  ;;  %v2169_v56 = vrot.slane %v6733_v14, 6 }
 0x29f   : > { %v6963_v2 = vsel %vm2065_vm5, %v12496_v35, %v2031_v16  ;;  %v2105_v16 = vmul.f32 %v6526_v60, %v6957_v50  ;;  %1448 = vst.msk [vmem:[#allocation2 + $0x130] sm:$0xff] %vm269_vm0, %v1402_v57  ;;  %v1403_v21 = vmul.f32 %v5531_v17, %v6649_v10  ;;  %v2170_v51 = vrot.slane %v6744_v49, 6 }
 0x2a0   : > { %v2103_v25 = vmul.f32 %v6526_v60, %v6963_v2  ;;  %v2171_v39 = vrot.slane %v6730_v61, 6  ;;  %1451 = vst.msk [vmem:[#allocation2 + $0x148] sm:$0xff] %vm269_vm0, %v1405_v52  ;;  %v2136_v40 = vadd.f32 %v2104_v0, %v1998_v54  ;;  %v2172_v31 = vrot.slane %v6737_v55, 6 }
 0x2a1   : > { %v2137_v26 = vadd.f32 %v2105_v16, %v1999_v42  ;;  %v12022_v30 = vrot.slane %v6765_v5, 6  ;;  %1449 = vst.msk [vmem:[#allocation2 + $0x138] sm:$0xff] %vm269_vm0, %v1403_v21  ;;  %v6999_v10 = vsel %vm2203_vm6, %v2169_v56, %v2170_v51  ;;  %v2307_v42 = vrot.slane %v6733_v14, 7 }
 0x2a2   : > { %v2135_v36 = vadd.f32 %v2103_v25, %v1997_v32  ;;  %v6995_v60 = vsel %vm2203_vm6, %v2170_v51, %v2171_v39  ;;  %v12498_v32 = vrot.slane %v6436_v19, 6  ;;  %v7016_v35 = vsel %vm2203_vm6, %v2171_v39, %v2172_v31 }
 0x2a3   : > { %v7012_v7 = vsel %vm2203_vm6, %v2172_v31, %v12022_v30  ;;  %v2242_v57 = vmul.f32 %v6547_v18, %v6999_v10  ;;  %v5533_v25 = vpop.eup %5532  ;;  %v2243_v17 = vmul.f32 %v6547_v18, %v6995_v60  ;;  %v2308_v52 = vrot.slane %v6744_v49, 7 }
 0x2a4   : > { %v7005_v54 = vsel %vm2203_vm6, %v12498_v32, %v2169_v56  ;;  %v2309_v0 = vrot.slane %v6730_v61, 7  ;;  %v2310_v16 = vrot.slane %v6737_v55, 7  ;;  %v5535_v56 = vpop.eup %5534  ;;  %v1408_v21 = vmul.f32 %v5533_v25, %v6654_v6  ;;  %v7041_v6 = vld [vmem:[%s12009_s3 + $0x8] ss:$0 sm:$0xff] }
 0x2a5   : > { %v2241_v58 = vmul.f32 %v6547_v18, %v7005_v54  ;;  %v2274_v39 = vadd.f32 %v2242_v57, %v2136_v40  ;;  %v12025_v31 = vrot.slane %v6765_v5, 7  ;;  %v5537_v32 = vpop.eup %5536  ;;  %v1406_v30 = vmul.f32 %v5535_v56, %v6658_v63  ;;  %12499 = vst [vmem:[#allocation7_spill] sm:$0xff] %v7041_v6 }
 0x2a6   : > { %v2275_v24 = vadd.f32 %v2243_v17, %v2137_v26  ;;  %v7032_v18 = vsel %vm2341_vm7, %v2309_v0, %v2310_v16  ;;  %v7036_v38 = vsel %vm2341_vm7, %v2308_v52, %v2309_v0  ;;  %1454 = vst.msk [vmem:[#allocation2 + $0x160] sm:$0xff] %vm269_vm0, %v1408_v21  ;;  %v1409_v40 = vmul.f32 %v5537_v32, %v6662_v20 }
 0x2a7   : > { %v2273_v51 = vadd.f32 %v2241_v58, %v2135_v36  ;;  %v5539_v36 = vpop.eup %5538  ;;  %v7049_v63 = vsel %vm2341_vm7, %v2310_v16, %v12025_v31  ;;  %v7053_v26 = vsel %vm2341_vm7, %v2307_v42, %v2308_v52  ;;  %v12500_v58 = vrot.slane %v6436_v19, 7  ;;  %1452 = vst.msk [vmem:[#allocation2 + $0x150] sm:$0xff] %vm269_vm0, %v1406_v30  ;;  %v7069_v52 = vld [vmem:[%s12009_s3 + $0x9] ss:$0 sm:$0xff]  ;;  %v7116_v31 = vld [vmem:[%s12009_s3 + $0xc] ss:$0 sm:$0xff] }
 0x2a8   : > { %v1407_v25 = vmul.f32 %v5539_v36, %v6666_v46  ;;  %v2380_v17 = vmul.f32 %v6563_v22, %v7053_v26  ;;  %v2381_v0 = vmul.f32 %v6563_v22, %v7036_v38  ;;  %12501 = vst [vmem:[#allocation8_spill] sm:$0xff] %v7069_v52  ;;  %1455 = vst.msk [vmem:[#allocation2 + $0x168] sm:$0xff] %vm269_vm0, %v1409_v40 }
 0x2a9   : > { %v2372_v57 = vsel %vm2341_vm7, %v12500_v58, %v2307_v42  ;;  %v2448_v19 = vmul.f32 %v6585_v12, %v6733_v14  ;;  %v2524_v46 = vmul.f32 %v7041_v6, %v6772_v47  ;;  %v2525_v30 = vmul.f32 %v7041_v6, %v6763_v4  ;;  %12504 = vst [vmem:[#allocation11_spill] sm:$0xff] %v7116_v31 }
 0x2aa   : > { %v2379_v20 = vmul.f32 %v6563_v22, %v2372_v57  ;;  %v2526_v42 = vmul.f32 %v7041_v6, %v6758_v23  ;;  %v7083_v22 = vld [vmem:[%s12009_s3 + $0xa] ss:$0 sm:$0xff]  ;;  %1453 = vst.msk [vmem:[#allocation2 + $0x158] sm:$0xff] %vm269_vm0, %v1407_v25  ;;  %v7086_v56 = vadd.f32 %v2380_v17, %v2274_v39  ;;  %v7088_v12 = vadd.f32 %v2381_v0, %v2275_v24  ;;  %v7103_v24 = vld [vmem:[%s12009_s3 + $0xb] ss:$0 sm:$0xff] }
 0x2ab   : > { %12502 = vst [vmem:[#allocation9_spill] sm:$0xff] %v7083_v22  ;;  %v2527_v47 = vmul.f32 %v7041_v6, %v6754_v3  ;;  %v2569_v21 = vmul.f32 %v7069_v52, %v6843_v1  ;;  %v2570_v32 = vmul.f32 %v7069_v52, %v6832_v59  ;;  %v2571_v36 = vmul.f32 %v7069_v52, %v6818_v53  ;;  %v7308_v6 = vld [vmem:[%s12009_s3 + $0x1d] ss:$0 sm:$0xff] }
 0x2ac   : > { %v2411_v16 = vadd.f32 %v2379_v20, %v2273_v51  ;;  %v2572_v40 = vmul.f32 %v7069_v52, %v6812_v8  ;;  %12503 = vst [vmem:[#allocation10_spill] sm:$0xff] %v7103_v24  ;;  %v2646_v39 = vmul.f32 %v7083_v22, %v6894_v11  ;;  %v2647_v1 = vmul.f32 %v7083_v22, %v6872_v29 }
 0x2ad   : > { %v2648_v58 = vmul.f32 %v7083_v22, %v6881_v44  ;;  %v2601_v25 = vadd.f32 %v2569_v21, %v2524_v46  ;;  %v2602_v20 = vadd.f32 %v2570_v32, %v2525_v30  ;;  %v2603_v17 = vadd.f32 %v2571_v36, %v2526_v42  ;;  %v7131_v32 = vld [vmem:[%s12009_s3 + $0xd] ss:$0 sm:$0xff] }
 0x2ae   : > { %v7105_v51 = vadd.f32 %v2448_v19, %v2411_v16  ;;  %v2604_v0 = vadd.f32 %v2572_v40, %v2527_v47  ;;  %v2649_v19 = vmul.f32 %v7083_v22, %v6877_v27  ;;  %v2723_v11 = vmul.f32 %v7103_v24, %v6915_v15  ;;  %12505 = vst [vmem:[#allocation12_spill] sm:$0xff] %v7131_v32 }
 0x2af   : > { %v2724_v16 = vmul.f32 %v7103_v24, %v6925_v9  ;;  %v2725_v46 = vmul.f32 %v7103_v24, %v6921_v34  ;;  %v2678_v30 = vadd.f32 %v2646_v39, %v2601_v25  ;;  %v2679_v42 = vadd.f32 %v2647_v1, %v2602_v20 }
 0x2b0   : > { %v2680_v47 = vadd.f32 %v2648_v58, %v2603_v17  ;;  %v2726_v21 = vmul.f32 %v7103_v24, %v6938_v33  ;;  %v2681_v36 = vadd.f32 %v2649_v19, %v2604_v0  ;;  %v2800_v15 = vmul.f32 %v7116_v31, %v6963_v2  ;;  %v7144_v17 = vld [vmem:[%s12009_s3 + $0xe] ss:$0 sm:$0xff] }
 0x2b1   : > { %v2801_v40 = vmul.f32 %v7116_v31, %v6952_v48  ;;  %v2802_v39 = vmul.f32 %v7116_v31, %v6957_v50  ;;  %v2755_v1 = vadd.f32 %v2723_v11, %v2678_v30  ;;  %v2756_v58 = vadd.f32 %v2724_v16, %v2679_v42  ;;  %12506 = vst [vmem:[#allocation13_spill] sm:$0xff] %v7144_v17 }
 0x2b2   : > { %v2757_v25 = vadd.f32 %v2725_v46, %v2680_v47  ;;  %v2803_v20 = vmul.f32 %v7116_v31, %v6974_v45  ;;  %v2758_v0 = vadd.f32 %v2726_v21, %v2681_v36  ;;  %v2877_v2 = vmul.f32 %v7131_v32, %v7005_v54  ;;  %v7157_v47 = vld [vmem:[%s12009_s3 + $0xf] ss:$0 sm:$0xff]  ;;  %v7162_v54 = vld [vmem:[%s12009_s3 + $0x10] ss:$0 sm:$0xff] }
 0x2b3   : > { %v2878_v19 = vmul.f32 %v7131_v32, %v6999_v10  ;;  %v2879_v11 = vmul.f32 %v7131_v32, %v6995_v60  ;;  %v2832_v16 = vadd.f32 %v2800_v15, %v2755_v1  ;;  %v2833_v46 = vadd.f32 %v2801_v40, %v2756_v58  ;;  %12507 = vst [vmem:[#allocation14_spill] sm:$0xff] %v7157_v47 }
 0x2b4   : > { %v2834_v30 = vadd.f32 %v2802_v39, %v2757_v25  ;;  %v2880_v42 = vmul.f32 %v7131_v32, %v7016_v35  ;;  %12508 = vst [vmem:[#allocation15_spill] sm:$0xff] %v7162_v54  ;;  %v2835_v21 = vadd.f32 %v2803_v20, %v2758_v0  ;;  %v2954_v36 = vmul.f32 %v7144_v17, %v2372_v57 }
 0x2b5   : > { %v2955_v15 = vmul.f32 %v7144_v17, %v7053_v26  ;;  %v2956_v40 = vmul.f32 %v7144_v17, %v7036_v38  ;;  %v2909_v39 = vadd.f32 %v2877_v2, %v2832_v16  ;;  %v2910_v1 = vadd.f32 %v2878_v19, %v2833_v46  ;;  %v7185_v19 = vld [vmem:[%s12009_s3 + $0x12] ss:$0 sm:$0xff] }
 0x2b6   : > { %v2911_v58 = vadd.f32 %v2879_v11, %v2834_v30  ;;  %v2957_v25 = vmul.f32 %v7144_v17, %v7032_v18  ;;  %v2912_v20 = vadd.f32 %v2880_v42, %v2835_v21  ;;  %v3023_v57 = vmul.f32 %v7157_v47, %v6733_v14  ;;  %12510 = vst [vmem:[#allocation17_spill] sm:$0xff] %v7185_v19  ;;  %v7215_v17 = vld [vmem:[%s12009_s3 + $0x14] ss:$0 sm:$0xff] }
 0x2b7   : > { %v3024_v0 = vmul.f32 %v7157_v47, %v6744_v49  ;;  %v3132_v2 = vmul.f32 %v7162_v54, %v6763_v4  ;;  %v2986_v11 = vadd.f32 %v2954_v36, %v2909_v39  ;;  %v2987_v16 = vadd.f32 %v2955_v15, %v2910_v1  ;;  %v7202_v36 = vld [vmem:[%s12009_s3 + $0x13] ss:$0 sm:$0xff]  ;;  %12512 = vst [vmem:[#allocation19_spill] sm:$0xff] %v7215_v17 }
 0x2b8   : > { %v7187_v46 = vadd.f32 %v2956_v40, %v2911_v58  ;;  %v3133_v30 = vmul.f32 %v7162_v54, %v6758_v23  ;;  %v7191_v42 = vadd.f32 %v2957_v25, %v2912_v20  ;;  %v3134_v14 = vmul.f32 %v7162_v54, %v6754_v3  ;;  %12511 = vst [vmem:[#allocation18_spill] sm:$0xff] %v7202_v36 }
 0x2b9   : > { %v3177_v4 = vmul.f32 %v7174_v28, %v6832_v59  ;;  %v3178_v21 = vmul.f32 %v7174_v28, %v6818_v53  ;;  %v3055_v15 = vadd.f32 %v3023_v57, %v2986_v11  ;;  %v3056_v40 = vadd.f32 %v3024_v0, %v2987_v16  ;;  %v7228_v11 = vld [vmem:[%s12009_s3 + $0x15] ss:$0 sm:$0xff] }
 0x2ba   : > { %v3179_v39 = vmul.f32 %v7174_v28, %v6812_v8  ;;  %v3254_v1 = vmul.f32 %v7185_v19, %v6872_v29  ;;  %v3255_v59 = vmul.f32 %v7185_v19, %v6881_v44  ;;  %v3256_v20 = vmul.f32 %v7185_v19, %v6877_v27  ;;  %12513 = vst [vmem:[#allocation20_spill] sm:$0xff] %v7228_v11 }
 0x2bb   : > { %v3209_v58 = vadd.f32 %v3177_v4, %v3132_v2  ;;  %v3210_v25 = vadd.f32 %v3178_v21, %v3133_v30  ;;  %v7218_v57 = vadd.f32 %v3055_v15, %v6612_v41  ;;  %v7221_v0 = vadd.f32 %v3056_v40, %v7105_v51  ;;  %v7237_v51 = vld [vmem:[%s12009_s3 + $0x16] ss:$0 sm:$0xff] }
 0x2bc   : > { %v3211_v29 = vadd.f32 %v3179_v39, %v3134_v14  ;;  %v3331_v2 = vmul.f32 %v7202_v36, %v6925_v9  ;;  %v3332_v4 = vmul.f32 %v7202_v36, %v6921_v34  ;;  %v3333_v41 = vmul.f32 %v7202_v36, %v6938_v33  ;;  %12514 = vst [vmem:[#allocation21_spill] sm:$0xff] %v7237_v51 }
 0x2bd   : > { %v3286_v16 = vadd.f32 %v3254_v1, %v3209_v58  ;;  %v3287_v30 = vadd.f32 %v3255_v59, %v3210_v25  ;;  %v3408_v9 = vmul.f32 %v7215_v17, %v6952_v48  ;;  %v3409_v21 = vmul.f32 %v7215_v17, %v6957_v50  ;;  %v7252_v25 = vld [vmem:[%s12009_s3 + $0x17] ss:$0 sm:$0xff]  ;;  %v7257_v48 = vld [vmem:[%s12009_s3 + $0x18] ss:$0 sm:$0xff] }
 0x2be   : > { %v3288_v14 = vadd.f32 %v3256_v20, %v3211_v29  ;;  %v3410_v15 = vmul.f32 %v7215_v17, %v6974_v45  ;;  %v3485_v1 = vmul.f32 %v7228_v11, %v6999_v10  ;;  %v3486_v58 = vmul.f32 %v7228_v11, %v6995_v60  ;;  %12515 = vst [vmem:[#allocation22_spill] sm:$0xff] %v7252_v25 }
 0x2bf   : > { %v3363_v40 = vadd.f32 %v3331_v2, %v3286_v16  ;;  %v3364_v39 = vadd.f32 %v3332_v4, %v3287_v30  ;;  %12516 = vst [vmem:[#allocation23_spill] sm:$0xff] %v7257_v48  ;;  %v3487_v20 = vmul.f32 %v7228_v11, %v7016_v35  ;;  %v3562_v10 = vmul.f32 %v7237_v51, %v7053_v26  ;;  %v7268_v2 = vld [vmem:[%s12009_s3 + $0x19] ss:$0 sm:$0xff]  ;;  %v7277_v26 = vld [vmem:[%s12009_s3 + $0x1a] ss:$0 sm:$0xff] }
 0x2c0   : > { %v3365_v59 = vadd.f32 %v3333_v41, %v3288_v14  ;;  %v3563_v29 = vmul.f32 %v7237_v51, %v7036_v38  ;;  %12517 = vst [vmem:[#allocation24_spill] sm:$0xff] %v7268_v2  ;;  %v3564_v4 = vmul.f32 %v7237_v51, %v7032_v18  ;;  %v3631_v41 = vmul.f32 %v7252_v25, %v6744_v49  ;;  %v7282_v14 = vld [vmem:[%s12009_s3 + $0x1b] ss:$0 sm:$0xff] }
 0x2c1   : > { %v3440_v16 = vadd.f32 %v3408_v9, %v3363_v40  ;;  %v3441_v30 = vadd.f32 %v3409_v21, %v3364_v39  ;;  %12518 = vst [vmem:[#allocation25_spill] sm:$0xff] %v7277_v26  ;;  %v3632_v9 = vmul.f32 %v7252_v25, %v6730_v61  ;;  %v3740_v21 = vmul.f32 %v7257_v48, %v6758_v23 }
 0x2c2   : > { %v3442_v32 = vadd.f32 %v3410_v15, %v3365_v59  ;;  %v3741_v40 = vmul.f32 %v7257_v48, %v6754_v3  ;;  %v3785_v24 = vmul.f32 %v7268_v2, %v6818_v53  ;;  %v3786_v22 = vmul.f32 %v7268_v2, %v6812_v8  ;;  %v7297_v15 = vld [vmem:[%s12009_s3 + $0x1c] ss:$0 sm:$0xff] }
 0x2c3   : > { %v3517_v39 = vadd.f32 %v3485_v1, %v3440_v16  ;;  %v3518_v31 = vadd.f32 %v3486_v58, %v3441_v30  ;;  %v3862_v23 = vmul.f32 %v7277_v26, %v6881_v44  ;;  %v3863_v52 = vmul.f32 %v7277_v26, %v6877_v27 }
 0x2c4   : > { %v3519_v59 = vadd.f32 %v3487_v20, %v3442_v32  ;;  %v3939_v1 = vmul.f32 %v7282_v14, %v6921_v34  ;;  %v3817_v16 = vadd.f32 %v3785_v24, %v3740_v21  ;;  %v3818_v30 = vadd.f32 %v3786_v22, %v3741_v40  ;;  %v7313_v32 = vld [vmem:[%s12009_s3 + $0x1e] ss:$0 sm:$0xff] }
 0x2c5   : > { %v3594_v58 = vadd.f32 %v3562_v10, %v3517_v39  ;;  %v3595_v53 = vadd.f32 %v3563_v29, %v3518_v31  ;;  %v3940_v20 = vmul.f32 %v7282_v14, %v6938_v33  ;;  %v4016_v34 = vmul.f32 %v7297_v15, %v6957_v50  ;;  %v7323_v22 = vld [vmem:[#allocation2 + $0x38] sm:$0xff] }
 0x2c6   : > { %v7315_v44 = vadd.f32 %v3564_v4, %v3519_v59  ;;  %v4017_v31 = vmul.f32 %v7297_v15, %v6974_v45  ;;  %v3894_v29 = vadd.f32 %v3862_v23, %v3817_v16  ;;  %v3895_v21 = vadd.f32 %v3863_v52, %v3818_v30 }
 0x2c7   : > { %v3663_v24 = vadd.f32 %v3631_v41, %v3594_v58  ;;  %v3664_v10 = vadd.f32 %v3632_v9, %v3595_v53  ;;  %v4093_v40 = vmul.f32 %v7308_v6, %v6995_v60  ;;  %v4094_v4 = vmul.f32 %v7308_v6, %v7016_v35 }
 0x2c8   : > { %v4170_v39 = vmul.f32 %v7313_v32, %v7036_v38  ;;  %v4171_v50 = vmul.f32 %v7313_v32, %v7032_v18  ;;  %v3971_v41 = vadd.f32 %v3939_v1, %v3894_v29  ;;  %v3972_v9 = vadd.f32 %v3940_v20, %v3895_v21 }
 0x2c9   : > { %v3695_v59 = vadd.f32 %v3663_v24, %v7218_v57  ;;  %v3696_v45 = vadd.f32 %v3664_v10, %v7221_v0  ;;  %v12047_v52 = vrot.slane %v7323_v22, 1  ;;  %v12046_v23 = vrot.slane %v7323_v22, 2 }
 0x2ca   : > { %v12045_v60 = vrot.slane %v7323_v22, 3  ;;  %v12044_v58 = vrot.slane %v7323_v22, 4  ;;  %v4048_v53 = vadd.f32 %v4016_v34, %v3971_v41  ;;  %v4049_v16 = vadd.f32 %v4017_v31, %v3972_v9 }
 0x2cb   : > { %v12043_v38 = vrot.slane %v7323_v22, 5  ;;  %v12042_v30 = vrot.slane %v7323_v22, 6  ;;  %v12519_v57 = vrot.slane %v6765_v5, 1  ;;  %v12520_v1 = vrot.slane %v6765_v5, 2 }
 0x2cc   : > { %v12521_v34 = vrot.slane %v6765_v5, 3  ;;  %v12522_v24 = vrot.slane %v6765_v5, 4  ;;  %v4125_v29 = vadd.f32 %v4093_v40, %v4048_v53  ;;  %v4126_v21 = vadd.f32 %v4094_v4, %v4049_v16  ;;  %v7393_v40 = vld [vmem:[%s12009_s3 + $0x7] ss:$0 sm:$0xff] }
 0x2cd   : > { %v7347_v0 = vsel %vm1545_vm1, %v12519_v57, %v12047_v52  ;;  %v7355_v20 = vsel %vm1651_vm2, %v12520_v1, %v12046_v23  ;;  %v12523_v41 = vrot.slane %v6765_v5, 5  ;;  %v12524_v57 = vrot.slane %v6765_v5, 6  ;;  %12525 = vst [vmem:[#allocation26_spill] sm:$0xff] %v7393_v40  ;;  %v12529_v52 = vld [vmem:[#allocation5_spill] sm:$0xff] }
 0x2ce   : > { %v7363_v31 = vsel %vm1789_vm3, %v12521_v34, %v12045_v60  ;;  %v7371_v10 = vsel %vm1927_vm4, %v12522_v24, %v12044_v58  ;;  %v12052_v34 = vrot.slane %v7323_v22, 7  ;;  %v2449_v4 = vmul.f32 %v7393_v40, %v6744_v49  ;;  %v7408_v58 = vld [vmem:[%s12007_s1 + $0x4] ss:$0 sm:$0xff] }
 0x2cf   : > { %v7379_v9 = vsel %vm2065_vm5, %v12523_v41, %v12043_v38  ;;  %v7387_v1 = vsel %vm2203_vm6, %v12524_v57, %v12042_v30  ;;  %v2450_v53 = vmul.f32 %v7393_v40, %v6730_v61  ;;  %v3025_v16 = vmul.f32 %v7157_v47, %v6730_v61  ;;  %v12526_v30 = vld [vmem:[#allocation4_spill] sm:$0xff] }
 0x2d0   : > { %v4202_v24 = vadd.f32 %v4170_v39, %v4125_v29  ;;  %v4203_v41 = vadd.f32 %v4171_v50, %v4126_v21  ;;  %v3026_v57 = vmul.f32 %v7157_v47, %v6737_v55  ;;  %v3135_v38 = vmul.f32 %v7162_v54, %v12526_v30  ;;  %12527 = vst [vmem:[#allocation4_spill] sm:$0xff] %v7408_v58  ;;  %v7427_v47 = vld [vmem:[%s12007_s1 + $0x5] ss:$0 sm:$0xff] }
 0x2d1   : > { %v12528_v49 = vrot.slane %v6765_v5, 7  ;;  %v2481_v39 = vadd.f32 %v2449_v4, %v7086_v56  ;;  %v2482_v50 = vadd.f32 %v2450_v53, %v7088_v12  ;;  %v3057_v29 = vadd.f32 %v3025_v16, %v7187_v46  ;;  %12530 = vst [vmem:[#allocation5_spill] sm:$0xff] %v7427_v47  ;;  %v7440_v53 = vld [vmem:[%s12007_s1 + $0x6] ss:$0 sm:$0xff] }
 0x2d2   : > { %v4234_v21 = vadd.f32 %v4202_v24, %v3695_v59  ;;  %v4235_v60 = vadd.f32 %v4203_v41, %v3696_v45  ;;  %v3058_v23 = vadd.f32 %v3026_v57, %v7191_v42  ;;  %v3180_v54 = vmul.f32 %v7174_v28, %v12529_v52  ;;  %12531 = vst [vmem:[#allocation27_spill] sm:$0xff] %v7440_v53 }
 0x2d3   : > { %v7416_v61 = vsel %vm2341_vm7, %v12528_v49, %v12052_v34  ;;  %v3089_v49 = vadd.f32 %v3057_v29, %v2481_v39  ;;  %v3257_v56 = vmul.f32 %v7185_v19, %v6888_v43  ;;  %v3334_v12 = vmul.f32 %v7202_v36, %v6934_v13 }
 0x2d4   : > { %v3411_v45 = vmul.f32 %v7215_v17, %v6970_v62  ;;  %v4270_v46 = vadd.f32 %v7408_v58, %v4234_v21  ;;  %v4271_v42 = vadd.f32 %v7408_v58, %v4235_v60  ;;  %v3090_v59 = vadd.f32 %v3058_v23, %v2482_v50 }
 0x2d5   : > { %v3212_v4 = vadd.f32 %v3180_v54, %v3135_v38  ;;  %v3488_v16 = vmul.f32 %v7228_v11, %v7012_v7  ;;  %v3565_v24 = vmul.f32 %v7237_v51, %v7049_v63  ;;  %v3633_v41 = vmul.f32 %v7252_v25, %v6737_v55 }
 0x2d6   : > { %v3634_v57 = vmul.f32 %v7252_v25, %v6765_v5  ;;  %v4306_v23 = vmul.f32 %v7427_v47, %v4270_v46  ;;  %v4307_v54 = vmul.f32 %v7427_v47, %v4271_v42  ;;  %v3742_v38 = vmul.f32 %v7257_v48, %v12526_v30 }
 0x2d7   : > { %v3289_v60 = vadd.f32 %v3257_v56, %v3212_v4  ;;  %v3665_v39 = vadd.f32 %v3633_v41, %v7315_v44  ;;  %v3743_v50 = vmul.f32 %v7257_v48, %v7347_v0  ;;  %v3787_v29 = vmul.f32 %v7268_v2, %v12529_v52 }
 0x2d8   : > { %v3788_v55 = vmul.f32 %v7268_v2, %v7355_v20  ;;  %v7462_v5 = vadd.f32 %v7440_v53, %v4306_v23  ;;  %v7465_v21 = vadd.f32 %v7440_v53, %v4307_v54  ;;  %v3864_v46 = vmul.f32 %v7277_v26, %v6888_v43 }
 0x2d9   : > { %v3366_v56 = vadd.f32 %v3334_v12, %v3289_v60  ;;  %v3697_v44 = vadd.f32 %v3665_v39, %v3089_v49  ;;  %v3819_v42 = vadd.f32 %v3787_v29, %v3742_v38  ;;  %v3865_v41 = vmul.f32 %v7277_v26, %v7363_v31  ;;  %v7479_v60 = vld [vmem:[#allocation2 + $0x40] sm:$0xff] }
 0x2da   : > { %v3820_v4 = vadd.f32 %v3788_v55, %v3743_v50  ;;  %v5114_v34 = vmul.f32 -1.442695, %v7462_v5  ;;  %v5115_v2 = vmul.f32 -1.442695, %v7465_v21  ;;  %v3941_v23 = vmul.f32 %v7282_v14, %v6934_v13 }
 0x2db   : > { %v3443_v48 = vadd.f32 %v3411_v45, %v3366_v56  ;;  %v3896_v54 = vadd.f32 %v3864_v46, %v3819_v42  ;;  %v3942_v12 = vmul.f32 %v7282_v14, %v7371_v10  ;;  %v4018_v49 = vmul.f32 %v7297_v15, %v6970_v62 }
 0x2dc   : > { %v3897_v25 = vadd.f32 %v3865_v41, %v3820_v4  ;;  %5540 = vpow2.f32 %v5114_v34  ;;  %v4019_v39 = vmul.f32 %v7297_v15, %v7379_v9  ;;  %v4095_v45 = vmul.f32 %v7308_v6, %v7012_v7 }
 0x2dd   : > { %v3520_v38 = vadd.f32 %v3488_v16, %v3443_v48  ;;  %5542 = vpow2.f32 %v5115_v2  ;;  %v3973_v50 = vadd.f32 %v3941_v23, %v3896_v54  ;;  %v4096_v55 = vmul.f32 %v7308_v6, %v7387_v1  ;;  %v7495_v2 = vld [vmem:[%s12009_s3] ss:$0 sm:$0xff] }
 0x2de   : > { %v3974_v29 = vadd.f32 %v3942_v12, %v3897_v25  ;;  %v4172_v46 = vmul.f32 %v7313_v32, %v7049_v63  ;;  %v4173_v34 = vmul.f32 %v7313_v32, %v7416_v61  ;;  %v12062_v48 = vrot.slane %v7479_v60, 1  ;;  %v7513_v12 = vld [vmem:[%s12009_s3 + $0x1] ss:$0 sm:$0xff] }
 0x2df   : > { %v3597_v56 = vadd.f32 %v3565_v24, %v3520_v38  ;;  %v4050_v16 = vadd.f32 %v4018_v49, %v3973_v50  ;;  %v1586_v25 = vmul.f32 %v7495_v2, %v6754_v3  ;;  %v1587_v24 = vmul.f32 %v7495_v2, %v12526_v30 }
 0x2e0   : > { %v4051_v42 = vadd.f32 %v4019_v39, %v3974_v29  ;;  %v12532_v41 = vrot.slane %v7323_v22, 1  ;;  %v12061_v54 = vrot.slane %v7479_v60, 2  ;;  %v1692_v3 = vmul.f32 %v7513_v12, %v6812_v8  ;;  %v7531_v8 = vld [vmem:[%s12009_s3 + $0x2] ss:$0 sm:$0xff] }
 0x2e1   : > { %v3666_v4 = vadd.f32 %v3634_v57, %v3597_v56  ;;  %v4127_v49 = vadd.f32 %v4095_v45, %v4050_v16  ;;  %v1693_v38 = vmul.f32 %v7513_v12, %v12529_v52  ;;  %v12059_v39 = vrot.slane %v7479_v60, 3 }
 0x2e2   : > { %v7507_v23 = vsel %vm1545_vm1, %v12532_v41, %v12062_v48  ;;  %v4128_v57 = vadd.f32 %v4096_v55, %v4051_v42  ;;  %v12533_v29 = vrot.slane %v7323_v22, 2  ;;  %v1724_v41 = vadd.f32 %v1692_v3, %v1586_v25 }
 0x2e3   : > { %v3698_v50 = vadd.f32 %v3666_v4, %v3090_v59  ;;  %v1830_v45 = vmul.f32 %v7531_v8, %v6877_v27  ;;  %v4204_v55 = vadd.f32 %v4172_v46, %v4127_v49  ;;  %v1725_v59 = vadd.f32 %v1693_v38, %v1587_v24  ;;  %v7549_v27 = vld [vmem:[%s12009_s3 + $0x3] ss:$0 sm:$0xff] }
 0x2e4   : > { %v7526_v56 = vsel %vm1651_vm2, %v12533_v29, %v12061_v54  ;;  %v4205_v16 = vadd.f32 %v4173_v34, %v4128_v57  ;;  %v12534_v42 = vrot.slane %v7323_v22, 3  ;;  %v1831_v25 = vmul.f32 %v7531_v8, %v6888_v43  ;;  %12535 = vst [vmem:[#allocation28_spill] sm:$0xff] %v7549_v27 }
 0x2e5   : > { %v1862_v3 = vadd.f32 %v1830_v45, %v1724_v41  ;;  %v12060_v29 = vrot.slane %v7479_v60, 4  ;;  %v1968_v46 = vmul.f32 %v7549_v27, %v6938_v33  ;;  %v4236_v34 = vadd.f32 %v4204_v55, %v3697_v44  ;;  %v7567_v33 = vld [vmem:[%s12009_s3 + $0x4] ss:$0 sm:$0xff]  ;;  %v12538_v44 = vld [vmem:[#allocation6_spill] sm:$0xff] }
 0x2e6   : > { %v7541_v4 = vsel %vm1789_vm3, %v12534_v42, %v12059_v39  ;;  %v4237_v24 = vadd.f32 %v4205_v16, %v3698_v50  ;;  %v1969_v49 = vmul.f32 %v7549_v27, %v6934_v13  ;;  %v12064_v57 = vrot.slane %v7479_v60, 5  ;;  %v5541_v38 = vpop.eup %5540  ;;  %12537 = vst [vmem:[#allocation29_spill] sm:$0xff] %v7567_v33 }
 0x2e7   : > { %v1863_v42 = vadd.f32 %v1831_v25, %v1725_v59  ;;  %v12536_v41 = vrot.slane %v7323_v22, 4  ;;  %v2000_v39 = vadd.f32 %v1968_v46, %v1862_v3  ;;  %v2106_v50 = vmul.f32 %v7567_v33, %v12538_v44  ;;  %v5543_v55 = vpop.eup %5542 }
 0x2e8   : > { %v4470_v16 = vadd.f32 1.0, %v5541_v38  ;;  %v4272_v59 = vadd.f32 %v7408_v58, %v4236_v34  ;;  %v4273_v25 = vadd.f32 %v7408_v58, %v4237_v24  ;;  %v4471_v46 = vadd.f32 1.0, %v5543_v55  ;;  %v7601_v55 = vld [vmem:[#allocation2 + $0x48] sm:$0xff]  ;;  %v12545_v58 = vld [vmem:[#allocation7_spill] sm:$0xff] }
 0x2e9   : > { %v7562_v45 = vsel %vm1927_vm4, %v12536_v41, %v12060_v29  ;;  %v12539_v41 = vrot.slane %v7323_v22, 5  ;;  %v2001_v29 = vadd.f32 %v1969_v49, %v1863_v42  ;;  %v2107_v54 = vmul.f32 %v7567_v33, %v6970_v62  ;;  %12541 = vst [vmem:[#allocation30_spill] sm:$0xff] %v7601_v55 }
 0x2ea   : > { %v2138_v44 = vadd.f32 %v2106_v50, %v2000_v39  ;;  %5544 = vrcp.f32 %v4470_v16  ;;  %v4308_v38 = vmul.f32 %v7427_v47, %v4272_v59  ;;  %v4309_v34 = vmul.f32 %v7427_v47, %v4273_v25  ;;  %v7615_v25 = vld [vmem:[%s12009_s3 + $0x6] ss:$0 sm:$0xff] }
 0x2eb   : > { %v7579_v3 = vsel %vm2065_vm5, %v12539_v41, %v12064_v57  ;;  %v12063_v24 = vrot.slane %v7479_v60, 6  ;;  %5546 = vrcp.f32 %v4471_v46  ;;  %v2139_v48 = vadd.f32 %v2107_v54, %v2001_v29  ;;  %v7589_v41 = vld [vmem:[%s12009_s3 + $0x5] ss:$0 sm:$0xff]  ;;  %12543 = vst [vmem:[#allocation31_spill] sm:$0xff] %v7615_v25  ;;  %v5677_v57 = vld [vmem:[#allocation2 + $0x30] sm:$0xff] }
 0x2ec   : > { %12540 = vst [vmem:[#allocation6_spill] sm:$0xff] %v7589_v41  ;;  %v2244_v49 = vmul.f32 %v7589_v41, %v7016_v35  ;;  %v2245_v39 = vmul.f32 %v7589_v41, %v7012_v7  ;;  %v7596_v42 = vadd.f32 %v7440_v53, %v4308_v38  ;;  %v7599_v50 = vadd.f32 %v7440_v53, %v4309_v34 }
 0x2ed   : > { %v12542_v54 = vrot.slane %v7323_v22, 6  ;;  %v12075_v35 = vrot.slane %v7479_v60, 7  ;;  %v2382_v46 = vmul.f32 %v7615_v25, %v7032_v18  ;;  %v2383_v38 = vmul.f32 %v7615_v25, %v7049_v63 }
 0x2ee   : > { %v2276_v16 = vadd.f32 %v2244_v49, %v2138_v44  ;;  %v2277_v59 = vadd.f32 %v2245_v39, %v2139_v48  ;;  %v5116_v34 = vmul.f32 -1.442695, %v7596_v42  ;;  %v12544_v44 = vrot.slane %v7323_v22, 7  ;;  %v5676_v49 = vld [vmem:[#allocation2 + $0x28] sm:$0xff] }
 0x2ef   : > { %v7609_v29 = vsel %vm2203_vm6, %v12542_v54, %v12063_v24  ;;  %v5117_v54 = vmul.f32 -1.442695, %v7599_v50  ;;  %v2451_v39 = vmul.f32 %v5676_v49, %v7393_v40  ;;  %v2452_v53 = vmul.f32 %v5677_v57, %v7393_v40 }
 0x2f0   : > { %v7629_v48 = vsel %vm2341_vm7, %v12544_v44, %v12075_v35  ;;  %v2414_v24 = vadd.f32 %v2382_v46, %v2276_v16  ;;  %v2415_v18 = vadd.f32 %v2383_v38, %v2277_v59  ;;  %v12076_v47 = vrot.slane %v7601_v55, 1 }
 0x2f1   : > { %5548 = vpow2.f32 %v5116_v34  ;;  %v2528_v25 = vmul.f32 %v12545_v58, %v12526_v30  ;;  %v2529_v41 = vmul.f32 %v12545_v58, %v7347_v0  ;;  %v12077_v44 = vrot.slane %v7601_v55, 2 }
 0x2f2   : > { %5550 = vpow2.f32 %v5117_v54  ;;  %v7639_v35 = vadd.f32 %v2451_v39, %v2414_v24  ;;  %v7641_v49 = vadd.f32 %v2452_v53, %v2415_v18  ;;  %v12546_v16 = vrot.slane %v7479_v60, 1  ;;  %v12551_v24 = vld [vmem:[#allocation8_spill] sm:$0xff]  ;;  %v12553_v18 = vld [vmem:[#allocation9_spill] sm:$0xff] }
 0x2f3   : > { %v12549_v46 = vrot.slane %v7479_v60, 2  ;;  %v2573_v38 = vmul.f32 %v12551_v24, %v12529_v52  ;;  %v2574_v34 = vmul.f32 %v12551_v24, %v7355_v20  ;;  %v12084_v39 = vrot.slane %v7601_v55, 3 }
 0x2f4   : > { %v7649_v59 = vsel %vm1545_vm1, %v12546_v16, %v12076_v47  ;;  %v2650_v16 = vmul.f32 %v12553_v18, %v6888_v43  ;;  %v2651_v47 = vmul.f32 %v12553_v18, %v7363_v31  ;;  %v12085_v52 = vrot.slane %v7601_v55, 4 }
 0x2f5   : > { %12547 = vst [vmem:[#allocation32_spill] sm:$0xff] %v7649_v59  ;;  %v7653_v30 = vmul.f32 %v12545_v58, %v7649_v59  ;;  %v7661_v53 = vsel %vm1651_vm2, %v12549_v46, %v12077_v44  ;;  %v5545_v46 = vpop.eup %5544  ;;  %v2605_v44 = vadd.f32 %v2573_v38, %v2528_v25  ;;  %v12554_v58 = vld [vmem:[#allocation10_spill] sm:$0xff] }
 0x2f6   : > { %12550 = vst [vmem:[#allocation34_spill] sm:$0xff] %v7661_v53  ;;  %v7669_v54 = vmul.f32 %v12551_v24, %v7661_v53  ;;  %v2727_v40 = vmul.f32 %v12554_v58, %v6934_v13  ;;  %v5547_v33 = vpop.eup %5546  ;;  %v4566_v24 = vmul.f32 %v5545_v46, %v7462_v5  ;;  %v2728_v25 = vmul.f32 %v12554_v58, %v7371_v10 }
 0x2f7   : > { %12548 = vst [vmem:[#allocation33_spill] sm:$0xff] %v7653_v30  ;;  %v2606_v30 = vadd.f32 %v2574_v34, %v2529_v41  ;;  %v12086_v41 = vrot.slane %v7601_v55, 5  ;;  %v4567_v38 = vmul.f32 %v5547_v33, %v7465_v21  ;;  %v2682_v5 = vadd.f32 %v2650_v16, %v2605_v44  ;;  %v12560_v33 = vld [vmem:[#allocation11_spill] sm:$0xff] }
 0x2f8   : > { %12552 = vst [vmem:[#allocation35_spill] sm:$0xff] %v7669_v54  ;;  %v12555_v54 = vrot.slane %v7479_v60, 3  ;;  %v12558_v46 = vrot.slane %v7479_v60, 4  ;;  %v2804_v44 = vmul.f32 %v12560_v33, %v6970_v62 }
 0x2f9   : > { %v2683_v34 = vadd.f32 %v2651_v47, %v2606_v30  ;;  %v2805_v47 = vmul.f32 %v12560_v33, %v7379_v9  ;;  %v4598_v30 = vpack.c.bf16 %v4567_v38, %v4566_v24 }
 0x2fa   : > { %v7686_v43 = vsel %vm1789_vm3, %v12555_v54, %v12084_v39  ;;  %v7702_v54 = vsel %vm1927_vm4, %v12558_v46, %v12085_v52  ;;  %v12559_v39 = vrot.slane %v7479_v60, 5  ;;  %v2759_v46 = vadd.f32 %v2727_v40, %v2682_v5 }
 0x2fb   : > { %12556 = vst [vmem:[#allocation10_spill] sm:$0xff] %v7686_v43  ;;  %v7694_v13 = vmul.f32 %v12553_v18, %v7686_v43  ;;  %v7718_v16 = vmul.f32 %v12554_v58, %v7702_v54  ;;  %v2760_v52 = vadd.f32 %v2728_v25, %v2683_v34  ;;  %v5549_v27 = vpop.eup %5548  ;;  %5297 = vmatprep.mubr.msk.bf16.mxu0 %vm269_vm0, %v4598_v30  ;;  %v12092_v40 = vrot.slane %v7601_v55, 7  ;;  %v12564_v25 = vld [vmem:[#allocation13_spill] sm:$0xff] }
 0x2fc   : > { %v7710_v21 = vsel %vm2065_vm5, %v12559_v39, %v12086_v41  ;;  %v12091_v39 = vrot.slane %v7601_v55, 6  ;;  %v12563_v41 = vld [vmem:[#allocation12_spill] sm:$0xff]  ;;  %v2836_v24 = vadd.f32 %v2804_v44, %v2759_v46  ;;  %v2958_v5 = vmul.f32 %v12564_v25, %v7049_v63  ;;  %v5551_v34 = vpop.eup %5550  ;;  %v12566_v44 = vld [vmem:[#allocation14_spill] sm:$0xff] }
 0x2fd   : > { %12557 = vst [vmem:[#allocation36_spill] sm:$0xff] %v7694_v13  ;;  %12561 = vst [vmem:[#allocation37_spill] sm:$0xff] %v7718_v16  ;;  %v7722_v13 = vmul.f32 %v12560_v33, %v7710_v21  ;;  %v2881_v18 = vmul.f32 %v12563_v41, %v7012_v7  ;;  %v2882_v62 = vmul.f32 %v12563_v41, %v7387_v1  ;;  %v12565_v16 = vrot.slane %v7479_v60, 6 }
 0x2fe   : > { %v2837_v38 = vadd.f32 %v2805_v47, %v2760_v52  ;;  %v2959_v30 = vmul.f32 %v12564_v25, %v7416_v61  ;;  %v3027_v52 = vmul.f32 %v5677_v57, %v12566_v44  ;;  %v4473_v47 = vadd.f32 1.0, %v5551_v34  ;;  %v12569_v57 = vld [vmem:[#allocation15_spill] sm:$0xff] }
 0x2ff   : > { %12562 = vst [vmem:[#allocation38_spill] sm:$0xff] %v7722_v13  ;;  %v4472_v13 = vadd.f32 1.0, %v5549_v27  ;;  %v7739_v7 = vsel %vm2203_vm6, %v12565_v16, %v12091_v39  ;;  %v2913_v63 = vadd.f32 %v2881_v18, %v2836_v24  ;;  %v12568_v33 = vrot.slane %v7479_v60, 7 }
 0x300   : > { %v7746_v46 = vmul.f32 %v12563_v41, %v7739_v7  ;;  %v2914_v27 = vadd.f32 %v2882_v62, %v2837_v38  ;;  %v3028_v39 = vmul.f32 %v12566_v44, %v7323_v22  ;;  %v3136_v34 = vmul.f32 %v12569_v57, %v7347_v0 }
 0x301   : > { %5552 = vrcp.f32 %v4472_v13  ;;  %v7754_v16 = vsel %vm2341_vm7, %v12568_v33, %v12092_v40  ;;  %v2990_v13 = vadd.f32 %v2958_v5, %v2913_v63  ;;  %v3137_v24 = vmul.f32 %v12569_v57, %v7507_v23 }
 0x302   : > { %12567 = vst [vmem:[#allocation12_spill] sm:$0xff] %v7746_v46  ;;  %5554 = vrcp.f32 %v4473_v47  ;;  %v7762_v18 = vmul.f32 %v12564_v25, %v7754_v16  ;;  %v2991_v62 = vadd.f32 %v2959_v30, %v2914_v27  ;;  %v3181_v33 = vmul.f32 %v7174_v28, %v7355_v20 }
 0x303   : > { %v3182_v38 = vmul.f32 %v7174_v28, %v7526_v56  ;;  %v3258_v40 = vmul.f32 %v7185_v19, %v7363_v31  ;;  %v3059_v37 = vadd.f32 %v3027_v52, %v2990_v13  ;;  %v3259_v46 = vmul.f32 %v7185_v19, %v7541_v4 }
 0x304   : > { %12570 = vst [vmem:[#allocation13_spill] sm:$0xff] %v7762_v18  ;;  %v3060_v47 = vadd.f32 %v3028_v39, %v2991_v62  ;;  %v3335_v5 = vmul.f32 %v7202_v36, %v7371_v10  ;;  %v3213_v30 = vadd.f32 %v3181_v33, %v3136_v34  ;;  %v3336_v27 = vmul.f32 %v7202_v36, %v7562_v45 }
 0x305   : > { %v3214_v63 = vadd.f32 %v3182_v38, %v3137_v24  ;;  %v3412_v18 = vmul.f32 %v7215_v17, %v7379_v9  ;;  %v3091_v28 = vadd.f32 %v3059_v37, %v7639_v35  ;;  %v3413_v39 = vmul.f32 %v7215_v17, %v7579_v3  ;;  %v12571_v37 = vld [vmem:[#allocation22_spill] sm:$0xff]  ;;  %v12572_v38 = vld [vmem:[#allocation23_spill] sm:$0xff] }
 0x306   : > { %v3092_v57 = vadd.f32 %v3060_v47, %v7641_v49  ;;  %v3489_v52 = vmul.f32 %v7228_v11, %v7387_v1  ;;  %v3290_v13 = vadd.f32 %v3258_v40, %v3213_v30  ;;  %v3490_v34 = vmul.f32 %v7228_v11, %v7609_v29 }
 0x307   : > { %v3291_v62 = vadd.f32 %v3259_v46, %v3214_v63  ;;  %v3566_v24 = vmul.f32 %v7237_v51, %v7416_v61  ;;  %v3567_v33 = vmul.f32 %v7237_v51, %v7629_v48  ;;  %v3635_v35 = vmul.f32 %v12571_v37, %v7323_v22  ;;  %v12573_v63 = vld [vmem:[#allocation24_spill] sm:$0xff] }
 0x308   : > { %v3636_v49 = vmul.f32 %v12571_v37, %v7479_v60  ;;  %v3744_v47 = vmul.f32 %v12572_v38, %v7507_v23  ;;  %v3367_v40 = vadd.f32 %v3335_v5, %v3290_v13  ;;  %v3745_v30 = vmul.f32 %v12572_v38, %v7649_v59 }
 0x309   : > { %v3368_v46 = vadd.f32 %v3336_v27, %v3291_v62  ;;  %v3789_v11 = vmul.f32 %v12573_v63, %v7526_v56  ;;  %v3790_v51 = vmul.f32 %v12573_v63, %v7661_v53  ;;  %v3866_v17 = vmul.f32 %v7277_v26, %v7541_v4 }
 0x30a   : > { %v3867_v37 = vmul.f32 %v7277_v26, %v7686_v43  ;;  %v3943_v36 = vmul.f32 %v7282_v14, %v7562_v45  ;;  %v3444_v27 = vadd.f32 %v3412_v18, %v3367_v40  ;;  %v3944_v38 = vmul.f32 %v7282_v14, %v7702_v54 }
 0x30b   : > { %v5553_v5 = vpop.eup %5552  ;;  %v3445_v13 = vadd.f32 %v3413_v39, %v3368_v46  ;;  %v3821_v62 = vadd.f32 %v3789_v11, %v3744_v47  ;;  %v3822_v63 = vadd.f32 %v3790_v51, %v3745_v30  ;;  %v4020_v53 = vmul.f32 %v7297_v15, %v7579_v3 }
 0x30c   : > { %v5555_v19 = vpop.eup %5554  ;;  %v4568_v59 = vmul.f32 %v5553_v5, %v7596_v42  ;;  %v4021_v26 = vmul.f32 %v7297_v15, %v7710_v21  ;;  %v3521_v55 = vadd.f32 %v3489_v52, %v3444_v27  ;;  %v4097_v11 = vmul.f32 %v7308_v6, %v7609_v29 }
 0x30d   : > { %v4569_v43 = vmul.f32 %v5555_v19, %v7599_v50  ;;  %v3522_v44 = vadd.f32 %v3490_v34, %v3445_v13  ;;  %v3898_v18 = vadd.f32 %v3866_v17, %v3821_v62  ;;  %v3899_v39 = vadd.f32 %v3867_v37, %v3822_v63  ;;  %v12575_v13 = vld [vmem:[#allocation29_spill] sm:$0xff] }
 0x30e   : > { %v4098_v47 = vmul.f32 %v7308_v6, %v7739_v7  ;;  %v4174_v51 = vmul.f32 %v7313_v32, %v7629_v48  ;;  %v3598_v40 = vadd.f32 %v3566_v24, %v3521_v55  ;;  %v4175_v19 = vmul.f32 %v7313_v32, %v7754_v16 }
 0x30f   : > { %v4599_v42 = vpack.c.bf16 %v4569_v43, %v4568_v59  ;;  %v3599_v46 = vadd.f32 %v3567_v33, %v3522_v44  ;;  %v3975_v30 = vadd.f32 %v3943_v36, %v3898_v18  ;;  %v3976_v5 = vadd.f32 %v3944_v38, %v3899_v39  ;;  %v12576_v18 = vld [vmem:[#allocation6_spill] sm:$0xff] }
 0x310   : > { %v1588_v17 = vmul.f32 %v7495_v2, %v7347_v0  ;;  %v1589_v50 = vmul.f32 %v7495_v2, %v7507_v23  ;;  %v3667_v52 = vadd.f32 %v3635_v35, %v3598_v40  ;;  %v1694_v55 = vmul.f32 %v7513_v12, %v7355_v20 }
 0x311   : > { %5298 = vmatmul.mubr.msk.bf16.vlgmr.msra.gmra.mrb[16].mxu0 %vm269_vm0, %v4599_v42  ;;  %v3668_v34 = vadd.f32 %v3636_v49, %v3599_v46  ;;  %v4052_v37 = vadd.f32 %v4020_v53, %v3975_v30  ;;  %v4053_v59 = vadd.f32 %v4021_v26, %v3976_v5  ;;  %v1695_v36 = vmul.f32 %v7513_v12, %v7526_v56  ;;  %v12574_v53 = vld [vmem:[#allocation28_spill] sm:$0xff]  ;;  %v12577_v42 = vld [vmem:[#allocation31_spill] sm:$0xff]  ;;  %v12578_v30 = vld [vmem:[#allocation26_spill] sm:$0xff] }
 0x312   : > { %v1832_v43 = vmul.f32 %v7531_v8, %v7363_v31  ;;  %v1833_v0 = vmul.f32 %v7531_v8, %v7541_v4  ;;  %v3699_v44 = vadd.f32 %v3667_v52, %v3091_v28  ;;  %v1726_v38 = vadd.f32 %v1694_v55, %v1588_v17  ;;  %v12580_v52 = vld [vmem:[#allocation7_spill] sm:$0xff] }
 0x313   : > { %v3700_v24 = vadd.f32 %v3668_v34, %v3092_v57  ;;  %v4129_v33 = vadd.f32 %v4097_v11, %v4052_v37  ;;  %v4130_v35 = vadd.f32 %v4098_v47, %v4053_v59  ;;  %v1727_v49 = vadd.f32 %v1695_v36, %v1589_v50  ;;  %v12581_v37 = vld [vmem:[#allocation8_spill] sm:$0xff]  ;;  %v12582_v36 = vld [vmem:[#allocation33_spill] sm:$0xff] }
 0x314   : > { %v1970_v63 = vmul.f32 %v12574_v53, %v7371_v10  ;;  %v1971_v26 = vmul.f32 %v12574_v53, %v7562_v45  ;;  %v1864_v27 = vadd.f32 %v1832_v43, %v1726_v38  ;;  %v2108_v31 = vmul.f32 %v12575_v13, %v7379_v9  ;;  %v12583_v43 = vld [vmem:[#allocation35_spill] sm:$0xff] }
 0x315   : > { %v4206_v20 = vadd.f32 %v4174_v51, %v4129_v33  ;;  %v2109_v62 = vmul.f32 %v12575_v13, %v7579_v3  ;;  %v4207_v28 = vadd.f32 %v4175_v19, %v4130_v35  ;;  %v1865_v57 = vadd.f32 %v1833_v0, %v1727_v49 }
 0x316   : > { %v2246_v39 = vmul.f32 %v12576_v18, %v7387_v1  ;;  %v2247_v11 = vmul.f32 %v12576_v18, %v7609_v29  ;;  %v2002_v47 = vadd.f32 %v1970_v63, %v1864_v27  ;;  %v2384_v51 = vmul.f32 %v12577_v42, %v7416_v61  ;;  %v12579_v1 = vld [vmem:[#allocation4_spill] sm:$0xff] }
 0x317   : > { %v4238_v10 = vadd.f32 %v4206_v20, %v3699_v44  ;;  %v2385_v40 = vmul.f32 %v12577_v42, %v7629_v48  ;;  %v4239_v9 = vadd.f32 %v4207_v28, %v3700_v24  ;;  %v2003_v46 = vadd.f32 %v1971_v26, %v1865_v57  ;;  %v12585_v24 = vld [vmem:[#allocation5_spill] sm:$0xff]  ;;  %v12587_v20 = vld [vmem:[#allocation11_spill] sm:$0xff] }
 0x318   : > { %v2453_v5 = vmul.f32 %v12578_v30, %v7323_v22  ;;  %v2454_v19 = vmul.f32 %v12578_v30, %v7479_v60  ;;  %v2140_v50 = vadd.f32 %v2108_v31, %v2002_v47  ;;  %v2530_v34 = vmul.f32 %v12580_v52, %v7507_v23  ;;  %v12584_v22 = vld [vmem:[#allocation9_spill] sm:$0xff]  ;;  %v12588_v31 = vld [vmem:[#allocation27_spill] sm:$0xff]  ;;  %v12592_v52 = vld [vmem:[#allocation30_spill] sm:$0xff] }
 0x319   : > { %v4274_v17 = vadd.f32 %v12579_v1, %v4238_v10  ;;  %v2575_v61 = vmul.f32 %v12581_v37, %v7526_v56  ;;  %v4275_v55 = vadd.f32 %v12579_v1, %v4239_v9  ;;  %v2141_v59 = vadd.f32 %v2109_v62, %v2003_v46  ;;  %v12586_v56 = vld [vmem:[#allocation36_spill] sm:$0xff] }
 0x31a   : > { %v2608_v0 = vadd.f32 %v12583_v43, %v12582_v36  ;;  %v2652_v44 = vmul.f32 %v12584_v22, %v7541_v4  ;;  %v2278_v38 = vadd.f32 %v2246_v39, %v2140_v50  ;;  %v2729_v49 = vmul.f32 %v12554_v58, %v7562_v45  ;;  %v7884_v58 = vld [vmem:[#allocation2 + $0x50] sm:$0xff]  ;;  %v12597_v36 = vld [vmem:[#allocation16_spill] sm:$0xff] }
 0x31b   : > { %v4310_v33 = vmul.f32 %v12585_v24, %v4274_v17  ;;  %v2607_v35 = vadd.f32 %v2575_v61, %v2530_v34  ;;  %v4311_v23 = vmul.f32 %v12585_v24, %v4275_v55  ;;  %v2279_v63 = vadd.f32 %v2247_v11, %v2141_v59  ;;  %v12589_v11 = vld [vmem:[#allocation37_spill] sm:$0xff]  ;;  %v12591_v17 = vld [vmem:[#allocation38_spill] sm:$0xff] }
 0x31c   : > { %v2685_v26 = vadd.f32 %v12586_v56, %v2608_v0  ;;  %v2806_v27 = vmul.f32 %v12587_v20, %v7579_v3  ;;  %v2416_v28 = vadd.f32 %v2384_v51, %v2278_v38  ;;  %v2883_v57 = vmul.f32 %v12563_v41, %v7609_v29  ;;  %v12590_v51 = vld [vmem:[#allocation14_spill] sm:$0xff] }
 0x31d   : > { %v7877_v62 = vadd.f32 %v12588_v31, %v4310_v33  ;;  %v2684_v4 = vadd.f32 %v2652_v44, %v2607_v35  ;;  %v7882_v39 = vadd.f32 %v12588_v31, %v4311_v23  ;;  %v2417_v45 = vadd.f32 %v2385_v40, %v2279_v63  ;;  %v12596_v59 = vld [vmem:[#allocation34_spill] sm:$0xff]  ;;  %v12601_v35 = vld [vmem:[#allocation17_spill] sm:$0xff] }
 0x31e   : > { %v2762_v10 = vadd.f32 %v12589_v11, %v2685_v26  ;;  %v2960_v47 = vmul.f32 %v12564_v25, %v7629_v48  ;;  %v2485_v9 = vadd.f32 %v2453_v5, %v2416_v28  ;;  %v3029_v30 = vmul.f32 %v12590_v51, %v7479_v60  ;;  %v12593_v48 = vld [vmem:[#allocation32_spill] sm:$0xff]  ;;  %v12594_v25 = vld [vmem:[#allocation15_spill] sm:$0xff]  ;;  %v12600_v38 = vld [vmem:[#allocation10_spill] sm:$0xff] }
 0x31f   : > { %v5118_v3 = vmul.f32 -1.442695, %v7877_v62  ;;  %v2761_v46 = vadd.f32 %v2729_v49, %v2684_v4  ;;  %v5119_v29 = vmul.f32 -1.442695, %v7882_v39  ;;  %v2486_v41 = vadd.f32 %v2454_v19, %v2417_v45  ;;  %v12595_v5 = vld [vmem:[#allocation12_spill] sm:$0xff]  ;;  %v12602_v23 = vld [vmem:[#allocation13_spill] sm:$0xff] }
 0x320   : > { %v2839_v50 = vadd.f32 %v12591_v17, %v2762_v10  ;;  %v3030_v40 = vmul.f32 %v12590_v51, %v12592_v52  ;;  %v3120_v37 = vrot.slane %v7884_v58, 1  ;;  %v3138_v61 = vmul.f32 %v12594_v25, %v12593_v48  ;;  %v12605_v51 = vld [vmem:[#allocation18_spill] sm:$0xff] }
 0x321   : > { %5556 = vpow2.f32 %v5118_v3  ;;  %v2838_v34 = vadd.f32 %v2806_v27, %v2761_v46  ;;  %v3165_v60 = vrot.slane %v7884_v58, 2  ;;  %v3183_v19 = vmul.f32 %v12597_v36, %v12596_v59 }
 0x322   : > { %5558 = vpow2.f32 %v5119_v29  ;;  %v2916_v55 = vadd.f32 %v12595_v5, %v2839_v50  ;;  %v12598_v0 = vrot.slane %v12592_v52, 1  ;;  %v3242_v33 = vrot.slane %v7884_v58, 3 }
 0x323   : > { %v2915_v43 = vadd.f32 %v2883_v57, %v2838_v34  ;;  %v3260_v49 = vmul.f32 %v12601_v35, %v12600_v38  ;;  %v12603_v26 = vrot.slane %v12592_v52, 2  ;;  %v3215_v27 = vadd.f32 %v3183_v19, %v3138_v61 }
 0x324   : > { %v3127_v44 = vsel %vm1545_vm1, %v12598_v0, %v3120_v37  ;;  %v2993_v63 = vadd.f32 %v12602_v23, %v2916_v55  ;;  %v12604_v57 = vrot.slane %v12592_v52, 3  ;;  %v3319_v11 = vrot.slane %v7884_v58, 4  ;;  %v12609_v0 = vld [vmem:[#allocation20_spill] sm:$0xff] }
 0x325   : > { %v3139_v56 = vmul.f32 %v12594_v25, %v3127_v44  ;;  %v3172_v20 = vsel %vm1651_vm2, %v12603_v26, %v3165_v60  ;;  %v2992_v28 = vadd.f32 %v2960_v47, %v2915_v43  ;;  %v3292_v46 = vadd.f32 %v3260_v49, %v3215_v27  ;;  %v12612_v27 = vld [vmem:[#allocation22_spill] sm:$0xff] }
 0x326   : > { %v3184_v4 = vmul.f32 %v12597_v36, %v3172_v20  ;;  %v3249_v45 = vsel %vm1789_vm3, %v12604_v57, %v3242_v33  ;;  %v3062_v10 = vadd.f32 %v3030_v40, %v2993_v63  ;;  %v3337_v29 = vmul.f32 %v12605_v51, %v7702_v54  ;;  %v12607_v40 = vld [vmem:[#allocation19_spill] sm:$0xff] }
 0x327   : > { %v3261_v3 = vmul.f32 %v12601_v35, %v3249_v45  ;;  %v3061_v17 = vadd.f32 %v3029_v30, %v2992_v28  ;;  %v12606_v50 = vrot.slane %v12592_v52, 4  ;;  %v3396_v48 = vrot.slane %v7884_v58, 5 }
 0x328   : > { %v3216_v47 = vadd.f32 %v3184_v4, %v3139_v56  ;;  %v3094_v25 = vadd.f32 %v3062_v10, %v2486_v41  ;;  %v3369_v5 = vadd.f32 %v3337_v29, %v3292_v46  ;;  %v3414_v55 = vmul.f32 %v12607_v40, %v7710_v21  ;;  %v12611_v56 = vld [vmem:[#allocation21_spill] sm:$0xff] }
 0x329   : > { %v3326_v34 = vsel %vm1927_vm4, %v12606_v50, %v3319_v11  ;;  %v3093_v59 = vadd.f32 %v3061_v17, %v2485_v9  ;;  %v12608_v54 = vrot.slane %v12592_v52, 5  ;;  %v3473_v19 = vrot.slane %v7884_v58, 6  ;;  %v7950_v9 = vld [vmem:[#allocation2 + $0x58] sm:$0xff] }
 0x32a   : > { %v3338_v61 = vmul.f32 %v12605_v51, %v3326_v34  ;;  %v3293_v36 = vadd.f32 %v3261_v3, %v3216_v47  ;;  %v3446_v41 = vadd.f32 %v3414_v55, %v3369_v5  ;;  %v3491_v38 = vmul.f32 %v12609_v0, %v7739_v7  ;;  %v12615_v55 = vld [vmem:[#allocation24_spill] sm:$0xff] }
 0x32b   : > { %v3403_v30 = vsel %vm2065_vm5, %v12608_v54, %v3396_v48  ;;  %v3550_v35 = vrot.slane %v7884_v58, 7  ;;  %v5557_v21 = vpop.eup %5556  ;;  %v12610_v23 = vrot.slane %v12592_v52, 6  ;;  %v3568_v26 = vmul.f32 %v12611_v56, %v7754_v16 }
 0x32c   : > { %v3415_v43 = vmul.f32 %v12607_v40, %v3403_v30  ;;  %v3370_v49 = vadd.f32 %v3338_v61, %v3293_v36  ;;  %v3637_v28 = vmul.f32 %v12612_v27, %v12592_v52  ;;  %v5559_v4 = vpop.eup %5558  ;;  %v4474_v57 = vadd.f32 1.0, %v5557_v21  ;;  %v12614_v61 = vld [vmem:[#allocation23_spill] sm:$0xff] }
 0x32d   : > { %v3480_v63 = vsel %vm2203_vm6, %v12610_v23, %v3473_v19  ;;  %v3523_v10 = vadd.f32 %v3491_v38, %v3446_v41  ;;  %v12613_v3 = vrot.slane %v12592_v52, 7  ;;  %v4475_v51 = vadd.f32 1.0, %v5559_v4 }
 0x32e   : > { %v3492_v7 = vmul.f32 %v12609_v0, %v3480_v63  ;;  %v3447_v29 = vadd.f32 %v3415_v43, %v3370_v49  ;;  %v3638_v16 = vmul.f32 %v12612_v27, %v7884_v58  ;;  %5560 = vrcp.f32 %v4474_v57  ;;  %v12616_v0 = vld [vmem:[#allocation25_spill] sm:$0xff] }
 0x32f   : > { %v3557_v46 = vsel %vm2341_vm7, %v12613_v3, %v3550_v35  ;;  %v3600_v47 = vadd.f32 %v3568_v26, %v3523_v10  ;;  %v3728_v50 = vrot.slane %v7950_v9, 1  ;;  %v3746_v5 = vmul.f32 %v12614_v61, %v3127_v44 }
 0x330   : > { %v3569_v17 = vmul.f32 %v12611_v56, %v3557_v46  ;;  %5562 = vrcp.f32 %v4475_v51  ;;  %v3524_v40 = vadd.f32 %v3492_v7, %v3447_v29  ;;  %v3773_v52 = vrot.slane %v7950_v9, 2  ;;  %v7999_v29 = vld [vmem:[#allocation2 + $0x60] sm:$0xff] }
 0x331   : > { %v3791_v36 = vmul.f32 %v12615_v55, %v3172_v20  ;;  %v3669_v54 = vadd.f32 %v3637_v28, %v3600_v47  ;;  %v3735_v43 = vsel %vm1545_vm1, %v3120_v37, %v3728_v50  ;;  %v3850_v41 = vrot.slane %v7950_v9, 3  ;;  %v8007_v47 = vld [vmem:[#allocation2 + $0x68] sm:$0xff] }
 0x332   : > { %v3868_v38 = vmul.f32 %v12616_v0, %v3249_v45  ;;  %v3601_v21 = vadd.f32 %v3569_v17, %v3524_v40  ;;  %v3747_v49 = vmul.f32 %v12614_v61, %v3735_v43  ;;  %v3780_v44 = vsel %vm1651_vm2, %v3165_v60, %v3773_v52  ;;  %v8013_v61 = vld [vmem:[#allocation2 + $0x70] sm:$0xff]  ;;  %v8024_v52 = vld [vmem:[#allocation2 + $0x80] sm:$0xff] }
 0x333   : > { %v3823_v23 = vadd.f32 %v3791_v36, %v3746_v5  ;;  %v3701_v20 = vadd.f32 %v3669_v54, %v3093_v59  ;;  %v3792_v56 = vmul.f32 %v12615_v55, %v3780_v44  ;;  %v3857_v37 = vsel %vm1789_vm3, %v3242_v33, %v3850_v41  ;;  %v8015_v5 = vld [vmem:[#allocation2 + $0x78] sm:$0xff] }
 0x334   : > { %v3927_v26 = vrot.slane %v7950_v9, 4  ;;  %v3670_v45 = vadd.f32 %v3638_v16, %v3601_v21  ;;  %v3869_v27 = vmul.f32 %v12616_v0, %v3857_v37  ;;  %v3945_v4 = vmul.f32 %v7282_v14, %v3326_v34 }
 0x335   : > { %v3900_v28 = vadd.f32 %v3868_v38, %v3823_v23  ;;  %v3824_v57 = vadd.f32 %v3792_v56, %v3747_v49  ;;  %v4004_v59 = vrot.slane %v7950_v9, 5  ;;  %v4022_v7 = vmul.f32 %v7297_v15, %v3403_v30 }
 0x336   : > { %v3934_v60 = vsel %vm1927_vm4, %v3319_v11, %v3927_v26  ;;  %v3702_v10 = vadd.f32 %v3670_v45, %v3094_v25  ;;  %v4081_v51 = vrot.slane %v7950_v9, 6  ;;  %v4099_v11 = vmul.f32 %v7308_v6, %v3480_v63 }
 0x337   : > { %v3946_v3 = vmul.f32 %v7282_v14, %v3934_v60  ;;  %v3977_v33 = vadd.f32 %v3945_v4, %v3900_v28  ;;  %v3901_v17 = vadd.f32 %v3869_v27, %v3824_v57  ;;  %v4011_v34 = vsel %vm2065_vm5, %v3396_v48, %v4004_v59  ;;  %v8017_v48 = vld [vmem:[#allocation2 + $0x88] sm:$0xff] }
 0x338   : > { %v4158_v16 = vrot.slane %v7950_v9, 7  ;;  %v4023_v25 = vmul.f32 %v7297_v15, %v4011_v34  ;;  %v4088_v30 = vsel %vm2203_vm6, %v3473_v19, %v4081_v51  ;;  %v4176_v50 = vmul.f32 %v7313_v32, %v3557_v46  ;;  %v5561_v40 = vpop.eup %5560 }
 0x339   : > { %v4054_v14 = vadd.f32 %v4022_v7, %v3977_v33  ;;  %v3978_v63 = vadd.f32 %v3946_v3, %v3901_v17  ;;  %v4100_v9 = vmul.f32 %v7308_v6, %v4088_v30  ;;  %v1516_v19 = vrot.slane %v7999_v29, 1 }
 0x33a   : > { %v4165_v15 = vsel %vm2341_vm7, %v3550_v35, %v4158_v16  ;;  %v5563_v46 = vpop.eup %5562  ;;  %v4570_v55 = vmul.f32 %v5561_v40, %v7877_v62  ;;  %v1517_v43 = vrot.slane %v8007_v47, 1  ;;  %v1518_v58 = vrot.slane %v8013_v61, 1 }
 0x33b   : > { %v4131_v36 = vadd.f32 %v4099_v11, %v4054_v14  ;;  %v4177_v54 = vmul.f32 %v7313_v32, %v4165_v15  ;;  %v4571_v41 = vmul.f32 %v5563_v46, %v7882_v39  ;;  %v4055_v6 = vadd.f32 %v4023_v25, %v3978_v63 }
 0x33c   : > { %v1519_v0 = vrot.slane %v8015_v5, 1  ;;  %v1520_v38 = vrot.slane %v8024_v52, 1  ;;  %v12125_v21 = vrot.slane %v8017_v48, 1  ;;  %v1569_v62 = vsel %vm1545_vm1, %v1516_v19, %v1517_v43 }
 0x33d   : > { %v4208_v35 = vadd.f32 %v4176_v50, %v4131_v36  ;;  %v4600_v49 = vpack.c.bf16 %v4571_v41, %v4570_v55  ;;  %v4132_v44 = vadd.f32 %v4100_v9, %v4055_v6  ;;  %v8043_v39 = vsel %vm1545_vm1, %v1517_v43, %v1518_v58 }
 0x33e   : > { %v8039_v32 = vsel %vm1545_vm1, %v1518_v58, %v1519_v0  ;;  %v8049_v56 = vsel %vm1545_vm1, %v1520_v38, %v12125_v21  ;;  %v8053_v37 = vsel %vm1545_vm1, %v1519_v0, %v1520_v38  ;;  %v1590_v26 = vmul.f32 %v7495_v2, %v1569_v62 }
 0x33f   : > { %v4240_v23 = vadd.f32 %v4208_v35, %v3701_v20  ;;  %5301 = vmatprep.mubr.msk.bf16.mxu0 %vm269_vm0, %v4600_v49  ;;  %v4209_v45 = vadd.f32 %v4177_v54, %v4132_v44  ;;  %v1591_v27 = vmul.f32 %v7495_v2, %v8043_v39  ;;  %v1624_v20 = vrot.slane %v7999_v29, 2 }
 0x340   : > { %v1625_v28 = vrot.slane %v8007_v47, 2  ;;  %v1626_v57 = vrot.slane %v8013_v61, 2  ;;  %v1627_v60 = vrot.slane %v8015_v5, 2  ;;  %v1628_v59 = vrot.slane %v8024_v52, 2 }
 0x341   : > { %v4276_v4 = vadd.f32 %v12579_v1, %v4240_v23  ;;  %v4241_v7 = vadd.f32 %v4209_v45, %v3702_v10  ;;  %v12124_v3 = vrot.slane %v8017_v48, 2  ;;  %v1762_v2 = vrot.slane %v7999_v29, 3 }
 0x342   : > { %v1675_v33 = vsel %vm1651_vm2, %v1624_v20, %v1625_v28  ;;  %v8072_v17 = vsel %vm1651_vm2, %v1627_v60, %v1628_v59  ;;  %v8076_v34 = vsel %vm1651_vm2, %v1626_v57, %v1627_v60  ;;  %v8080_v10 = vsel %vm1651_vm2, %v1625_v28, %v1626_v57 }
 0x343   : > { %v4312_v51 = vmul.f32 %v12585_v24, %v4276_v4  ;;  %v4277_v11 = vadd.f32 %v12579_v1, %v4241_v7  ;;  %v8087_v16 = vsel %vm1651_vm2, %v1628_v59, %v12124_v3  ;;  %v1696_v25 = vmul.f32 %v7513_v12, %v1675_v33 }
 0x344   : > { %v1697_v14 = vmul.f32 %v7513_v12, %v8080_v10  ;;  %v1763_v50 = vrot.slane %v8007_v47, 3  ;;  %v1764_v40 = vrot.slane %v8013_v61, 3  ;;  %v1765_v1 = vrot.slane %v8015_v5, 3 }
 0x345   : > { %v8093_v30 = vadd.f32 %v12588_v31, %v4312_v51  ;;  %v4313_v63 = vmul.f32 %v12585_v24, %v4277_v11  ;;  %v1728_v9 = vadd.f32 %v1696_v25, %v1590_v26  ;;  %v1766_v19 = vrot.slane %v8024_v52, 3 }
 0x346   : > { %v1729_v15 = vadd.f32 %v1697_v14, %v1591_v27  ;;  %v12123_v55 = vrot.slane %v8017_v48, 3  ;;  %v8104_v12 = vsel %vm1789_vm3, %v1764_v40, %v1765_v1  ;;  %v8108_v36 = vsel %vm1789_vm3, %v1763_v50, %v1764_v40 }
 0x347   : > { %v5120_v46 = vmul.f32 -1.442695, %v8093_v30  ;;  %v8111_v54 = vadd.f32 %v12588_v31, %v4313_v63  ;;  %v8115_v24 = vsel %vm1789_vm3, %v1765_v1, %v1766_v19  ;;  %v1813_v43 = vsel %vm1789_vm3, %v1762_v2, %v1763_v50 }
 0x348   : > { %v1835_v41 = vmul.f32 %v7531_v8, %v8108_v36  ;;  %v8125_v6 = vsel %vm1789_vm3, %v1766_v19, %v12123_v55  ;;  %v1834_v31 = vmul.f32 %v7531_v8, %v1813_v43  ;;  %v1900_v58 = vrot.slane %v7999_v29, 4 }
 0x349   : > { %5564 = vpow2.f32 %v5120_v46  ;;  %v5121_v0 = vmul.f32 -1.442695, %v8111_v54  ;;  %v1901_v38 = vrot.slane %v8007_v47, 4  ;;  %v1902_v62 = vrot.slane %v8013_v61, 4 }
 0x34a   : > { %v1867_v35 = vadd.f32 %v1835_v41, %v1729_v15  ;;  %v1866_v49 = vadd.f32 %v1834_v31, %v1728_v9  ;;  %v1903_v44 = vrot.slane %v8015_v5, 4  ;;  %v1904_v23 = vrot.slane %v8024_v52, 4 }
 0x34b   : > { %v12122_v26 = vrot.slane %v8017_v48, 4  ;;  %5566 = vpow2.f32 %v5121_v0  ;;  %v8137_v8 = vsel %vm1927_vm4, %v1901_v38, %v1902_v62  ;;  %v1951_v45 = vsel %vm1927_vm4, %v1900_v58, %v1901_v38 }
 0x34c   : > { %v2038_v27 = vrot.slane %v7999_v29, 5  ;;  %v8150_v28 = vsel %vm1927_vm4, %v1903_v44, %v1904_v23  ;;  %v8154_v4 = vsel %vm1927_vm4, %v1902_v62, %v1903_v44  ;;  %v1972_v57 = vmul.f32 %v12574_v53, %v1951_v45 }
 0x34d   : > { %v8146_v20 = vsel %vm1927_vm4, %v1904_v23, %v12122_v26  ;;  %v1973_v60 = vmul.f32 %v12574_v53, %v8137_v8  ;;  %v2039_v59 = vrot.slane %v8007_v47, 5  ;;  %v2040_v7 = vrot.slane %v8013_v61, 5  ;;  %v8353_v26 = vld [vmem:[%s12009_s3 + $0x13] ss:$0 sm:$0xff] }
 0x34e   : > { %12617 = vst [vmem:[#allocation28_spill] sm:$0xff] %v8146_v20  ;;  %v2041_v33 = vrot.slane %v8015_v5, 5  ;;  %v2004_v2 = vadd.f32 %v1972_v57, %v1866_v49  ;;  %v2042_v51 = vrot.slane %v8024_v52, 5  ;;  %v12121_v11 = vrot.slane %v8017_v48, 5  ;;  %12630 = vst [vmem:[#allocation11_spill] sm:$0xff] %v8353_v26 }
 0x34f   : > { %v2176_v25 = vrot.slane %v7999_v29, 6  ;;  %v2005_v14 = vadd.f32 %v1973_v60, %v1867_v35  ;;  %v8171_v53 = vsel %vm2065_vm5, %v2039_v59, %v2040_v7  ;;  %v2089_v40 = vsel %vm2065_vm5, %v2038_v27, %v2039_v59 }
 0x350   : > { %v8167_v50 = vsel %vm2065_vm5, %v2040_v7, %v2041_v33  ;;  %v8179_v1 = vsel %vm2065_vm5, %v2042_v51, %v12121_v11  ;;  %v8183_v63 = vsel %vm2065_vm5, %v2041_v33, %v2042_v51  ;;  %v2110_v9 = vmul.f32 %v12575_v13, %v2089_v40 }
 0x351   : > { %v2111_v15 = vmul.f32 %v12575_v13, %v8171_v53  ;;  %v2177_v19 = vrot.slane %v8007_v47, 6  ;;  %v2178_v46 = vrot.slane %v8013_v61, 6  ;;  %v2179_v43 = vrot.slane %v8015_v5, 6 }
 0x352   : > { %v2180_v41 = vrot.slane %v8024_v52, 6  ;;  %v2142_v58 = vadd.f32 %v2110_v9, %v2004_v2  ;;  %v12120_v35 = vrot.slane %v8017_v48, 6  ;;  %v2314_v38 = vrot.slane %v7999_v29, 7 }
 0x353   : > { %v5565_v31 = vpop.eup %5564  ;;  %v2143_v0 = vadd.f32 %v2111_v15, %v2005_v14  ;;  %v8200_v13 = vsel %vm2203_vm6, %v2178_v46, %v2179_v43  ;;  %v2226_v44 = vsel %vm2203_vm6, %v2177_v19, %v2178_v46  ;;  %v2227_v29 = vsel %vm2203_vm6, %v2176_v25, %v2177_v19 }
 0x354   : > { %v4476_v62 = vadd.f32 1.0, %v5565_v31  ;;  %v8196_v49 = vsel %vm2203_vm6, %v2179_v43, %v2180_v41  ;;  %v8208_v23 = vsel %vm2203_vm6, %v2180_v41, %v12120_v35  ;;  %v2249_v45 = vmul.f32 %v12576_v18, %v2226_v44  ;;  %v8242_v41 = vld [vmem:[%s12009_s3 + $0x7] ss:$0 sm:$0xff] }
 0x355   : > { %v2315_v27 = vrot.slane %v8007_v47, 7  ;;  %v5567_v57 = vpop.eup %5566  ;;  %v2248_v60 = vmul.f32 %v12576_v18, %v2227_v29  ;;  %v2316_v59 = vrot.slane %v8013_v61, 7  ;;  %v2317_v7 = vrot.slane %v8015_v5, 7  ;;  %12618 = vst [vmem:[#allocation29_spill] sm:$0xff] %v8242_v41  ;;  %v8260_v29 = vld [vmem:[%s12009_s3 + $0x9] ss:$0 sm:$0xff] }
 0x356   : > { %5568 = vrcp.f32 %v4476_v62  ;;  %v4477_v33 = vadd.f32 1.0, %v5567_v57  ;;  %v2281_v2 = vadd.f32 %v2249_v45, %v2143_v0  ;;  %v2318_v51 = vrot.slane %v8024_v52, 7  ;;  %v8251_v0 = vld [vmem:[%s12009_s3 + $0x8] ss:$0 sm:$0xff]  ;;  %12620 = vst [vmem:[#allocation31_spill] sm:$0xff] %v8260_v29 }
 0x357   : > { %v12119_v14 = vrot.slane %v8017_v48, 7  ;;  %v2280_v40 = vadd.f32 %v2248_v60, %v2142_v58  ;;  %v8221_v25 = vsel %vm2341_vm7, %v2316_v59, %v2317_v7  ;;  %v2364_v9 = vsel %vm2341_vm7, %v2315_v27, %v2316_v59  ;;  %12619 = vst [vmem:[#allocation6_spill] sm:$0xff] %v8251_v0  ;;  %v8278_v59 = vld [vmem:[%s12009_s3 + $0xb] ss:$0 sm:$0xff] }
 0x358   : > { %v2365_v18 = vsel %vm2341_vm7, %v2314_v38, %v2315_v27  ;;  %5570 = vrcp.f32 %v4477_v33  ;;  %v8235_v19 = vsel %vm2341_vm7, %v2317_v7, %v2318_v51  ;;  %v2387_v43 = vmul.f32 %v12577_v42, %v2364_v9  ;;  %12622 = vst [vmem:[#allocation4_spill] sm:$0xff] %v8278_v59 }
 0x359   : > { %v8231_v15 = vsel %vm2341_vm7, %v2318_v51, %v12119_v14  ;;  %v2386_v46 = vmul.f32 %v12577_v42, %v2365_v18  ;;  %v2455_v31 = vmul.f32 %v8242_v41, %v8007_v47  ;;  %v2456_v58 = vmul.f32 %v8242_v41, %v8013_v61 }
 0x35a   : > { %v2532_v38 = vmul.f32 %v8251_v0, %v8043_v39  ;;  %v2533_v62 = vmul.f32 %v8251_v0, %v8039_v32  ;;  %v2577_v47 = vmul.f32 %v8260_v29, %v8080_v10  ;;  %v2578_v45 = vmul.f32 %v8260_v29, %v8076_v34  ;;  %v8269_v39 = vld [vmem:[%s12009_s3 + $0xa] ss:$0 sm:$0xff] }
 0x35b   : > { %v2418_v42 = vadd.f32 %v2386_v46, %v2280_v40  ;;  %v2419_v27 = vadd.f32 %v2387_v43, %v2281_v2  ;;  %12621 = vst [vmem:[#allocation26_spill] sm:$0xff] %v8269_v39  ;;  %v2654_v57 = vmul.f32 %v8269_v39, %v8108_v36  ;;  %v2655_v60 = vmul.f32 %v8269_v39, %v8104_v12  ;;  %v8291_v36 = vld [vmem:[%s12009_s3 + $0xc] ss:$0 sm:$0xff]  ;;  %v8300_v46 = vld [vmem:[%s12009_s3 + $0xd] ss:$0 sm:$0xff] }
 0x35c   : > { %v2731_v10 = vmul.f32 %v8278_v59, %v8137_v8  ;;  %v2609_v33 = vadd.f32 %v2577_v47, %v2532_v38  ;;  %v2610_v2 = vadd.f32 %v2578_v45, %v2533_v62  ;;  %v2732_v51 = vmul.f32 %v8278_v59, %v8154_v4  ;;  %12623 = vst [vmem:[#allocation7_spill] sm:$0xff] %v8291_v36 }
 0x35d   : > { %v8282_v7 = vadd.f32 %v2455_v31, %v2418_v42  ;;  %v8286_v40 = vadd.f32 %v2456_v58, %v2419_v27  ;;  %v2808_v18 = vmul.f32 %v8291_v36, %v8171_v53  ;;  %v2809_v8 = vmul.f32 %v8291_v36, %v8167_v50  ;;  %12624 = vst [vmem:[#allocation8_spill] sm:$0xff] %v8300_v46  ;;  %v8308_v42 = vld [vmem:[%s12009_s3 + $0xe] ss:$0 sm:$0xff] }
 0x35e   : > { %v2885_v43 = vmul.f32 %v8300_v46, %v2226_v44  ;;  %v2686_v31 = vadd.f32 %v2654_v57, %v2609_v33  ;;  %v2687_v58 = vadd.f32 %v2655_v60, %v2610_v2  ;;  %v2886_v38 = vmul.f32 %v8300_v46, %v8200_v13  ;;  %12625 = vst [vmem:[#allocation33_spill] sm:$0xff] %v8308_v42  ;;  %v8316_v44 = vld [vmem:[%s12009_s3 + $0xf] ss:$0 sm:$0xff]  ;;  %v8325_v57 = vld [vmem:[%s12009_s3 + $0x10] ss:$0 sm:$0xff] }
 0x35f   : > { %v2962_v53 = vmul.f32 %v8308_v42, %v2364_v9  ;;  %v2963_v47 = vmul.f32 %v8308_v42, %v8221_v25  ;;  %12626 = vst [vmem:[#allocation35_spill] sm:$0xff] %v8316_v44  ;;  %v3031_v45 = vmul.f32 %v8316_v44, %v8013_v61  ;;  %v3032_v27 = vmul.f32 %v8316_v44, %v8015_v5  ;;  %v8335_v61 = vld [vmem:[%s12009_s3 + $0x11] ss:$0 sm:$0xff] }
 0x360   : > { %v5569_v62 = vpop.eup %5568  ;;  %12627 = vst [vmem:[#allocation9_spill] sm:$0xff] %v8325_v57  ;;  %v3140_v9 = vmul.f32 %v8325_v57, %v8039_v32  ;;  %v2763_v33 = vadd.f32 %v2731_v10, %v2686_v31  ;;  %v2764_v2 = vadd.f32 %v2732_v51, %v2687_v58  ;;  %v3141_v14 = vmul.f32 %v8325_v57, %v8053_v37 }
 0x361   : > { %v4572_v60 = vmul.f32 %v5569_v62, %v8093_v30  ;;  %12628 = vst [vmem:[#allocation5_spill] sm:$0xff] %v8335_v61  ;;  %v3185_v35 = vmul.f32 %v8335_v61, %v8076_v34  ;;  %v3186_v11 = vmul.f32 %v8335_v61, %v8072_v17  ;;  %v8344_v30 = vld [vmem:[%s12009_s3 + $0x12] ss:$0 sm:$0xff]  ;;  %v3339_v55 = vmul.f32 %v8353_v26, %v8154_v4 }
 0x362   : > { %12629 = vst [vmem:[#allocation36_spill] sm:$0xff] %v8344_v30  ;;  %v3262_v10 = vmul.f32 %v8344_v30, %v8104_v12  ;;  %v3263_v51 = vmul.f32 %v8344_v30, %v8115_v24  ;;  %v5571_v31 = vpop.eup %5570  ;;  %v2840_v58 = vadd.f32 %v2808_v18, %v2763_v33  ;;  %v2841_v62 = vadd.f32 %v2809_v8, %v2764_v2  ;;  %v8363_v18 = vld [vmem:[%s12009_s3 + $0x14] ss:$0 sm:$0xff] }
 0x363   : > { %v3340_v3 = vmul.f32 %v8353_v26, %v8150_v28  ;;  %v4573_v21 = vmul.f32 %v5571_v31, %v8111_v54  ;;  %v3217_v61 = vadd.f32 %v3185_v35, %v3140_v9  ;;  %v3218_v57 = vadd.f32 %v3186_v11, %v3141_v14  ;;  %12631 = vst [vmem:[#allocation27_spill] sm:$0xff] %v8363_v18  ;;  %v8372_v26 = vld [vmem:[%s12009_s3 + $0x15] ss:$0 sm:$0xff] }
 0x364   : > { %v3416_v8 = vmul.f32 %v8363_v18, %v8167_v50  ;;  %v2917_v33 = vadd.f32 %v2885_v43, %v2840_v58  ;;  %v2918_v2 = vadd.f32 %v2886_v38, %v2841_v62  ;;  %v3417_v30 = vmul.f32 %v8363_v18, %v8183_v63  ;;  %12632 = vst [vmem:[#allocation37_spill] sm:$0xff] %v8372_v26  ;;  %v8381_v38 = vld [vmem:[%s12009_s3 + $0x16] ss:$0 sm:$0xff] }
 0x365   : > { %v3493_v54 = vmul.f32 %v8372_v26, %v8200_v13  ;;  %v4601_v11 = vpack.c.bf16 %v4573_v21, %v4572_v60  ;;  %v3294_v35 = vadd.f32 %v3262_v10, %v3217_v61  ;;  %v3295_v14 = vadd.f32 %v3263_v51, %v3218_v57  ;;  %12633 = vst [vmem:[#allocation14_spill] sm:$0xff] %v8381_v38  ;;  %v8400_v51 = vld [vmem:[%s12009_s3 + $0x18] ss:$0 sm:$0xff] }
 0x366   : > { %v3494_v9 = vmul.f32 %v8372_v26, %v8196_v49  ;;  %v2994_v31 = vadd.f32 %v2962_v53, %v2917_v33  ;;  %v2995_v43 = vadd.f32 %v2963_v47, %v2918_v2  ;;  %v3570_v58 = vmul.f32 %v8381_v38, %v8221_v25  ;;  %v8391_v53 = vld [vmem:[%s12009_s3 + $0x17] ss:$0 sm:$0xff]  ;;  %12635 = vst [vmem:[#allocation30_spill] sm:$0xff] %v8400_v51 }
 0x367   : > { %v3571_v62 = vmul.f32 %v8381_v38, %v8235_v19  ;;  %5302 = vmatmul.mubr.msk.bf16.gmra.mrb[20].mxu0 %vm269_vm0, %v4601_v11  ;;  %v3371_v21 = vadd.f32 %v3339_v55, %v3294_v35  ;;  %v3372_v57 = vadd.f32 %v3340_v3, %v3295_v14  ;;  %12634 = vst [vmem:[#allocation38_spill] sm:$0xff] %v8391_v53  ;;  %v8409_v11 = vld [vmem:[%s12009_s3 + $0x19] ss:$0 sm:$0xff] }
 0x368   : > { %v3639_v47 = vmul.f32 %v8391_v53, %v8015_v5  ;;  %v3640_v60 = vmul.f32 %v8391_v53, %v8024_v52  ;;  %v3063_v61 = vadd.f32 %v3031_v45, %v2994_v31  ;;  %v3064_v10 = vadd.f32 %v3032_v27, %v2995_v43  ;;  %12636 = vst [vmem:[#allocation32_spill] sm:$0xff] %v8409_v11 }
 0x369   : > { %v3748_v3 = vmul.f32 %v8400_v51, %v8053_v37  ;;  %v3749_v55 = vmul.f32 %v8400_v51, %v8049_v56  ;;  %v3448_v33 = vadd.f32 %v3416_v8, %v3371_v21  ;;  %v3449_v2 = vadd.f32 %v3417_v30, %v3372_v57  ;;  %v8420_v8 = vld [vmem:[%s12009_s3 + $0x1a] ss:$0 sm:$0xff] }
 0x36a   : > { %v3793_v45 = vmul.f32 %v8409_v11, %v8072_v17  ;;  %v3794_v27 = vmul.f32 %v8409_v11, %v8087_v16  ;;  %v3095_v35 = vadd.f32 %v3063_v61, %v8282_v7  ;;  %v3096_v14 = vadd.f32 %v3064_v10, %v8286_v40  ;;  %12637 = vst [vmem:[#allocation15_spill] sm:$0xff] %v8420_v8  ;;  %v8429_v7 = vld [vmem:[%s12009_s3 + $0x1b] ss:$0 sm:$0xff]  ;;  %v8438_v10 = vld [vmem:[%s12009_s3 + $0x1c] ss:$0 sm:$0xff] }
 0x36b   : > { %v3870_v30 = vmul.f32 %v8420_v8, %v8115_v24  ;;  %v3871_v31 = vmul.f32 %v8420_v8, %v8125_v6  ;;  %v3525_v43 = vadd.f32 %v3493_v54, %v3448_v33  ;;  %v3526_v21 = vadd.f32 %v3494_v9, %v3449_v2  ;;  %12638 = vst [vmem:[#allocation12_spill] sm:$0xff] %v8429_v7 }
 0x36c   : > { %v3825_v57 = vadd.f32 %v3793_v45, %v3748_v3  ;;  %v3826_v51 = vadd.f32 %v3794_v27, %v3749_v55  ;;  %v3947_v40 = vmul.f32 %v8429_v7, %v8150_v28  ;;  %v3948_v61 = vmul.f32 %v8429_v7, %v8146_v20  ;;  %12639 = vst [vmem:[#allocation34_spill] sm:$0xff] %v8438_v10  ;;  %v8444_v3 = vld [vmem:[#allocation2 + $0x98] sm:$0xff]  ;;  %v8446_v27 = vld [vmem:[#allocation2 + $0x90] sm:$0xff] }
 0x36d   : > { %v4024_v54 = vmul.f32 %v8438_v10, %v8183_v63  ;;  %v4025_v9 = vmul.f32 %v8438_v10, %v8179_v1  ;;  %v3602_v55 = vadd.f32 %v3570_v58, %v3525_v43  ;;  %v3603_v33 = vadd.f32 %v3571_v62, %v3526_v21  ;;  %v8451_v7 = vld [vmem:[%s12009_s3 + $0x1d] ss:$0 sm:$0xff]  ;;  %v8460_v58 = vld [vmem:[%s12009_s3 + $0x1e] ss:$0 sm:$0xff] }
 0x36e   : > { %v3902_v2 = vadd.f32 %v3870_v30, %v3825_v57  ;;  %v3903_v45 = vadd.f32 %v3871_v31, %v3826_v51  ;;  %12640 = vst [vmem:[#allocation16_spill] sm:$0xff] %v8451_v7  ;;  %v4101_v8 = vmul.f32 %v8451_v7, %v8196_v49  ;;  %v4102_v11 = vmul.f32 %v8451_v7, %v8208_v23  ;;  %v8471_v7 = vld [vmem:[%s12009_s3] ss:$0 sm:$0xff] }
 0x36f   : > { %12641 = vst [vmem:[#allocation10_spill] sm:$0xff] %v8460_v58  ;;  %v4178_v62 = vmul.f32 %v8460_v58, %v8235_v19  ;;  %v4179_v51 = vmul.f32 %v8460_v58, %v8231_v15  ;;  %v3671_v30 = vadd.f32 %v3639_v47, %v3602_v55  ;;  %v3672_v31 = vadd.f32 %v3640_v60, %v3603_v33 }
 0x370   : > { %v3979_v43 = vadd.f32 %v3947_v40, %v3902_v2  ;;  %v3980_v21 = vadd.f32 %v3948_v61, %v3903_v45  ;;  %v1522_v57 = vrot.slane %v8446_v27, 1  ;;  %v12156_v10 = vrot.slane %v8444_v3, 1 }
 0x371   : > { %v1592_v53 = vmul.f32 %v8471_v7, %v8039_v32  ;;  %v1593_v38 = vmul.f32 %v8471_v7, %v8053_v37  ;;  %v3703_v58 = vadd.f32 %v3671_v30, %v3095_v35  ;;  %v3704_v47 = vadd.f32 %v3672_v31, %v3096_v14 }
 0x372   : > { %v4056_v60 = vadd.f32 %v4024_v54, %v3979_v43  ;;  %v4057_v40 = vadd.f32 %v4025_v9, %v3980_v21  ;;  %v8481_v61 = vsel %vm1545_vm1, %v1522_v57, %v12156_v10  ;;  %v12642_v55 = vrot.slane %v8017_v48, 1  ;;  %v8494_v54 = vld [vmem:[%s12009_s3 + $0x1] ss:$0 sm:$0xff] }
 0x373   : > { %v1630_v32 = vrot.slane %v8446_v27, 2  ;;  %v12154_v2 = vrot.slane %v8444_v3, 2  ;;  %v1698_v9 = vmul.f32 %v8494_v54, %v8076_v34  ;;  %v1699_v45 = vmul.f32 %v8494_v54, %v8072_v17 }
 0x374   : > { %v8487_v33 = vsel %vm1545_vm1, %v12642_v55, %v1522_v57  ;;  %v4133_v35 = vadd.f32 %v4101_v8, %v4056_v60  ;;  %v4134_v14 = vadd.f32 %v4102_v11, %v4057_v40  ;;  %v12643_v8 = vrot.slane %v8017_v48, 2 }
 0x375   : > { %v8504_v30 = vsel %vm1651_vm2, %v1630_v32, %v12154_v2  ;;  %v1768_v31 = vrot.slane %v8446_v27, 3  ;;  %v12153_v43 = vrot.slane %v8444_v3, 3  ;;  %v1730_v57 = vadd.f32 %v1698_v9, %v1592_v53 }
 0x376   : > { %v8510_v11 = vsel %vm1651_vm2, %v12643_v8, %v1630_v32  ;;  %v4210_v34 = vadd.f32 %v4178_v62, %v4133_v35  ;;  %v4211_v21 = vadd.f32 %v4179_v51, %v4134_v14  ;;  %v1731_v60 = vadd.f32 %v1699_v45, %v1593_v38  ;;  %v8529_v8 = vld [vmem:[%s12009_s3 + $0x2] ss:$0 sm:$0xff] }
 0x377   : > { %v8518_v40 = vsel %vm1789_vm3, %v1768_v31, %v12153_v43  ;;  %v12644_v55 = vrot.slane %v8017_v48, 3  ;;  %12645 = vst [vmem:[#allocation17_spill] sm:$0xff] %v8529_v8  ;;  %v1836_v38 = vmul.f32 %v8529_v8, %v8104_v12  ;;  %v1837_v53 = vmul.f32 %v8529_v8, %v8115_v24 }
 0x378   : > { %v4242_v62 = vadd.f32 %v4210_v34, %v3703_v58  ;;  %v4243_v51 = vadd.f32 %v4211_v21, %v3704_v47  ;;  %v1906_v35 = vrot.slane %v8446_v27, 4  ;;  %v12152_v14 = vrot.slane %v8444_v3, 4  ;;  %v8549_v58 = vld [vmem:[%s12007_s1 + $0x4] ss:$0 sm:$0xff] }
 0x379   : > { %v8524_v32 = vsel %vm1789_vm3, %v12644_v55, %v1768_v31  ;;  %v1868_v9 = vadd.f32 %v1836_v38, %v1730_v57  ;;  %v1869_v45 = vadd.f32 %v1837_v53, %v1731_v60  ;;  %v8540_v31 = vld [vmem:[%s12009_s3 + $0x3] ss:$0 sm:$0xff]  ;;  %12647 = vst [vmem:[#allocation18_spill] sm:$0xff] %v8549_v58  ;;  %v2044_v53 = vrot.slane %v8446_v27, 5 }
 0x37a   : > { %12646 = vst [vmem:[#allocation13_spill] sm:$0xff] %v8540_v31  ;;  %v1974_v55 = vmul.f32 %v8540_v31, %v8154_v4  ;;  %v1975_v12 = vmul.f32 %v8540_v31, %v8150_v28  ;;  %v4278_v47 = vadd.f32 %v8549_v58, %v4242_v62  ;;  %v4279_v34 = vadd.f32 %v8549_v58, %v4243_v51  ;;  %v8570_v51 = vld [vmem:[%s12007_s1 + $0x5] ss:$0 sm:$0xff] }
 0x37b   : > { %v8557_v21 = vsel %vm1927_vm4, %v1906_v35, %v12152_v14  ;;  %v12648_v4 = vrot.slane %v8017_v48, 4  ;;  %v12155_v62 = vrot.slane %v8444_v3, 5  ;;  %12649 = vst [vmem:[#allocation19_spill] sm:$0xff] %v8570_v51  ;;  %v2579_v31 = vmul.f32 %v8260_v29, %v8072_v17 }
 0x37c   : > { %v2006_v60 = vadd.f32 %v1974_v55, %v1868_v9  ;;  %v2007_v38 = vadd.f32 %v1975_v12, %v1869_v45  ;;  %v4314_v14 = vmul.f32 %v8570_v51, %v4278_v47  ;;  %v4315_v43 = vmul.f32 %v8570_v51, %v4279_v34 }
 0x37d   : > { %v8563_v57 = vsel %vm1927_vm4, %v12648_v4, %v1906_v35  ;;  %v8577_v35 = vld [vmem:[%s12009_s3 + $0x4] ss:$0 sm:$0xff]  ;;  %v8587_v55 = vsel %vm2065_vm5, %v2044_v53, %v12155_v62  ;;  %v12651_v12 = vrot.slane %v8017_v48, 5  ;;  %v2182_v34 = vrot.slane %v8446_v27, 6 }
 0x37e   : > { %12650 = vst [vmem:[#allocation20_spill] sm:$0xff] %v8577_v35  ;;  %v2112_v9 = vmul.f32 %v8577_v35, %v8167_v50  ;;  %v2113_v45 = vmul.f32 %v8577_v35, %v8183_v63  ;;  %v12161_v4 = vrot.slane %v8444_v3, 6  ;;  %v8600_v50 = vld [vmem:[%s12007_s1 + $0x6] ss:$0 sm:$0xff]  ;;  %v2810_v17 = vmul.f32 %v8291_v36, %v8183_v63 }
 0x37f   : > { %v8593_v47 = vsel %vm2065_vm5, %v12651_v12, %v2044_v53  ;;  %12652 = vst [vmem:[#allocation21_spill] sm:$0xff] %v8600_v50  ;;  %v8603_v2 = vadd.f32 %v8600_v50, %v4314_v14  ;;  %v8606_v62 = vadd.f32 %v8600_v50, %v4315_v43  ;;  %v12653_v12 = vrot.slane %v8017_v48, 6  ;;  %v8623_v14 = vld [vmem:[%s12009_s3 + $0x5] ss:$0 sm:$0xff]  ;;  %v8636_v50 = vld [vmem:[%s12009_s3 + $0x6] ss:$0 sm:$0xff] }
 0x380   : > { %v2144_v10 = vadd.f32 %v2112_v9, %v2006_v60  ;;  %v2145_v51 = vadd.f32 %v2113_v45, %v2007_v38  ;;  %v8612_v53 = vsel %vm2203_vm6, %v2182_v34, %v12161_v4  ;;  %12654 = vst [vmem:[#allocation22_spill] sm:$0xff] %v8623_v14  ;;  %v2250_v43 = vmul.f32 %v8623_v14, %v8200_v13 }
 0x381   : > { %v8618_v58 = vsel %vm2203_vm6, %v12653_v12, %v2182_v34  ;;  %v2251_v60 = vmul.f32 %v8623_v14, %v8196_v49  ;;  %v5122_v38 = vmul.f32 -1.442695, %v8603_v2  ;;  %v5123_v9 = vmul.f32 -1.442695, %v8606_v62  ;;  %12655 = vst [vmem:[#allocation23_spill] sm:$0xff] %v8636_v50 }
 0x382   : > { %v2320_v45 = vrot.slane %v8446_v27, 7  ;;  %v12170_v34 = vrot.slane %v8444_v3, 7  ;;  %v2282_v12 = vadd.f32 %v2250_v43, %v2144_v10  ;;  %v2388_v13 = vmul.f32 %v8636_v50, %v8221_v25 }
 0x383   : > { %v2283_v4 = vadd.f32 %v2251_v60, %v2145_v51  ;;  %v2389_v14 = vmul.f32 %v8636_v50, %v8235_v19  ;;  %5572 = vpow2.f32 %v5122_v38  ;;  %v12656_v10 = vrot.slane %v8017_v48, 7 }
 0x384   : > { %v8646_v35 = vsel %vm2341_vm7, %v2320_v45, %v12170_v34  ;;  %v2457_v43 = vmul.f32 %v8242_v41, %v8015_v5  ;;  %5574 = vpow2.f32 %v5123_v9  ;;  %v2420_v25 = vadd.f32 %v2388_v13, %v2282_v12 }
 0x385   : > { %v8652_v51 = vsel %vm2341_vm7, %v12656_v10, %v2320_v45  ;;  %v2421_v60 = vadd.f32 %v2389_v14, %v2283_v4  ;;  %v2458_v38 = vmul.f32 %v8242_v41, %v8024_v52  ;;  %v2534_v50 = vmul.f32 %v8251_v0, %v8053_v37 }
 0x386   : > { %v2535_v34 = vmul.f32 %v8251_v0, %v8049_v56  ;;  %v2580_v45 = vmul.f32 %v8260_v29, %v8087_v16  ;;  %v2489_v10 = vadd.f32 %v2457_v43, %v2420_v25  ;;  %v2656_v4 = vmul.f32 %v8269_v39, %v8115_v24 }
 0x387   : > { %v2490_v5 = vadd.f32 %v2458_v38, %v2421_v60  ;;  %v2657_v14 = vmul.f32 %v8269_v39, %v8125_v6  ;;  %v2611_v9 = vadd.f32 %v2579_v31, %v2534_v50  ;;  %v2733_v37 = vmul.f32 %v8278_v59, %v8150_v28  ;;  %v12657_v38 = vld [vmem:[#allocation9_spill] sm:$0xff] }
 0x388   : > { %v2612_v12 = vadd.f32 %v2580_v45, %v2535_v34  ;;  %v2734_v13 = vmul.f32 %v8278_v59, %v8146_v20  ;;  %v2811_v43 = vmul.f32 %v8291_v36, %v8179_v1  ;;  %v2887_v24 = vmul.f32 %v8300_v46, %v8196_v49 }
 0x389   : > { %v2888_v25 = vmul.f32 %v8300_v46, %v8208_v23  ;;  %v2688_v31 = vadd.f32 %v2656_v4, %v2611_v9  ;;  %v2964_v28 = vmul.f32 %v8308_v42, %v8235_v19  ;;  %v2965_v34 = vmul.f32 %v8308_v42, %v8231_v15  ;;  %v12658_v9 = vld [vmem:[#allocation5_spill] sm:$0xff]  ;;  %v12659_v42 = vld [vmem:[#allocation36_spill] sm:$0xff]  ;;  %v12660_v46 = vld [vmem:[#allocation11_spill] sm:$0xff] }
 0x38a   : > { %v2689_v50 = vadd.f32 %v2657_v14, %v2612_v12  ;;  %v3033_v63 = vmul.f32 %v8316_v44, %v8024_v52  ;;  %v3034_v60 = vmul.f32 %v8316_v44, %v8017_v48  ;;  %v3142_v49 = vmul.f32 %v12657_v38, %v8049_v56 }
 0x38b   : > { %v3143_v45 = vmul.f32 %v12657_v38, %v8487_v33  ;;  %v2765_v4 = vadd.f32 %v2733_v37, %v2688_v31  ;;  %v3187_v19 = vmul.f32 %v12658_v9, %v8087_v16  ;;  %v3188_v12 = vmul.f32 %v12658_v9, %v8510_v11 }
 0x38c   : > { %v2766_v14 = vadd.f32 %v2734_v13, %v2689_v50  ;;  %v3264_v52 = vmul.f32 %v12659_v42, %v8125_v6  ;;  %v3265_v44 = vmul.f32 %v12659_v42, %v8524_v32  ;;  %v3341_v36 = vmul.f32 %v12660_v46, %v8146_v20 }
 0x38d   : > { %v3342_v38 = vmul.f32 %v12660_v46, %v8563_v57  ;;  %v5573_v37 = vpop.eup %5572  ;;  %v2842_v13 = vadd.f32 %v2810_v17, %v2765_v4  ;;  %v3219_v50 = vadd.f32 %v3187_v19, %v3142_v49  ;;  %v3220_v59 = vadd.f32 %v3188_v12, %v3143_v45  ;;  %v12661_v49 = vld [vmem:[#allocation14_spill] sm:$0xff] }
 0x38e   : > { %v2843_v31 = vadd.f32 %v2811_v43, %v2766_v14  ;;  %v5575_v39 = vpop.eup %5574  ;;  %v4478_v29 = vadd.f32 1.0, %v5573_v37  ;;  %v3418_v9 = vmul.f32 %v8363_v18, %v8179_v1  ;;  %v3419_v0 = vmul.f32 %v8363_v18, %v8593_v47 }
 0x38f   : > { %v3495_v42 = vmul.f32 %v8372_v26, %v8208_v23  ;;  %v4479_v41 = vadd.f32 1.0, %v5575_v39  ;;  %v2919_v20 = vadd.f32 %v2887_v24, %v2842_v13  ;;  %v3296_v46 = vadd.f32 %v3264_v52, %v3219_v50  ;;  %v12662_v39 = vld [vmem:[#allocation38_spill] sm:$0xff] }
 0x390   : > { %v2920_v8 = vadd.f32 %v2888_v25, %v2843_v31  ;;  %5576 = vrcp.f32 %v4478_v29  ;;  %v3297_v17 = vadd.f32 %v3265_v44, %v3220_v59  ;;  %v3496_v43 = vmul.f32 %v8372_v26, %v8618_v58  ;;  %v12663_v52 = vld [vmem:[#allocation30_spill] sm:$0xff] }
 0x391   : > { %v3572_v45 = vmul.f32 %v12661_v49, %v8231_v15  ;;  %5578 = vrcp.f32 %v4479_v41  ;;  %v2996_v4 = vadd.f32 %v2964_v28, %v2919_v20  ;;  %v3373_v19 = vadd.f32 %v3341_v36, %v3296_v46  ;;  %v12664_v36 = vld [vmem:[#allocation32_spill] sm:$0xff] }
 0x392   : > { %v2997_v14 = vadd.f32 %v2965_v34, %v2920_v8  ;;  %v3374_v12 = vadd.f32 %v3342_v38, %v3297_v17  ;;  %v3573_v37 = vmul.f32 %v12661_v49, %v8652_v51  ;;  %v3641_v24 = vmul.f32 %v12662_v39, %v8017_v48 }
 0x393   : > { %v3642_v29 = vmul.f32 %v12662_v39, %v8446_v27  ;;  %v3065_v59 = vadd.f32 %v3033_v63, %v2996_v4  ;;  %v3450_v25 = vadd.f32 %v3418_v9, %v3373_v19  ;;  %v3750_v13 = vmul.f32 %v12663_v52, %v8487_v33  ;;  %v12665_v63 = vld [vmem:[#allocation15_spill] sm:$0xff]  ;;  %v12666_v4 = vld [vmem:[#allocation12_spill] sm:$0xff] }
 0x394   : > { %v3066_v44 = vadd.f32 %v3034_v60, %v2997_v14  ;;  %v3451_v41 = vadd.f32 %v3419_v0, %v3374_v12  ;;  %v3751_v20 = vmul.f32 %v12663_v52, %v8481_v61  ;;  %v3795_v46 = vmul.f32 %v12664_v36, %v8510_v11 }
 0x395   : > { %v3796_v8 = vmul.f32 %v12664_v36, %v8504_v30  ;;  %v3097_v28 = vadd.f32 %v3065_v59, %v2489_v10  ;;  %v3527_v38 = vadd.f32 %v3495_v42, %v3450_v25  ;;  %v3872_v60 = vmul.f32 %v12665_v63, %v8524_v32  ;;  %v12667_v10 = vld [vmem:[#allocation34_spill] sm:$0xff] }
 0x396   : > { %v3098_v34 = vadd.f32 %v3066_v44, %v2490_v5  ;;  %v3528_v9 = vadd.f32 %v3496_v43, %v3451_v41  ;;  %v3827_v31 = vadd.f32 %v3795_v46, %v3750_v13  ;;  %v3873_v0 = vmul.f32 %v12665_v63, %v8518_v40  ;;  %v8742_v44 = vld [vmem:[#allocation2 + $0xa0] sm:$0xff] }
 0x397   : > { %v3828_v50 = vadd.f32 %v3796_v8, %v3751_v20  ;;  %v3604_v17 = vadd.f32 %v3572_v45, %v3527_v38  ;;  %v3949_v14 = vmul.f32 %v12666_v4, %v8563_v57  ;;  %v3950_v19 = vmul.f32 %v12666_v4, %v8557_v21  ;;  %v12668_v45 = vld [vmem:[#allocation16_spill] sm:$0xff]  ;;  %v12669_v20 = vld [vmem:[#allocation10_spill] sm:$0xff] }
 0x398   : > { %v4026_v5 = vmul.f32 %v12667_v10, %v8593_v47  ;;  %v3605_v42 = vadd.f32 %v3573_v37, %v3528_v9  ;;  %v3904_v12 = vadd.f32 %v3872_v60, %v3827_v31  ;;  %v4027_v43 = vmul.f32 %v12667_v10, %v8587_v55 }
 0x399   : > { %v3905_v59 = vadd.f32 %v3873_v0, %v3828_v50  ;;  %v3673_v25 = vadd.f32 %v3641_v24, %v3604_v17  ;;  %v4103_v13 = vmul.f32 %v12668_v45, %v8618_v58  ;;  %v4104_v41 = vmul.f32 %v12668_v45, %v8612_v53 }
 0x39a   : > { %v4180_v46 = vmul.f32 %v12669_v20, %v8652_v51  ;;  %v5577_v8 = vpop.eup %5576  ;;  %v3674_v38 = vadd.f32 %v3642_v29, %v3605_v42  ;;  %v3981_v37 = vadd.f32 %v3949_v14, %v3904_v12  ;;  %v4181_v9 = vmul.f32 %v12669_v20, %v8646_v35 }
 0x39b   : > { %v3982_v60 = vadd.f32 %v3950_v19, %v3905_v59  ;;  %v5579_v31 = vpop.eup %5578  ;;  %v4574_v50 = vmul.f32 %v5577_v8, %v8603_v2  ;;  %v3705_v24 = vadd.f32 %v3673_v25, %v3097_v28  ;;  %v1524_v0 = vrot.slane %v8742_v44, 1  ;;  %v12672_v25 = vld [vmem:[#allocation17_spill] sm:$0xff] }
 0x39c   : > { %v1594_v17 = vmul.f32 %v8471_v7, %v8049_v56  ;;  %v4575_v45 = vmul.f32 %v5579_v31, %v8606_v62  ;;  %v3706_v10 = vadd.f32 %v3674_v38, %v3098_v34  ;;  %v4058_v4 = vadd.f32 %v4026_v5, %v3981_v37 }
 0x39d   : > { %v4059_v63 = vadd.f32 %v4027_v43, %v3982_v60  ;;  %v12670_v29 = vrot.slane %v8444_v3, 1  ;;  %v1595_v2 = vmul.f32 %v8471_v7, %v8487_v33  ;;  %v12205_v28 = vrot.slane %v8742_v44, 2  ;;  %v12675_v60 = vld [vmem:[#allocation13_spill] sm:$0xff] }
 0x39e   : > { %v1700_v56 = vmul.f32 %v8494_v54, %v8087_v16  ;;  %v4602_v62 = vpack.c.bf16 %v4575_v45, %v4574_v50  ;;  %v4135_v34 = vadd.f32 %v4103_v13, %v4058_v4  ;;  %v1701_v5 = vmul.f32 %v8494_v54, %v8510_v11 }
 0x39f   : > { %v8763_v14 = vsel %vm1545_vm1, %v12670_v29, %v1524_v0  ;;  %v4136_v19 = vadd.f32 %v4104_v41, %v4059_v63  ;;  %v12671_v42 = vrot.slane %v8444_v3, 2  ;;  %v12204_v43 = vrot.slane %v8742_v44, 3 }
 0x3a0   : > { %v1732_v59 = vadd.f32 %v1700_v56, %v1594_v17  ;;  %v1838_v16 = vmul.f32 %v12672_v25, %v8125_v6  ;;  %5305 = vmatprep.mubr.msk.bf16.mxu0 %vm269_vm0, %v4602_v62  ;;  %v4212_v63 = vadd.f32 %v4180_v46, %v4135_v34  ;;  %v1733_v45 = vadd.f32 %v1701_v5, %v1595_v2  ;;  %v12674_v6 = vld [vmem:[#allocation28_spill] sm:$0xff] }
 0x3a1   : > { %v8778_v12 = vsel %vm1651_vm2, %v12671_v42, %v12205_v28  ;;  %v4213_v4 = vadd.f32 %v4181_v9, %v4136_v19  ;;  %v1839_v13 = vmul.f32 %v12672_v25, %v8524_v32  ;;  %v12673_v41 = vrot.slane %v8444_v3, 3  ;;  %v12677_v34 = vld [vmem:[#allocation20_spill] sm:$0xff]  ;;  %v12688_v28 = vld [vmem:[#allocation6_spill] sm:$0xff] }
 0x3a2   : > { %v1870_v38 = vadd.f32 %v1838_v16, %v1732_v59  ;;  %v12202_v37 = vrot.slane %v8742_v44, 4  ;;  %v1976_v31 = vmul.f32 %v12675_v60, %v12674_v6  ;;  %v4244_v46 = vadd.f32 %v4212_v63, %v3705_v24  ;;  %v12678_v24 = vld [vmem:[#allocation18_spill] sm:$0xff] }
 0x3a3   : > { %v8792_v8 = vsel %vm1789_vm3, %v12673_v41, %v12204_v43  ;;  %v4245_v9 = vadd.f32 %v4213_v4, %v3706_v10  ;;  %v1871_v50 = vadd.f32 %v1839_v13, %v1733_v45  ;;  %v1977_v17 = vmul.f32 %v12675_v60, %v8563_v57  ;;  %v12680_v13 = vld [vmem:[#allocation22_spill] sm:$0xff]  ;;  %v12681_v41 = vld [vmem:[#allocation19_spill] sm:$0xff] }
 0x3a4   : > { %v12676_v29 = vrot.slane %v8444_v3, 4  ;;  %v2008_v56 = vadd.f32 %v1976_v31, %v1870_v38  ;;  %v2046_v62 = vrot.slane %v8742_v44, 5  ;;  %v2114_v19 = vmul.f32 %v12677_v34, %v8179_v1 }
 0x3a5   : > { %v4280_v10 = vadd.f32 %v12678_v24, %v4244_v46  ;;  %v4281_v5 = vadd.f32 %v12678_v24, %v4245_v9  ;;  %v2009_v42 = vadd.f32 %v1977_v17, %v1871_v50  ;;  %v2115_v59 = vmul.f32 %v12677_v34, %v8593_v47  ;;  %v8827_v9 = vld [vmem:[#allocation2 + $0xa8] sm:$0xff] }
 0x3a6   : > { %v8805_v2 = vsel %vm1927_vm4, %v12676_v29, %v12202_v37  ;;  %v12679_v16 = vrot.slane %v8444_v3, 5  ;;  %v2146_v4 = vadd.f32 %v2114_v19, %v2008_v56  ;;  %v12203_v45 = vrot.slane %v8742_v44, 6  ;;  %12682 = vst [vmem:[#allocation24_spill] sm:$0xff] %v8827_v9  ;;  %v12684_v56 = vld [vmem:[#allocation23_spill] sm:$0xff] }
 0x3a7   : > { %v2252_v1 = vmul.f32 %v12680_v13, %v8208_v23  ;;  %v4316_v38 = vmul.f32 %v12681_v41, %v4280_v10  ;;  %v4317_v6 = vmul.f32 %v12681_v41, %v4281_v5  ;;  %v2147_v31 = vadd.f32 %v2115_v59, %v2009_v42  ;;  %v12685_v10 = vld [vmem:[#allocation21_spill] sm:$0xff] }
 0x3a8   : > { %v8818_v63 = vsel %vm2065_vm5, %v12679_v16, %v2046_v62  ;;  %v2253_v46 = vmul.f32 %v12680_v13, %v8618_v58  ;;  %v12683_v50 = vrot.slane %v8444_v3, 6  ;;  %v2322_v23 = vrot.slane %v8742_v44, 7 }
 0x3a9   : > { %v2284_v29 = vadd.f32 %v2252_v1, %v2146_v4  ;;  %v2390_v19 = vmul.f32 %v12684_v56, %v8231_v15  ;;  %v8841_v5 = vadd.f32 %v12685_v10, %v4316_v38  ;;  %v8844_v42 = vadd.f32 %v12685_v10, %v4317_v6 }
 0x3aa   : > { %v8835_v17 = vsel %vm2203_vm6, %v12683_v50, %v12203_v45  ;;  %v2285_v59 = vadd.f32 %v2253_v46, %v2147_v31  ;;  %v2391_v16 = vmul.f32 %v12684_v56, %v8652_v51  ;;  %v12686_v37 = vrot.slane %v8444_v3, 7  ;;  %v12687_v50 = vld [vmem:[#allocation29_spill] sm:$0xff] }
 0x3ab   : > { %v2422_v1 = vadd.f32 %v2390_v19, %v2284_v29  ;;  %v2459_v15 = vmul.f32 %v12687_v50, %v8017_v48  ;;  %v2460_v38 = vmul.f32 %v12687_v50, %v8446_v27  ;;  %v5124_v6 = vmul.f32 -1.442695, %v8841_v5 }
 0x3ac   : > { %v8852_v4 = vsel %vm2341_vm7, %v12686_v37, %v2322_v23  ;;  %v5125_v31 = vmul.f32 -1.442695, %v8844_v42  ;;  %v2423_v46 = vadd.f32 %v2391_v16, %v2285_v59  ;;  %v12206_v45 = vrot.slane %v8827_v9, 1  ;;  %v12689_v16 = vld [vmem:[#allocation31_spill] sm:$0xff] }
 0x3ad   : > { %v8861_v43 = vadd.f32 %v2459_v15, %v2422_v1  ;;  %v2536_v37 = vmul.f32 %v12688_v28, %v8487_v33  ;;  %v2537_v29 = vmul.f32 %v12688_v28, %v8481_v61  ;;  %v12209_v48 = vrot.slane %v8827_v9, 2 }
 0x3ae   : > { %5580 = vpow2.f32 %v5124_v6  ;;  %v8868_v19 = vadd.f32 %v2460_v38, %v2423_v46  ;;  %v8876_v59 = vsel %vm1545_vm1, %v1524_v0, %v12206_v45  ;;  %v2581_v1 = vmul.f32 %v12689_v16, %v8510_v11  ;;  %v12693_v46 = vld [vmem:[#allocation26_spill] sm:$0xff] }
 0x3af   : > { %5582 = vpow2.f32 %v5125_v31  ;;  %v8882_v33 = vmul.f32 %v12688_v28, %v8876_v59  ;;  %v12691_v15 = vrot.slane %v8742_v44, 2  ;;  %v2582_v0 = vmul.f32 %v12689_v16, %v8504_v30 }
 0x3b0   : > { %v2613_v11 = vadd.f32 %v2581_v1, %v2536_v37  ;;  %v12212_v31 = vrot.slane %v8827_v9, 3  ;;  %v2658_v45 = vmul.f32 %v12693_v46, %v8524_v32  ;;  %v2659_v41 = vmul.f32 %v12693_v46, %v8518_v40 }
 0x3b1   : > { %12690 = vst [vmem:[#allocation25_spill] sm:$0xff] %v8882_v33  ;;  %v8890_v38 = vsel %vm1651_vm2, %v12691_v15, %v12209_v48  ;;  %v2614_v10 = vadd.f32 %v2582_v0, %v2537_v29  ;;  %v12694_v48 = vld [vmem:[#allocation4_spill] sm:$0xff]  ;;  %v12695_v24 = vrot.slane %v8742_v44, 3  ;;  %v12213_v29 = vrot.slane %v8827_v9, 5 }
 0x3b2   : > { %v8896_v6 = vmul.f32 %v12689_v16, %v8890_v38  ;;  %v2735_v33 = vmul.f32 %v12694_v48, %v8563_v57  ;;  %v2690_v1 = vadd.f32 %v2658_v45, %v2613_v11  ;;  %v2736_v32 = vmul.f32 %v12694_v48, %v8557_v21 }
 0x3b3   : > { %v8912_v37 = vsel %vm1789_vm3, %v12695_v24, %v12212_v31  ;;  %v2691_v15 = vadd.f32 %v2659_v41, %v2614_v10  ;;  %v12698_v57 = vrot.slane %v8827_v9, 4  ;;  %v12700_v24 = vld [vmem:[#allocation7_spill] sm:$0xff]  ;;  %v8939_v41 = vsel %vm2065_vm5, %v2046_v62, %v12213_v29  ;;  %v12705_v29 = vld [vmem:[#allocation33_spill] sm:$0xff] }
 0x3b4   : > { %12692 = vst [vmem:[#allocation10_spill] sm:$0xff] %v8896_v6  ;;  %12696 = vst [vmem:[#allocation17_spill] sm:$0xff] %v8912_v37  ;;  %v8919_v0 = vmul.f32 %v12693_v46, %v8912_v37  ;;  %v12699_v6 = vrot.slane %v8742_v44, 4  ;;  %v2812_v45 = vmul.f32 %v12700_v24, %v8593_v47  ;;  %v2767_v31 = vadd.f32 %v2735_v33, %v2690_v1 }
 0x3b5   : > { %12702 = vst [vmem:[#allocation20_spill] sm:$0xff] %v8939_v41  ;;  %v2813_v10 = vmul.f32 %v12700_v24, %v8587_v55  ;;  %v12216_v47 = vrot.slane %v8827_v9, 6 }
 0x3b6   : > { %12697 = vst [vmem:[#allocation28_spill] sm:$0xff] %v8919_v0  ;;  %v8927_v16 = vsel %vm1927_vm4, %v12699_v6, %v12698_v57  ;;  %v2768_v0 = vadd.f32 %v2736_v32, %v2691_v15  ;;  %v8945_v6 = vmul.f32 %v12700_v24, %v8939_v41  ;;  %v12704_v57 = vld [vmem:[#allocation8_spill] sm:$0xff]  ;;  %v2844_v33 = vadd.f32 %v2812_v45, %v2767_v31  ;;  %v12708_v31 = vld [vmem:[#allocation35_spill] sm:$0xff] }
 0x3b7   : > { %v8933_v11 = vmul.f32 %v12694_v48, %v8927_v16  ;;  %v2890_v1 = vmul.f32 %v12704_v57, %v8612_v53  ;;  %v2966_v48 = vmul.f32 %v12705_v29, %v8652_v51  ;;  %v12706_v15 = vrot.slane %v8742_v44, 6 }
 0x3b8   : > { %12703 = vst [vmem:[#allocation22_spill] sm:$0xff] %v8945_v6  ;;  %v2845_v46 = vadd.f32 %v2813_v10, %v2768_v0  ;;  %v3035_v45 = vmul.f32 %v12708_v31, %v8446_v27  ;;  %v5581_v6 = vpop.eup %5580  ;;  %v12710_v0 = vrot.slane %v8827_v9, 7 }
 0x3b9   : > { %12701 = vst [vmem:[#allocation13_spill] sm:$0xff] %v8933_v11  ;;  %v2889_v11 = vmul.f32 %v12704_v57, %v8618_v58  ;;  %v8961_v32 = vsel %vm2203_vm6, %v12706_v15, %v12216_v47  ;;  %v2967_v58 = vmul.f32 %v12705_v29, %v8646_v35  ;;  %v3036_v15 = vmul.f32 %v12708_v31, %v8444_v3  ;;  %v5583_v47 = vpop.eup %5582 }
 0x3ba   : > { %12707 = vst [vmem:[#allocation23_spill] sm:$0xff] %v8961_v32  ;;  %v8969_v62 = vmul.f32 %v12704_v57, %v8961_v32  ;;  %v8975_v10 = vsel %vm2341_vm7, %v2322_v23, %v12710_v0  ;;  %v4480_v24 = vadd.f32 1.0, %v5581_v6  ;;  %v2922_v28 = vadd.f32 %v2890_v1, %v2845_v46  ;;  %v12712_v57 = vld [vmem:[#allocation9_spill] sm:$0xff]  ;;  %v12714_v6 = vld [vmem:[#allocation36_spill] sm:$0xff] }
 0x3bb   : > { %v2921_v51 = vadd.f32 %v2889_v11, %v2844_v33  ;;  %v8981_v27 = vmul.f32 %v12705_v29, %v8975_v10  ;;  %v4481_v11 = vadd.f32 1.0, %v5583_v47  ;;  %v3145_v22 = vmul.f32 %v12712_v57, %v8763_v14  ;;  %v12713_v23 = vld [vmem:[#allocation5_spill] sm:$0xff] }
 0x3bc   : > { %12709 = vst [vmem:[#allocation29_spill] sm:$0xff] %v8969_v62  ;;  %v3144_v62 = vmul.f32 %v12712_v57, %v8481_v61  ;;  %v3189_v0 = vmul.f32 %v12713_v23, %v8504_v30  ;;  %5584 = vrcp.f32 %v4480_v24  ;;  %v2999_v9 = vadd.f32 %v2967_v58, %v2922_v28  ;;  %v12715_v57 = vld [vmem:[#allocation11_spill] sm:$0xff] }
 0x3bd   : > { %12711 = vst [vmem:[#allocation39_spill] sm:$0xff] %v8981_v27  ;;  %v2998_v33 = vadd.f32 %v2966_v48, %v2921_v51  ;;  %v3190_v46 = vmul.f32 %v12713_v23, %v8778_v12  ;;  %v3266_v1 = vmul.f32 %v12714_v6, %v8518_v40  ;;  %5586 = vrcp.f32 %v4481_v11 }
 0x3be   : > { %v3221_v31 = vadd.f32 %v3189_v0, %v3144_v62  ;;  %v3267_v48 = vmul.f32 %v12714_v6, %v8792_v8  ;;  %v3068_v47 = vadd.f32 %v3036_v15, %v2999_v9  ;;  %v3343_v29 = vmul.f32 %v12715_v57, %v8557_v21 }
 0x3bf   : > { %v3067_v27 = vadd.f32 %v3035_v45, %v2998_v33  ;;  %v3222_v51 = vadd.f32 %v3190_v46, %v3145_v22  ;;  %v3344_v28 = vmul.f32 %v12715_v57, %v8805_v2  ;;  %v3420_v23 = vmul.f32 %v8363_v18, %v8587_v55 }
 0x3c0   : > { %v3298_v58 = vadd.f32 %v3266_v1, %v3221_v31  ;;  %v3421_v62 = vmul.f32 %v8363_v18, %v8818_v63  ;;  %v3100_v45 = vadd.f32 %v3068_v47, %v8868_v19  ;;  %v3497_v22 = vmul.f32 %v8372_v26, %v8612_v53  ;;  %v12716_v47 = vld [vmem:[#allocation15_spill] sm:$0xff] }
 0x3c1   : > { %v3099_v24 = vadd.f32 %v3067_v27, %v8861_v43  ;;  %v3299_v11 = vadd.f32 %v3267_v48, %v3222_v51  ;;  %v3498_v9 = vmul.f32 %v8372_v26, %v8835_v17  ;;  %v3574_v43 = vmul.f32 %v12661_v49, %v8646_v35  ;;  %v12718_v26 = vld [vmem:[#allocation34_spill] sm:$0xff] }
 0x3c2   : > { %v3375_v15 = vadd.f32 %v3343_v29, %v3298_v58  ;;  %v3575_v31 = vmul.f32 %v12661_v49, %v8852_v4  ;;  %v3643_v27 = vmul.f32 %v12662_v39, %v8444_v3  ;;  %v3644_v19 = vmul.f32 %v12662_v39, %v8742_v44 }
 0x3c3   : > { %v3376_v33 = vadd.f32 %v3344_v28, %v3299_v11  ;;  %v3752_v0 = vmul.f32 %v12663_v52, %v8763_v14  ;;  %v3753_v46 = vmul.f32 %v12663_v52, %v8876_v59  ;;  %v3797_v1 = vmul.f32 %v12664_v36, %v8778_v12  ;;  %v12717_v11 = vld [vmem:[#allocation12_spill] sm:$0xff] }
 0x3c4   : > { %v3452_v29 = vadd.f32 %v3420_v23, %v3375_v15  ;;  %v3798_v48 = vmul.f32 %v12664_v36, %v8890_v38  ;;  %v3874_v51 = vmul.f32 %v12716_v47, %v8792_v8  ;;  %v3875_v58 = vmul.f32 %v12716_v47, %v8912_v37 }
 0x3c5   : > { %v3453_v28 = vadd.f32 %v3421_v62, %v3376_v33  ;;  %v3951_v39 = vmul.f32 %v12717_v11, %v8805_v2  ;;  %v3952_v52 = vmul.f32 %v12717_v11, %v8927_v16  ;;  %v3829_v15 = vadd.f32 %v3797_v1, %v3752_v0  ;;  %v12719_v33 = vld [vmem:[#allocation16_spill] sm:$0xff] }
 0x3c6   : > { %v3529_v23 = vadd.f32 %v3497_v22, %v3452_v29  ;;  %v3830_v49 = vadd.f32 %v3798_v48, %v3753_v46  ;;  %v4028_v18 = vmul.f32 %v12718_v26, %v8818_v63  ;;  %v5585_v36 = vpop.eup %5584  ;;  %v4029_v62 = vmul.f32 %v12718_v26, %v8939_v41 }
 0x3c7   : > { %v3530_v57 = vadd.f32 %v3498_v9, %v3453_v28  ;;  %v4105_v47 = vmul.f32 %v12719_v33, %v8835_v17  ;;  %v4106_v6 = vmul.f32 %v12719_v33, %v8961_v32  ;;  %v5587_v37 = vpop.eup %5586  ;;  %v4576_v11 = vmul.f32 %v5585_v36, %v8841_v5 }
 0x3c8   : > { %v3606_v22 = vadd.f32 %v3574_v43, %v3529_v23  ;;  %v3906_v0 = vadd.f32 %v3874_v51, %v3829_v15  ;;  %v3907_v46 = vadd.f32 %v3875_v58, %v3830_v49  ;;  %v4577_v29 = vmul.f32 %v5587_v37, %v8844_v42  ;;  %v12720_v15 = vld [vmem:[#allocation6_spill] sm:$0xff] }
 0x3c9   : > { %v3607_v1 = vadd.f32 %v3575_v31, %v3530_v57  ;;  %v4182_v9 = vmul.f32 %v12669_v20, %v8852_v4  ;;  %v4183_v26 = vmul.f32 %v12669_v20, %v8975_v10  ;;  %v1596_v33 = vmul.f32 %v8471_v7, %v8481_v61 }
 0x3ca   : > { %v3675_v48 = vadd.f32 %v3643_v27, %v3606_v22  ;;  %v3983_v28 = vadd.f32 %v3951_v39, %v3906_v0  ;;  %v3984_v41 = vadd.f32 %v3952_v52, %v3907_v46  ;;  %v4603_v32 = vpack.c.bf16 %v4577_v29, %v4576_v11  ;;  %v12723_v0 = vld [vmem:[#allocation25_spill] sm:$0xff]  ;;  %v12724_v46 = vld [vmem:[#allocation10_spill] sm:$0xff] }
 0x3cb   : > { %v3676_v36 = vadd.f32 %v3644_v19, %v3607_v1  ;;  %v1597_v49 = vmul.f32 %v8471_v7, %v8763_v14  ;;  %v1702_v5 = vmul.f32 %v8494_v54, %v8504_v30  ;;  %v1703_v20 = vmul.f32 %v8494_v54, %v8778_v12 }
 0x3cc   : > { %v3707_v42 = vadd.f32 %v3675_v48, %v3099_v24  ;;  %v4060_v37 = vadd.f32 %v4028_v18, %v3983_v28  ;;  %v4061_v57 = vadd.f32 %v4029_v62, %v3984_v41  ;;  %5306 = vmatmul.mubr.msk.bf16.gmra.mrb[24].mxu0 %vm269_vm0, %v4603_v32  ;;  %v1840_v61 = vmul.f32 %v12672_v25, %v8518_v40 }
 0x3cd   : > { %v3708_v39 = vadd.f32 %v3676_v36, %v3100_v45  ;;  %v1734_v52 = vadd.f32 %v1702_v5, %v1596_v33  ;;  %v1841_v43 = vmul.f32 %v12672_v25, %v8792_v8  ;;  %v1735_v27 = vadd.f32 %v1703_v20, %v1597_v49  ;;  %v12728_v36 = vld [vmem:[#allocation28_spill] sm:$0xff] }
 0x3ce   : > { %v4137_v7 = vadd.f32 %v4105_v47, %v4060_v37  ;;  %v4138_v31 = vadd.f32 %v4106_v6, %v4061_v57  ;;  %v1978_v18 = vmul.f32 %v12675_v60, %v8557_v21  ;;  %v1979_v54 = vmul.f32 %v12675_v60, %v8805_v2  ;;  %v12729_v37 = vld [vmem:[#allocation7_spill] sm:$0xff]  ;;  %v12730_v20 = vld [vmem:[#allocation8_spill] sm:$0xff] }
 0x3cf   : > { %v1872_v30 = vadd.f32 %v1840_v61, %v1734_v52  ;;  %v2116_v41 = vmul.f32 %v12677_v34, %v8587_v55  ;;  %v2117_v32 = vmul.f32 %v12677_v34, %v8818_v63  ;;  %v1873_v45 = vadd.f32 %v1841_v43, %v1735_v27  ;;  %v12731_v52 = vld [vmem:[#allocation21_spill] sm:$0xff] }
 0x3d0   : > { %v4214_v40 = vadd.f32 %v4182_v9, %v4137_v7  ;;  %v4215_v24 = vadd.f32 %v4183_v26, %v4138_v31  ;;  %v2254_v25 = vmul.f32 %v12680_v13, %v8612_v53  ;;  %v2255_v21 = vmul.f32 %v12680_v13, %v8835_v17  ;;  %v12721_v13 = vld [vmem:[#allocation31_spill] sm:$0xff]  ;;  %v12725_v9 = vld [vmem:[#allocation26_spill] sm:$0xff]  ;;  %v9105_v61 = vld [vmem:[#allocation2 + $0xb0] sm:$0xff] }
 0x3d1   : > { %v2010_v6 = vadd.f32 %v1978_v18, %v1872_v30  ;;  %v2392_v19 = vmul.f32 %v12684_v56, %v8646_v35  ;;  %v2393_v60 = vmul.f32 %v12684_v56, %v8852_v4  ;;  %v2011_v58 = vadd.f32 %v1979_v54, %v1873_v45  ;;  %v12722_v35 = vld [vmem:[#allocation18_spill] sm:$0xff]  ;;  %v12732_v7 = vld [vmem:[#allocation13_spill] sm:$0xff] }
 0x3d2   : > { %v4246_v55 = vadd.f32 %v4214_v40, %v3707_v42  ;;  %v4247_v51 = vadd.f32 %v4215_v24, %v3708_v39  ;;  %v2461_v34 = vmul.f32 %v12687_v50, %v8444_v3  ;;  %v2462_v53 = vmul.f32 %v12687_v50, %v8742_v44  ;;  %v12726_v50 = vld [vmem:[#allocation4_spill] sm:$0xff]  ;;  %v12733_v30 = vld [vmem:[#allocation33_spill] sm:$0xff]  ;;  %v12735_v24 = vld [vmem:[#allocation22_spill] sm:$0xff] }
 0x3d3   : > { %v2148_v23 = vadd.f32 %v2116_v41, %v2010_v6  ;;  %v2538_v62 = vmul.f32 %v12720_v15, %v8763_v14  ;;  %v2583_v47 = vmul.f32 %v12721_v13, %v8778_v12  ;;  %v2149_v22 = vadd.f32 %v2117_v32, %v2011_v58  ;;  %v12727_v14 = vld [vmem:[#allocation19_spill] sm:$0xff]  ;;  %v12736_v6 = vld [vmem:[#allocation24_spill] sm:$0xff]  ;;  %v12739_v58 = vld [vmem:[#allocation5_spill] sm:$0xff] }
 0x3d4   : > { %v4282_v11 = vadd.f32 %v12722_v35, %v4246_v55  ;;  %v4283_v56 = vadd.f32 %v12722_v35, %v4247_v51  ;;  %v2616_v29 = vadd.f32 %v12724_v46, %v12723_v0  ;;  %v2660_v26 = vmul.f32 %v12725_v9, %v8792_v8 }
 0x3d5   : > { %v2286_v1 = vadd.f32 %v2254_v25, %v2148_v23  ;;  %v2615_v3 = vadd.f32 %v2583_v47, %v2538_v62  ;;  %v2737_v48 = vmul.f32 %v12726_v50, %v8805_v2  ;;  %v2287_v33 = vadd.f32 %v2255_v21, %v2149_v22 }
 0x3d6   : > { %v4318_v28 = vmul.f32 %v12727_v14, %v4282_v11  ;;  %v4319_v12 = vmul.f32 %v12727_v14, %v4283_v56  ;;  %v2693_v49 = vadd.f32 %v12728_v36, %v2616_v29  ;;  %v2814_v57 = vmul.f32 %v12729_v37, %v8818_v63  ;;  %v12734_v63 = vld [vmem:[#allocation35_spill] sm:$0xff] }
 0x3d7   : > { %v2424_v5 = vadd.f32 %v2392_v19, %v2286_v1  ;;  %v2692_v42 = vadd.f32 %v2660_v26, %v2615_v3  ;;  %v2891_v39 = vmul.f32 %v12730_v20, %v8835_v17  ;;  %v2425_v43 = vadd.f32 %v2393_v60, %v2287_v33  ;;  %v12737_v60 = vld [vmem:[#allocation9_spill] sm:$0xff]  ;;  %v12746_v3 = vld [vmem:[#allocation36_spill] sm:$0xff]  ;;  %v12747_v14 = vld [vmem:[#allocation11_spill] sm:$0xff] }
 0x3d8   : > { %v9100_v8 = vadd.f32 %v12731_v52, %v4318_v28  ;;  %v9103_v2 = vadd.f32 %v12731_v52, %v4319_v12  ;;  %v2770_v31 = vadd.f32 %v12732_v7, %v2693_v49  ;;  %v2968_v54 = vmul.f32 %v12733_v30, %v8852_v4  ;;  %v12738_v4 = vld [vmem:[#allocation29_spill] sm:$0xff]  ;;  %v12750_v20 = vld [vmem:[#allocation27_spill] sm:$0xff] }
 0x3d9   : > { %v2493_v27 = vadd.f32 %v2461_v34, %v2424_v5  ;;  %v2769_v18 = vadd.f32 %v2737_v48, %v2692_v42  ;;  %v3037_v41 = vmul.f32 %v12734_v63, %v8742_v44  ;;  %v2494_v40 = vadd.f32 %v2462_v53, %v2425_v43  ;;  %v12745_v1 = vld [vmem:[#allocation17_spill] sm:$0xff] }
 0x3da   : > { %v5126_v17 = vmul.f32 -1.442695, %v9100_v8  ;;  %v5127_v32 = vmul.f32 -1.442695, %v9103_v2  ;;  %v2847_v45 = vadd.f32 %v12735_v24, %v2770_v31  ;;  %v3038_v21 = vmul.f32 %v12734_v63, %v12736_v6 }
 0x3db   : > { %v2846_v25 = vadd.f32 %v2814_v57, %v2769_v18  ;;  %v3121_v19 = vrot.slane %v9105_v61, 1  ;;  %v3146_v55 = vmul.f32 %v12737_v60, %v8876_v59  ;;  %v3166_v44 = vrot.slane %v9105_v61, 2  ;;  %v12742_v59 = vld [vmem:[#allocation39_spill] sm:$0xff]  ;;  %v12749_v57 = vld [vmem:[#allocation20_spill] sm:$0xff] }
 0x3dc   : > { %5588 = vpow2.f32 %v5126_v17  ;;  %v2924_v51 = vadd.f32 %v12738_v4, %v2847_v45  ;;  %v3191_v34 = vmul.f32 %v12739_v58, %v8890_v38  ;;  %v12740_v53 = vrot.slane %v12736_v6, 1 }
 0x3dd   : > { %5590 = vpow2.f32 %v5127_v32  ;;  %v2923_v23 = vadd.f32 %v2891_v39, %v2846_v25  ;;  %v3243_v13 = vrot.slane %v9105_v61, 3  ;;  %v12743_v11 = vrot.slane %v12736_v6, 2 }
 0x3de   : > { %v3126_v62 = vsel %vm1545_vm1, %v12740_v53, %v3121_v19  ;;  %v3001_v47 = vadd.f32 %v12742_v59, %v2924_v51  ;;  %v3223_v56 = vadd.f32 %v3191_v34, %v3146_v55  ;;  %v12744_v46 = vrot.slane %v12736_v6, 3  ;;  %v12756_v51 = vld [vmem:[#allocation14_spill] sm:$0xff] }
 0x3df   : > { %v3147_v35 = vmul.f32 %v12737_v60, %v3126_v62  ;;  %v3171_v38 = vsel %vm1651_vm2, %v12743_v11, %v3166_v44  ;;  %v3000_v22 = vadd.f32 %v2968_v54, %v2923_v23  ;;  %v3268_v9 = vmul.f32 %v12746_v3, %v12745_v1  ;;  %v12757_v34 = vld [vmem:[#allocation38_spill] sm:$0xff] }
 0x3e0   : > { %v3192_v0 = vmul.f32 %v12739_v58, %v3171_v38  ;;  %v3248_v29 = vsel %vm1789_vm3, %v12744_v46, %v3243_v13  ;;  %v3070_v26 = vadd.f32 %v3038_v21, %v3001_v47  ;;  %v3320_v48 = vrot.slane %v9105_v61, 4  ;;  %v12758_v46 = vld [vmem:[#allocation30_spill] sm:$0xff] }
 0x3e1   : > { %v3269_v50 = vmul.f32 %v12746_v3, %v3248_v29  ;;  %v3345_v28 = vmul.f32 %v12747_v14, %v8927_v16  ;;  %v3069_v12 = vadd.f32 %v3037_v41, %v3000_v22  ;;  %v3300_v36 = vadd.f32 %v3268_v9, %v3223_v56  ;;  %v12753_v41 = vld [vmem:[#allocation23_spill] sm:$0xff]  ;;  %v9195_v56 = vld [vmem:[%s12009_s3 + $0x16] ss:$0 sm:$0xff] }
 0x3e2   : > { %v3224_v33 = vadd.f32 %v3192_v0, %v3147_v35  ;;  %v3397_v49 = vrot.slane %v9105_v61, 5  ;;  %v3102_v5 = vadd.f32 %v3070_v26, %v2494_v40  ;;  %v12748_v42 = vrot.slane %v12736_v6, 4  ;;  %v9176_v40 = vld [vmem:[#allocation2 + $0xb8] sm:$0xff]  ;;  %v12759_v26 = vld [vmem:[#allocation32_spill] sm:$0xff] }
 0x3e3   : > { %v3422_v39 = vmul.f32 %v12750_v20, %v12749_v57  ;;  %v3474_v52 = vrot.slane %v9105_v61, 6  ;;  %v3101_v43 = vadd.f32 %v3069_v12, %v2493_v27  ;;  %v3377_v31 = vadd.f32 %v3345_v28, %v3300_v36  ;;  %v12754_v27 = vld [vmem:[#allocation37_spill] sm:$0xff]  ;;  %v9212_v36 = vld [vmem:[%s12009_s3 + $0x18] ss:$0 sm:$0xff] }
 0x3e4   : > { %v3325_v37 = vsel %vm1927_vm4, %v12748_v42, %v3320_v48  ;;  %v3301_v16 = vadd.f32 %v3269_v50, %v3224_v33  ;;  %v12751_v18 = vrot.slane %v12736_v6, 5  ;;  %v12752_v54 = vrot.slane %v12736_v6, 6  ;;  %v9218_v42 = vld [vmem:[%s12009_s3 + $0x19] ss:$0 sm:$0xff] }
 0x3e5   : > { %v3346_v7 = vmul.f32 %v12747_v14, %v3325_v37  ;;  %v3499_v17 = vmul.f32 %v12754_v27, %v12753_v41  ;;  %v3551_v32 = vrot.slane %v9105_v61, 7  ;;  %v3454_v25 = vadd.f32 %v3422_v39, %v3377_v31 }
 0x3e6   : > { %v3402_v30 = vsel %vm2065_vm5, %v12751_v18, %v3397_v49  ;;  %v3479_v63 = vsel %vm2203_vm6, %v12752_v54, %v3474_v52  ;;  %v5589_v60 = vpop.eup %5588  ;;  %v12755_v55 = vrot.slane %v12736_v6, 7  ;;  %v3576_v58 = vmul.f32 %v12756_v51, %v8975_v10  ;;  %v9263_v51 = vld [vmem:[%s12009_s3 + $0x1d] ss:$0 sm:$0xff] }
 0x3e7   : > { %v3378_v24 = vadd.f32 %v3346_v7, %v3301_v16  ;;  %v3423_v45 = vmul.f32 %v12750_v20, %v3402_v30  ;;  %v3500_v21 = vmul.f32 %v12754_v27, %v3479_v63  ;;  %v3645_v23 = vmul.f32 %v12757_v34, %v12736_v6  ;;  %v5591_v59 = vpop.eup %5590  ;;  %v9228_v20 = vld [vmem:[%s12009_s3 + $0x1a] ss:$0 sm:$0xff]  ;;  %v9240_v27 = vld [vmem:[%s12009_s3 + $0x1b] ss:$0 sm:$0xff] }
 0x3e8   : > { %v3556_v4 = vsel %vm2341_vm7, %v12755_v55, %v3551_v32  ;;  %v3646_v53 = vmul.f32 %v12757_v34, %v9105_v61  ;;  %v4482_v47 = vadd.f32 1.0, %v5589_v60  ;;  %v3531_v11 = vadd.f32 %v3499_v17, %v3454_v25  ;;  %v9248_v25 = vld [vmem:[%s12009_s3 + $0x1c] ss:$0 sm:$0xff]  ;;  %v9253_v60 = vld [vmem:[#allocation2 + $0xc8] sm:$0xff] }
 0x3e9   : > { %v3455_v35 = vadd.f32 %v3423_v45, %v3378_v24  ;;  %v3577_v22 = vmul.f32 %v9195_v56, %v3556_v4  ;;  %v4483_v0 = vadd.f32 1.0, %v5591_v59  ;;  %v3729_v10 = vrot.slane %v9176_v40, 1 }
 0x3ea   : > { %v3754_v1 = vmul.f32 %v12758_v46, %v3126_v62  ;;  %v3774_v6 = vrot.slane %v9176_v40, 2  ;;  %5592 = vrcp.f32 %v4482_v47  ;;  %v3608_v9 = vadd.f32 %v3576_v58, %v3531_v11  ;;  %v9276_v47 = vld [vmem:[#allocation2 + $0xd8] sm:$0xff] }
 0x3eb   : > { %v3532_v3 = vadd.f32 %v3500_v21, %v3455_v35  ;;  %v3799_v50 = vmul.f32 %v12759_v26, %v3171_v38  ;;  %5594 = vrcp.f32 %v4483_v0  ;;  %v3734_v14 = vsel %vm1545_vm1, %v3121_v19, %v3729_v10  ;;  %v9251_v21 = vld [vmem:[#allocation2 + $0xc0] sm:$0xff]  ;;  %v9278_v35 = vld [vmem:[#allocation2 + $0xe8] sm:$0xff] }
 0x3ec   : > { %v3779_v28 = vsel %vm1651_vm2, %v3166_v44, %v3774_v6  ;;  %v3851_v12 = vrot.slane %v9176_v40, 3  ;;  %v3677_v62 = vadd.f32 %v3645_v23, %v3608_v9  ;;  %v3755_v38 = vmul.f32 %v9212_v36, %v3734_v14 }
 0x3ed   : > { %v3609_v33 = vadd.f32 %v3577_v22, %v3532_v3  ;;  %v3800_v19 = vmul.f32 %v9218_v42, %v3779_v28  ;;  %v3831_v57 = vadd.f32 %v3799_v50, %v3754_v1  ;;  %v3876_v39 = vmul.f32 %v9228_v20, %v3248_v29  ;;  %v9284_v22 = vld [vmem:[#allocation2 + $0xe0] sm:$0xff] }
 0x3ee   : > { %v3856_v44 = vsel %vm1789_vm3, %v3243_v13, %v3851_v12  ;;  %v3928_v16 = vrot.slane %v9176_v40, 4  ;;  %v3709_v31 = vadd.f32 %v3677_v62, %v3101_v43  ;;  %v3953_v29 = vmul.f32 %v9240_v27, %v3325_v37 }
 0x3ef   : > { %v3678_v7 = vadd.f32 %v3646_v53, %v3609_v33  ;;  %v3832_v18 = vadd.f32 %v3800_v19, %v3755_v38  ;;  %v3877_v54 = vmul.f32 %v9228_v20, %v3856_v44  ;;  %v3908_v41 = vadd.f32 %v3876_v39, %v3831_v57  ;;  %v9323_v39 = vld [vmem:[%s12009_s3] ss:$0 sm:$0xff] }
 0x3f0   : > { %v3933_v13 = vsel %vm1927_vm4, %v3320_v48, %v3928_v16  ;;  %v4005_v17 = vrot.slane %v9176_v40, 5  ;;  %v4030_v48 = vmul.f32 %v9248_v25, %v3402_v30  ;;  %v4082_v37 = vrot.slane %v9176_v40, 6  ;;  %v9266_v30 = vld [vmem:[#allocation2 + $0xd0] sm:$0xff]  ;;  %12761 = vst [vmem:[#allocation12_spill] sm:$0xff] %v9323_v39 }
 0x3f1   : > { %v3710_v24 = vadd.f32 %v3678_v7, %v3102_v5  ;;  %v3909_v43 = vadd.f32 %v3877_v54, %v3832_v18  ;;  %v3954_v45 = vmul.f32 %v9240_v27, %v3933_v13  ;;  %v3985_v55 = vadd.f32 %v3953_v29, %v3908_v41  ;;  %v9336_v29 = vld [vmem:[%s12007_s1 + $0x4] ss:$0 sm:$0xff] }
 0x3f2   : > { %v4010_v5 = vsel %vm2065_vm5, %v3397_v49, %v4005_v17  ;;  %v4107_v58 = vmul.f32 %v9263_v51, %v3479_v63  ;;  %v4159_v53 = vrot.slane %v9176_v40, 7  ;;  %v9273_v49 = vld [vmem:[%s12009_s3 + $0x1e] ss:$0 sm:$0xff]  ;;  %v4087_v63 = vsel %vm2203_vm6, %v3474_v52, %v4082_v37  ;;  %12762 = vst [vmem:[#allocation34_spill] sm:$0xff] %v9336_v29 }
 0x3f3   : > { %v3986_v34 = vadd.f32 %v3954_v45, %v3909_v43  ;;  %v4031_v23 = vmul.f32 %v9248_v25, %v4010_v5  ;;  %v4184_v59 = vmul.f32 %v9273_v49, %v3556_v4  ;;  %v4062_v11 = vadd.f32 %v4030_v48, %v3985_v55 }
 0x3f4   : > { %v1525_v40 = vrot.slane %v9251_v21, 1  ;;  %v1526_v0 = vrot.slane %v9253_v60, 1  ;;  %v5593_v10 = vpop.eup %5592  ;;  %v4108_v4 = vmul.f32 %v9263_v51, %v4087_v63  ;;  %v4164_v1 = vsel %vm2341_vm7, %v3551_v32, %v4159_v53 }
 0x3f5   : > { %v4063_v46 = vadd.f32 %v4031_v23, %v3986_v34  ;;  %v1527_v6 = vrot.slane %v9266_v30, 1  ;;  %v5595_v3 = vpop.eup %5594  ;;  %v4578_v52 = vmul.f32 %v5593_v10, %v9100_v8  ;;  %v4139_v9 = vadd.f32 %v4107_v58, %v4062_v11  ;;  %v9356_v58 = vld [vmem:[%s12007_s1 + $0x5] ss:$0 sm:$0xff] }
 0x3f6   : > { %v4185_v26 = vmul.f32 %v9273_v49, %v4164_v1  ;;  %v1528_v50 = vrot.slane %v9276_v47, 1  ;;  %v4579_v14 = vmul.f32 %v5595_v3, %v9103_v2  ;;  %v1529_v12 = vrot.slane %v9284_v22, 1  ;;  %12763 = vst [vmem:[#allocation16_spill] sm:$0xff] %v9356_v58 }
 0x3f7   : > { %v4140_v28 = vadd.f32 %v4108_v4, %v4063_v46  ;;  %v12245_v61 = vrot.slane %v9278_v35, 1  ;;  %v4216_v33 = vadd.f32 %v4184_v59, %v4139_v9  ;;  %v9306_v8 = vsel %vm1545_vm1, %v1526_v0, %v1527_v6  ;;  %v9372_v59 = vld [vmem:[%s12009_s3 + $0x1] ss:$0 sm:$0xff]  ;;  %v9383_v46 = vld [vmem:[%s12007_s1 + $0x6] ss:$0 sm:$0xff] }
 0x3f8   : > { %v9302_v32 = vsel %vm1545_vm1, %v1527_v6, %v1528_v50  ;;  %v1561_v62 = vsel %vm1545_vm1, %v1525_v40, %v1526_v0  ;;  %v4604_v38 = vpack.c.bf16 %v4579_v14, %v4578_v52  ;;  %v9318_v57 = vsel %vm1545_vm1, %v1528_v50, %v1529_v12  ;;  %12765 = vst [vmem:[#allocation31_spill] sm:$0xff] %v9372_v59 }
 0x3f9   : > { %v4217_v19 = vadd.f32 %v4185_v26, %v4140_v28  ;;  %v9314_v2 = vsel %vm1545_vm1, %v1529_v12, %v12245_v61  ;;  %v4248_v44 = vadd.f32 %v4216_v33, %v3709_v31  ;;  %v1598_v16 = vmul.f32 %v9323_v39, %v1561_v62  ;;  %12766 = vst [vmem:[#allocation18_spill] sm:$0xff] %v9383_v46 }
 0x3fa   : > { %12760 = vst [vmem:[#allocation15_spill] sm:$0xff] %v9314_v2  ;;  %v1599_v7 = vmul.f32 %v9323_v39, %v9306_v8  ;;  %v1633_v18 = vrot.slane %v9251_v21, 2  ;;  %5309 = vmatprep.mubr.msk.bf16.mxu0 %vm269_vm0, %v4604_v38  ;;  %v1634_v41 = vrot.slane %v9253_v60, 2  ;;  %v1635_v13 = vrot.slane %v9266_v30, 2 }
 0x3fb   : > { %v4249_v54 = vadd.f32 %v4217_v19, %v3710_v24  ;;  %v1636_v31 = vrot.slane %v9276_v47, 2  ;;  %v4284_v17 = vadd.f32 %v9336_v29, %v4248_v44  ;;  %v1637_v43 = vrot.slane %v9284_v22, 2  ;;  %v9419_v19 = vld [vmem:[%s12009_s3 + $0x2] ss:$0 sm:$0xff] }
 0x3fc   : > { %v12243_v45 = vrot.slane %v9278_v35, 2  ;;  %v1771_v48 = vrot.slane %v9251_v21, 3  ;;  %v9349_v5 = vsel %vm1651_vm2, %v1634_v41, %v1635_v13  ;;  %v1667_v37 = vsel %vm1651_vm2, %v1633_v18, %v1634_v41  ;;  %12769 = vst [vmem:[#allocation26_spill] sm:$0xff] %v9419_v19 }
 0x3fd   : > { %v4285_v24 = vadd.f32 %v9336_v29, %v4249_v54  ;;  %v9345_v55 = vsel %vm1651_vm2, %v1635_v13, %v1636_v31  ;;  %v4320_v34 = vmul.f32 %v9356_v58, %v4284_v17  ;;  %v9367_v53 = vsel %vm1651_vm2, %v1636_v31, %v1637_v43 }
 0x3fe   : > { %v9363_v23 = vsel %vm1651_vm2, %v1637_v43, %v12243_v45  ;;  %v1704_v11 = vmul.f32 %v9372_v59, %v1667_v37  ;;  %v1705_v40 = vmul.f32 %v9372_v59, %v9349_v5  ;;  %v1772_v0 = vrot.slane %v9253_v60, 3 }
 0x3ff   : > { %12764 = vst [vmem:[#allocation6_spill] sm:$0xff] %v9363_v23  ;;  %v4321_v63 = vmul.f32 %v9356_v58, %v4285_v24  ;;  %v1773_v10 = vrot.slane %v9266_v30, 3  ;;  %v9386_v4 = vadd.f32 %v9383_v46, %v4320_v34  ;;  %v1774_v6 = vrot.slane %v9276_v47, 3  ;;  %v9443_v34 = vld [vmem:[%s12009_s3 + $0x3] ss:$0 sm:$0xff] }
 0x400   : > { %v1736_v1 = vadd.f32 %v1704_v11, %v1598_v16  ;;  %v1775_v3 = vrot.slane %v9284_v22, 3  ;;  %v1737_v9 = vadd.f32 %v1705_v40, %v1599_v7  ;;  %v12242_v26 = vrot.slane %v9278_v35, 3  ;;  %12770 = vst [vmem:[#allocation4_spill] sm:$0xff] %v9443_v34  ;;  %v9659_v58 = vld [vmem:[%s12009_s3 + $0x12] ss:$0 sm:$0xff] }
 0x401   : > { %v9391_v52 = vadd.f32 %v9383_v46, %v4321_v63  ;;  %v9396_v50 = vsel %vm1789_vm3, %v1772_v0, %v1773_v10  ;;  %v5128_v14 = vmul.f32 -1.442695, %v9386_v4  ;;  %v9405_v12 = vsel %vm1789_vm3, %v1773_v10, %v1774_v6  ;;  %12786 = vst [vmem:[#allocation36_spill] sm:$0xff] %v9659_v58 }
 0x402   : > { %v9401_v28 = vsel %vm1789_vm3, %v1774_v6, %v1775_v3  ;;  %12767 = vst [vmem:[#allocation25_spill] sm:$0xff] %v9405_v12  ;;  %v1805_v33 = vsel %vm1789_vm3, %v1771_v48, %v1772_v0  ;;  %v9414_v38 = vsel %vm1789_vm3, %v1775_v3, %v12242_v26  ;;  %v1843_v16 = vmul.f32 %v9419_v19, %v9396_v50 }
 0x403   : > { %v5129_v62 = vmul.f32 -1.442695, %v9391_v52  ;;  %12768 = vst [vmem:[#allocation10_spill] sm:$0xff] %v9414_v38  ;;  %v1842_v44 = vmul.f32 %v9419_v19, %v1805_v33  ;;  %5596 = vpow2.f32 %v5128_v14  ;;  %v1909_v7 = vrot.slane %v9251_v21, 4 }
 0x404   : > { %v1910_v18 = vrot.slane %v9253_v60, 4  ;;  %v1911_v54 = vrot.slane %v9266_v30, 4  ;;  %v1875_v13 = vadd.f32 %v1843_v16, %v1737_v9  ;;  %v1912_v31 = vrot.slane %v9276_v47, 4 }
 0x405   : > { %5598 = vpow2.f32 %v5129_v62  ;;  %v1874_v41 = vadd.f32 %v1842_v44, %v1736_v1  ;;  %v1913_v17 = vrot.slane %v9284_v22, 4  ;;  %v12240_v43 = vrot.slane %v9278_v35, 4 }
 0x406   : > { %v9432_v48 = vsel %vm1927_vm4, %v1910_v18, %v1911_v54  ;;  %v1943_v24 = vsel %vm1927_vm4, %v1909_v7, %v1910_v18  ;;  %v9438_v37 = vsel %vm1927_vm4, %v1911_v54, %v1912_v31  ;;  %v2047_v40 = vrot.slane %v9251_v21, 5 }
 0x407   : > { %v1980_v11 = vmul.f32 %v9443_v34, %v1943_v24  ;;  %v1981_v63 = vmul.f32 %v9443_v34, %v9432_v48  ;;  %v9453_v0 = vsel %vm1927_vm4, %v1913_v17, %v12240_v43  ;;  %v9457_v10 = vsel %vm1927_vm4, %v1912_v31, %v1913_v17 }
 0x408   : > { %12771 = vst [vmem:[#allocation19_spill] sm:$0xff] %v9453_v0  ;;  %v2048_v1 = vrot.slane %v9253_v60, 5  ;;  %v2049_v6 = vrot.slane %v9266_v30, 5  ;;  %v2050_v14 = vrot.slane %v9276_v47, 5  ;;  %v2051_v33 = vrot.slane %v9284_v22, 5 }
 0x409   : > { %v2012_v3 = vadd.f32 %v1980_v11, %v1874_v41  ;;  %v2013_v9 = vadd.f32 %v1981_v63, %v1875_v13  ;;  %v12241_v62 = vrot.slane %v9278_v35, 5  ;;  %v2185_v7 = vrot.slane %v9251_v21, 6  ;;  %v9482_v41 = vld [vmem:[%s12009_s3 + $0x4] ss:$0 sm:$0xff] }
 0x40a   : > { %v9466_v44 = vsel %vm2065_vm5, %v2048_v1, %v2049_v6  ;;  %v2081_v16 = vsel %vm2065_vm5, %v2047_v40, %v2048_v1  ;;  %v9473_v18 = vsel %vm2065_vm5, %v2050_v14, %v2051_v33  ;;  %v9477_v54 = vsel %vm2065_vm5, %v2049_v6, %v2050_v14  ;;  %12772 = vst [vmem:[#allocation28_spill] sm:$0xff] %v9482_v41 }
 0x40b   : > { %v2118_v13 = vmul.f32 %v9482_v41, %v2081_v16  ;;  %v2119_v31 = vmul.f32 %v9482_v41, %v9466_v44  ;;  %v9491_v17 = vsel %vm2065_vm5, %v2051_v33, %v12241_v62  ;;  %v2186_v24 = vrot.slane %v9253_v60, 6 }
 0x40c   : > { %v2187_v11 = vrot.slane %v9266_v30, 6  ;;  %v2188_v63 = vrot.slane %v9276_v47, 6  ;;  %v2189_v6 = vrot.slane %v9284_v22, 6  ;;  %v12244_v14 = vrot.slane %v9278_v35, 6 }
 0x40d   : > { %v2150_v40 = vadd.f32 %v2118_v13, %v2012_v3  ;;  %v2151_v1 = vadd.f32 %v2119_v31, %v2013_v9  ;;  %v5597_v16 = vpop.eup %5596  ;;  %v2219_v62 = vsel %vm2203_vm6, %v2185_v7, %v2186_v24  ;;  %v2323_v26 = vrot.slane %v9251_v21, 7  ;;  %v9520_v31 = vld [vmem:[%s12009_s3 + $0x5] ss:$0 sm:$0xff] }
 0x40e   : > { %v9500_v43 = vsel %vm2203_vm6, %v2187_v11, %v2188_v63  ;;  %v2218_v33 = vsel %vm2203_vm6, %v2186_v24, %v2187_v11  ;;  %v4484_v3 = vadd.f32 1.0, %v5597_v16  ;;  %v9511_v9 = vsel %vm2203_vm6, %v2189_v6, %v12244_v14  ;;  %12773 = vst [vmem:[#allocation7_spill] sm:$0xff] %v9520_v31 }
 0x40f   : > { %v5599_v45 = vpop.eup %5598  ;;  %v9515_v13 = vsel %vm2203_vm6, %v2188_v63, %v2189_v6  ;;  %v2256_v7 = vmul.f32 %v9520_v31, %v2219_v62  ;;  %v2257_v24 = vmul.f32 %v9520_v31, %v2218_v33  ;;  %v2324_v11 = vrot.slane %v9253_v60, 7 }
 0x410   : > { %v4485_v21 = vadd.f32 1.0, %v5599_v45  ;;  %v2325_v16 = vrot.slane %v9266_v30, 7  ;;  %5600 = vrcp.f32 %v4484_v3  ;;  %v2326_v61 = vrot.slane %v9276_v47, 7 }
 0x411   : > { %v2288_v14 = vadd.f32 %v2256_v7, %v2150_v40  ;;  %v2327_v63 = vrot.slane %v9284_v22, 7  ;;  %v2289_v6 = vadd.f32 %v2257_v24, %v2151_v1  ;;  %v12250_v46 = vrot.slane %v9278_v35, 7  ;;  %v9544_v1 = vld [vmem:[%s12009_s3 + $0x6] ss:$0 sm:$0xff] }
 0x412   : > { %5602 = vrcp.f32 %v4485_v21  ;;  %v2356_v62 = vsel %vm2341_vm7, %v2324_v11, %v2325_v16  ;;  %v9537_v31 = vsel %vm2341_vm7, %v2325_v16, %v2326_v61  ;;  %v2357_v40 = vsel %vm2341_vm7, %v2323_v26, %v2324_v11  ;;  %12774 = vst [vmem:[#allocation8_spill] sm:$0xff] %v9544_v1  ;;  %v9566_v16 = vld [vmem:[%s12009_s3 + $0x8] ss:$0 sm:$0xff] }
 0x413   : > { %v9533_v45 = vsel %vm2341_vm7, %v2326_v61, %v2327_v63  ;;  %v2395_v3 = vmul.f32 %v9544_v1, %v2356_v62  ;;  %v9551_v7 = vsel %vm2341_vm7, %v2327_v63, %v12250_v46  ;;  %v2394_v21 = vmul.f32 %v9544_v1, %v2357_v40  ;;  %v9557_v61 = vld [vmem:[%s12009_s3 + $0x7] ss:$0 sm:$0xff]  ;;  %12776 = vst [vmem:[#allocation13_spill] sm:$0xff] %v9566_v16  ;;  %v9575_v46 = vld [vmem:[%s12009_s3 + $0x9] ss:$0 sm:$0xff] }
 0x414   : > { %12775 = vst [vmem:[#allocation21_spill] sm:$0xff] %v9557_v61  ;;  %v2463_v26 = vmul.f32 %v9557_v61, %v9253_v60  ;;  %v2464_v24 = vmul.f32 %v9557_v61, %v9266_v30  ;;  %v2540_v63 = vmul.f32 %v9566_v16, %v9306_v8  ;;  %v2541_v40 = vmul.f32 %v9566_v16, %v9302_v32  ;;  %v9584_v61 = vld [vmem:[%s12009_s3 + $0xa] ss:$0 sm:$0xff] }
 0x415   : > { %v2427_v11 = vadd.f32 %v2395_v3, %v2289_v6  ;;  %12777 = vst [vmem:[#allocation33_spill] sm:$0xff] %v9575_v46  ;;  %v2585_v60 = vmul.f32 %v9575_v46, %v9349_v5  ;;  %v2426_v6 = vadd.f32 %v2394_v21, %v2288_v14  ;;  %v2586_v3 = vmul.f32 %v9575_v46, %v9345_v55  ;;  %v9595_v5 = vld [vmem:[%s12009_s3 + $0xb] ss:$0 sm:$0xff] }
 0x416   : > { %12778 = vst [vmem:[#allocation35_spill] sm:$0xff] %v9584_v61  ;;  %v2662_v8 = vmul.f32 %v9584_v61, %v9396_v50  ;;  %v2663_v16 = vmul.f32 %v9584_v61, %v9405_v12  ;;  %12779 = vst [vmem:[#allocation22_spill] sm:$0xff] %v9595_v5  ;;  %v2739_v14 = vmul.f32 %v9595_v5, %v9432_v48  ;;  %v9615_v48 = vld [vmem:[%s12009_s3 + $0xd] ss:$0 sm:$0xff] }
 0x417   : > { %v9590_v1 = vadd.f32 %v2464_v24, %v2427_v11  ;;  %v2617_v41 = vadd.f32 %v2585_v60, %v2540_v63  ;;  %v2740_v21 = vmul.f32 %v9595_v5, %v9438_v37  ;;  %v9601_v46 = vadd.f32 %v2463_v26, %v2426_v6  ;;  %v9606_v24 = vld [vmem:[%s12009_s3 + $0xc] ss:$0 sm:$0xff]  ;;  %12781 = vst [vmem:[#allocation9_spill] sm:$0xff] %v9615_v48  ;;  %v9623_v6 = vld [vmem:[%s12009_s3 + $0xe] ss:$0 sm:$0xff] }
 0x418   : > { %v2618_v50 = vadd.f32 %v2586_v3, %v2541_v40  ;;  %12780 = vst [vmem:[#allocation24_spill] sm:$0xff] %v9606_v24  ;;  %v2816_v11 = vmul.f32 %v9606_v24, %v9466_v44  ;;  %v2817_v63 = vmul.f32 %v9606_v24, %v9477_v54  ;;  %v2893_v26 = vmul.f32 %v9615_v48, %v2218_v33 }
 0x419   : > { %v2694_v60 = vadd.f32 %v2662_v8, %v2617_v41  ;;  %v2894_v40 = vmul.f32 %v9615_v48, %v9500_v43  ;;  %12782 = vst [vmem:[#allocation29_spill] sm:$0xff] %v9623_v6  ;;  %v2970_v44 = vmul.f32 %v9623_v6, %v2356_v62  ;;  %v2971_v41 = vmul.f32 %v9623_v6, %v9537_v31  ;;  %v9631_v8 = vld [vmem:[%s12009_s3 + $0xf] ss:$0 sm:$0xff]  ;;  %v9640_v62 = vld [vmem:[%s12009_s3 + $0x10] ss:$0 sm:$0xff] }
 0x41a   : > { %v2695_v3 = vadd.f32 %v2663_v16, %v2618_v50  ;;  %12783 = vst [vmem:[#allocation5_spill] sm:$0xff] %v9631_v8  ;;  %v3039_v33 = vmul.f32 %v9631_v8, %v9266_v30  ;;  %v3040_v48 = vmul.f32 %v9631_v8, %v9276_v47  ;;  %v5601_v24 = vpop.eup %5600  ;;  %12784 = vst [vmem:[#allocation39_spill] sm:$0xff] %v9640_v62  ;;  %v9649_v30 = vld [vmem:[%s12009_s3 + $0x11] ss:$0 sm:$0xff] }
 0x41b   : > { %v2771_v5 = vadd.f32 %v2739_v14, %v2694_v60  ;;  %v3148_v16 = vmul.f32 %v9640_v62, %v9302_v32  ;;  %v3149_v50 = vmul.f32 %v9640_v62, %v9318_v57  ;;  %12785 = vst [vmem:[#allocation17_spill] sm:$0xff] %v9649_v30  ;;  %v3193_v8 = vmul.f32 %v9649_v30, %v9345_v55 }
 0x41c   : > { %v5603_v14 = vpop.eup %5602  ;;  %v4580_v60 = vmul.f32 %v5601_v24, %v9386_v4  ;;  %v2772_v6 = vadd.f32 %v2740_v21, %v2695_v3  ;;  %v3194_v61 = vmul.f32 %v9649_v30, %v9367_v53  ;;  %v3270_v62 = vmul.f32 %v9659_v58, %v9405_v12  ;;  %v9669_v24 = vld [vmem:[%s12009_s3 + $0x13] ss:$0 sm:$0xff] }
 0x41d   : > { %v4581_v29 = vmul.f32 %v5603_v14, %v9391_v52  ;;  %v2848_v34 = vadd.f32 %v2816_v11, %v2771_v5  ;;  %v3225_v19 = vadd.f32 %v3193_v8, %v3148_v16  ;;  %v3271_v59 = vmul.f32 %v9659_v58, %v9401_v28  ;;  %12787 = vst [vmem:[#allocation11_spill] sm:$0xff] %v9669_v24  ;;  %v9678_v11 = vld [vmem:[%s12009_s3 + $0x14] ss:$0 sm:$0xff]  ;;  %v9687_v16 = vld [vmem:[%s12009_s3 + $0x15] ss:$0 sm:$0xff] }
 0x41e   : > { %v2849_v4 = vadd.f32 %v2817_v63, %v2772_v6  ;;  %v3226_v21 = vadd.f32 %v3194_v61, %v3149_v50  ;;  %v3347_v3 = vmul.f32 %v9669_v24, %v9438_v37  ;;  %v3348_v30 = vmul.f32 %v9669_v24, %v9457_v10  ;;  %12788 = vst [vmem:[#allocation20_spill] sm:$0xff] %v9678_v11  ;;  %v9701_v14 = vld [vmem:[%s12009_s3 + $0x17] ss:$0 sm:$0xff] }
 0x41f   : > { %v4605_v12 = vpack.c.bf16 %v4581_v29, %v4580_v60  ;;  %v2925_v52 = vadd.f32 %v2893_v26, %v2848_v34  ;;  %v3302_v5 = vadd.f32 %v3270_v62, %v3225_v19  ;;  %v3424_v61 = vmul.f32 %v9678_v11, %v9477_v54  ;;  %12789 = vst [vmem:[#allocation27_spill] sm:$0xff] %v9687_v16 }
 0x420   : > { %v2926_v63 = vadd.f32 %v2894_v40, %v2849_v4  ;;  %v3303_v6 = vadd.f32 %v3271_v59, %v3226_v21  ;;  %v3425_v8 = vmul.f32 %v9678_v11, %v9473_v18  ;;  %v3501_v29 = vmul.f32 %v9687_v16, %v9500_v43  ;;  %12790 = vst [vmem:[#allocation23_spill] sm:$0xff] %v9701_v14 }
 0x421   : > { %5310 = vmatmul.mubr.msk.bf16.gmra.mrb[28].mxu0 %vm269_vm0, %v4605_v12  ;;  %v3002_v19 = vadd.f32 %v2970_v44, %v2925_v52  ;;  %v3379_v34 = vadd.f32 %v3347_v3, %v3302_v5  ;;  %v3502_v26 = vmul.f32 %v9687_v16, %v9515_v13  ;;  %v3578_v59 = vmul.f32 %v9195_v56, %v9537_v31 }
 0x422   : > { %v3003_v40 = vadd.f32 %v2971_v41, %v2926_v63  ;;  %v3380_v62 = vadd.f32 %v3348_v30, %v3303_v6  ;;  %v3579_v50 = vmul.f32 %v9195_v56, %v9533_v45  ;;  %v3647_v12 = vmul.f32 %v9701_v14, %v9276_v47 }
 0x423   : > { %v3071_v44 = vadd.f32 %v3039_v33, %v3002_v19  ;;  %v3456_v60 = vadd.f32 %v3424_v61, %v3379_v34  ;;  %v3648_v4 = vmul.f32 %v9701_v14, %v9284_v22  ;;  %v3756_v41 = vmul.f32 %v9212_v36, %v9318_v57 }
 0x424   : > { %v3072_v30 = vadd.f32 %v3040_v48, %v3003_v40  ;;  %v3457_v21 = vadd.f32 %v3425_v8, %v3380_v62  ;;  %v3757_v3 = vmul.f32 %v9212_v36, %v9314_v2  ;;  %v3801_v52 = vmul.f32 %v9218_v42, %v9367_v53 }
 0x425   : > { %v3103_v5 = vadd.f32 %v3071_v44, %v9601_v46  ;;  %v3533_v63 = vadd.f32 %v3501_v29, %v3456_v60  ;;  %v3802_v33 = vmul.f32 %v9218_v42, %v9363_v23  ;;  %v3878_v61 = vmul.f32 %v9228_v20, %v9401_v28  ;;  %v9725_v29 = vld [vmem:[#allocation2 + $0xf8] sm:$0xff] }
 0x426   : > { %v3104_v6 = vadd.f32 %v3072_v30, %v9590_v1  ;;  %v3534_v19 = vadd.f32 %v3502_v26, %v3457_v21  ;;  %v3833_v48 = vadd.f32 %v3801_v52, %v3756_v41  ;;  %v3879_v8 = vmul.f32 %v9228_v20, %v9414_v38  ;;  %12791 = vst [vmem:[#allocation37_spill] sm:$0xff] %v9725_v29  ;;  %v9731_v41 = vld [vmem:[#allocation2 + $0xf0] sm:$0xff] }
 0x427   : > { %v3610_v34 = vadd.f32 %v3578_v59, %v3533_v63  ;;  %v3834_v40 = vadd.f32 %v3802_v33, %v3757_v3  ;;  %v3955_v62 = vmul.f32 %v9240_v27, %v9457_v10  ;;  %v3956_v46 = vmul.f32 %v9240_v27, %v9453_v0 }
 0x428   : > { %v3611_v44 = vadd.f32 %v3579_v50, %v3534_v19  ;;  %v3910_v60 = vadd.f32 %v3878_v61, %v3833_v48  ;;  %v4032_v1 = vmul.f32 %v9248_v25, %v9473_v18  ;;  %v4033_v26 = vmul.f32 %v9248_v25, %v9491_v17 }
 0x429   : > { %v3679_v59 = vadd.f32 %v3647_v12, %v3610_v34  ;;  %v3911_v30 = vadd.f32 %v3879_v8, %v3834_v40  ;;  %v4109_v21 = vmul.f32 %v9263_v51, %v9515_v13  ;;  %v4110_v3 = vmul.f32 %v9263_v51, %v9511_v9 }
 0x42a   : > { %v3680_v52 = vadd.f32 %v3648_v4, %v3611_v44  ;;  %v3987_v63 = vadd.f32 %v3955_v62, %v3910_v60  ;;  %v4186_v50 = vmul.f32 %v9273_v49, %v9533_v45  ;;  %v4187_v33 = vmul.f32 %v9273_v49, %v9551_v7 }
 0x42b   : > { %v3711_v61 = vadd.f32 %v3679_v59, %v3103_v5  ;;  %v3988_v19 = vadd.f32 %v3956_v46, %v3911_v30  ;;  %v1531_v48 = vrot.slane %v9731_v41, 1  ;;  %v12288_v12 = vrot.slane %v9725_v29, 1 }
 0x42c   : > { %v3712_v8 = vadd.f32 %v3680_v52, %v3104_v6  ;;  %v4064_v34 = vadd.f32 %v4032_v1, %v3987_v63  ;;  %v1600_v40 = vmul.f32 %v9323_v39, %v9302_v32  ;;  %v1601_v4 = vmul.f32 %v9323_v39, %v9318_v57  ;;  %v12793_v1 = vld [vmem:[#allocation31_spill] sm:$0xff] }
 0x42d   : > { %v4065_v62 = vadd.f32 %v4033_v26, %v3988_v19  ;;  %v9751_v44 = vsel %vm1545_vm1, %v1531_v48, %v12288_v12  ;;  %v12792_v5 = vrot.slane %v9278_v35, 1  ;;  %v1639_v6 = vrot.slane %v9731_v41, 2  ;;  %v12797_v12 = vld [vmem:[#allocation26_spill] sm:$0xff] }
 0x42e   : > { %v4141_v60 = vadd.f32 %v4109_v21, %v4064_v34  ;;  %v12291_v32 = vrot.slane %v9725_v29, 2  ;;  %v1706_v26 = vmul.f32 %v12793_v1, %v9345_v55  ;;  %v1707_v59 = vmul.f32 %v12793_v1, %v9367_v53 }
 0x42f   : > { %v9757_v46 = vsel %vm1545_vm1, %v12792_v5, %v1531_v48  ;;  %v4142_v30 = vadd.f32 %v4110_v3, %v4065_v62  ;;  %v12794_v52 = vrot.slane %v9278_v35, 2  ;;  %v1777_v19 = vrot.slane %v9731_v41, 3 }
 0x430   : > { %v12290_v48 = vrot.slane %v9725_v29, 3  ;;  %v4218_v21 = vadd.f32 %v4186_v50, %v4141_v60  ;;  %v9777_v55 = vsel %vm1651_vm2, %v1639_v6, %v12291_v32  ;;  %v1738_v34 = vadd.f32 %v1706_v26, %v1600_v40  ;;  %v12796_v60 = vld [vmem:[#allocation25_spill] sm:$0xff] }
 0x431   : > { %v9769_v63 = vsel %vm1651_vm2, %v12794_v52, %v1639_v6  ;;  %v1739_v5 = vadd.f32 %v1707_v59, %v1601_v4  ;;  %v4219_v3 = vadd.f32 %v4187_v33, %v4142_v30  ;;  %v12795_v52 = vrot.slane %v9278_v35, 3  ;;  %v12798_v30 = vld [vmem:[#allocation4_spill] sm:$0xff] }
 0x432   : > { %v9783_v62 = vsel %vm1789_vm3, %v1777_v19, %v12290_v48  ;;  %v1844_v1 = vmul.f32 %v12797_v12, %v12796_v60  ;;  %v4250_v6 = vadd.f32 %v4218_v21, %v3711_v61  ;;  %v1845_v40 = vmul.f32 %v12797_v12, %v9401_v28 }
 0x433   : > { %v9789_v50 = vsel %vm1789_vm3, %v12795_v52, %v1777_v19  ;;  %v1915_v33 = vrot.slane %v9731_v41, 4  ;;  %v12294_v4 = vrot.slane %v9725_v29, 4  ;;  %v4251_v26 = vadd.f32 %v4219_v3, %v3712_v8  ;;  %v12799_v52 = vld [vmem:[#allocation34_spill] sm:$0xff] }
 0x434   : > { %v1876_v59 = vadd.f32 %v1844_v1, %v1738_v34  ;;  %v1982_v48 = vmul.f32 %v12798_v30, %v9438_v37  ;;  %v1983_v19 = vmul.f32 %v12798_v30, %v9457_v10  ;;  %v4286_v32 = vadd.f32 %v12799_v52, %v4250_v6 }
 0x435   : > { %v1877_v39 = vadd.f32 %v1845_v40, %v1739_v5  ;;  %v9806_v61 = vsel %vm1927_vm4, %v1915_v33, %v12294_v4  ;;  %v12800_v21 = vrot.slane %v9278_v35, 4  ;;  %v4287_v37 = vadd.f32 %v12799_v52, %v4251_v26  ;;  %v12801_v5 = vld [vmem:[#allocation16_spill] sm:$0xff] }
 0x436   : > { %v2014_v1 = vadd.f32 %v1982_v48, %v1876_v59  ;;  %v2053_v34 = vrot.slane %v9731_v41, 5  ;;  %v12297_v3 = vrot.slane %v9725_v29, 5  ;;  %v4322_v60 = vmul.f32 %v12801_v5, %v4286_v32  ;;  %v12802_v40 = vld [vmem:[#allocation28_spill] sm:$0xff] }
 0x437   : > { %v9812_v8 = vsel %vm1927_vm4, %v12800_v21, %v1915_v33  ;;  %v2015_v6 = vadd.f32 %v1983_v19, %v1877_v39  ;;  %v2120_v4 = vmul.f32 %v12802_v40, %v9477_v54  ;;  %v2121_v30 = vmul.f32 %v12802_v40, %v9473_v18  ;;  %v12804_v54 = vld [vmem:[#allocation18_spill] sm:$0xff] }
 0x438   : > { %v4323_v12 = vmul.f32 %v12801_v5, %v4287_v37  ;;  %v9827_v48 = vsel %vm2065_vm5, %v2053_v34, %v12297_v3  ;;  %v12803_v33 = vrot.slane %v9278_v35, 5  ;;  %v2191_v39 = vrot.slane %v9731_v41, 6 }
 0x439   : > { %v9837_v26 = vadd.f32 %v12804_v54, %v4322_v60  ;;  %v2152_v59 = vadd.f32 %v2120_v4, %v2014_v1  ;;  %v2153_v19 = vadd.f32 %v2121_v30, %v2015_v6  ;;  %v12302_v21 = vrot.slane %v9725_v29, 6 }
 0x43a   : > { %v9833_v32 = vsel %vm2065_vm5, %v12803_v33, %v2053_v34  ;;  %v9841_v37 = vadd.f32 %v12804_v54, %v4323_v12  ;;  %v12807_v3 = vrot.slane %v9278_v35, 6  ;;  %v12808_v34 = vld [vmem:[#allocation7_spill] sm:$0xff]  ;;  %v2329_v30 = vrot.slane %v9731_v41, 7 }
 0x43b   : > { %12805 = vst [vmem:[#allocation14_spill] sm:$0xff] %v9837_v26  ;;  %v2258_v33 = vmul.f32 %v12808_v34, %v9500_v43  ;;  %v2259_v60 = vmul.f32 %v12808_v34, %v9515_v13  ;;  %v5130_v4 = vmul.f32 -1.442695, %v9837_v26  ;;  %v9858_v12 = vsel %vm2203_vm6, %v2191_v39, %v12302_v21  ;;  %v12809_v43 = vld [vmem:[#allocation8_spill] sm:$0xff] }
 0x43c   : > { %12806 = vst [vmem:[#allocation38_spill] sm:$0xff] %v9841_v37  ;;  %v9847_v5 = vsel %vm2203_vm6, %v12807_v3, %v2191_v39  ;;  %v12303_v1 = vrot.slane %v9725_v29, 7  ;;  %v5131_v3 = vmul.f32 -1.442695, %v9841_v37  ;;  %v2396_v52 = vmul.f32 %v12809_v43, %v9537_v31  ;;  %v12811_v31 = vld [vmem:[#allocation21_spill] sm:$0xff] }
 0x43d   : > { %v2290_v6 = vadd.f32 %v2258_v33, %v2152_v59  ;;  %v2291_v54 = vadd.f32 %v2259_v60, %v2153_v19  ;;  %5604 = vpow2.f32 %v5130_v4  ;;  %v12810_v39 = vrot.slane %v9278_v35, 7 }
 0x43e   : > { %v9869_v34 = vsel %vm2341_vm7, %v2329_v30, %v12303_v1  ;;  %v2397_v59 = vmul.f32 %v12809_v43, %v9533_v45  ;;  %5606 = vpow2.f32 %v5131_v3  ;;  %v2465_v33 = vmul.f32 %v12811_v31, %v9276_v47  ;;  %v12812_v1 = vld [vmem:[#allocation13_spill] sm:$0xff]  ;;  %v12814_v3 = vld [vmem:[#allocation35_spill] sm:$0xff] }
 0x43f   : > { %v9875_v21 = vsel %vm2341_vm7, %v12810_v39, %v2329_v30  ;;  %v2428_v19 = vadd.f32 %v2396_v52, %v2290_v6  ;;  %v2466_v60 = vmul.f32 %v12811_v31, %v9284_v22  ;;  %v2542_v40 = vmul.f32 %v12812_v1, %v9318_v57  ;;  %v12813_v30 = vld [vmem:[#allocation33_spill] sm:$0xff]  ;;  %v12815_v57 = vld [vmem:[#allocation22_spill] sm:$0xff] }
 0x440   : > { %v2429_v4 = vadd.f32 %v2397_v59, %v2291_v54  ;;  %v2543_v15 = vmul.f32 %v12812_v1, %v9314_v2  ;;  %v2587_v39 = vmul.f32 %v12813_v30, %v9367_v53  ;;  %v2588_v52 = vmul.f32 %v12813_v30, %v9363_v23  ;;  %v12816_v53 = vld [vmem:[#allocation24_spill] sm:$0xff] }
 0x441   : > { %v2497_v29 = vadd.f32 %v2465_v33, %v2428_v19  ;;  %v2664_v47 = vmul.f32 %v12814_v3, %v9401_v28  ;;  %v2665_v6 = vmul.f32 %v12814_v3, %v9414_v38  ;;  %v2741_v31 = vmul.f32 %v12815_v57, %v9457_v10  ;;  %v12817_v28 = vld [vmem:[#allocation9_spill] sm:$0xff] }
 0x442   : > { %v2498_v54 = vadd.f32 %v2466_v60, %v2429_v4  ;;  %v2619_v59 = vadd.f32 %v2587_v39, %v2542_v40  ;;  %v2742_v1 = vmul.f32 %v12815_v57, %v9453_v0  ;;  %v2620_v43 = vadd.f32 %v2588_v52, %v2543_v15  ;;  %v12818_v60 = vld [vmem:[#allocation29_spill] sm:$0xff] }
 0x443   : > { %v2818_v19 = vmul.f32 %v12816_v53, %v9473_v18  ;;  %v2819_v33 = vmul.f32 %v12816_v53, %v9491_v17  ;;  %v2895_v30 = vmul.f32 %v12817_v28, %v9515_v13  ;;  %v2896_v40 = vmul.f32 %v12817_v28, %v9511_v9  ;;  %v12819_v39 = vld [vmem:[#allocation5_spill] sm:$0xff]  ;;  %v12820_v53 = vld [vmem:[#allocation39_spill] sm:$0xff] }
 0x444   : > { %v2696_v37 = vadd.f32 %v2664_v47, %v2619_v59  ;;  %v2972_v10 = vmul.f32 %v12818_v60, %v9533_v45  ;;  %v2973_v4 = vmul.f32 %v12818_v60, %v9551_v7  ;;  %v2697_v15 = vadd.f32 %v2665_v6, %v2620_v43  ;;  %v12821_v28 = vld [vmem:[#allocation17_spill] sm:$0xff] }
 0x445   : > { %v3041_v18 = vmul.f32 %v12819_v39, %v9284_v22  ;;  %v3042_v52 = vmul.f32 %v12819_v39, %v9278_v35  ;;  %v3150_v13 = vmul.f32 %v12820_v53, %v9314_v2  ;;  %v3151_v59 = vmul.f32 %v12820_v53, %v9757_v46 }
 0x446   : > { %v2773_v47 = vadd.f32 %v2741_v31, %v2696_v37  ;;  %v3195_v45 = vmul.f32 %v12821_v28, %v9363_v23  ;;  %v3196_v60 = vmul.f32 %v12821_v28, %v9769_v63  ;;  %v2774_v43 = vadd.f32 %v2742_v1, %v2697_v15 }
 0x447   : > { %v3272_v22 = vmul.f32 %v9659_v58, %v9414_v38  ;;  %v3273_v6 = vmul.f32 %v9659_v58, %v9789_v50  ;;  %v3349_v39 = vmul.f32 %v9669_v24, %v9453_v0  ;;  %v5605_v37 = vpop.eup %5604  ;;  %v3350_v3 = vmul.f32 %v9669_v24, %v9812_v8 }
 0x448   : > { %v2850_v31 = vadd.f32 %v2818_v19, %v2773_v47  ;;  %v3227_v57 = vadd.f32 %v3195_v45, %v3150_v13  ;;  %v3228_v53 = vadd.f32 %v3196_v60, %v3151_v59  ;;  %v5607_v23 = vpop.eup %5606  ;;  %v4486_v2 = vadd.f32 1.0, %v5605_v37 }
 0x449   : > { %v2851_v28 = vadd.f32 %v2819_v33, %v2774_v43  ;;  %v3426_v1 = vmul.f32 %v9678_v11, %v9491_v17  ;;  %v3427_v15 = vmul.f32 %v9678_v11, %v9833_v32  ;;  %v4487_v58 = vadd.f32 1.0, %v5607_v23 }
 0x44a   : > { %v2927_v38 = vadd.f32 %v2895_v30, %v2850_v31  ;;  %v3304_v26 = vadd.f32 %v3272_v22, %v3227_v57  ;;  %v3305_v0 = vadd.f32 %v3273_v6, %v3228_v53  ;;  %5608 = vrcp.f32 %v4486_v2 }
 0x44b   : > { %v2928_v19 = vadd.f32 %v2896_v40, %v2851_v28  ;;  %v3503_v60 = vmul.f32 %v9687_v16, %v9511_v9  ;;  %v3504_v13 = vmul.f32 %v9687_v16, %v9847_v5  ;;  %5610 = vrcp.f32 %v4487_v58 }
 0x44c   : > { %v3004_v33 = vadd.f32 %v2972_v10, %v2927_v38  ;;  %v3381_v47 = vadd.f32 %v3349_v39, %v3304_v26  ;;  %v3382_v59 = vadd.f32 %v3350_v3, %v3305_v0  ;;  %v3580_v43 = vmul.f32 %v9195_v56, %v9551_v7 }
 0x44d   : > { %v3005_v45 = vadd.f32 %v2973_v4, %v2928_v19  ;;  %v3581_v23 = vmul.f32 %v9195_v56, %v9875_v21  ;;  %v3649_v2 = vmul.f32 %v9701_v14, %v9278_v35  ;;  %v3650_v28 = vmul.f32 %v9701_v14, %v9731_v41 }
 0x44e   : > { %v3073_v30 = vadd.f32 %v3041_v18, %v3004_v33  ;;  %v3458_v57 = vadd.f32 %v3426_v1, %v3381_v47  ;;  %v3459_v53 = vadd.f32 %v3427_v15, %v3382_v59  ;;  %v3758_v38 = vmul.f32 %v9212_v36, %v9757_v46 }
 0x44f   : > { %v3074_v58 = vadd.f32 %v3042_v52, %v3005_v45  ;;  %v3759_v0 = vmul.f32 %v9212_v36, %v9751_v44  ;;  %v3803_v26 = vmul.f32 %v9218_v42, %v9769_v63  ;;  %v3804_v10 = vmul.f32 %v9218_v42, %v9777_v55  ;;  %v12822_v45 = vld [vmem:[#allocation14_spill] sm:$0xff] }
 0x450   : > { %v3105_v56 = vadd.f32 %v3073_v30, %v2497_v29  ;;  %v3535_v3 = vadd.f32 %v3503_v60, %v3458_v57  ;;  %v3536_v40 = vadd.f32 %v3504_v13, %v3459_v53  ;;  %v3880_v18 = vmul.f32 %v9228_v20, %v9789_v50  ;;  %v9969_v60 = vld [vmem:[#allocation2 + $0x100] sm:$0xff]  ;;  %v12823_v57 = vld [vmem:[#allocation38_spill] sm:$0xff] }
 0x451   : > { %v3106_v4 = vadd.f32 %v3074_v58, %v2498_v54  ;;  %v3835_v39 = vadd.f32 %v3803_v26, %v3758_v38  ;;  %v3881_v52 = vmul.f32 %v9228_v20, %v9783_v62  ;;  %v3836_v36 = vadd.f32 %v3804_v10, %v3759_v0  ;;  %v12824_v38 = vld [vmem:[#allocation15_spill] sm:$0xff]  ;;  %v12825_v0 = vld [vmem:[#allocation12_spill] sm:$0xff] }
 0x452   : > { %v3612_v22 = vadd.f32 %v3580_v43, %v3535_v3  ;;  %v3613_v6 = vadd.f32 %v3581_v23, %v3536_v40  ;;  %v3957_v37 = vmul.f32 %v9240_v27, %v9812_v8  ;;  %v3958_v31 = vmul.f32 %v9240_v27, %v9806_v61  ;;  %v12826_v40 = vld [vmem:[#allocation6_spill] sm:$0xff]  ;;  %v12827_v10 = vld [vmem:[#allocation31_spill] sm:$0xff] }
 0x453   : > { %v3912_v29 = vadd.f32 %v3880_v18, %v3835_v39  ;;  %v4034_v42 = vmul.f32 %v9248_v25, %v9833_v32  ;;  %v4035_v54 = vmul.f32 %v9248_v25, %v9827_v48  ;;  %v3913_v19 = vadd.f32 %v3881_v52, %v3836_v36  ;;  %v12828_v18 = vld [vmem:[#allocation37_spill] sm:$0xff] }
 0x454   : > { %v3681_v1 = vadd.f32 %v3649_v2, %v3612_v22  ;;  %v3682_v15 = vadd.f32 %v3650_v28, %v3613_v6  ;;  %v4111_v20 = vmul.f32 %v9263_v51, %v9847_v5  ;;  %v5609_v13 = vpop.eup %5608  ;;  %v4112_v47 = vmul.f32 %v9263_v51, %v9858_v12 }
 0x455   : > { %v3989_v33 = vadd.f32 %v3957_v37, %v3912_v29  ;;  %v4188_v27 = vmul.f32 %v9273_v49, %v9875_v21  ;;  %v4189_v59 = vmul.f32 %v9273_v49, %v9869_v34  ;;  %v5611_v25 = vpop.eup %5610  ;;  %v4582_v43 = vmul.f32 %v5609_v13, %v12822_v45 }
 0x456   : > { %v3713_v23 = vadd.f32 %v3681_v1, %v3105_v56  ;;  %v3714_v2 = vadd.f32 %v3682_v15, %v3106_v4  ;;  %v3990_v30 = vadd.f32 %v3958_v31, %v3913_v19  ;;  %v4583_v53 = vmul.f32 %v5611_v25, %v12823_v57  ;;  %v12832_v19 = vld [vmem:[#allocation10_spill] sm:$0xff] }
 0x457   : > { %v4066_v28 = vadd.f32 %v4034_v42, %v3989_v33  ;;  %v1533_v58 = vrot.slane %v9969_v60, 1  ;;  %v1602_v51 = vmul.f32 %v12825_v0, %v12824_v38  ;;  %v1603_v3 = vmul.f32 %v12825_v0, %v9757_v46 }
 0x458   : > { %v4067_v26 = vadd.f32 %v4035_v54, %v3990_v30  ;;  %v1641_v49 = vrot.slane %v9969_v60, 2  ;;  %v1708_v39 = vmul.f32 %v12827_v10, %v12826_v40  ;;  %v4606_v56 = vpack.c.bf16 %v4583_v53, %v4582_v43  ;;  %v12835_v30 = vld [vmem:[#allocation19_spill] sm:$0xff]  ;;  %v12838_v40 = vld [vmem:[#allocation28_spill] sm:$0xff] }
 0x459   : > { %v4143_v4 = vadd.f32 %v4111_v20, %v4066_v28  ;;  %v12829_v52 = vrot.slane %v12828_v18, 1  ;;  %v1709_v36 = vmul.f32 %v12827_v10, %v9769_v63  ;;  %v12831_v29 = vrot.slane %v12828_v18, 2  ;;  %v12833_v20 = vld [vmem:[#allocation26_spill] sm:$0xff] }
 0x45a   : > { %v4144_v37 = vadd.f32 %v4112_v47, %v4067_v26  ;;  %v1740_v42 = vadd.f32 %v1708_v39, %v1602_v51  ;;  %v1779_v54 = vrot.slane %v9969_v60, 3  ;;  %5313 = vmatprep.mubr.msk.bf16.mxu0 %vm269_vm0, %v4606_v56  ;;  %v1846_v13 = vmul.f32 %v12833_v20, %v12832_v19 }
 0x45b   : > { %v9993_v6 = vsel %vm1545_vm1, %v12829_v52, %v1533_v58  ;;  %v10003_v31 = vsel %vm1651_vm2, %v12831_v29, %v1641_v49  ;;  %v4220_v1 = vadd.f32 %v4188_v27, %v4143_v4  ;;  %v1741_v15 = vadd.f32 %v1709_v36, %v1603_v3  ;;  %v12836_v27 = vld [vmem:[#allocation4_spill] sm:$0xff] }
 0x45c   : > { %v1847_v33 = vmul.f32 %v12833_v20, %v9789_v50  ;;  %v4221_v47 = vadd.f32 %v4189_v59, %v4144_v37  ;;  %v12834_v25 = vrot.slane %v12828_v18, 3  ;;  %v1917_v43 = vrot.slane %v9969_v60, 4 }
 0x45d   : > { %v1984_v57 = vmul.f32 %v12836_v27, %v12835_v30  ;;  %v4252_v53 = vadd.f32 %v4220_v1, %v3713_v23  ;;  %v1878_v28 = vadd.f32 %v1846_v13, %v1740_v42  ;;  %v1985_v0 = vmul.f32 %v12836_v27, %v9812_v8  ;;  %v12839_v23 = vld [vmem:[#allocation34_spill] sm:$0xff]  ;;  %v12841_v42 = vld [vmem:[#allocation7_spill] sm:$0xff]  ;;  %v12842_v1 = vld [vmem:[#allocation16_spill] sm:$0xff] }
 0x45e   : > { %v10017_v45 = vsel %vm1789_vm3, %v12834_v25, %v1779_v54  ;;  %v1879_v38 = vadd.f32 %v1847_v33, %v1741_v15  ;;  %v4253_v59 = vadd.f32 %v4221_v47, %v3714_v2  ;;  %v12837_v51 = vrot.slane %v12828_v18, 4  ;;  %v10052_v47 = vld [vmem:[#allocation2 + $0x108] sm:$0xff] }
 0x45f   : > { %v2055_v3 = vrot.slane %v9969_v60, 5  ;;  %v2122_v10 = vmul.f32 %v12838_v40, %v9491_v17  ;;  %v4288_v39 = vadd.f32 %v12839_v23, %v4252_v53  ;;  %v2016_v56 = vadd.f32 %v1984_v57, %v1878_v28  ;;  %12843 = vst [vmem:[#allocation30_spill] sm:$0xff] %v10052_v47  ;;  %v12845_v27 = vld [vmem:[#allocation8_spill] sm:$0xff]  ;;  %v12846_v53 = vld [vmem:[#allocation18_spill] sm:$0xff] }
 0x460   : > { %v10030_v26 = vsel %vm1927_vm4, %v12837_v51, %v1917_v43  ;;  %v2017_v4 = vadd.f32 %v1985_v0, %v1879_v38  ;;  %v2123_v2 = vmul.f32 %v12838_v40, %v9833_v32  ;;  %v4289_v52 = vadd.f32 %v12839_v23, %v4253_v59 }
 0x461   : > { %v12840_v36 = vrot.slane %v12828_v18, 5  ;;  %v12333_v29 = vrot.slane %v9969_v60, 6  ;;  %v2260_v17 = vmul.f32 %v12841_v42, %v9511_v9  ;;  %v4324_v15 = vmul.f32 %v12842_v1, %v4288_v39  ;;  %v12848_v39 = vld [vmem:[#allocation21_spill] sm:$0xff] }
 0x462   : > { %v2154_v19 = vadd.f32 %v2122_v10, %v2016_v56  ;;  %v2155_v20 = vadd.f32 %v2123_v2, %v2017_v4  ;;  %v2261_v13 = vmul.f32 %v12841_v42, %v9847_v5  ;;  %v4325_v33 = vmul.f32 %v12842_v1, %v4289_v52  ;;  %v12849_v1 = vld [vmem:[#allocation13_spill] sm:$0xff] }
 0x463   : > { %v10043_v37 = vsel %vm2065_vm5, %v12840_v36, %v2055_v3  ;;  %v12844_v25 = vrot.slane %v12828_v18, 6  ;;  %v2331_v9 = vrot.slane %v9969_v60, 7  ;;  %v2398_v57 = vmul.f32 %v12845_v27, %v9551_v7 }
 0x464   : > { %v10066_v28 = vadd.f32 %v12846_v53, %v4324_v15  ;;  %v2292_v38 = vadd.f32 %v2260_v17, %v2154_v19  ;;  %v2293_v0 = vadd.f32 %v2261_v13, %v2155_v20  ;;  %v2399_v59 = vmul.f32 %v12845_v27, %v9875_v21 }
 0x465   : > { %v10060_v30 = vsel %vm2203_vm6, %v12844_v25, %v12333_v29  ;;  %v10071_v51 = vadd.f32 %v12846_v53, %v4325_v33  ;;  %v12847_v10 = vrot.slane %v12828_v18, 7  ;;  %v2467_v7 = vmul.f32 %v12848_v39, %v9278_v35 }
 0x466   : > { %v2468_v56 = vmul.f32 %v12848_v39, %v9731_v41  ;;  %v5132_v4 = vmul.f32 -1.442695, %v10066_v28  ;;  %v2430_v2 = vadd.f32 %v2398_v57, %v2292_v38  ;;  %v2431_v52 = vadd.f32 %v2399_v59, %v2293_v0  ;;  %v12850_v57 = vld [vmem:[#allocation33_spill] sm:$0xff]  ;;  %v12851_v59 = vld [vmem:[#allocation35_spill] sm:$0xff] }
 0x467   : > { %v10077_v23 = vsel %vm2341_vm7, %v12847_v10, %v2331_v9  ;;  %v12331_v36 = vrot.slane %v10052_v47, 1  ;;  %v5133_v17 = vmul.f32 -1.442695, %v10071_v51  ;;  %v2544_v15 = vmul.f32 %v12849_v1, %v9757_v46 }
 0x468   : > { %v2545_v19 = vmul.f32 %v12849_v1, %v9751_v44  ;;  %v12329_v20 = vrot.slane %v10052_v47, 2  ;;  %5612 = vpow2.f32 %v5132_v4  ;;  %v10091_v35 = vadd.f32 %v2467_v7, %v2430_v2 }
 0x469   : > { %v10093_v13 = vadd.f32 %v2468_v56, %v2431_v52  ;;  %v10101_v33 = vsel %vm1545_vm1, %v1533_v58, %v12331_v36  ;;  %5614 = vpow2.f32 %v5133_v17  ;;  %v2589_v53 = vmul.f32 %v12850_v57, %v9769_v63  ;;  %v12852_v63 = vld [vmem:[#allocation22_spill] sm:$0xff] }
 0x46a   : > { %v10105_v46 = vmul.f32 %v12849_v1, %v10101_v33  ;;  %v10113_v25 = vsel %vm1651_vm2, %v1641_v49, %v12329_v20  ;;  %v2590_v58 = vmul.f32 %v12850_v57, %v9777_v55  ;;  %v12328_v0 = vrot.slane %v10052_v47, 3 }
 0x46b   : > { %v10121_v38 = vmul.f32 %v12850_v57, %v10113_v25  ;;  %v2666_v10 = vmul.f32 %v12851_v59, %v9789_v50  ;;  %v2621_v7 = vadd.f32 %v2589_v53, %v2544_v15  ;;  %v2667_v49 = vmul.f32 %v12851_v59, %v9783_v62 }
 0x46c   : > { %v12330_v56 = vrot.slane %v10052_v47, 4  ;;  %v2743_v4 = vmul.f32 %v12852_v63, %v9812_v8  ;;  %v2622_v2 = vadd.f32 %v2590_v58, %v2545_v19  ;;  %v10137_v52 = vsel %vm1789_vm3, %v1779_v54, %v12328_v0  ;;  %v12856_v54 = vld [vmem:[#allocation24_spill] sm:$0xff] }
 0x46d   : > { %12853 = vst [vmem:[#allocation32_spill] sm:$0xff] %v10137_v52  ;;  %v2744_v50 = vmul.f32 %v12852_v63, %v9806_v61  ;;  %v12332_v17 = vrot.slane %v10052_v47, 5  ;;  %v10144_v15 = vmul.f32 %v12851_v59, %v10137_v52  ;;  %v2698_v53 = vadd.f32 %v2666_v10, %v2621_v7 }
 0x46e   : > { %v10152_v8 = vsel %vm1927_vm4, %v1917_v43, %v12330_v56  ;;  %v2820_v19 = vmul.f32 %v12856_v54, %v9833_v32  ;;  %v2699_v58 = vadd.f32 %v2667_v49, %v2622_v2  ;;  %v2821_v7 = vmul.f32 %v12856_v54, %v9827_v48  ;;  %v12860_v49 = vld [vmem:[#allocation9_spill] sm:$0xff] }
 0x46f   : > { %12854 = vst [vmem:[#allocation25_spill] sm:$0xff] %v10144_v15  ;;  %12855 = vst [vmem:[#allocation14_spill] sm:$0xff] %v10152_v8  ;;  %v10158_v0 = vmul.f32 %v12852_v63, %v10152_v8  ;;  %v10164_v10 = vsel %vm2065_vm5, %v2055_v3, %v12332_v17  ;;  %v2775_v20 = vadd.f32 %v2743_v4, %v2698_v53  ;;  %v12334_v32 = vrot.slane %v10052_v47, 6  ;;  %v12861_v17 = vld [vmem:[#allocation29_spill] sm:$0xff] }
 0x470   : > { %12858 = vst [vmem:[#allocation15_spill] sm:$0xff] %v10164_v10  ;;  %v10170_v43 = vmul.f32 %v12856_v54, %v10164_v10  ;;  %v2897_v2 = vmul.f32 %v12860_v49, %v9847_v5  ;;  %v2776_v56 = vadd.f32 %v2744_v50, %v2699_v58  ;;  %v2898_v36 = vmul.f32 %v12860_v49, %v9858_v12  ;;  %v12863_v50 = vld [vmem:[#allocation5_spill] sm:$0xff] }
 0x471   : > { %12857 = vst [vmem:[#allocation38_spill] sm:$0xff] %v10158_v0  ;;  %v2974_v29 = vmul.f32 %v12861_v17, %v9875_v21  ;;  %v2852_v0 = vadd.f32 %v2820_v19, %v2775_v20  ;;  %v12862_v4 = vrot.slane %v9969_v60, 6  ;;  %v2975_v5 = vmul.f32 %v12861_v17, %v9869_v34 }
 0x472   : > { %12859 = vst [vmem:[#allocation12_spill] sm:$0xff] %v10170_v43  ;;  %v3043_v58 = vmul.f32 %v12863_v50, %v9731_v41  ;;  %v5613_v43 = vpop.eup %5612  ;;  %v2853_v3 = vadd.f32 %v2821_v7, %v2776_v56  ;;  %v12865_v20 = vrot.slane %v10052_v47, 7  ;;  %v12867_v56 = vld [vmem:[#allocation39_spill] sm:$0xff] }
 0x473   : > { %v10186_v53 = vsel %vm2203_vm6, %v12862_v4, %v12334_v32  ;;  %v3044_v4 = vmul.f32 %v12863_v50, %v12828_v18  ;;  %v5615_v32 = vpop.eup %5614  ;;  %v4488_v54 = vadd.f32 1.0, %v5613_v43  ;;  %v2929_v15 = vadd.f32 %v2897_v2, %v2852_v0  ;;  %v12869_v43 = vld [vmem:[#allocation36_spill] sm:$0xff] }
 0x474   : > { %v10194_v21 = vmul.f32 %v12860_v49, %v10186_v53  ;;  %v10200_v19 = vsel %vm2341_vm7, %v2331_v9, %v12865_v20  ;;  %v3152_v7 = vmul.f32 %v12867_v56, %v9751_v44  ;;  %v2930_v49 = vadd.f32 %v2898_v36, %v2853_v3  ;;  %v12868_v9 = vld [vmem:[#allocation17_spill] sm:$0xff] }
 0x475   : > { %v10206_v41 = vmul.f32 %v12861_v17, %v10200_v19  ;;  %v3153_v22 = vmul.f32 %v12867_v56, %v9993_v6  ;;  %v3197_v20 = vmul.f32 %v12868_v9, %v9777_v55  ;;  %5616 = vrcp.f32 %v4488_v54 }
 0x476   : > { %12864 = vst [vmem:[#allocation6_spill] sm:$0xff] %v10194_v21  ;;  %v4489_v21 = vadd.f32 1.0, %v5615_v32  ;;  %v3006_v47 = vadd.f32 %v2974_v29, %v2929_v15  ;;  %v3198_v0 = vmul.f32 %v12868_v9, %v10003_v31  ;;  %v3274_v2 = vmul.f32 %v12869_v43, %v9783_v62 }
 0x477   : > { %12866 = vst [vmem:[#allocation31_spill] sm:$0xff] %v10206_v41  ;;  %v3007_v41 = vadd.f32 %v2975_v5, %v2930_v49  ;;  %v3229_v50 = vadd.f32 %v3197_v20, %v3152_v7  ;;  %v3275_v36 = vmul.f32 %v12869_v43, %v10017_v45  ;;  %v3351_v56 = vmul.f32 %v9669_v24, %v9806_v61 }
 0x478   : > { %5618 = vrcp.f32 %v4489_v21  ;;  %v3075_v32 = vadd.f32 %v3043_v58, %v3006_v47  ;;  %v3230_v3 = vadd.f32 %v3198_v0, %v3153_v22  ;;  %v3352_v29 = vmul.f32 %v9669_v24, %v10030_v26 }
 0x479   : > { %v3076_v15 = vadd.f32 %v3044_v4, %v3007_v41  ;;  %v3306_v54 = vadd.f32 %v3274_v2, %v3229_v50  ;;  %v3428_v9 = vmul.f32 %v9678_v11, %v9827_v48  ;;  %v3429_v49 = vmul.f32 %v9678_v11, %v10043_v37  ;;  %v10237_v50 = vld [vmem:[%s12009_s3 + $0x16] ss:$0 sm:$0xff] }
 0x47a   : > { %v3107_v5 = vadd.f32 %v3075_v32, %v10091_v35  ;;  %v3307_v21 = vadd.f32 %v3275_v36, %v3230_v3  ;;  %v3505_v22 = vmul.f32 %v9687_v16, %v9858_v12  ;;  %v3506_v47 = vmul.f32 %v9687_v16, %v10060_v30  ;;  %12870 = vst [vmem:[#allocation37_spill] sm:$0xff] %v10237_v50  ;;  %v10259_v32 = vld [vmem:[%s12009_s3 + $0x19] ss:$0 sm:$0xff] }
 0x47b   : > { %v3108_v58 = vadd.f32 %v3076_v15, %v10093_v13  ;;  %v3383_v7 = vadd.f32 %v3351_v56, %v3306_v54  ;;  %v3582_v4 = vmul.f32 %v10237_v50, %v9869_v34  ;;  %v3583_v35 = vmul.f32 %v10237_v50, %v10077_v23  ;;  %v10250_v13 = vld [vmem:[%s12009_s3 + $0x18] ss:$0 sm:$0xff]  ;;  %12872 = vst [vmem:[#allocation26_spill] sm:$0xff] %v10259_v32  ;;  %v10268_v54 = vld [vmem:[%s12009_s3 + $0x1a] ss:$0 sm:$0xff] }
 0x47c   : > { %v3384_v41 = vadd.f32 %v3352_v29, %v3307_v21  ;;  %v3651_v20 = vmul.f32 %v9701_v14, %v12828_v18  ;;  %v3652_v0 = vmul.f32 %v9701_v14, %v9969_v60  ;;  %12871 = vst [vmem:[#allocation10_spill] sm:$0xff] %v10250_v13  ;;  %v3760_v56 = vmul.f32 %v10250_v13, %v9993_v6 }
 0x47d   : > { %v3460_v2 = vadd.f32 %v3428_v9, %v3383_v7  ;;  %v3761_v36 = vmul.f32 %v10250_v13, %v10101_v33  ;;  %v3805_v3 = vmul.f32 %v10259_v32, %v10003_v31  ;;  %v3806_v29 = vmul.f32 %v10259_v32, %v10113_v25  ;;  %12873 = vst [vmem:[#allocation19_spill] sm:$0xff] %v10268_v54  ;;  %v10277_v7 = vld [vmem:[%s12009_s3 + $0x1b] ss:$0 sm:$0xff] }
 0x47e   : > { %v3461_v15 = vadd.f32 %v3429_v49, %v3384_v41  ;;  %v3882_v9 = vmul.f32 %v10268_v54, %v10017_v45  ;;  %v3883_v21 = vmul.f32 %v10268_v54, %v10137_v52  ;;  %12874 = vst [vmem:[#allocation4_spill] sm:$0xff] %v10277_v7  ;;  %v3959_v32 = vmul.f32 %v10277_v7, %v10030_v26  ;;  %v10286_v54 = vld [vmem:[%s12009_s3 + $0x1c] ss:$0 sm:$0xff] }
 0x47f   : > { %v3537_v49 = vadd.f32 %v3505_v22, %v3460_v2  ;;  %v3837_v41 = vadd.f32 %v3805_v3, %v3760_v56  ;;  %v3838_v13 = vadd.f32 %v3806_v29, %v3761_v36  ;;  %v3960_v14 = vmul.f32 %v10277_v7, %v10152_v8  ;;  %v5617_v50 = vpop.eup %5616  ;;  %12875 = vst [vmem:[#allocation28_spill] sm:$0xff] %v10286_v54  ;;  %v10295_v22 = vld [vmem:[%s12009_s3 + $0x1d] ss:$0 sm:$0xff] }
 0x480   : > { %v3538_v16 = vadd.f32 %v3506_v47, %v3461_v15  ;;  %v4036_v11 = vmul.f32 %v10286_v54, %v10043_v37  ;;  %v4037_v24 = vmul.f32 %v10286_v54, %v10164_v10  ;;  %v4113_v56 = vmul.f32 %v10295_v22, %v10060_v30  ;;  %v10306_v10 = vld [vmem:[%s12009_s3 + $0x1e] ss:$0 sm:$0xff] }
 0x481   : > { %v4584_v2 = vmul.f32 %v5617_v50, %v10066_v28  ;;  %v3614_v36 = vadd.f32 %v3582_v4, %v3537_v49  ;;  %v3914_v3 = vadd.f32 %v3882_v9, %v3837_v41  ;;  %v3915_v29 = vadd.f32 %v3883_v21, %v3838_v13 }
 0x482   : > { %v5619_v47 = vpop.eup %5618  ;;  %v3615_v7 = vadd.f32 %v3583_v35, %v3538_v16  ;;  %v4114_v54 = vmul.f32 %v10295_v22, %v10186_v53  ;;  %v4190_v8 = vmul.f32 %v10306_v10, %v10077_v23  ;;  %v4191_v50 = vmul.f32 %v10306_v10, %v10200_v19  ;;  %v10315_v16 = vld [vmem:[%s12009_s3] ss:$0 sm:$0xff] }
 0x483   : > { %v4585_v15 = vmul.f32 %v5619_v47, %v10071_v51  ;;  %v3683_v43 = vadd.f32 %v3651_v20, %v3614_v36  ;;  %v3991_v52 = vadd.f32 %v3959_v32, %v3914_v3  ;;  %v3992_v28 = vadd.f32 %v3960_v14, %v3915_v29  ;;  %v10324_v14 = vld [vmem:[%s12009_s3 + $0x1] ss:$0 sm:$0xff] }
 0x484   : > { %v3684_v51 = vadd.f32 %v3652_v0, %v3615_v7  ;;  %v1604_v35 = vmul.f32 %v10315_v16, %v9751_v44  ;;  %v1605_v13 = vmul.f32 %v10315_v16, %v9993_v6  ;;  %12876 = vst [vmem:[#allocation34_spill] sm:$0xff] %v10324_v14  ;;  %v1710_v0 = vmul.f32 %v10324_v14, %v9777_v55 }
 0x485   : > { %v4607_v4 = vpack.c.bf16 %v4585_v15, %v4584_v2  ;;  %v3715_v9 = vadd.f32 %v3683_v43, %v3107_v5  ;;  %v4068_v20 = vadd.f32 %v4036_v11, %v3991_v52  ;;  %v4069_v32 = vadd.f32 %v4037_v24, %v3992_v28  ;;  %v10334_v43 = vld [vmem:[%s12009_s3 + $0x2] ss:$0 sm:$0xff] }
 0x486   : > { %v3716_v21 = vadd.f32 %v3684_v51, %v3108_v58  ;;  %v1711_v44 = vmul.f32 %v10324_v14, %v10003_v31  ;;  %12877 = vst [vmem:[#allocation7_spill] sm:$0xff] %v10334_v43  ;;  %v1848_v24 = vmul.f32 %v10334_v43, %v9783_v62  ;;  %v1849_v11 = vmul.f32 %v10334_v43, %v10017_v45  ;;  %v10343_v58 = vld [vmem:[%s12009_s3 + $0x3] ss:$0 sm:$0xff] }
 0x487   : > { %5314 = vmatmul.mubr.msk.bf16.gmra.mrb[32].mxu0 %vm269_vm0, %v4607_v4  ;;  %v4145_v52 = vadd.f32 %v4113_v56, %v4068_v20  ;;  %v4146_v5 = vadd.f32 %v4114_v54, %v4069_v32  ;;  %v1742_v55 = vadd.f32 %v1710_v0, %v1604_v35  ;;  %12878 = vst [vmem:[#allocation16_spill] sm:$0xff] %v10343_v58  ;;  %v12881_v32 = vld [vmem:[#allocation25_spill] sm:$0xff] }
 0x488   : > { %v1986_v7 = vmul.f32 %v10343_v58, %v9806_v61  ;;  %v1743_v49 = vadd.f32 %v1711_v44, %v1605_v13  ;;  %v1987_v41 = vmul.f32 %v10343_v58, %v10030_v26  ;;  %v2124_v62 = vmul.f32 %v12838_v40, %v9827_v48 }
 0x489   : > { %v2125_v56 = vmul.f32 %v12838_v40, %v10043_v37  ;;  %v4222_v54 = vadd.f32 %v4190_v8, %v4145_v52  ;;  %v4223_v47 = vadd.f32 %v4191_v50, %v4146_v5  ;;  %v1880_v2 = vadd.f32 %v1848_v24, %v1742_v55  ;;  %v12885_v5 = vld [vmem:[#allocation38_spill] sm:$0xff] }
 0x48a   : > { %v2262_v36 = vmul.f32 %v12841_v42, %v9858_v12  ;;  %v1881_v3 = vadd.f32 %v1849_v11, %v1743_v49  ;;  %v2263_v61 = vmul.f32 %v12841_v42, %v10060_v30  ;;  %v2400_v29 = vmul.f32 %v12845_v27, %v9869_v34  ;;  %v10372_v34 = vld [vmem:[%s12007_s1 + $0x4] ss:$0 sm:$0xff]  ;;  %v10405_v11 = vld [vmem:[#allocation2 + $0x110] sm:$0xff] }
 0x48b   : > { %v2401_v15 = vmul.f32 %v12845_v27, %v10077_v23  ;;  %v4254_v48 = vadd.f32 %v4222_v54, %v3715_v9  ;;  %v4255_v28 = vadd.f32 %v4223_v47, %v3716_v21  ;;  %v2018_v4 = vadd.f32 %v1986_v7, %v1880_v2  ;;  %12879 = vst [vmem:[#allocation8_spill] sm:$0xff] %v10372_v34  ;;  %v12882_v21 = vld [vmem:[#allocation24_spill] sm:$0xff]  ;;  %v12886_v49 = vld [vmem:[#allocation5_spill] sm:$0xff] }
 0x48c   : > { %v2469_v40 = vmul.f32 %v12848_v39, %v12828_v18  ;;  %v2019_v8 = vadd.f32 %v1987_v41, %v1881_v3  ;;  %v2470_v12 = vmul.f32 %v12848_v39, %v9969_v60  ;;  %v2546_v50 = vmul.f32 %v12849_v1, %v9993_v6  ;;  %v10385_v1 = vld [vmem:[%s12007_s1 + $0x5] ss:$0 sm:$0xff]  ;;  %v12887_v47 = vld [vmem:[#allocation12_spill] sm:$0xff] }
 0x48d   : > { %v2591_v42 = vmul.f32 %v12850_v57, %v10003_v31  ;;  %v4290_v27 = vadd.f32 %v10372_v34, %v4254_v48  ;;  %v4291_v51 = vadd.f32 %v10372_v34, %v4255_v28  ;;  %v2156_v18 = vadd.f32 %v2124_v62, %v2018_v4  ;;  %12880 = vst [vmem:[#allocation18_spill] sm:$0xff] %v10385_v1  ;;  %v12889_v48 = vld [vmem:[#allocation6_spill] sm:$0xff] }
 0x48e   : > { %v2624_v35 = vadd.f32 %v10121_v38, %v10105_v46  ;;  %v2157_v39 = vadd.f32 %v2125_v56, %v2019_v8  ;;  %v2668_v6 = vmul.f32 %v12851_v59, %v10017_v45  ;;  %v2745_v31 = vmul.f32 %v12852_v63, %v10030_v26  ;;  %v12883_v59 = vld [vmem:[#allocation9_spill] sm:$0xff]  ;;  %v10397_v63 = vld [vmem:[%s12007_s1 + $0x6] ss:$0 sm:$0xff] }
 0x48f   : > { %v2623_v13 = vadd.f32 %v2591_v42, %v2546_v50  ;;  %v4326_v57 = vmul.f32 %v10385_v1, %v4290_v27  ;;  %v4327_v9 = vmul.f32 %v10385_v1, %v4291_v51  ;;  %v2294_v20 = vadd.f32 %v2262_v36, %v2156_v18  ;;  %12884 = vst [vmem:[#allocation21_spill] sm:$0xff] %v10397_v63  ;;  %v12893_v50 = vld [vmem:[#allocation17_spill] sm:$0xff]  ;;  %v12894_v27 = vld [vmem:[#allocation31_spill] sm:$0xff] }
 0x490   : > { %v2701_v46 = vadd.f32 %v12881_v32, %v2624_v35  ;;  %v2295_v38 = vadd.f32 %v2263_v61, %v2157_v39  ;;  %v2822_v45 = vmul.f32 %v12882_v21, %v10043_v37  ;;  %v2899_v26 = vmul.f32 %v12883_v59, %v10060_v30  ;;  %v12888_v61 = vld [vmem:[#allocation30_spill] sm:$0xff]  ;;  %v12900_v21 = vld [vmem:[#allocation11_spill] sm:$0xff] }
 0x491   : > { %v2700_v0 = vadd.f32 %v2668_v6, %v2623_v13  ;;  %v10400_v44 = vadd.f32 %v10397_v63, %v4326_v57  ;;  %v10403_v24 = vadd.f32 %v10397_v63, %v4327_v9  ;;  %v2432_v52 = vadd.f32 %v2400_v29, %v2294_v20  ;;  %v12896_v57 = vld [vmem:[#allocation32_spill] sm:$0xff] }
 0x492   : > { %v2778_v55 = vadd.f32 %v12885_v5, %v2701_v46  ;;  %v2433_v37 = vadd.f32 %v2401_v15, %v2295_v38  ;;  %v2976_v30 = vmul.f32 %v12861_v17, %v10077_v23  ;;  %v3045_v41 = vmul.f32 %v12886_v49, %v9969_v60  ;;  %v12890_v17 = vld [vmem:[#allocation39_spill] sm:$0xff]  ;;  %v12897_v9 = vld [vmem:[#allocation36_spill] sm:$0xff] }
 0x493   : > { %v2777_v7 = vadd.f32 %v2745_v31, %v2700_v0  ;;  %v5134_v62 = vmul.f32 -1.442695, %v10400_v44  ;;  %v5135_v56 = vmul.f32 -1.442695, %v10403_v24  ;;  %v2501_v54 = vadd.f32 %v2469_v40, %v2432_v52  ;;  %v12899_v0 = vld [vmem:[#allocation14_spill] sm:$0xff] }
 0x494   : > { %v2855_v2 = vadd.f32 %v12887_v47, %v2778_v55  ;;  %v2502_v36 = vadd.f32 %v2470_v12, %v2433_v37  ;;  %v3046_v29 = vmul.f32 %v12886_v49, %v12888_v61  ;;  %v3122_v15 = vrot.slane %v10405_v11, 1  ;;  %v12902_v49 = vld [vmem:[#allocation15_spill] sm:$0xff] }
 0x495   : > { %v2854_v3 = vadd.f32 %v2822_v45, %v2777_v7  ;;  %5620 = vpow2.f32 %v5134_v62  ;;  %v3154_v60 = vmul.f32 %v12890_v17, %v10101_v33  ;;  %v3167_v28 = vrot.slane %v10405_v11, 2  ;;  %v12903_v62 = vld [vmem:[#allocation20_spill] sm:$0xff] }
 0x496   : > { %v2932_v23 = vadd.f32 %v12889_v48, %v2855_v2  ;;  %5622 = vpow2.f32 %v5135_v56  ;;  %v12891_v40 = vrot.slane %v12888_v61, 1  ;;  %v3199_v42 = vmul.f32 %v12893_v50, %v10113_v25 }
 0x497   : > { %v2931_v4 = vadd.f32 %v2899_v26, %v2854_v3  ;;  %v12895_v33 = vrot.slane %v12888_v61, 2  ;;  %v3244_v39 = vrot.slane %v10405_v11, 3  ;;  %v3276_v25 = vmul.f32 %v12897_v9, %v12896_v57 }
 0x498   : > { %v3125_v12 = vsel %vm1545_vm1, %v12891_v40, %v3122_v15  ;;  %v3009_v51 = vadd.f32 %v12894_v27, %v2932_v23  ;;  %v3231_v31 = vadd.f32 %v3199_v42, %v3154_v60  ;;  %v12898_v32 = vrot.slane %v12888_v61, 3  ;;  %v12905_v23 = vld [vmem:[#allocation27_spill] sm:$0xff]  ;;  %v12906_v42 = vld [vmem:[#allocation37_spill] sm:$0xff] }
 0x499   : > { %v3155_v18 = vmul.f32 %v12890_v17, %v3125_v12  ;;  %v3170_v35 = vsel %vm1651_vm2, %v12895_v33, %v3167_v28  ;;  %v3008_v13 = vadd.f32 %v2976_v30, %v2931_v4  ;;  %v3321_v38 = vrot.slane %v10405_v11, 4  ;;  %v10468_v4 = vld [vmem:[#allocation2 + $0x118] sm:$0xff] }
 0x49a   : > { %v3200_v6 = vmul.f32 %v12893_v50, %v3170_v35  ;;  %v3078_v20 = vadd.f32 %v3046_v29, %v3009_v51  ;;  %v3247_v46 = vsel %vm1789_vm3, %v12898_v32, %v3244_v39  ;;  %v3353_v45 = vmul.f32 %v12900_v21, %v12899_v0 }
 0x49b   : > { %v3077_v59 = vadd.f32 %v3045_v41, %v3008_v13  ;;  %v3277_v52 = vmul.f32 %v12897_v9, %v3247_v46  ;;  %v3308_v5 = vadd.f32 %v3276_v25, %v3231_v31  ;;  %v12901_v37 = vrot.slane %v12888_v61, 4 }
 0x49c   : > { %v3232_v26 = vadd.f32 %v3200_v6, %v3155_v18  ;;  %v3110_v55 = vadd.f32 %v3078_v20, %v2502_v36  ;;  %v3398_v30 = vrot.slane %v10405_v11, 5  ;;  %v3430_v56 = vmul.f32 %v12903_v62, %v12902_v49  ;;  %v12909_v6 = vld [vmem:[#allocation23_spill] sm:$0xff]  ;;  %v10490_v20 = vld [vmem:[%s12009_s3 + $0x15] ss:$0 sm:$0xff] }
 0x49d   : > { %v3324_v7 = vsel %vm1927_vm4, %v12901_v37, %v3321_v38  ;;  %v3109_v47 = vadd.f32 %v3077_v59, %v2501_v54  ;;  %v3385_v3 = vadd.f32 %v3353_v45, %v3308_v5  ;;  %v12904_v29 = vrot.slane %v12888_v61, 5 }
 0x49e   : > { %v3309_v2 = vadd.f32 %v3277_v52, %v3232_v26  ;;  %v3354_v41 = vmul.f32 %v12900_v21, %v3324_v7  ;;  %v3475_v48 = vrot.slane %v10405_v11, 6  ;;  %v3507_v17 = vmul.f32 %v12905_v23, %v10186_v53 }
 0x49f   : > { %v3401_v36 = vsel %vm2065_vm5, %v12904_v29, %v3398_v30  ;;  %v3552_v60 = vrot.slane %v10405_v11, 7  ;;  %v3462_v50 = vadd.f32 %v3430_v56, %v3385_v3  ;;  %v3584_v27 = vmul.f32 %v12906_v42, %v10200_v19  ;;  %v5621_v51 = vpop.eup %5620 }
 0x4a0   : > { %v3386_v40 = vadd.f32 %v3354_v41, %v3309_v2  ;;  %v3431_v54 = vmul.f32 %v12903_v62, %v3401_v36  ;;  %v12907_v18 = vrot.slane %v12888_v61, 6  ;;  %v12908_v53 = vrot.slane %v12888_v61, 7  ;;  %v5623_v19 = vpop.eup %5622  ;;  %v12911_v62 = vld [vmem:[#allocation26_spill] sm:$0xff] }
 0x4a1   : > { %v3653_v31 = vmul.f32 %v12909_v6, %v12888_v61  ;;  %v3654_v57 = vmul.f32 %v12909_v6, %v10405_v11  ;;  %v4490_v9 = vadd.f32 1.0, %v5621_v51  ;;  %v3539_v0 = vadd.f32 %v3507_v17, %v3462_v50  ;;  %v12910_v61 = vld [vmem:[#allocation10_spill] sm:$0xff]  ;;  %v12913_v6 = vld [vmem:[#allocation4_spill] sm:$0xff] }
 0x4a2   : > { %v3478_v33 = vsel %vm2203_vm6, %v12907_v18, %v3475_v48  ;;  %v3555_v13 = vsel %vm2341_vm7, %v12908_v53, %v3552_v60  ;;  %v3463_v25 = vadd.f32 %v3431_v54, %v3386_v40  ;;  %v4491_v21 = vadd.f32 1.0, %v5623_v19 }
 0x4a3   : > { %v3508_v32 = vmul.f32 %v10490_v20, %v3478_v33  ;;  %v3585_v45 = vmul.f32 %v12906_v42, %v3555_v13  ;;  %v3730_v59 = vrot.slane %v10468_v4, 1  ;;  %v3762_v26 = vmul.f32 %v12910_v61, %v3125_v12 }
 0x4a4   : > { %5624 = vrcp.f32 %v4490_v9  ;;  %v3616_v5 = vadd.f32 %v3584_v27, %v3539_v0  ;;  %v3775_v37 = vrot.slane %v10468_v4, 2  ;;  %v3807_v56 = vmul.f32 %v12911_v62, %v3170_v35  ;;  %v12914_v9 = vld [vmem:[#allocation28_spill] sm:$0xff] }
 0x4a5   : > { %v3540_v52 = vadd.f32 %v3508_v32, %v3463_v25  ;;  %5626 = vrcp.f32 %v4491_v21  ;;  %v3733_v49 = vsel %vm1545_vm1, %v3122_v15, %v3730_v59  ;;  %v3852_v2 = vrot.slane %v10468_v4, 3  ;;  %v12912_v15 = vld [vmem:[#allocation19_spill] sm:$0xff]  ;;  %v10527_v21 = vld [vmem:[#allocation2 + $0x128] sm:$0xff] }
 0x4a6   : > { %v3685_v3 = vadd.f32 %v3653_v31, %v3616_v5  ;;  %v3763_v29 = vmul.f32 %v12910_v61, %v3733_v49  ;;  %v3778_v12 = vsel %vm1651_vm2, %v3167_v28, %v3775_v37  ;;  %v3839_v17 = vadd.f32 %v3807_v56, %v3762_v26  ;;  %v10536_v26 = vld [vmem:[#allocation2 + $0x148] sm:$0xff]  ;;  %v10540_v49 = vld [vmem:[#allocation2 + $0x138] sm:$0xff]  ;;  %v10542_v56 = vld [vmem:[#allocation2 + $0x140] sm:$0xff] }
 0x4a7   : > { %v3617_v41 = vadd.f32 %v3585_v45, %v3540_v52  ;;  %v3808_v23 = vmul.f32 %v12911_v62, %v3778_v12  ;;  %v3855_v40 = vsel %vm1789_vm3, %v3244_v39, %v3852_v2  ;;  %v3884_v54 = vmul.f32 %v12912_v15, %v3247_v46 }
 0x4a8   : > { %v3717_v50 = vadd.f32 %v3685_v3, %v3109_v47  ;;  %v3885_v27 = vmul.f32 %v12912_v15, %v3855_v40  ;;  %v3929_v51 = vrot.slane %v10468_v4, 4  ;;  %v3961_v31 = vmul.f32 %v12913_v6, %v3324_v7  ;;  %v10525_v7 = vld [vmem:[#allocation2 + $0x120] sm:$0xff] }
 0x4a9   : > { %v3686_v35 = vadd.f32 %v3654_v57, %v3617_v41  ;;  %v3840_v18 = vadd.f32 %v3808_v23, %v3763_v29  ;;  %v3916_v53 = vadd.f32 %v3884_v54, %v3839_v17  ;;  %v4006_v28 = vrot.slane %v10468_v4, 5 }
 0x4aa   : > { %v3932_v39 = vsel %vm1927_vm4, %v3321_v38, %v3929_v51  ;;  %v4038_v46 = vmul.f32 %v12914_v9, %v3401_v36  ;;  %v4083_v47 = vrot.slane %v10468_v4, 6  ;;  %v4115_v36 = vmul.f32 %v10295_v22, %v3478_v33 }
 0x4ab   : > { %v3718_v19 = vadd.f32 %v3686_v35, %v3110_v55  ;;  %v3917_v57 = vadd.f32 %v3885_v27, %v3840_v18  ;;  %v3962_v25 = vmul.f32 %v12913_v6, %v3932_v39  ;;  %v3993_v32 = vadd.f32 %v3961_v31, %v3916_v53  ;;  %v10529_v55 = vld [vmem:[#allocation2 + $0x130] sm:$0xff] }
 0x4ac   : > { %v4009_v0 = vsel %vm2065_vm5, %v3398_v30, %v4006_v28  ;;  %v4086_v38 = vsel %vm2203_vm6, %v3475_v48, %v4083_v47  ;;  %v4160_v59 = vrot.slane %v10468_v4, 7  ;;  %v4192_v37 = vmul.f32 %v10306_v10, %v3555_v13 }
 0x4ad   : > { %v4039_v45 = vmul.f32 %v12914_v9, %v4009_v0  ;;  %v3994_v52 = vadd.f32 %v3962_v25, %v3917_v57  ;;  %v4070_v5 = vadd.f32 %v4038_v46, %v3993_v32  ;;  %v4116_v30 = vmul.f32 %v10295_v22, %v4086_v38 }
 0x4ae   : > { %v5625_v2 = vpop.eup %5624  ;;  %v4163_v48 = vsel %vm2341_vm7, %v3552_v60, %v4160_v59  ;;  %v1534_v4 = vrot.slane %v10525_v7, 1  ;;  %v1535_v33 = vrot.slane %v10527_v21, 1  ;;  %v1536_v41 = vrot.slane %v10529_v55, 1 }
 0x4af   : > { %v5627_v3 = vpop.eup %5626  ;;  %v4586_v29 = vmul.f32 %v5625_v2, %v10400_v44  ;;  %v4071_v13 = vadd.f32 %v4039_v45, %v3994_v52  ;;  %v4147_v12 = vadd.f32 %v4115_v36, %v4070_v5  ;;  %v4193_v23 = vmul.f32 %v10306_v10, %v4163_v48 }
 0x4b0   : > { %v4587_v17 = vmul.f32 %v5627_v3, %v10403_v24  ;;  %v1537_v11 = vrot.slane %v10540_v49, 1  ;;  %v1538_v40 = vrot.slane %v10542_v56, 1  ;;  %v12371_v60 = vrot.slane %v10536_v26, 1 }
 0x4b1   : > { %v4148_v54 = vadd.f32 %v4116_v30, %v4071_v13  ;;  %v4224_v35 = vadd.f32 %v4192_v37, %v4147_v12  ;;  %v10559_v27 = vsel %vm1545_vm1, %v1535_v33, %v1536_v41  ;;  %v1553_v44 = vsel %vm1545_vm1, %v1534_v4, %v1535_v33 }
 0x4b2   : > { %v4608_v51 = vpack.c.bf16 %v4587_v17, %v4586_v29  ;;  %v10567_v24 = vsel %vm1545_vm1, %v1538_v40, %v12371_v60  ;;  %v10571_v18 = vsel %vm1545_vm1, %v1537_v11, %v1538_v40  ;;  %v10575_v53 = vsel %vm1545_vm1, %v1536_v41, %v1537_v11 }
 0x4b3   : > { %v4225_v31 = vadd.f32 %v4193_v23, %v4148_v54  ;;  %v4256_v28 = vadd.f32 %v4224_v35, %v3717_v50  ;;  %v1606_v39 = vmul.f32 %v10315_v16, %v1553_v44  ;;  %v1607_v46 = vmul.f32 %v10315_v16, %v10559_v27 }
 0x4b4   : > { %5317 = vmatprep.mubr.msk.bf16.mxu0 %vm269_vm0, %v4608_v51  ;;  %v1642_v47 = vrot.slane %v10525_v7, 2  ;;  %v1643_v57 = vrot.slane %v10527_v21, 2  ;;  %v1644_v25 = vrot.slane %v10529_v55, 2  ;;  %v1645_v32 = vrot.slane %v10540_v49, 2 }
 0x4b5   : > { %v4257_v0 = vadd.f32 %v4225_v31, %v3718_v19  ;;  %v4292_v45 = vadd.f32 %v10372_v34, %v4256_v28  ;;  %v1646_v50 = vrot.slane %v10542_v56, 2  ;;  %v12369_v38 = vrot.slane %v10536_v26, 2 }
 0x4b6   : > { %v10590_v36 = vsel %vm1651_vm2, %v1644_v25, %v1645_v32  ;;  %v10594_v59 = vsel %vm1651_vm2, %v1643_v57, %v1644_v25  ;;  %v1659_v52 = vsel %vm1651_vm2, %v1642_v47, %v1643_v57  ;;  %v1780_v5 = vrot.slane %v10525_v7, 3 }
 0x4b7   : > { %12915 = vst [vmem:[#allocation13_spill] sm:$0xff] %v10590_v36  ;;  %v4293_v19 = vadd.f32 %v10372_v34, %v4257_v0  ;;  %v4328_v30 = vmul.f32 %v10385_v1, %v4292_v45  ;;  %v10605_v37 = vsel %vm1651_vm2, %v1646_v50, %v12369_v38  ;;  %v10609_v2 = vsel %vm1651_vm2, %v1645_v32, %v1646_v50 }
 0x4b8   : > { %v1712_v48 = vmul.f32 %v10324_v14, %v1659_v52  ;;  %v1713_v4 = vmul.f32 %v10324_v14, %v10594_v59  ;;  %v1781_v33 = vrot.slane %v10527_v21, 3  ;;  %v1782_v41 = vrot.slane %v10529_v55, 3 }
 0x4b9   : > { %v4329_v3 = vmul.f32 %v10385_v1, %v4293_v19  ;;  %v10618_v29 = vadd.f32 %v10397_v63, %v4328_v30  ;;  %v1783_v13 = vrot.slane %v10540_v49, 3  ;;  %v1784_v12 = vrot.slane %v10542_v56, 3 }
 0x4ba   : > { %v1744_v23 = vadd.f32 %v1712_v48, %v1606_v39  ;;  %v1745_v17 = vadd.f32 %v1713_v4, %v1607_v46  ;;  %v12368_v11 = vrot.slane %v10536_v26, 3  ;;  %v10625_v40 = vsel %vm1789_vm3, %v1781_v33, %v1782_v41 }
 0x4bb   : > { %v10628_v54 = vadd.f32 %v10397_v63, %v4329_v3  ;;  %v5136_v35 = vmul.f32 -1.442695, %v10618_v29  ;;  %v10633_v44 = vsel %vm1789_vm3, %v1783_v13, %v1784_v12  ;;  %v10637_v51 = vsel %vm1789_vm3, %v1782_v41, %v1783_v13 }
 0x4bc   : > { %12916 = vst [vmem:[#allocation33_spill] sm:$0xff] %v10637_v51  ;;  %v10643_v31 = vsel %vm1789_vm3, %v1784_v12, %v12368_v11  ;;  %v1797_v28 = vsel %vm1789_vm3, %v1780_v5, %v1781_v33  ;;  %v1851_v39 = vmul.f32 %v10334_v43, %v10625_v40  ;;  %v1918_v46 = vrot.slane %v10525_v7, 4 }
 0x4bd   : > { %5628 = vpow2.f32 %v5136_v35  ;;  %v5137_v47 = vmul.f32 -1.442695, %v10628_v54  ;;  %v1850_v57 = vmul.f32 %v10334_v43, %v1797_v28  ;;  %v1919_v25 = vrot.slane %v10527_v21, 4 }
 0x4be   : > { %v1883_v32 = vadd.f32 %v1851_v39, %v1745_v17  ;;  %v1920_v0 = vrot.slane %v10529_v55, 4  ;;  %v1921_v45 = vrot.slane %v10540_v49, 4  ;;  %v1922_v50 = vrot.slane %v10542_v56, 4 }
 0x4bf   : > { %5630 = vpow2.f32 %v5137_v47  ;;  %v1882_v52 = vadd.f32 %v1850_v57, %v1744_v23  ;;  %v12366_v5 = vrot.slane %v10536_v26, 4  ;;  %v1935_v19 = vsel %vm1927_vm4, %v1918_v46, %v1919_v25 }
 0x4c0   : > { %v10661_v30 = vsel %vm1927_vm4, %v1921_v45, %v1922_v50  ;;  %v10665_v48 = vsel %vm1927_vm4, %v1920_v0, %v1921_v45  ;;  %v10669_v4 = vsel %vm1927_vm4, %v1919_v25, %v1920_v0  ;;  %v1988_v33 = vmul.f32 %v10343_v58, %v1935_v19 }
 0x4c1   : > { %12917 = vst [vmem:[#allocation35_spill] sm:$0xff] %v10665_v48  ;;  %v10676_v41 = vsel %vm1927_vm4, %v1922_v50, %v12366_v5  ;;  %v1989_v3 = vmul.f32 %v10343_v58, %v10669_v4  ;;  %v2056_v13 = vrot.slane %v10525_v7, 5  ;;  %v2057_v12 = vrot.slane %v10527_v21, 5 }
 0x4c2   : > { %v2020_v23 = vadd.f32 %v1988_v33, %v1882_v52  ;;  %v2058_v17 = vrot.slane %v10529_v55, 5  ;;  %v2059_v35 = vrot.slane %v10540_v49, 5  ;;  %v2060_v28 = vrot.slane %v10542_v56, 5 }
 0x4c3   : > { %v2021_v39 = vadd.f32 %v1989_v3, %v1883_v32  ;;  %v12367_v46 = vrot.slane %v10536_v26, 5  ;;  %v2073_v47 = vsel %vm2065_vm5, %v2056_v13, %v2057_v12  ;;  %v2194_v57 = vrot.slane %v10525_v7, 6  ;;  %v10704_v32 = vld [vmem:[%s12009_s3 + $0x4] ss:$0 sm:$0xff] }
 0x4c4   : > { %v10691_v25 = vsel %vm2065_vm5, %v2059_v35, %v2060_v28  ;;  %v10695_v0 = vsel %vm2065_vm5, %v2058_v17, %v2059_v35  ;;  %v10699_v45 = vsel %vm2065_vm5, %v2057_v12, %v2058_v17  ;;  %12918 = vst [vmem:[#allocation22_spill] sm:$0xff] %v10704_v32  ;;  %v2126_v50 = vmul.f32 %v10704_v32, %v2073_v47 }
 0x4c5   : > { %v10711_v52 = vsel %vm2065_vm5, %v2060_v28, %v12367_v46  ;;  %v2127_v19 = vmul.f32 %v10704_v32, %v10699_v45  ;;  %v2195_v33 = vrot.slane %v10527_v21, 6  ;;  %v2196_v3 = vrot.slane %v10529_v55, 6 }
 0x4c6   : > { %v2158_v13 = vadd.f32 %v2126_v50, %v2020_v23  ;;  %v2197_v12 = vrot.slane %v10540_v49, 6  ;;  %v2198_v17 = vrot.slane %v10542_v56, 6  ;;  %v12370_v35 = vrot.slane %v10536_v26, 6 }
 0x4c7   : > { %v5629_v47 = vpop.eup %5628  ;;  %v2159_v5 = vadd.f32 %v2127_v19, %v2021_v39  ;;  %v2210_v28 = vsel %vm2203_vm6, %v2195_v33, %v2196_v3  ;;  %v2211_v46 = vsel %vm2203_vm6, %v2194_v57, %v2195_v33  ;;  %v2332_v11 = vrot.slane %v10525_v7, 7  ;;  %v10742_v7 = vld [vmem:[%s12009_s3 + $0x5] ss:$0 sm:$0xff] }
 0x4c8   : > { %v4492_v38 = vadd.f32 1.0, %v5629_v47  ;;  %v10729_v23 = vsel %vm2203_vm6, %v2198_v17, %v12370_v35  ;;  %v10733_v50 = vsel %vm2203_vm6, %v2197_v12, %v2198_v17  ;;  %v10737_v39 = vsel %vm2203_vm6, %v2196_v3, %v2197_v12  ;;  %12919 = vst [vmem:[#allocation29_spill] sm:$0xff] %v10742_v7 }
 0x4c9   : > { %v5631_v19 = vpop.eup %5630  ;;  %v2264_v57 = vmul.f32 %v10742_v7, %v2211_v46  ;;  %v2265_v33 = vmul.f32 %v10742_v7, %v2210_v28  ;;  %v2333_v47 = vrot.slane %v10527_v21, 7  ;;  %v2334_v35 = vrot.slane %v10529_v55, 7 }
 0x4ca   : > { %v4493_v17 = vadd.f32 1.0, %v5631_v19  ;;  %5632 = vrcp.f32 %v4492_v38  ;;  %v2335_v60 = vrot.slane %v10540_v49, 7  ;;  %v2336_v3 = vrot.slane %v10542_v56, 7 }
 0x4cb   : > { %v2296_v12 = vadd.f32 %v2264_v57, %v2158_v13  ;;  %v2297_v63 = vadd.f32 %v2265_v33, %v2159_v5  ;;  %v12378_v1 = vrot.slane %v10536_v26, 7  ;;  %v2348_v32 = vsel %vm2341_vm7, %v2333_v47, %v2334_v35  ;;  %v10772_v13 = vld [vmem:[%s12009_s3 + $0x6] ss:$0 sm:$0xff] }
 0x4cc   : > { %5634 = vrcp.f32 %v4493_v17  ;;  %v10755_v46 = vsel %vm2341_vm7, %v2335_v60, %v2336_v3  ;;  %v10759_v19 = vsel %vm2341_vm7, %v2334_v35, %v2335_v60  ;;  %v2349_v38 = vsel %vm2341_vm7, %v2332_v11, %v2333_v47  ;;  %12920 = vst [vmem:[#allocation25_spill] sm:$0xff] %v10772_v13  ;;  %v10779_v60 = vld [vmem:[%s12009_s3 + $0x7] ss:$0 sm:$0xff]  ;;  %v10788_v47 = vld [vmem:[%s12009_s3 + $0x8] ss:$0 sm:$0xff] }
 0x4cd   : > { %v10767_v5 = vsel %vm2341_vm7, %v2336_v3, %v12378_v1  ;;  %v2402_v57 = vmul.f32 %v10772_v13, %v2349_v38  ;;  %v2403_v33 = vmul.f32 %v10772_v13, %v2348_v32  ;;  %12921 = vst [vmem:[#allocation24_spill] sm:$0xff] %v10779_v60  ;;  %v2471_v11 = vmul.f32 %v10779_v60, %v10527_v21  ;;  %v10797_v38 = vld [vmem:[%s12009_s3 + $0x9] ss:$0 sm:$0xff] }
 0x4ce   : > { %v2472_v35 = vmul.f32 %v10779_v60, %v10529_v55  ;;  %12922 = vst [vmem:[#allocation9_spill] sm:$0xff] %v10788_v47  ;;  %v2548_v17 = vmul.f32 %v10788_v47, %v10559_v27  ;;  %v2549_v3 = vmul.f32 %v10788_v47, %v10575_v53  ;;  %12923 = vst [vmem:[#allocation38_spill] sm:$0xff] %v10797_v38  ;;  %v10806_v27 = vld [vmem:[%s12009_s3 + $0xa] ss:$0 sm:$0xff] }
 0x4cf   : > { %v2593_v21 = vmul.f32 %v10797_v38, %v10594_v59  ;;  %v2434_v1 = vadd.f32 %v2402_v57, %v2296_v12  ;;  %v2435_v60 = vadd.f32 %v2403_v33, %v2297_v63  ;;  %v2594_v13 = vmul.f32 %v10797_v38, %v10590_v36  ;;  %12924 = vst [vmem:[#allocation5_spill] sm:$0xff] %v10806_v27  ;;  %v10815_v59 = vld [vmem:[%s12009_s3 + $0xb] ss:$0 sm:$0xff] }
 0x4d0   : > { %v2670_v47 = vmul.f32 %v10806_v27, %v10625_v40  ;;  %v2671_v34 = vmul.f32 %v10806_v27, %v10637_v51  ;;  %12925 = vst [vmem:[#allocation12_spill] sm:$0xff] %v10815_v59  ;;  %v2747_v63 = vmul.f32 %v10815_v59, %v10669_v4  ;;  %v2748_v12 = vmul.f32 %v10815_v59, %v10665_v48 }
 0x4d1   : > { %v2625_v7 = vadd.f32 %v2593_v21, %v2548_v17  ;;  %v10821_v57 = vadd.f32 %v2471_v11, %v2434_v1  ;;  %v10823_v33 = vadd.f32 %v2472_v35, %v2435_v60  ;;  %v2626_v40 = vadd.f32 %v2594_v13, %v2549_v3  ;;  %v10828_v17 = vld [vmem:[%s12009_s3 + $0xc] ss:$0 sm:$0xff]  ;;  %v10837_v1 = vld [vmem:[%s12009_s3 + $0xd] ss:$0 sm:$0xff]  ;;  %v10845_v35 = vld [vmem:[%s12009_s3 + $0xe] ss:$0 sm:$0xff] }
 0x4d2   : > { %12926 = vst [vmem:[#allocation30_spill] sm:$0xff] %v10828_v17  ;;  %v2824_v21 = vmul.f32 %v10828_v17, %v10699_v45  ;;  %v2825_v4 = vmul.f32 %v10828_v17, %v10695_v0  ;;  %12927 = vst [vmem:[#allocation6_spill] sm:$0xff] %v10837_v1  ;;  %v2901_v60 = vmul.f32 %v10837_v1, %v2210_v28 }
 0x4d3   : > { %v2702_v27 = vadd.f32 %v2670_v47, %v2625_v7  ;;  %v2902_v13 = vmul.f32 %v10837_v1, %v10737_v39  ;;  %v2703_v11 = vadd.f32 %v2671_v34, %v2626_v40  ;;  %12928 = vst [vmem:[#allocation39_spill] sm:$0xff] %v10845_v35  ;;  %v2978_v45 = vmul.f32 %v10845_v35, %v2348_v32  ;;  %v10853_v47 = vld [vmem:[%s12009_s3 + $0xf] ss:$0 sm:$0xff]  ;;  %v10862_v32 = vld [vmem:[%s12009_s3 + $0x10] ss:$0 sm:$0xff] }
 0x4d4   : > { %v2979_v7 = vmul.f32 %v10845_v35, %v10759_v19  ;;  %12929 = vst [vmem:[#allocation17_spill] sm:$0xff] %v10853_v47  ;;  %v3047_v28 = vmul.f32 %v10853_v47, %v10529_v55  ;;  %v5633_v3 = vpop.eup %5632  ;;  %v3048_v40 = vmul.f32 %v10853_v47, %v10540_v49  ;;  %12930 = vst [vmem:[#allocation31_spill] sm:$0xff] %v10862_v32  ;;  %v10872_v55 = vld [vmem:[%s12009_s3 + $0x11] ss:$0 sm:$0xff] }
 0x4d5   : > { %v2779_v34 = vadd.f32 %v2747_v63, %v2702_v27  ;;  %v3156_v35 = vmul.f32 %v10862_v32, %v10575_v53  ;;  %v3157_v1 = vmul.f32 %v10862_v32, %v10571_v18  ;;  %v4588_v17 = vmul.f32 %v5633_v3, %v10618_v29  ;;  %12931 = vst [vmem:[#allocation32_spill] sm:$0xff] %v10872_v55  ;;  %v10881_v32 = vld [vmem:[%s12009_s3 + $0x12] ss:$0 sm:$0xff] }
 0x4d6   : > { %v2780_v59 = vadd.f32 %v2748_v12, %v2703_v11  ;;  %v3201_v27 = vmul.f32 %v10872_v55, %v10590_v36  ;;  %v3202_v63 = vmul.f32 %v10872_v55, %v10609_v2  ;;  %v5635_v47 = vpop.eup %5634  ;;  %12932 = vst [vmem:[#allocation36_spill] sm:$0xff] %v10881_v32  ;;  %v3278_v29 = vmul.f32 %v10881_v32, %v10637_v51  ;;  %v10890_v11 = vld [vmem:[%s12009_s3 + $0x13] ss:$0 sm:$0xff] }
 0x4d7   : > { %v2856_v38 = vadd.f32 %v2824_v21, %v2779_v34  ;;  %v3279_v12 = vmul.f32 %v10881_v32, %v10633_v44  ;;  %v3355_v3 = vmul.f32 %v10890_v11, %v10665_v48  ;;  %v4589_v21 = vmul.f32 %v5635_v47, %v10628_v54  ;;  %v10900_v32 = vld [vmem:[%s12009_s3 + $0x14] ss:$0 sm:$0xff] }
 0x4d8   : > { %v2857_v34 = vadd.f32 %v2825_v4, %v2780_v59  ;;  %v3233_v55 = vadd.f32 %v3201_v27, %v3156_v35  ;;  %v3234_v58 = vadd.f32 %v3202_v63, %v3157_v1  ;;  %v3356_v51 = vmul.f32 %v10890_v11, %v10661_v30 }
 0x4d9   : > { %v2933_v43 = vadd.f32 %v2901_v60, %v2856_v38  ;;  %v3432_v14 = vmul.f32 %v10900_v32, %v10695_v0  ;;  %v3433_v48 = vmul.f32 %v10900_v32, %v10691_v25  ;;  %v4609_v36 = vpack.c.bf16 %v4589_v21, %v4588_v17 }
 0x4da   : > { %v2934_v54 = vadd.f32 %v2902_v13, %v2857_v34  ;;  %v3310_v59 = vadd.f32 %v3278_v29, %v3233_v55  ;;  %v3311_v4 = vadd.f32 %v3279_v12, %v3234_v58  ;;  %v3509_v38 = vmul.f32 %v10490_v20, %v10737_v39 }
 0x4db   : > { %v3010_v1 = vadd.f32 %v2978_v45, %v2933_v43  ;;  %v3510_v60 = vmul.f32 %v10490_v20, %v10733_v50  ;;  %v3586_v35 = vmul.f32 %v12906_v42, %v10759_v19  ;;  %5318 = vmatmul.mubr.msk.bf16.gmra.mrb[36].mxu0 %vm269_vm0, %v4609_v36  ;;  %v3587_v17 = vmul.f32 %v12906_v42, %v10755_v46  ;;  %v10918_v43 = vld [vmem:[%s12009_s3 + $0x17] ss:$0 sm:$0xff] }
 0x4dc   : > { %v3011_v47 = vadd.f32 %v2979_v7, %v2934_v54  ;;  %v3387_v27 = vadd.f32 %v3355_v3, %v3310_v59  ;;  %v3388_v63 = vadd.f32 %v3356_v51, %v3311_v4  ;;  %v3655_v58 = vmul.f32 %v10918_v43, %v10540_v49  ;;  %v10942_v59 = vld [vmem:[#allocation2 + $0x158] sm:$0xff] }
 0x4dd   : > { %v3079_v13 = vadd.f32 %v3047_v28, %v3010_v1  ;;  %v3656_v45 = vmul.f32 %v10918_v43, %v10542_v56  ;;  %v3764_v36 = vmul.f32 %v12910_v61, %v10571_v18  ;;  %v3765_v42 = vmul.f32 %v12910_v61, %v10567_v24 }
 0x4de   : > { %v3080_v7 = vadd.f32 %v3048_v40, %v3011_v47  ;;  %v3464_v51 = vadd.f32 %v3432_v14, %v3387_v27  ;;  %v3465_v55 = vadd.f32 %v3433_v48, %v3388_v63  ;;  %v3809_v29 = vmul.f32 %v12911_v62, %v10609_v2 }
 0x4df   : > { %v3111_v28 = vadd.f32 %v3079_v13, %v10821_v57  ;;  %v3810_v12 = vmul.f32 %v12911_v62, %v10605_v37  ;;  %v3886_v3 = vmul.f32 %v12912_v15, %v10633_v44  ;;  %v3887_v14 = vmul.f32 %v12912_v15, %v10643_v31 }
 0x4e0   : > { %v3112_v21 = vadd.f32 %v3080_v7, %v10823_v33  ;;  %v3541_v34 = vadd.f32 %v3509_v38, %v3464_v51  ;;  %v3542_v40 = vadd.f32 %v3510_v60, %v3465_v55  ;;  %v3841_v48 = vadd.f32 %v3809_v29, %v3764_v36  ;;  %v10948_v38 = vld [vmem:[#allocation2 + $0x150] sm:$0xff] }
 0x4e1   : > { %v3842_v61 = vadd.f32 %v3810_v12, %v3765_v42  ;;  %v3963_v57 = vmul.f32 %v12913_v6, %v10661_v30  ;;  %v3964_v54 = vmul.f32 %v12913_v6, %v10676_v41  ;;  %v4040_v33 = vmul.f32 %v12914_v9, %v10691_v25 }
 0x4e2   : > { %v3618_v62 = vadd.f32 %v3586_v35, %v3541_v34  ;;  %v3619_v4 = vadd.f32 %v3587_v17, %v3542_v40  ;;  %v4041_v1 = vmul.f32 %v12914_v9, %v10711_v52  ;;  %v3918_v15 = vadd.f32 %v3886_v3, %v3841_v48  ;;  %v12934_v3 = vld [vmem:[#allocation13_spill] sm:$0xff] }
 0x4e3   : > { %v3919_v60 = vadd.f32 %v3887_v14, %v3842_v61  ;;  %v4117_v47 = vmul.f32 %v10295_v22, %v10733_v50  ;;  %v4118_v6 = vmul.f32 %v10295_v22, %v10729_v23  ;;  %v4194_v35 = vmul.f32 %v10306_v10, %v10755_v46 }
 0x4e4   : > { %v3687_v27 = vadd.f32 %v3655_v58, %v3618_v62  ;;  %v3688_v63 = vadd.f32 %v3656_v45, %v3619_v4  ;;  %v4195_v17 = vmul.f32 %v10306_v10, %v10767_v5  ;;  %v3995_v13 = vadd.f32 %v3963_v57, %v3918_v15 }
 0x4e5   : > { %v3996_v9 = vadd.f32 %v3964_v54, %v3919_v60  ;;  %v1540_v36 = vrot.slane %v10948_v38, 1  ;;  %v12424_v7 = vrot.slane %v10942_v59, 1  ;;  %v1608_v42 = vmul.f32 %v10315_v16, %v10575_v53 }
 0x4e6   : > { %v3719_v51 = vadd.f32 %v3687_v27, %v3111_v28  ;;  %v3720_v55 = vadd.f32 %v3688_v63, %v3112_v21  ;;  %v1609_v22 = vmul.f32 %v10315_v16, %v10571_v18  ;;  %v4072_v58 = vadd.f32 %v4040_v33, %v3995_v13  ;;  %v12935_v16 = vld [vmem:[#allocation34_spill] sm:$0xff]  ;;  %v12938_v27 = vld [vmem:[#allocation33_spill] sm:$0xff]  ;;  %v12939_v63 = vld [vmem:[#allocation7_spill] sm:$0xff] }
 0x4e7   : > { %v4073_v45 = vadd.f32 %v4041_v1, %v3996_v9  ;;  %v10968_v10 = vsel %vm1545_vm1, %v1540_v36, %v12424_v7  ;;  %v12933_v29 = vrot.slane %v10536_v26, 1  ;;  %v1648_v12 = vrot.slane %v10948_v38, 2  ;;  %v12958_v7 = vld [vmem:[#allocation6_spill] sm:$0xff] }
 0x4e8   : > { %v12423_v53 = vrot.slane %v10942_v59, 2  ;;  %v1714_v21 = vmul.f32 %v12935_v16, %v12934_v3  ;;  %v1715_v34 = vmul.f32 %v12935_v16, %v10609_v2  ;;  %v4149_v40 = vadd.f32 %v4117_v47, %v4072_v58  ;;  %v12941_v58 = vld [vmem:[#allocation16_spill] sm:$0xff] }
 0x4e9   : > { %v10974_v28 = vsel %vm1545_vm1, %v12933_v29, %v1540_v36  ;;  %v4150_v14 = vadd.f32 %v4118_v6, %v4073_v45  ;;  %v1786_v48 = vrot.slane %v10948_v38, 3  ;;  %v12422_v61 = vrot.slane %v10942_v59, 3 }
 0x4ea   : > { %v10988_v57 = vsel %vm1651_vm2, %v1648_v12, %v12423_v53  ;;  %v12936_v54 = vrot.slane %v10536_v26, 2  ;;  %v1746_v4 = vadd.f32 %v1714_v21, %v1608_v42  ;;  %v1747_v33 = vadd.f32 %v1715_v34, %v1609_v22  ;;  %v12940_v22 = vld [vmem:[#allocation35_spill] sm:$0xff] }
 0x4eb   : > { %v4226_v1 = vadd.f32 %v4194_v35, %v4149_v40  ;;  %v4227_v15 = vadd.f32 %v4195_v17, %v4150_v14  ;;  %v11000_v60 = vsel %vm1789_vm3, %v1786_v48, %v12422_v61  ;;  %v12937_v47 = vrot.slane %v10536_v26, 3 }
 0x4ec   : > { %v10994_v62 = vsel %vm1651_vm2, %v12936_v54, %v1648_v12  ;;  %v1852_v13 = vmul.f32 %v12939_v63, %v12938_v27  ;;  %v1853_v9 = vmul.f32 %v12939_v63, %v10633_v44  ;;  %v1924_v35 = vrot.slane %v10948_v38, 4 }
 0x4ed   : > { %v11006_v6 = vsel %vm1789_vm3, %v12937_v47, %v1786_v48  ;;  %v12421_v17 = vrot.slane %v10942_v59, 4  ;;  %v4258_v36 = vadd.f32 %v4226_v1, %v3719_v51  ;;  %v4259_v42 = vadd.f32 %v4227_v15, %v3720_v55  ;;  %v12943_v55 = vld [vmem:[#allocation8_spill] sm:$0xff]  ;;  %v12945_v47 = vld [vmem:[#allocation18_spill] sm:$0xff] }
 0x4ee   : > { %v1990_v45 = vmul.f32 %v12941_v58, %v12940_v22  ;;  %v1991_v29 = vmul.f32 %v12941_v58, %v10661_v30  ;;  %v1884_v12 = vadd.f32 %v1852_v13, %v1746_v4  ;;  %v1885_v3 = vadd.f32 %v1853_v9, %v1747_v33  ;;  %v12944_v33 = vld [vmem:[#allocation22_spill] sm:$0xff]  ;;  %v12947_v58 = vld [vmem:[#allocation21_spill] sm:$0xff] }
 0x4ef   : > { %v11022_v16 = vsel %vm1927_vm4, %v1924_v35, %v12421_v17  ;;  %v12942_v21 = vrot.slane %v10536_v26, 4  ;;  %v4294_v34 = vadd.f32 %v12943_v55, %v4258_v36  ;;  %v4295_v40 = vadd.f32 %v12943_v55, %v4259_v42 }
 0x4f0   : > { %v2062_v14 = vrot.slane %v10948_v38, 5  ;;  %v12420_v48 = vrot.slane %v10942_v59, 5  ;;  %v2022_v54 = vadd.f32 %v1990_v45, %v1884_v12  ;;  %v2023_v4 = vadd.f32 %v1991_v29, %v1885_v3  ;;  %v12948_v12 = vld [vmem:[#allocation29_spill] sm:$0xff] }
 0x4f1   : > { %v11028_v51 = vsel %vm1927_vm4, %v12942_v21, %v1924_v35  ;;  %v2128_v1 = vmul.f32 %v12944_v33, %v10695_v0  ;;  %v2129_v15 = vmul.f32 %v12944_v33, %v10691_v25  ;;  %v4330_v27 = vmul.f32 %v12945_v47, %v4294_v34 }
 0x4f2   : > { %v4331_v63 = vmul.f32 %v12945_v47, %v4295_v40  ;;  %v11044_v13 = vsel %vm2065_vm5, %v2062_v14, %v12420_v48  ;;  %v12946_v9 = vrot.slane %v10536_v26, 5  ;;  %v2200_v42 = vrot.slane %v10948_v38, 6 }
 0x4f3   : > { %v2160_v0 = vadd.f32 %v2128_v1, %v2022_v54  ;;  %v2161_v36 = vadd.f32 %v2129_v15, %v2023_v4  ;;  %v12419_v22 = vrot.slane %v10942_v59, 6  ;;  %v11055_v45 = vadd.f32 %v12947_v58, %v4330_v27 }
 0x4f4   : > { %v11050_v35 = vsel %vm2065_vm5, %v12946_v9, %v2062_v14  ;;  %v11058_v29 = vadd.f32 %v12947_v58, %v4331_v63  ;;  %v2266_v3 = vmul.f32 %v12948_v12, %v10737_v39  ;;  %v2267_v21 = vmul.f32 %v12948_v12, %v10733_v50  ;;  %v12951_v9 = vld [vmem:[#allocation25_spill] sm:$0xff] }
 0x4f5   : > { %v11068_v55 = vsel %vm2203_vm6, %v2200_v42, %v12419_v22  ;;  %v12949_v34 = vrot.slane %v10536_v26, 6  ;;  %v2338_v14 = vrot.slane %v10948_v38, 7  ;;  %v12418_v54 = vrot.slane %v10942_v59, 7 }
 0x4f6   : > { %v5138_v39 = vmul.f32 -1.442695, %v11055_v45  ;;  %v5139_v4 = vmul.f32 -1.442695, %v11058_v29  ;;  %v2298_v1 = vadd.f32 %v2266_v3, %v2160_v0  ;;  %v2299_v15 = vadd.f32 %v2267_v21, %v2161_v36  ;;  %v12952_v0 = vld [vmem:[#allocation24_spill] sm:$0xff]  ;;  %v12953_v21 = vld [vmem:[#allocation9_spill] sm:$0xff] }
 0x4f7   : > { %v11074_v40 = vsel %vm2203_vm6, %v12949_v34, %v2200_v42  ;;  %v11084_v47 = vsel %vm2341_vm7, %v2338_v14, %v12418_v54  ;;  %v12950_v27 = vrot.slane %v10536_v26, 7  ;;  %v2404_v42 = vmul.f32 %v12951_v9, %v10759_v19  ;;  %v12954_v19 = vld [vmem:[#allocation38_spill] sm:$0xff] }
 0x4f8   : > { %v2405_v58 = vmul.f32 %v12951_v9, %v10755_v46  ;;  %5636 = vpow2.f32 %v5138_v39  ;;  %v2473_v36 = vmul.f32 %v12952_v0, %v10540_v49  ;;  %v2474_v3 = vmul.f32 %v12952_v0, %v10542_v56  ;;  %v12955_v49 = vld [vmem:[#allocation5_spill] sm:$0xff] }
 0x4f9   : > { %v11090_v63 = vsel %vm2341_vm7, %v12950_v27, %v2338_v14  ;;  %v2550_v34 = vmul.f32 %v12953_v21, %v10571_v18  ;;  %5638 = vpow2.f32 %v5139_v4  ;;  %v2436_v54 = vadd.f32 %v2404_v42, %v2298_v1  ;;  %v12956_v4 = vld [vmem:[#allocation12_spill] sm:$0xff] }
 0x4fa   : > { %v2437_v14 = vadd.f32 %v2405_v58, %v2299_v15  ;;  %v2551_v27 = vmul.f32 %v12953_v21, %v10567_v24  ;;  %v2595_v22 = vmul.f32 %v12954_v19, %v10609_v2  ;;  %v2596_v39 = vmul.f32 %v12954_v19, %v10605_v37  ;;  %v12957_v58 = vld [vmem:[#allocation30_spill] sm:$0xff] }
 0x4fb   : > { %v2672_v48 = vmul.f32 %v12955_v49, %v10633_v44  ;;  %v2673_v17 = vmul.f32 %v12955_v49, %v10643_v31  ;;  %v11112_v61 = vadd.f32 %v2473_v36, %v2436_v54  ;;  %v2749_v1 = vmul.f32 %v12956_v4, %v10661_v30 }
 0x4fc   : > { %v11114_v18 = vadd.f32 %v2474_v3, %v2437_v14  ;;  %v2750_v15 = vmul.f32 %v12956_v4, %v10676_v41  ;;  %v2627_v2 = vadd.f32 %v2595_v22, %v2550_v34  ;;  %v2628_v42 = vadd.f32 %v2596_v39, %v2551_v27  ;;  %v12959_v3 = vld [vmem:[#allocation39_spill] sm:$0xff]  ;;  %v12960_v27 = vld [vmem:[#allocation17_spill] sm:$0xff]  ;;  %v12962_v4 = vld [vmem:[#allocation32_spill] sm:$0xff] }
 0x4fd   : > { %v2826_v53 = vmul.f32 %v12957_v58, %v10691_v25  ;;  %v2827_v44 = vmul.f32 %v12957_v58, %v10711_v52  ;;  %v2903_v54 = vmul.f32 %v12958_v7, %v10733_v50  ;;  %v2904_v36 = vmul.f32 %v12958_v7, %v10729_v23  ;;  %v12961_v58 = vld [vmem:[#allocation31_spill] sm:$0xff] }
 0x4fe   : > { %v2980_v30 = vmul.f32 %v12959_v3, %v10755_v46  ;;  %v2981_v14 = vmul.f32 %v12959_v3, %v10767_v5  ;;  %v2704_v22 = vadd.f32 %v2672_v48, %v2627_v2  ;;  %v2705_v34 = vadd.f32 %v2673_v17, %v2628_v42  ;;  %v12963_v2 = vld [vmem:[#allocation36_spill] sm:$0xff] }
 0x4ff   : > { %v3049_v25 = vmul.f32 %v12960_v27, %v10542_v56  ;;  %v3050_v39 = vmul.f32 %v12960_v27, %v10536_v26  ;;  %v3158_v50 = vmul.f32 %v12961_v58, %v10567_v24  ;;  %v3159_v7 = vmul.f32 %v12961_v58, %v10974_v28 }
 0x500   : > { %v3203_v46 = vmul.f32 %v12962_v4, %v10605_v37  ;;  %v3204_v3 = vmul.f32 %v12962_v4, %v10994_v62  ;;  %v2781_v48 = vadd.f32 %v2749_v1, %v2704_v22  ;;  %v2782_v17 = vadd.f32 %v2750_v15, %v2705_v34 }
 0x501   : > { %v3280_v56 = vmul.f32 %v12963_v2, %v10643_v31  ;;  %v3281_v42 = vmul.f32 %v12963_v2, %v11006_v6  ;;  %v3357_v19 = vmul.f32 %v10890_v11, %v10676_v41  ;;  %v3358_v58 = vmul.f32 %v10890_v11, %v11028_v51 }
 0x502   : > { %v3235_v27 = vadd.f32 %v3203_v46, %v3158_v50  ;;  %v3236_v49 = vadd.f32 %v3204_v3, %v3159_v7  ;;  %v5637_v21 = vpop.eup %5636  ;;  %v2858_v0 = vadd.f32 %v2826_v53, %v2781_v48  ;;  %v2859_v9 = vadd.f32 %v2827_v44, %v2782_v17  ;;  %v11163_v17 = vld [vmem:[%s12009_s3 + $0x16] ss:$0 sm:$0xff] }
 0x503   : > { %v3434_v1 = vmul.f32 %v10900_v32, %v10711_v52  ;;  %v3435_v15 = vmul.f32 %v10900_v32, %v11050_v35  ;;  %v5639_v22 = vpop.eup %5638  ;;  %v4494_v34 = vadd.f32 1.0, %v5637_v21  ;;  %v3511_v7 = vmul.f32 %v10490_v20, %v10729_v23 }
 0x504   : > { %v3312_v2 = vadd.f32 %v3280_v56, %v3235_v27  ;;  %v3313_v50 = vadd.f32 %v3281_v42, %v3236_v49  ;;  %v4495_v3 = vadd.f32 1.0, %v5639_v22  ;;  %v2935_v46 = vadd.f32 %v2903_v54, %v2858_v0  ;;  %v11185_v42 = vld [vmem:[%s12009_s3 + $0x19] ss:$0 sm:$0xff]  ;;  %v11196_v22 = vld [vmem:[%s12009_s3 + $0x1a] ss:$0 sm:$0xff] }
 0x505   : > { %v2936_v4 = vadd.f32 %v2904_v36, %v2859_v9  ;;  %v3512_v53 = vmul.f32 %v10490_v20, %v11074_v40  ;;  %5640 = vrcp.f32 %v4494_v34  ;;  %v3588_v21 = vmul.f32 %v11163_v17, %v10767_v5  ;;  %12965 = vst [vmem:[#allocation11_spill] sm:$0xff] %v11185_v42  ;;  %12966 = vst [vmem:[#allocation15_spill] sm:$0xff] %v11196_v22 }
 0x506   : > { %v3389_v44 = vadd.f32 %v3357_v19, %v3312_v2  ;;  %v3390_v48 = vadd.f32 %v3358_v58, %v3313_v50  ;;  %5642 = vrcp.f32 %v4495_v3  ;;  %v3012_v49 = vadd.f32 %v2980_v30, %v2935_v46  ;;  %v11176_v2 = vld [vmem:[%s12009_s3 + $0x18] ss:$0 sm:$0xff] }
 0x507   : > { %v3013_v27 = vadd.f32 %v2981_v14, %v2936_v4  ;;  %v3589_v9 = vmul.f32 %v11163_v17, %v11090_v63  ;;  %v3657_v20 = vmul.f32 %v10918_v43, %v10536_v26  ;;  %v3658_v19 = vmul.f32 %v10918_v43, %v10948_v38  ;;  %12964 = vst [vmem:[#allocation14_spill] sm:$0xff] %v11176_v2 }
 0x508   : > { %v3466_v0 = vadd.f32 %v3434_v1, %v3389_v44  ;;  %v3467_v54 = vadd.f32 %v3435_v15, %v3390_v48  ;;  %v3081_v58 = vadd.f32 %v3049_v25, %v3012_v49  ;;  %v3766_v4 = vmul.f32 %v11176_v2, %v10974_v28  ;;  %v11214_v48 = vld [vmem:[%s12009_s3 + $0x1c] ss:$0 sm:$0xff] }
 0x509   : > { %v3082_v36 = vadd.f32 %v3050_v39, %v3013_v27  ;;  %v3767_v30 = vmul.f32 %v11176_v2, %v10968_v10  ;;  %v3811_v25 = vmul.f32 %v11185_v42, %v10994_v62  ;;  %v3812_v39 = vmul.f32 %v11185_v42, %v10988_v57  ;;  %12968 = vst [vmem:[#allocation27_spill] sm:$0xff] %v11214_v48 }
 0x50a   : > { %v3543_v14 = vadd.f32 %v3511_v7, %v3466_v0  ;;  %v3544_v56 = vadd.f32 %v3512_v53, %v3467_v54  ;;  %v3113_v1 = vadd.f32 %v3081_v58, %v11112_v61  ;;  %v3888_v34 = vmul.f32 %v11196_v22, %v11006_v6  ;;  %v11205_v61 = vld [vmem:[%s12009_s3 + $0x1b] ss:$0 sm:$0xff]  ;;  %v11220_v58 = vld [vmem:[#allocation2 + $0x160] sm:$0xff] }
 0x50b   : > { %v3114_v15 = vadd.f32 %v3082_v36, %v11114_v18  ;;  %v3889_v50 = vmul.f32 %v11196_v22, %v11000_v60  ;;  %v3843_v46 = vadd.f32 %v3811_v25, %v3766_v4  ;;  %v3844_v53 = vadd.f32 %v3812_v39, %v3767_v30  ;;  %12967 = vst [vmem:[#allocation20_spill] sm:$0xff] %v11205_v61  ;;  %v11225_v36 = vld [vmem:[%s12009_s3 + $0x1d] ss:$0 sm:$0xff] }
 0x50c   : > { %v3620_v7 = vadd.f32 %v3588_v21, %v3543_v14  ;;  %v3621_v3 = vadd.f32 %v3589_v9, %v3544_v56  ;;  %v3965_v18 = vmul.f32 %v11205_v61, %v11028_v51  ;;  %v3966_v44 = vmul.f32 %v11205_v61, %v11022_v16  ;;  %12969 = vst [vmem:[#allocation37_spill] sm:$0xff] %v11225_v36 }
 0x50d   : > { %v4042_v21 = vmul.f32 %v11214_v48, %v11050_v35  ;;  %v4043_v49 = vmul.f32 %v11214_v48, %v11044_v13  ;;  %v3920_v0 = vadd.f32 %v3888_v34, %v3843_v46  ;;  %v3921_v54 = vadd.f32 %v3889_v50, %v3844_v53  ;;  %v11245_v53 = vld [vmem:[%s12009_s3] ss:$0 sm:$0xff] }
 0x50e   : > { %v3689_v27 = vadd.f32 %v3657_v20, %v3620_v7  ;;  %v3690_v9 = vadd.f32 %v3658_v19, %v3621_v3  ;;  %v4119_v4 = vmul.f32 %v11225_v36, %v11074_v40  ;;  %v4120_v30 = vmul.f32 %v11225_v36, %v11068_v55  ;;  %v11234_v20 = vld [vmem:[%s12009_s3 + $0x1e] ss:$0 sm:$0xff] }
 0x50f   : > { %12970 = vst [vmem:[#allocation23_spill] sm:$0xff] %v11234_v20  ;;  %v4196_v19 = vmul.f32 %v11234_v20, %v11090_v63  ;;  %v4197_v14 = vmul.f32 %v11234_v20, %v11084_v47  ;;  %v5641_v56 = vpop.eup %5640  ;;  %v3997_v34 = vadd.f32 %v3965_v18, %v3920_v0  ;;  %v3998_v50 = vadd.f32 %v3966_v44, %v3921_v54  ;;  %v11268_v0 = vld [vmem:[%s12009_s3 + $0x1] ss:$0 sm:$0xff] }
 0x510   : > { %v3721_v25 = vadd.f32 %v3689_v27, %v3113_v1  ;;  %v3722_v39 = vadd.f32 %v3690_v9, %v3114_v15  ;;  %v5643_v7 = vpop.eup %5642  ;;  %v4590_v3 = vmul.f32 %v5641_v56, %v11055_v45  ;;  %v12442_v46 = vrot.slane %v11220_v58, 1  ;;  %v11251_v1 = vpop.f32.mrb[16].mxu0 }
 0x511   : > { %v1610_v36 = vmul.f32 %v11245_v53, %v10567_v24  ;;  %v1611_v20 = vmul.f32 %v11245_v53, %v10974_v28  ;;  %12971 = vst [vmem:[#allocation10_spill] sm:$0xff] %v11251_v1  ;;  %v4591_v15 = vmul.f32 %v5643_v7, %v11058_v29  ;;  %v4074_v18 = vadd.f32 %v4042_v21, %v3997_v34  ;;  %v11255_v27 = vpop.f32.mrb[17].mxu0 }
 0x512   : > { %v4075_v44 = vadd.f32 %v4043_v49, %v3998_v50  ;;  %v12444_v45 = vrot.slane %v11220_v58, 2  ;;  %12972 = vst [vmem:[#allocation26_spill] sm:$0xff] %v11255_v27  ;;  %v12973_v9 = vrot.slane %v10942_v59, 1  ;;  %v1716_v29 = vmul.f32 %v11268_v0, %v10605_v37  ;;  %v11275_v54 = vpop.f32.mrb[18].mxu0 }
 0x513   : > { %v1717_v21 = vmul.f32 %v11268_v0, %v10994_v62  ;;  %v12443_v49 = vrot.slane %v11220_v58, 3  ;;  %12974 = vst [vmem:[#allocation19_spill] sm:$0xff] %v11275_v54  ;;  %v4610_v56 = vpack.c.bf16 %v4591_v15, %v4590_v3  ;;  %v4151_v34 = vadd.f32 %v4119_v4, %v4074_v18  ;;  %v13003_v54 = vld [vmem:[#allocation38_spill] sm:$0xff] }
 0x514   : > { %v11263_v24 = vsel %vm1545_vm1, %v12973_v9, %v12442_v46  ;;  %v4152_v50 = vadd.f32 %v4120_v30, %v4075_v44  ;;  %v12975_v7 = vrot.slane %v10942_v59, 2  ;;  %v11285_v46 = vpop.f32.mrb[19].mxu0  ;;  %v1748_v37 = vadd.f32 %v1716_v29, %v1610_v36  ;;  %v11298_v30 = vld [vmem:[%s12009_s3 + $0x2] ss:$0 sm:$0xff] }
 0x515   : > { %12976 = vst [vmem:[#allocation4_spill] sm:$0xff] %v11285_v46  ;;  %v1749_v27 = vadd.f32 %v1717_v21, %v1611_v20  ;;  %v12977_v1 = vrot.slane %v10942_v59, 3  ;;  %v1854_v3 = vmul.f32 %v11298_v30, %v10643_v31  ;;  %v11302_v15 = vpop.f32.mrb[20].mxu0  ;;  %5321 = vmatprep.mubr.msk.bf16.mxu0 %vm269_vm0, %v4610_v56  ;;  %v4228_v36 = vadd.f32 %v4196_v19, %v4151_v34  ;;  %v11313_v21 = vld [vmem:[%s12009_s3 + $0x3] ss:$0 sm:$0xff] }
 0x516   : > { %v11283_v9 = vsel %vm1651_vm2, %v12975_v7, %v12444_v45  ;;  %12978 = vst [vmem:[#allocation28_spill] sm:$0xff] %v11302_v15  ;;  %v4229_v20 = vadd.f32 %v4197_v14, %v4152_v50  ;;  %v1855_v18 = vmul.f32 %v11298_v30, %v11006_v6  ;;  %v11308_v44 = vpop.f32.mrb[21].mxu0  ;;  %v1992_v31 = vmul.f32 %v11313_v21, %v10676_v41  ;;  %v12999_v15 = vld [vmem:[#allocation9_spill] sm:$0xff] }
 0x517   : > { %v11293_v4 = vsel %vm1789_vm3, %v12977_v1, %v12443_v49  ;;  %v12446_v1 = vrot.slane %v11220_v58, 4  ;;  %12979 = vst [vmem:[#allocation13_spill] sm:$0xff] %v11308_v44  ;;  %v1886_v29 = vadd.f32 %v1854_v3, %v1748_v37  ;;  %v1993_v19 = vmul.f32 %v11313_v21, %v11028_v51  ;;  %v11320_v56 = vpop.f32.mrb[22].mxu0 }
 0x518   : > { %v12445_v14 = vrot.slane %v11220_v58, 5  ;;  %12980 = vst [vmem:[#allocation34_spill] sm:$0xff] %v11320_v56  ;;  %v4260_v34 = vadd.f32 %v4228_v36, %v3721_v25  ;;  %v4261_v50 = vadd.f32 %v4229_v20, %v3722_v39  ;;  %v1887_v7 = vadd.f32 %v1855_v18, %v1749_v27  ;;  %v11330_v49 = vpop.f32.mrb[23].mxu0  ;;  %v11349_v20 = vld [vmem:[%s12007_s1 + $0x4] ss:$0 sm:$0xff] }
 0x519   : > { %v12981_v37 = vrot.slane %v10942_v59, 4  ;;  %12982 = vst [vmem:[#allocation33_spill] sm:$0xff] %v11330_v49  ;;  %v2024_v41 = vadd.f32 %v1992_v31, %v1886_v29  ;;  %v12983_v45 = vrot.slane %v10942_v59, 5  ;;  %v2130_v39 = vmul.f32 %v12944_v33, %v10711_v52  ;;  %v11344_v36 = vpop.f32.mrb[24].mxu0  ;;  %12985 = vst [vmem:[#allocation35_spill] sm:$0xff] %v11349_v20 }
 0x51a   : > { %v2131_v27 = vmul.f32 %v12944_v33, %v11050_v35  ;;  %12984 = vst [vmem:[#allocation7_spill] sm:$0xff] %v11344_v36  ;;  %v4296_v18 = vadd.f32 %v11349_v20, %v4260_v34  ;;  %v4297_v29 = vadd.f32 %v11349_v20, %v4261_v50  ;;  %v2025_v31 = vadd.f32 %v1993_v19, %v1887_v7  ;;  %v11366_v34 = vld [vmem:[%s12007_s1 + $0x5] ss:$0 sm:$0xff]  ;;  %v11370_v7 = vld [vmem:[#allocation2 + $0x168] sm:$0xff] }
 0x51b   : > { %v11328_v3 = vsel %vm1927_vm4, %v12981_v37, %v12446_v1  ;;  %v11338_v25 = vsel %vm2065_vm5, %v12983_v45, %v12445_v14  ;;  %v12447_v45 = vrot.slane %v11220_v58, 6  ;;  %v11354_v37 = vpop.f32.mrb[25].mxu0  ;;  %v2162_v52 = vadd.f32 %v2130_v39, %v2024_v41  ;;  %12988 = vst [vmem:[#allocation22_spill] sm:$0xff] %v11366_v34  ;;  %12989 = vst [vmem:[#allocation18_spill] sm:$0xff] %v11370_v7 }
 0x51c   : > { %12986 = vst [vmem:[#allocation16_spill] sm:$0xff] %v11354_v37  ;;  %v2268_v33 = vmul.f32 %v12948_v12, %v10729_v23  ;;  %v2269_v14 = vmul.f32 %v12948_v12, %v11074_v40  ;;  %v11361_v36 = vpop.f32.mrb[26].mxu0  ;;  %v4332_v19 = vmul.f32 %v11366_v34, %v4296_v18  ;;  %v4333_v50 = vmul.f32 %v11366_v34, %v4297_v29 }
 0x51d   : > { %12987 = vst [vmem:[#allocation8_spill] sm:$0xff] %v11361_v36  ;;  %v2163_v41 = vadd.f32 %v2131_v27, %v2025_v31  ;;  %v12990_v23 = vrot.slane %v10942_v59, 6  ;;  %v11380_v1 = vpop.f32.mrb[27].mxu0  ;;  %v12992_v37 = vrot.slane %v11220_v58, 7  ;;  %v12993_v18 = vrot.slane %v10942_v59, 7  ;;  %v12994_v27 = vld [vmem:[#allocation25_spill] sm:$0xff] }
 0x51e   : > { %12991 = vst [vmem:[#allocation21_spill] sm:$0xff] %v11380_v1  ;;  %v2300_v36 = vadd.f32 %v2268_v33, %v2162_v52  ;;  %v2406_v31 = vmul.f32 %v12994_v27, %v10767_v5  ;;  %v2407_v49 = vmul.f32 %v12994_v27, %v11090_v63  ;;  %v11394_v56 = vpop.f32.mrb[28].mxu0  ;;  %v11399_v52 = vld [vmem:[%s12007_s1 + $0x6] ss:$0 sm:$0xff]  ;;  %v12448_v44 = vrot.slane %v11370_v7, 1 }
 0x51f   : > { %v11378_v39 = vsel %vm2203_vm6, %v12990_v23, %v12447_v45  ;;  %v11388_v29 = vsel %vm2341_vm7, %v12993_v18, %v12992_v37  ;;  %12995 = vst [vmem:[#allocation40_spill] sm:$0xff] %v11394_v56  ;;  %12996 = vst [vmem:[#allocation41_spill] sm:$0xff] %v11399_v52  ;;  %v11402_v33 = vadd.f32 %v11399_v52, %v4332_v19  ;;  %v12997_v18 = vld [vmem:[#allocation24_spill] sm:$0xff]  ;;  %v11409_v45 = vpop.f32.mrb[29].mxu0  ;;  %v13008_v34 = vrot.slane %v11220_v58, 3 }
 0x520   : > { %v11405_v23 = vadd.f32 %v11399_v52, %v4333_v50  ;;  %v2301_v37 = vadd.f32 %v2269_v14, %v2163_v41  ;;  %v2475_v5 = vmul.f32 %v12997_v18, %v10536_v26  ;;  %12998 = vst [vmem:[#allocation42_spill] sm:$0xff] %v11409_v45  ;;  %v2438_v1 = vadd.f32 %v2406_v31, %v2300_v36  ;;  %v11416_v19 = vpop.f32.mrb[30].mxu0 }
 0x521   : > { %v2476_v56 = vmul.f32 %v12997_v18, %v10948_v38  ;;  %v2552_v46 = vmul.f32 %v12999_v15, %v10974_v28  ;;  %13000 = vst [vmem:[#allocation43_spill] sm:$0xff] %v11416_v19  ;;  %v5140_v50 = vmul.f32 -1.442695, %v11402_v33  ;;  %v2553_v26 = vmul.f32 %v12999_v15, %v10968_v10  ;;  %v11422_v45 = vpop.f32.mrb[31].mxu0 }
 0x522   : > { %v5141_v14 = vmul.f32 -1.442695, %v11405_v23  ;;  %v2439_v41 = vadd.f32 %v2407_v49, %v2301_v37  ;;  %13001 = vst [vmem:[#allocation44_spill] sm:$0xff] %v11422_v45  ;;  %v11424_v36 = vadd.f32 %v2475_v5, %v2438_v1  ;;  %v13002_v31 = vrot.slane %v11220_v58, 1  ;;  %v13007_v45 = vld [vmem:[#allocation5_spill] sm:$0xff] }
 0x523   : > { %v12453_v19 = vrot.slane %v11370_v7, 2  ;;  %v2597_v49 = vmul.f32 %v13003_v54, %v10994_v62  ;;  %5644 = vpow2.f32 %v5140_v50  ;;  %v2598_v5 = vmul.f32 %v13003_v54, %v10988_v57 }
 0x524   : > { %v11432_v28 = vsel %vm1545_vm1, %v13002_v31, %v12448_v44  ;;  %v11437_v37 = vadd.f32 %v2476_v56, %v2439_v41  ;;  %5646 = vpow2.f32 %v5141_v14  ;;  %v13005_v31 = vrot.slane %v11220_v58, 2 }
 0x525   : > { %v11441_v1 = vmul.f32 %v12999_v15, %v11432_v28  ;;  %v2629_v62 = vadd.f32 %v2597_v49, %v2552_v46  ;;  %v12454_v56 = vrot.slane %v11370_v7, 3  ;;  %v2630_v41 = vadd.f32 %v2598_v5, %v2553_v26 }
 0x526   : > { %v11451_v44 = vsel %vm1651_vm2, %v13005_v31, %v12453_v19  ;;  %v2674_v52 = vmul.f32 %v13007_v45, %v11006_v6  ;;  %v2675_v14 = vmul.f32 %v13007_v45, %v11000_v60  ;;  %v12458_v49 = vrot.slane %v11370_v7, 4  ;;  %v13009_v31 = vld [vmem:[#allocation12_spill] sm:$0xff] }
 0x527   : > { %13004 = vst [vmem:[#allocation45_spill] sm:$0xff] %v11441_v1  ;;  %v11456_v50 = vmul.f32 %v13003_v54, %v11451_v44  ;;  %v11468_v46 = vsel %vm1789_vm3, %v13008_v34, %v12454_v56  ;;  %v2751_v19 = vmul.f32 %v13009_v31, %v11028_v51  ;;  %v2752_v26 = vmul.f32 %v13009_v31, %v11022_v16  ;;  %v13012_v51 = vld [vmem:[#allocation30_spill] sm:$0xff] }
 0x528   : > { %v11477_v6 = vmul.f32 %v13007_v45, %v11468_v46  ;;  %v2706_v5 = vadd.f32 %v2674_v52, %v2629_v62  ;;  %v12459_v1 = vrot.slane %v11370_v7, 5  ;;  %v13011_v34 = vrot.slane %v11220_v58, 4 }
 0x529   : > { %13006 = vst [vmem:[#allocation46_spill] sm:$0xff] %v11456_v50  ;;  %v2707_v50 = vadd.f32 %v2675_v14, %v2630_v41  ;;  %v2828_v54 = vmul.f32 %v13012_v51, %v11050_v35  ;;  %v2829_v20 = vmul.f32 %v13012_v51, %v11044_v13  ;;  %v13014_v14 = vrot.slane %v11220_v58, 5 }
 0x52a   : > { %13010 = vst [vmem:[#allocation47_spill] sm:$0xff] %v11477_v6  ;;  %v11486_v56 = vsel %vm1927_vm4, %v13011_v34, %v12458_v49  ;;  %v12462_v6 = vrot.slane %v11370_v7, 6  ;;  %v2783_v62 = vadd.f32 %v2751_v19, %v2706_v5  ;;  %v13016_v49 = vrot.slane %v11220_v58, 6 }
 0x52b   : > { %v11495_v52 = vmul.f32 %v13009_v31, %v11486_v56  ;;  %v2784_v41 = vadd.f32 %v2752_v26, %v2707_v50  ;;  %v11503_v34 = vsel %vm2065_vm5, %v13014_v14, %v12459_v1  ;;  %v13017_v50 = vld [vmem:[#allocation6_spill] sm:$0xff] }
 0x52c   : > { %v11507_v35 = vmul.f32 %v13012_v51, %v11503_v34  ;;  %v11515_v19 = vsel %vm2203_vm6, %v13016_v49, %v12462_v6  ;;  %v2905_v26 = vmul.f32 %v13017_v50, %v11074_v40  ;;  %v2906_v5 = vmul.f32 %v13017_v50, %v11068_v55  ;;  %v13019_v51 = vld [vmem:[#allocation39_spill] sm:$0xff]  ;;  %v13020_v6 = vld [vmem:[#allocation17_spill] sm:$0xff] }
 0x52d   : > { %13013 = vst [vmem:[#allocation48_spill] sm:$0xff] %v11495_v52  ;;  %v2860_v14 = vadd.f32 %v2828_v54, %v2783_v62  ;;  %v2861_v1 = vadd.f32 %v2829_v20, %v2784_v41  ;;  %v11523_v52 = vmul.f32 %v13017_v50, %v11515_v19  ;;  %v2982_v31 = vmul.f32 %v13019_v51, %v11090_v63  ;;  %v5645_v54 = vpop.eup %5644  ;;  %v13022_v63 = vld [vmem:[#allocation31_spill] sm:$0xff] }
 0x52e   : > { %13015 = vst [vmem:[#allocation49_spill] sm:$0xff] %v11507_v35  ;;  %v12470_v35 = vrot.slane %v11370_v7, 7  ;;  %v2983_v49 = vmul.f32 %v13019_v51, %v11084_v47  ;;  %v3051_v40 = vmul.f32 %v13020_v6, %v10948_v38  ;;  %v3052_v45 = vmul.f32 %v13020_v6, %v10942_v59  ;;  %v5647_v15 = vpop.eup %5646 }
 0x52f   : > { %13018 = vst [vmem:[#allocation50_spill] sm:$0xff] %v11523_v52  ;;  %v2937_v20 = vadd.f32 %v2905_v26, %v2860_v14  ;;  %v2938_v62 = vadd.f32 %v2906_v5, %v2861_v1  ;;  %v13021_v41 = vrot.slane %v11220_v58, 7  ;;  %v3160_v50 = vmul.f32 %v13022_v63, %v10968_v10  ;;  %v13024_v26 = vld [vmem:[#allocation32_spill] sm:$0xff] }
 0x530   : > { %v4496_v18 = vadd.f32 1.0, %v5645_v54  ;;  %v3161_v1 = vmul.f32 %v13022_v63, %v11263_v24  ;;  %v3205_v5 = vmul.f32 %v13024_v26, %v10988_v57  ;;  %v4497_v14 = vadd.f32 1.0, %v5647_v15  ;;  %v13025_v54 = vld [vmem:[#allocation36_spill] sm:$0xff] }
 0x531   : > { %v11540_v52 = vsel %vm2341_vm7, %v13021_v41, %v12470_v35  ;;  %v3014_v7 = vadd.f32 %v2982_v31, %v2937_v20  ;;  %v3015_v8 = vadd.f32 %v2983_v49, %v2938_v62  ;;  %v3206_v41 = vmul.f32 %v13024_v26, %v11283_v9 }
 0x532   : > { %v11546_v38 = vmul.f32 %v13019_v51, %v11540_v52  ;;  %5648 = vrcp.f32 %v4496_v18  ;;  %v3237_v35 = vadd.f32 %v3205_v5, %v3160_v50  ;;  %v3282_v6 = vmul.f32 %v13025_v54, %v11000_v60 }
 0x533   : > { %5650 = vrcp.f32 %v4497_v14  ;;  %v3083_v51 = vadd.f32 %v3051_v40, %v3014_v7  ;;  %v3084_v63 = vadd.f32 %v3052_v45, %v3015_v8  ;;  %v3238_v27 = vadd.f32 %v3206_v41, %v3161_v1  ;;  %v11571_v45 = vld [vmem:[%s12009_s3 + $0x15] ss:$0 sm:$0xff] }
 0x534   : > { %13023 = vst [vmem:[#allocation51_spill] sm:$0xff] %v11546_v38  ;;  %v3283_v38 = vmul.f32 %v13025_v54, %v11293_v4  ;;  %v3314_v12 = vadd.f32 %v3282_v6, %v3237_v35  ;;  %v3359_v15 = vmul.f32 %v10890_v11, %v11022_v16  ;;  %v3360_v31 = vmul.f32 %v10890_v11, %v11328_v3 }
 0x535   : > { %v3436_v18 = vmul.f32 %v10900_v32, %v11044_v13  ;;  %v3115_v50 = vadd.f32 %v3083_v51, %v11424_v36  ;;  %v3116_v49 = vadd.f32 %v3084_v63, %v11437_v37  ;;  %v3437_v7 = vmul.f32 %v10900_v32, %v11338_v25 }
 0x536   : > { %v3315_v20 = vadd.f32 %v3283_v38, %v3238_v27  ;;  %v3391_v8 = vadd.f32 %v3359_v15, %v3314_v12  ;;  %v3513_v11 = vmul.f32 %v11571_v45, %v11068_v55  ;;  %v3514_v6 = vmul.f32 %v11571_v45, %v11378_v39 }
 0x537   : > { %v3590_v36 = vmul.f32 %v11163_v17, %v11084_v47  ;;  %v3591_v27 = vmul.f32 %v11163_v17, %v11388_v29  ;;  %v3659_v32 = vmul.f32 %v10918_v43, %v10942_v59  ;;  %v3660_v12 = vmul.f32 %v10918_v43, %v11220_v58 }
 0x538   : > { %v3392_v37 = vadd.f32 %v3360_v31, %v3315_v20  ;;  %v3468_v51 = vadd.f32 %v3436_v18, %v3391_v8  ;;  %v3768_v35 = vmul.f32 %v11176_v2, %v11263_v24  ;;  %v3769_v40 = vmul.f32 %v11176_v2, %v11432_v28 }
 0x539   : > { %v3813_v62 = vmul.f32 %v11185_v42, %v11283_v9  ;;  %v3814_v38 = vmul.f32 %v11185_v42, %v11451_v44  ;;  %v3890_v1 = vmul.f32 %v11196_v22, %v11293_v4  ;;  %v3891_v43 = vmul.f32 %v11196_v22, %v11468_v46 }
 0x53a   : > { %v3469_v63 = vadd.f32 %v3437_v7, %v3392_v37  ;;  %v3545_v5 = vadd.f32 %v3513_v11, %v3468_v51  ;;  %v3967_v41 = vmul.f32 %v11205_v61, %v11328_v3  ;;  %v3968_v15 = vmul.f32 %v11205_v61, %v11486_v56  ;;  %v13026_v11 = vld [vmem:[#allocation37_spill] sm:$0xff] }
 0x53b   : > { %v3845_v14 = vadd.f32 %v3813_v62, %v3768_v35  ;;  %v3846_v18 = vadd.f32 %v3814_v38, %v3769_v40  ;;  %v4044_v20 = vmul.f32 %v11214_v48, %v11338_v25  ;;  %v4045_v7 = vmul.f32 %v11214_v48, %v11503_v34 }
 0x53c   : > { %v3546_v31 = vadd.f32 %v3514_v6, %v3469_v63  ;;  %v5649_v8 = vpop.eup %5648  ;;  %v3622_v37 = vadd.f32 %v3590_v36, %v3545_v5  ;;  %v4121_v51 = vmul.f32 %v13026_v11, %v11378_v39  ;;  %v4122_v35 = vmul.f32 %v13026_v11, %v11515_v19  ;;  %v13027_v63 = vld [vmem:[#allocation23_spill] sm:$0xff] }
 0x53d   : > { %v3922_v42 = vadd.f32 %v3890_v1, %v3845_v14  ;;  %v5651_v62 = vpop.eup %5650  ;;  %v4592_v61 = vmul.f32 %v5649_v8, %v11402_v33  ;;  %v3923_v40 = vadd.f32 %v3891_v43, %v3846_v18  ;;  %v4198_v38 = vmul.f32 %v13027_v63, %v11388_v29 }
 0x53e   : > { %v3623_v6 = vadd.f32 %v3591_v27, %v3546_v31  ;;  %v4593_v22 = vmul.f32 %v5651_v62, %v11405_v23  ;;  %v3691_v48 = vadd.f32 %v3659_v32, %v3622_v37  ;;  %v4199_v36 = vmul.f32 %v13027_v63, %v11540_v52 }
 0x53f   : > { %v3999_v2 = vadd.f32 %v3967_v41, %v3922_v42  ;;  %v4000_v5 = vadd.f32 %v3968_v15, %v3923_v40  ;;  %v1612_v14 = vmul.f32 %v11245_v53, %v10968_v10  ;;  %v1613_v33 = vmul.f32 %v11245_v53, %v11263_v24  ;;  %v5796_v53 = vld [vmem:[%s12009_s3 + $0x4] ss:$0 sm:$0xff] }
 0x540   : > { %v3692_v1 = vadd.f32 %v3660_v12, %v3623_v6  ;;  %v4611_v27 = vpack.c.bf16 %v4593_v22, %v4592_v61  ;;  %v3723_v43 = vadd.f32 %v3691_v48, %v3115_v50  ;;  %v1718_v18 = vmul.f32 %v11268_v0, %v10988_v57 }
 0x541   : > { %v4076_v31 = vadd.f32 %v4044_v20, %v3999_v2  ;;  %v4077_v32 = vadd.f32 %v4045_v7, %v4000_v5  ;;  %v1719_v42 = vmul.f32 %v11268_v0, %v11283_v9  ;;  %v1856_v12 = vmul.f32 %v11298_v30, %v11000_v60 }
 0x542   : > { %v3724_v23 = vadd.f32 %v3692_v1, %v3116_v49  ;;  %5322 = vmatmul.mubr.msk.bf16.gmra.mrb[40].mxu0 %vm269_vm0, %v4611_v27  ;;  %v1750_v41 = vadd.f32 %v1718_v18, %v1612_v14  ;;  %v1857_v22 = vmul.f32 %v11298_v30, %v11293_v4  ;;  %v1994_v2 = vmul.f32 %v11313_v21, %v11022_v16  ;;  %v13028_v30 = vld [vmem:[#allocation29_spill] sm:$0xff]  ;;  %v13032_v1 = vld [vmem:[#allocation35_spill] sm:$0xff] }
 0x543   : > { %v4153_v10 = vadd.f32 %v4121_v51, %v4076_v31  ;;  %v4154_v61 = vadd.f32 %v4122_v35, %v4077_v32  ;;  %v1751_v57 = vadd.f32 %v1719_v42, %v1613_v33  ;;  %v1995_v48 = vmul.f32 %v11313_v21, %v11328_v3  ;;  %v13029_v21 = vld [vmem:[#allocation25_spill] sm:$0xff]  ;;  %v13030_v35 = vld [vmem:[#allocation24_spill] sm:$0xff] }
 0x544   : > { %v2132_v60 = vmul.f32 %v5796_v53, %v11044_v13  ;;  %v1888_v50 = vadd.f32 %v1856_v12, %v1750_v41  ;;  %v2133_v49 = vmul.f32 %v5796_v53, %v11338_v25  ;;  %v2270_v15 = vmul.f32 %v13028_v30, %v11068_v55  ;;  %v13034_v27 = vld [vmem:[#allocation45_spill] sm:$0xff]  ;;  %v13037_v42 = vld [vmem:[#allocation12_spill] sm:$0xff] }
 0x545   : > { %v4230_v0 = vadd.f32 %v4198_v38, %v4153_v10  ;;  %v4231_v20 = vadd.f32 %v4199_v36, %v4154_v61  ;;  %v1889_v16 = vadd.f32 %v1857_v22, %v1751_v57  ;;  %v2271_v7 = vmul.f32 %v13028_v30, %v11378_v39  ;;  %v13031_v38 = vld [vmem:[#allocation9_spill] sm:$0xff]  ;;  %v13038_v10 = vld [vmem:[#allocation22_spill] sm:$0xff] }
 0x546   : > { %v2408_v8 = vmul.f32 %v13029_v21, %v11084_v47  ;;  %v2026_v51 = vadd.f32 %v1994_v2, %v1888_v50  ;;  %v2409_v13 = vmul.f32 %v13029_v21, %v11388_v29  ;;  %v2477_v62 = vmul.f32 %v13030_v35, %v10942_v59  ;;  %v13033_v47 = vld [vmem:[#allocation38_spill] sm:$0xff]  ;;  %v13039_v2 = vld [vmem:[#allocation47_spill] sm:$0xff]  ;;  %v13042_v50 = vld [vmem:[#allocation41_spill] sm:$0xff] }
 0x547   : > { %v4262_v37 = vadd.f32 %v4230_v0, %v3723_v43  ;;  %v4263_v6 = vadd.f32 %v4231_v20, %v3724_v23  ;;  %v2027_v40 = vadd.f32 %v1995_v48, %v1889_v16  ;;  %v2478_v55 = vmul.f32 %v13030_v35, %v11220_v58  ;;  %v13035_v43 = vld [vmem:[#allocation46_spill] sm:$0xff]  ;;  %v13036_v23 = vld [vmem:[#allocation5_spill] sm:$0xff] }
 0x548   : > { %v2554_v36 = vmul.f32 %v13031_v38, %v11263_v24  ;;  %v2164_v14 = vadd.f32 %v2132_v60, %v2026_v51  ;;  %v2599_v33 = vmul.f32 %v13033_v47, %v11283_v9  ;;  %v2632_v31 = vadd.f32 %v13035_v43, %v13034_v27  ;;  %v13040_v48 = vld [vmem:[#allocation30_spill] sm:$0xff] }
 0x549   : > { %v4298_v5 = vadd.f32 %v13032_v1, %v4262_v37  ;;  %v4299_v18 = vadd.f32 %v13032_v1, %v4263_v6  ;;  %v2165_v59 = vadd.f32 %v2133_v49, %v2027_v40  ;;  %v2676_v32 = vmul.f32 %v13036_v23, %v11293_v4  ;;  %v13041_v60 = vld [vmem:[#allocation6_spill] sm:$0xff]  ;;  %v11671_v49 = vld [vmem:[#allocation2 + $0x170] sm:$0xff]  ;;  %v13052_v23 = vld [vmem:[#allocation51_spill] sm:$0xff] }
 0x54a   : > { %v2753_v12 = vmul.f32 %v13037_v42, %v11328_v3  ;;  %v2302_v41 = vadd.f32 %v2270_v15, %v2164_v14  ;;  %v2631_v22 = vadd.f32 %v2599_v33, %v2554_v36  ;;  %v2709_v61 = vadd.f32 %v13039_v2, %v2632_v31  ;;  %v13043_v15 = vld [vmem:[#allocation48_spill] sm:$0xff]  ;;  %v13046_v40 = vld [vmem:[#allocation49_spill] sm:$0xff] }
 0x54b   : > { %v4334_v24 = vmul.f32 %v13038_v10, %v4298_v5  ;;  %v4335_v9 = vmul.f32 %v13038_v10, %v4299_v18  ;;  %v2303_v57 = vadd.f32 %v2271_v7, %v2165_v59  ;;  %v2830_v53 = vmul.f32 %v13040_v48, %v11338_v25  ;;  %v13044_v7 = vld [vmem:[#allocation39_spill] sm:$0xff]  ;;  %v13045_v25 = vld [vmem:[#allocation17_spill] sm:$0xff]  ;;  %v13047_v5 = vld [vmem:[#allocation18_spill] sm:$0xff] }
 0x54c   : > { %v2907_v0 = vmul.f32 %v13041_v60, %v11378_v39  ;;  %v2440_v3 = vadd.f32 %v2408_v8, %v2302_v41  ;;  %v2708_v30 = vadd.f32 %v2676_v32, %v2631_v22  ;;  %v2786_v20 = vadd.f32 %v13043_v15, %v2709_v61 }
 0x54d   : > { %v11669_v4 = vadd.f32 %v13042_v50, %v4334_v24  ;;  %v11675_v16 = vadd.f32 %v13042_v50, %v4335_v9  ;;  %v2441_v21 = vadd.f32 %v2409_v13, %v2303_v57  ;;  %v2984_v37 = vmul.f32 %v13044_v7, %v11388_v29  ;;  %v13048_v29 = vld [vmem:[#allocation50_spill] sm:$0xff]  ;;  %v5798_v9 = vld [vmem:[%s12009_s3 + $0x11] ss:$0 sm:$0xff] }
 0x54e   : > { %v3053_v51 = vmul.f32 %v13045_v25, %v11220_v58  ;;  %v2509_v35 = vadd.f32 %v2477_v62, %v2440_v3  ;;  %v2785_v6 = vadd.f32 %v2753_v12, %v2708_v30  ;;  %v2863_v38 = vadd.f32 %v13046_v40, %v2786_v20  ;;  %v13049_v58 = vld [vmem:[#allocation31_spill] sm:$0xff]  ;;  %v5800_v30 = vld [vmem:[%s12009_s3 + $0x13] ss:$0 sm:$0xff] }
 0x54f   : > { %v5142_v39 = vmul.f32 -1.442695, %v11669_v4  ;;  %v5143_v8 = vmul.f32 -1.442695, %v11675_v16  ;;  %v2510_v36 = vadd.f32 %v2478_v55, %v2441_v21  ;;  %v3054_v14 = vmul.f32 %v13045_v25, %v13047_v5 }
 0x550   : > { %v3123_v13 = vrot.slane %v11671_v49, 1  ;;  %v2862_v47 = vadd.f32 %v2830_v53, %v2785_v6  ;;  %v2940_v33 = vadd.f32 %v13048_v29, %v2863_v38  ;;  %v3162_v27 = vmul.f32 %v13049_v58, %v11432_v28  ;;  %v5797_v28 = vld [vmem:[%s12009_s3 + $0x10] ss:$0 sm:$0xff]  ;;  %v5801_v6 = vld [vmem:[%s12009_s3 + $0x14] ss:$0 sm:$0xff] }
 0x551   : > { %5652 = vpow2.f32 %v5142_v39  ;;  %v13050_v62 = vrot.slane %v13047_v5, 1  ;;  %v3168_v31 = vrot.slane %v11671_v49, 2  ;;  %v3207_v18 = vmul.f32 %v13024_v26, %v11451_v44 }
 0x552   : > { %5654 = vpow2.f32 %v5143_v8  ;;  %v2939_v59 = vadd.f32 %v2907_v0, %v2862_v47  ;;  %v3017_v32 = vadd.f32 %v13052_v23, %v2940_v33  ;;  %v3245_v12 = vrot.slane %v11671_v49, 3 }
 0x553   : > { %v3124_v55 = vsel %vm1545_vm1, %v13050_v62, %v3123_v13  ;;  %v13053_v24 = vrot.slane %v13047_v5, 2  ;;  %v3239_v22 = vadd.f32 %v3207_v18, %v3162_v27  ;;  %v3284_v44 = vmul.f32 %v13025_v54, %v11468_v46  ;;  %v5799_v46 = vld [vmem:[%s12009_s3 + $0x12] ss:$0 sm:$0xff] }
 0x554   : > { %v3163_v42 = vmul.f32 %v5797_v28, %v3124_v55  ;;  %v3322_v26 = vrot.slane %v11671_v49, 4  ;;  %v3016_v2 = vadd.f32 %v2984_v37, %v2939_v59  ;;  %v3086_v61 = vadd.f32 %v3054_v14, %v3017_v32 }
 0x555   : > { %v3169_v41 = vsel %vm1651_vm2, %v13053_v24, %v3168_v31  ;;  %v13054_v48 = vrot.slane %v13047_v5, 3  ;;  %v3316_v60 = vadd.f32 %v3284_v44, %v3239_v22  ;;  %v13055_v0 = vrot.slane %v13047_v5, 4 }
 0x556   : > { %v3208_v57 = vmul.f32 %v5798_v9, %v3169_v41  ;;  %v3361_v15 = vmul.f32 %v5800_v30, %v11486_v56  ;;  %v3085_v20 = vadd.f32 %v3053_v51, %v3016_v2  ;;  %v11735_v21 = vadd.f32 %v3086_v61, %v2510_v36  ;;  %v11746_v36 = vld [vmem:[#allocation2 + $0x178] sm:$0xff] }
 0x557   : > { %v3246_v53 = vsel %vm1789_vm3, %v13054_v48, %v3245_v12  ;;  %v3323_v3 = vsel %vm1927_vm4, %v13055_v0, %v3322_v26  ;;  %v3399_v39 = vrot.slane %v11671_v49, 5  ;;  %v3438_v40 = vmul.f32 %v5801_v6, %v11503_v34 }
 0x558   : > { %v3285_v54 = vmul.f32 %v5799_v46, %v3246_v53  ;;  %v3240_v7 = vadd.f32 %v3208_v57, %v3163_v42  ;;  %v3362_v37 = vmul.f32 %v5800_v30, %v3323_v3  ;;  %v3393_v25 = vadd.f32 %v3361_v15, %v3316_v60  ;;  %v13059_v57 = vld [vmem:[#allocation14_spill] sm:$0xff] }
 0x559   : > { %v3476_v38 = vrot.slane %v11671_v49, 6  ;;  %v3117_v8 = vadd.f32 %v3085_v20, %v2509_v35  ;;  %v3515_v56 = vmul.f32 %v11571_v45, %v11515_v19  ;;  %v3553_v51 = vrot.slane %v11671_v49, 7 }
 0x55a   : > { %v3317_v14 = vadd.f32 %v3285_v54, %v3240_v7  ;;  %v13056_v47 = vrot.slane %v13047_v5, 5  ;;  %v3470_v33 = vadd.f32 %v3438_v40, %v3393_v25  ;;  %v13057_v34 = vrot.slane %v13047_v5, 6  ;;  %v13061_v25 = vld [vmem:[#allocation15_spill] sm:$0xff] }
 0x55b   : > { %v3592_v19 = vmul.f32 %v11163_v17, %v11540_v52  ;;  %v5653_v58 = vpop.eup %5652  ;;  %v13058_v59 = vrot.slane %v13047_v5, 7  ;;  %v5802_v52 = vld [vmem:[%s12009_s3 + $0x17] ss:$0 sm:$0xff]  ;;  %v3731_v61 = vrot.slane %v11746_v36, 1  ;;  %v3770_v48 = vmul.f32 %v13059_v57, %v3124_v55 }
 0x55c   : > { %v3400_v29 = vsel %vm2065_vm5, %v13056_v47, %v3399_v39  ;;  %v3477_v35 = vsel %vm2203_vm6, %v13057_v34, %v3476_v38  ;;  %v3394_v27 = vadd.f32 %v3362_v37, %v3317_v14  ;;  %v5655_v32 = vpop.eup %5654  ;;  %v4498_v28 = vadd.f32 1.0, %v5653_v58  ;;  %v13062_v14 = vld [vmem:[#allocation20_spill] sm:$0xff]  ;;  %v11797_v47 = vpop.f32.mrb[32].mxu0 }
 0x55d   : > { %v3439_v62 = vmul.f32 %v5801_v6, %v3400_v29  ;;  %v3516_v18 = vmul.f32 %v11571_v45, %v3477_v35  ;;  %v3554_v23 = vsel %vm2341_vm7, %v13058_v59, %v3553_v51  ;;  %v3547_v42 = vadd.f32 %v3515_v56, %v3470_v33  ;;  %v11800_v58 = vpop.f32.mrb[33].mxu0 }
 0x55e   : > { %v3593_v24 = vmul.f32 %v11163_v17, %v3554_v23  ;;  %v3661_v22 = vmul.f32 %v5802_v52, %v13047_v5  ;;  %v4499_v44 = vadd.f32 1.0, %v5655_v32  ;;  %v3662_v2 = vmul.f32 %v5802_v52, %v11671_v49  ;;  %v13060_v5 = vld [vmem:[#allocation11_spill] sm:$0xff] }
 0x55f   : > { %v3471_v45 = vadd.f32 %v3439_v62, %v3394_v27  ;;  %5656 = vrcp.f32 %v4498_v28  ;;  %v3624_v9 = vadd.f32 %v3592_v19, %v3547_v42  ;;  %v3776_v46 = vrot.slane %v11746_v36, 2  ;;  %v11809_v62 = vpop.f32.mrb[34].mxu0 }
 0x560   : > { %5658 = vrcp.f32 %v4499_v44  ;;  %v3732_v54 = vsel %vm1545_vm1, %v3123_v13, %v3731_v61  ;;  %v3815_v60 = vmul.f32 %v13060_v5, %v3169_v41  ;;  %v3853_v55 = vrot.slane %v11746_v36, 3  ;;  %v11818_v42 = vpop.f32.mrb[35].mxu0  ;;  %v4845_v61 = vld [vmem:[%s5858_s24 + $0x10] sm:$0xff] }
 0x561   : > { %v3548_v17 = vadd.f32 %v3516_v18, %v3471_v45  ;;  %v3693_v0 = vadd.f32 %v3661_v22, %v3624_v9  ;;  %v3771_v30 = vmul.f32 %v13059_v57, %v3732_v54  ;;  %v3777_v15 = vsel %vm1651_vm2, %v3168_v31, %v3776_v46  ;;  %v4843_v9 = vld [vmem:[%s5858_s24] sm:$0xff] }
 0x562   : > { %v3816_v7 = vmul.f32 %v13060_v5, %v3777_v15  ;;  %v3847_v37 = vadd.f32 %v3815_v60, %v3770_v48  ;;  %v3892_v6 = vmul.f32 %v13061_v25, %v3246_v53  ;;  %v3854_v13 = vsel %vm1789_vm3, %v3245_v12, %v3853_v55  ;;  %v13065_v48 = vld [vmem:[#allocation26_spill] sm:$0xff]  ;;  %v4849_v15 = vld [vmem:[%s5858_s24 + $0x30] sm:$0xff] }
 0x563   : > { %v3625_v20 = vadd.f32 %v3593_v24, %v3548_v17  ;;  %v3725_v40 = vadd.f32 %v3693_v0, %v3117_v8  ;;  %v3930_v41 = vrot.slane %v11746_v36, 4  ;;  %v3969_v56 = vmul.f32 %v13062_v14, %v3323_v3  ;;  %v13063_v8 = vld [vmem:[#allocation27_spill] sm:$0xff] }
 0x564   : > { %v3848_v33 = vadd.f32 %v3816_v7, %v3771_v30  ;;  %v3893_v34 = vmul.f32 %v13061_v25, %v3854_v13  ;;  %v3924_v19 = vadd.f32 %v3892_v6, %v3847_v37  ;;  %v4007_v12 = vrot.slane %v11746_v36, 5  ;;  %v4844_v30 = vld [vmem:[%s5858_s24 + $0x8] sm:$0xff]  ;;  %v4847_v6 = vld [vmem:[%s5858_s24 + $0x20] sm:$0xff] }
 0x565   : > { %v3694_v31 = vadd.f32 %v3662_v2, %v3625_v20  ;;  %v3931_v53 = vsel %vm1927_vm4, %v3322_v26, %v3930_v41  ;;  %v4046_v27 = vmul.f32 %v13063_v8, %v3400_v29  ;;  %v4084_v3 = vrot.slane %v11746_v36, 6  ;;  %v11816_v26 = vld [vmem:[%s12007_s1 + $0x7] ss:$0 sm:$0xff]  ;;  %v13067_v20 = vld [vmem:[#allocation4_spill] sm:$0xff] }
 0x566   : > { %v3925_v59 = vadd.f32 %v3893_v34, %v3848_v33  ;;  %v3970_v32 = vmul.f32 %v13062_v14, %v3931_v53  ;;  %v4001_v28 = vadd.f32 %v3969_v56, %v3924_v19  ;;  %v4008_v29 = vsel %vm2065_vm5, %v3399_v39, %v4007_v12  ;;  %v13068_v37 = vld [vmem:[#allocation28_spill] sm:$0xff]  ;;  %v13069_v14 = vld [vmem:[#allocation13_spill] sm:$0xff] }
 0x567   : > { %v3726_v18 = vadd.f32 %v3694_v31, %v11735_v21  ;;  %v4085_v21 = vsel %vm2203_vm6, %v3476_v38, %v4084_v3  ;;  %v4123_v24 = vmul.f32 %v13026_v11, %v3477_v35  ;;  %v4161_v52 = vrot.slane %v11746_v36, 7  ;;  %v13064_v35 = vld [vmem:[#allocation10_spill] sm:$0xff] }
 0x568   : > { %v4002_v22 = vadd.f32 %v3970_v32, %v3925_v59  ;;  %v4047_v44 = vmul.f32 %v13063_v8, %v4008_v29  ;;  %v4078_v45 = vadd.f32 %v4046_v27, %v4001_v28  ;;  %v4124_v2 = vmul.f32 %v13026_v11, %v4085_v21  ;;  %v13070_v31 = vld [vmem:[#allocation34_spill] sm:$0xff]  ;;  %v4848_v8 = vld [vmem:[%s5858_s24 + $0x28] sm:$0xff]  ;;  %v4853_v27 = vld [vmem:[%s5858_s24 + $0x50] sm:$0xff] }
 0x569   : > { %v5657_v39 = vpop.eup %5656  ;;  %v4162_v38 = vsel %vm2341_vm7, %v3553_v51, %v4161_v52  ;;  %v4200_v36 = vmul.f32 %v13027_v63, %v3554_v23  ;;  %v4725_v57 = vadd.f32 %v13064_v35, %v11816_v26  ;;  %v4717_v46 = vadd.f32 %v11816_v26, %v13065_v48  ;;  %v4846_v51 = vld [vmem:[%s5858_s24 + $0x18] sm:$0xff]  ;;  %v13071_v32 = vld [vmem:[#allocation33_spill] sm:$0xff]  ;;  %v4851_v21 = vld [vmem:[%s5858_s24 + $0x40] sm:$0xff] }
 0x56a   : > { %v5659_v17 = vpop.eup %5658  ;;  %v4594_v11 = vmul.f32 %v5657_v39, %v11669_v4  ;;  %v4079_v54 = vadd.f32 %v4047_v44, %v4002_v22  ;;  %v4155_v49 = vadd.f32 %v4123_v24, %v4078_v45  ;;  %v4201_v43 = vmul.f32 %v13027_v63, %v4162_v38  ;;  %v13066_v4 = vld [vmem:[#allocation19_spill] sm:$0xff]  ;;  %v4854_v24 = vld [vmem:[%s5858_s24 + $0x58] sm:$0xff]  ;;  %v13073_v44 = vld [vmem:[#allocation16_spill] sm:$0xff] }
 0x56b   : > { %v4595_v23 = vmul.f32 %v5659_v17, %v11675_v16  ;;  %v4877_v5 = vadd.f32 %v4845_v61, %v4725_v57  ;;  %v4875_v60 = vadd.f32 %v4843_v9, %v4717_v46  ;;  %v4728_v0 = vadd.f32 %v13066_v4, %v11816_v26  ;;  %v4850_v16 = vld [vmem:[%s5858_s24 + $0x38] sm:$0xff]  ;;  %v4852_v9 = vld [vmem:[%s5858_s24 + $0x48] sm:$0xff]  ;;  %v4857_v39 = vld [vmem:[%s5858_s24 + $0x70] sm:$0xff] }
 0x56c   : > { %v4156_v55 = vadd.f32 %v4124_v2, %v4079_v54  ;;  %v4232_v63 = vadd.f32 %v4200_v36, %v4155_v49  ;;  %v4720_v7 = vadd.f32 %v11816_v26, %v13067_v20  ;;  %v4741_v25 = vadd.f32 %v13068_v37, %v11816_v26  ;;  %v13074_v2 = vld [vmem:[#allocation8_spill] sm:$0xff]  ;;  %v13075_v36 = vld [vmem:[#allocation21_spill] sm:$0xff]  ;;  %v4855_v49 = vld [vmem:[%s5858_s24 + $0x60] sm:$0xff] }
 0x56d   : > { %v4612_v13 = vpack.c.bf16 %v4595_v23, %v4594_v11  ;;  %4909 = vst.msk [vmem:[%s11850_s26 + $0x10] sm:$0xff] %vm269_vm0, %v4877_v5  ;;  %4907 = vst.msk [vmem:[%s11850_s26] sm:$0xff] %vm269_vm0, %v4875_v60  ;;  %v4878_v41 = vadd.f32 %v4846_v51, %v4728_v0  ;;  %v4733_v56 = vadd.f32 %v11816_v26, %v13069_v14  ;;  %v13076_v57 = vld [vmem:[#allocation40_spill] sm:$0xff]  ;;  %v13077_v5 = vld [vmem:[#allocation42_spill] sm:$0xff] }
 0x56e   : > { %v4744_v33 = vadd.f32 %v13070_v31, %v11816_v26  ;;  %v4233_v34 = vadd.f32 %v4201_v43, %v4156_v55  ;;  %v4264_v19 = vadd.f32 %v4232_v63, %v3725_v40  ;;  %v4876_v53 = vadd.f32 %v4844_v30, %v4720_v7  ;;  %v13072_v40 = vld [vmem:[#allocation7_spill] sm:$0xff]  ;;  %v4858_v43 = vld [vmem:[%s5858_s24 + $0x78] sm:$0xff]  ;;  %v4856_v0 = vld [vmem:[%s5858_s24 + $0x68] sm:$0xff] }
 0x56f   : > { %v4881_v12 = vadd.f32 %v4849_v15, %v4741_v25  ;;  %5325 = vmatprep.mubr.msk.bf16.mxu0 %vm269_vm0, %v4612_v13  ;;  %4910 = vst.msk [vmem:[%s11850_s26 + $0x18] sm:$0xff] %vm269_vm0, %v4878_v41  ;;  %v4879_v3 = vadd.f32 %v4847_v6, %v4733_v56  ;;  %v4736_v28 = vadd.f32 %v11816_v26, %v13071_v32  ;;  %v13078_v60 = vld [vmem:[#allocation43_spill] sm:$0xff]  ;;  %v4861_v30 = vld [vmem:[%s5858_s24 + $0x90] sm:$0xff]  ;;  %v13079_v63 = vld [vmem:[#allocation44_spill] sm:$0xff] }
 0x570   : > { %v4882_v59 = vadd.f32 %v4850_v16, %v4744_v33  ;;  %v4757_v29 = vadd.f32 %v13072_v40, %v11816_v26  ;;  %v4265_v52 = vadd.f32 %v4233_v34, %v3726_v18  ;;  %v4300_v22 = vadd.f32 %v13032_v1, %v4264_v19  ;;  %4908 = vst.msk [vmem:[%s11850_s26 + $0x8] sm:$0xff] %vm269_vm0, %v4876_v53  ;;  %v4859_v37 = vld [vmem:[%s5858_s24 + $0x80] sm:$0xff]  ;;  %v4862_v25 = vld [vmem:[%s5858_s24 + $0x98] sm:$0xff]  ;;  %v4860_v31 = vld [vmem:[%s5858_s24 + $0x88] sm:$0xff] }
 0x571   : > { %4913 = vst.msk [vmem:[%s11850_s26 + $0x30] sm:$0xff] %vm269_vm0, %v4881_v12  ;;  %v4749_v45 = vadd.f32 %v11816_v26, %v13073_v44  ;;  %v4760_v61 = vadd.f32 %v13074_v2, %v11816_v26  ;;  %4911 = vst.msk [vmem:[%s11850_s26 + $0x20] sm:$0xff] %vm269_vm0, %v4879_v3  ;;  %v4880_v18 = vadd.f32 %v4848_v8, %v4736_v28  ;;  %v4865_v40 = vld [vmem:[%s5858_s24 + $0xb0] sm:$0xff]  ;;  %v4866_v44 = vld [vmem:[%s5858_s24 + $0xb8] sm:$0xff] }
 0x572   : > { %4914 = vst.msk [vmem:[%s11850_s26 + $0x38] sm:$0xff] %vm269_vm0, %v4882_v59  ;;  %v4885_v38 = vadd.f32 %v4853_v27, %v4757_v29  ;;  %v4752_v35 = vadd.f32 %v11816_v26, %v13075_v36  ;;  %v4773_v48 = vadd.f32 %v13076_v57, %v11816_v26  ;;  %v4301_v46 = vadd.f32 %v13032_v1, %v4265_v52  ;;  %v4869_v57 = vld [vmem:[%s5858_s24 + $0xd0] sm:$0xff] }
 0x573   : > { %v4336_v17 = vmul.f32 %v13038_v10, %v4300_v22  ;;  %v4883_v11 = vadd.f32 %v4851_v21, %v4749_v45  ;;  %v4886_v54 = vadd.f32 %v4854_v24, %v4760_v61  ;;  %4912 = vst.msk [vmem:[%s11850_s26 + $0x28] sm:$0xff] %vm269_vm0, %v4880_v18  ;;  %v4765_v1 = vadd.f32 %v11816_v26, %v13077_v5  ;;  %v4863_v24 = vld [vmem:[%s5858_s24 + $0xa0] sm:$0xff]  ;;  %v4868_v5 = vld [vmem:[%s5858_s24 + $0xc8] sm:$0xff] }
 0x574   : > { %4917 = vst.msk [vmem:[%s11850_s26 + $0x50] sm:$0xff] %vm269_vm0, %v4885_v38  ;;  %v4884_v51 = vadd.f32 %v4852_v9, %v4752_v35  ;;  %v4889_v23 = vadd.f32 %v4857_v39, %v4773_v48  ;;  %v4776_v4 = vadd.f32 %v13078_v60, %v11816_v26  ;;  %v4337_v15 = vmul.f32 %v13038_v10, %v4301_v46  ;;  %v4864_v9 = vld [vmem:[%s5858_s24 + $0xa8] sm:$0xff] }
 0x575   : > { %v4372_v55 = vadd.f32 %v13042_v50, %v4336_v17  ;;  %4915 = vst.msk [vmem:[%s11850_s26 + $0x40] sm:$0xff] %vm269_vm0, %v4883_v11  ;;  %4918 = vst.msk [vmem:[%s11850_s26 + $0x58] sm:$0xff] %vm269_vm0, %v4886_v54  ;;  %v4768_v20 = vadd.f32 %v11816_v26, %v13079_v63  ;;  %v4789_v7 = vadd.f32 %v11797_v47, %v11816_v26  ;;  %v4867_v17 = vld [vmem:[%s5858_s24 + $0xc0] sm:$0xff] }
 0x576   : > { %4916 = vst.msk [vmem:[%s11850_s26 + $0x48] sm:$0xff] %vm269_vm0, %v4884_v51  ;;  %4921 = vst.msk [vmem:[%s11850_s26 + $0x70] sm:$0xff] %vm269_vm0, %v4889_v23  ;;  %v4887_v10 = vadd.f32 %v4855_v49, %v4765_v1  ;;  %v4890_v6 = vadd.f32 %v4858_v43, %v4776_v4  ;;  %v4781_v16 = vadd.f32 %v11816_v26, %v11800_v58  ;;  %v4870_v49 = vld [vmem:[%s5858_s24 + $0xd8] sm:$0xff] }
 0x577   : > { %v4792_v13 = vadd.f32 %v11809_v62, %v11816_v26  ;;  %v4373_v47 = vadd.f32 %v13042_v50, %v4337_v15  ;;  %v5144_v41 = vmul.f32 -1.442695, %v4372_v55  ;;  %v4888_v14 = vadd.f32 %v4856_v0, %v4768_v20  ;;  %v4873_v15 = vld [vmem:[%s5858_s24 + $0xf0] sm:$0xff]  ;;  %v4871_v20 = vld [vmem:[%s5858_s24 + $0xe0] sm:$0xff] }
 0x578   : > { %v4893_v56 = vadd.f32 %v4861_v30, %v4789_v7  ;;  %4919 = vst.msk [vmem:[%s11850_s26 + $0x60] sm:$0xff] %vm269_vm0, %v4887_v10  ;;  %4922 = vst.msk [vmem:[%s11850_s26 + $0x78] sm:$0xff] %vm269_vm0, %v4890_v6  ;;  %v4891_v33 = vadd.f32 %v4859_v37, %v4781_v16  ;;  %v4784_v58 = vadd.f32 %v11816_v26, %v11818_v42 }
 0x579   : > { %v4894_v34 = vadd.f32 %v4862_v25, %v4792_v13  ;;  %5660 = vpow2.f32 %v5144_v41  ;;  %v5145_v19 = vmul.f32 -1.442695, %v4373_v47  ;;  %4920 = vst.msk [vmem:[%s11850_s26 + $0x68] sm:$0xff] %vm269_vm0, %v4888_v14  ;;  %v4874_v25 = vld [vmem:[%s5858_s24 + $0xf8] sm:$0xff]  ;;  %v4872_v13 = vld [vmem:[%s5858_s24 + $0xe8] sm:$0xff] }
 0x57a   : > { %4925 = vst.msk [vmem:[%s11850_s26 + $0x90] sm:$0xff] %vm269_vm0, %v4893_v56  ;;  %4923 = vst.msk [vmem:[%s11850_s26 + $0x80] sm:$0xff] %vm269_vm0, %v4891_v33  ;;  %v4892_v50 = vadd.f32 %v4860_v31, %v4784_v58 }
 0x57b   : > { %4926 = vst.msk [vmem:[%s11850_s26 + $0x98] sm:$0xff] %vm269_vm0, %v4894_v34  ;;  %5662 = vpow2.f32 %v5145_v19 }
 0x57c   : > { %4924 = vst.msk [vmem:[%s11850_s26 + $0x88] sm:$0xff] %vm269_vm0, %v4892_v50 }
 0x583   : > { %v5661_v62 = vpop.eup %5660 }
 0x584   : > { %v4500_v53 = vadd.f32 1.0, %v5661_v62 }
 0x585   : > { %v5663_v12 = vpop.eup %5662 }
 0x586   : > { %v4501_v42 = vadd.f32 1.0, %v5663_v12  ;;  %5664 = vrcp.f32 %v4500_v53 }
 0x588   : > { %5666 = vrcp.f32 %v4501_v42 }
 0x590   : > { %v5665_v8 = vpop.eup %5664 }
 0x591   : > { %v4596_v27 = vmul.f32 %v5665_v8, %v4372_v55 }
 0x592   : > { %v5667_v3 = vpop.eup %5666 }
 0x593   : > { %v4597_v59 = vmul.f32 %v5667_v3, %v4373_v47 }
 0x595   : > { %v4613_v32 = vpack.c.bf16 %v4597_v59, %v4596_v27 }
 0x597   : > { %5326 = vmatmul.mubr.msk.bf16.gmra.mrb[44].mxu0 %vm269_vm0, %v4613_v32 }
 0x5ae   : > { %v5319_v28 = vpop.f32.mrb[36].mxu0 }
 0x5af   : > { %v4805_v29 = vadd.f32 %v5319_v28, %v11816_v26  ;;  %v4796_v21 = vpop.f32.mrb[37].mxu0 }
 0x5b0   : > { %v4797_v52 = vadd.f32 %v11816_v26, %v4796_v21  ;;  %v5320_v22 = vpop.f32.mrb[38].mxu0 }
 0x5b1   : > { %v4897_v45 = vadd.f32 %v4865_v40, %v4805_v29  ;;  %v4808_v2 = vadd.f32 %v5320_v22, %v11816_v26  ;;  %v4799_v61 = vpop.f32.mrb[39].mxu0 }
 0x5b2   : > { %v4895_v39 = vadd.f32 %v4863_v24, %v4797_v52  ;;  %v4800_v18 = vadd.f32 %v11816_v26, %v4799_v61 }
 0x5b3   : > { %4929 = vst.msk [vmem:[%s11850_s26 + $0xb0] sm:$0xff] %vm269_vm0, %v4897_v45  ;;  %v4898_v38 = vadd.f32 %v4866_v44, %v4808_v2 }
 0x5b4   : > { %4927 = vst.msk [vmem:[%s11850_s26 + $0xa0] sm:$0xff] %vm269_vm0, %v4895_v39  ;;  %v4896_v36 = vadd.f32 %v4864_v9, %v4800_v18 }
 0x5b5   : > { %4930 = vst.msk [vmem:[%s11850_s26 + $0xb8] sm:$0xff] %vm269_vm0, %v4898_v38 }
 0x5b6   : > { %4928 = vst.msk [vmem:[%s11850_s26 + $0xa8] sm:$0xff] %vm269_vm0, %v4896_v36 }
 0x615   : > { %v5323_v35 = vpop.f32.mrb[40].mxu0 }
 0x616   : > { %v4821_v48 = vadd.f32 %v5323_v35, %v11816_v26  ;;  %v4812_v46 = vpop.f32.mrb[41].mxu0 }
 0x617   : > { %v4813_v11 = vadd.f32 %v11816_v26, %v4812_v46  ;;  %v5324_v54 = vpop.f32.mrb[42].mxu0 }
 0x618   : > { %v4901_v43 = vadd.f32 %v4869_v57, %v4821_v48  ;;  %v4824_v51 = vadd.f32 %v5324_v54, %v11816_v26  ;;  %v4815_v23 = vpop.f32.mrb[43].mxu0 }
 0x619   : > { %v4899_v1 = vadd.f32 %v4867_v17, %v4813_v11  ;;  %v4816_v60 = vadd.f32 %v11816_v26, %v4815_v23 }
 0x61a   : > { %4933 = vst.msk [vmem:[%s11850_s26 + $0xd0] sm:$0xff] %vm269_vm0, %v4901_v43  ;;  %v4902_v4 = vadd.f32 %v4870_v49, %v4824_v51 }
 0x61b   : > { %4931 = vst.msk [vmem:[%s11850_s26 + $0xc0] sm:$0xff] %vm269_vm0, %v4899_v1  ;;  %v4900_v0 = vadd.f32 %v4868_v5, %v4816_v60 }
 0x61c   : > { %4934 = vst.msk [vmem:[%s11850_s26 + $0xd8] sm:$0xff] %vm269_vm0, %v4902_v4 }
 0x61d   : > { %4932 = vst.msk [vmem:[%s11850_s26 + $0xc8] sm:$0xff] %vm269_vm0, %v4900_v0 }
 0x66a   : > { %v5327_v30 = vpop.f32.mrb[44].mxu0 }
 0x66b   : > { %v4837_v55 = vadd.f32 %v5327_v30, %v11816_v26  ;;  %v4828_v63 = vpop.f32.mrb[45].mxu0 }
 0x66c   : > { %v4829_v7 = vadd.f32 %v11816_v26, %v4828_v63  ;;  %v5328_v37 = vpop.f32.mrb[46].mxu0 }
 0x66d   : > { %v4905_v10 = vadd.f32 %v4873_v15, %v4837_v55  ;;  %v4840_v6 = vadd.f32 %v5328_v37, %v11816_v26  ;;  %v4831_v16 = vpop.f32.mrb[47].mxu0 }
 0x66e   : > { %v4903_v47 = vadd.f32 %v4871_v20, %v4829_v7  ;;  %v4832_v41 = vadd.f32 %v11816_v26, %v4831_v16 }
 0x66f   : > { %4937 = vst.msk [vmem:[%s11850_s26 + $0xf0] sm:$0xff] %vm269_vm0, %v4905_v10  ;;  %v4906_v14 = vadd.f32 %v4874_v25, %v4840_v6 }
 0x670   : > { %4935 = vst.msk [vmem:[%s11850_s26 + $0xe0] sm:$0xff] %vm269_vm0, %v4903_v47  ;;  %v4904_v56 = vadd.f32 %v4872_v13, %v4832_v41 }
 0x671   : > { %4938 = vst.msk [vmem:[%s11850_s26 + $0xf8] sm:$0xff] %vm269_vm0, %v4906_v14 }
 0x672   : > { %4936 = vst.msk [vmem:[%s11850_s26 + $0xe8] sm:$0xff] %vm269_vm0, %v4904_v56 }
 0x673 PF: > { %s15_s18 = sadd.s32 1, %s5809_s18  }
 0x674   : > { %p12_p4 = scmp.ge.s32.totalorder %s15_s18, 4  }
 0x676   :  { %14 = sbr.rel (!%p12_p4) target bundleno = 1 (0x1), region = 71 }

</bundles_post_ra>
